<compile_context>
chip_gen: v5e
topology: v5e:2x2
jax: 0.10.0
libtpu: 0.0.40
codegen_flags: <defaults>
</compile_context>

<pallas_src>
import math

import jax
import jax.numpy as jnp
from jax.experimental import pallas as pl
from jax.experimental.pallas import tpu as pltpu  # noqa: F401  (kept for TPU-specific knobs)

# ----- model hyper-parameters (consistent with the module's __init__ args) -----
D_MODEL = 32          # args.d_model
NUM_HEADS = 4         # args.num_heads
DH = D_MODEL // NUM_HEADS
HIDDEN = 64           # args.hidden_dim (dim_feedforward)
NUM_LAYERS = 2        # args.num_layers
NUM_CLASSES = 40      # args.num_classes
PE_MAXLEN = 64        # args.peMaxLen
AUDIO_FEAT = 321      # STFT feature dim
C_PAD = 352           # 321 padded so that 4*C_PAD = 1408 is a multiple of 128
LN_EPS = 1e-5
NUM_STACKS = 3        # audioEncoder, videoEncoder, jointDecoder


# =========================== in-kernel building blocks ===========================
def _layernorm(y, g, b):
    mu = jnp.mean(y, axis=-1, keepdims=True)
    var = jnp.mean((y - mu) ** 2, axis=-1, keepdims=True)
    return (y - mu) * jax.lax.rsqrt(var + LN_EPS) * g + b


def _encoder_stack(x, si, mask, refs):
    """NUM_LAYERS post-norm nn.TransformerEncoderLayer's on one (N, D) slab.

    N = T*B rows (batch folded into sublanes); `mask` is an additive (N, N)
    mask that is 0 for same-sequence pairs and -1e9 otherwise, so per-sequence
    attention is computed with full-slab matmuls.  Weights are pre-split per
    head, so there are no lane slices / concats / transposes anywhere.
    """
    wqkv, bqkv, wout, wff1, wff2, bff1, vecd = refs
    for l in range(NUM_LAYERS):
        li = si * NUM_LAYERS + l
        attn = None
        for h in range(NUM_HEADS):                       # unrolled (H = 4)
            iq = (li * 3 + 0) * NUM_HEADS + h
            ik = (li * 3 + 1) * NUM_HEADS + h
            iv = (li * 3 + 2) * NUM_HEADS + h
            # per-head projections (softmax scale baked into the Q block)
            q = jnp.dot(x, wqkv[iq, :, :],
                        preferred_element_type=jnp.float32) + bqkv[iq, :, :]
            k = jnp.dot(x, wqkv[ik, :, :],
                        preferred_element_type=jnp.float32) + bqkv[ik, :, :]
            v = jnp.dot(x, wqkv[iv, :, :],
                        preferred_element_type=jnp.float32) + bqkv[iv, :, :]
            # scores: contract last dims (no explicit k.T transpose)
            sc = jax.lax.dot_general(
                q, k, (((1,), (1,)), ((), ())),
                preferred_element_type=jnp.float32) + mask
            m = jnp.max(sc, axis=-1, keepdims=True)
            p = jnp.exp(sc - m)
            p = p * pl.reciprocal(jnp.sum(p, axis=-1, keepdims=True),
                                  approx=True)
            oh = jnp.dot(p, v, preferred_element_type=jnp.float32)     # (N, dh)
            # out-proj contribution of this head (replaces the head concat)
            c = jnp.dot(oh, wout[li * NUM_HEADS + h, :, :],
                        preferred_element_type=jnp.float32)
            attn = c if attn is None else attn + c
        vb = li * 6
        attn = attn + vecd[vb + 4, :, :]                  # out_proj bias
        x1 = _layernorm(x + attn, vecd[vb + 0, :, :], vecd[vb + 1, :, :])
        h1 = jnp.maximum(
            jnp.dot(x1, wff1[li, :, :],
                    preferred_element_type=jnp.float32) + bff1[li, :, :], 0.0)
        ff = jnp.dot(h1, wff2[li, :, :],
                     preferred_element_type=jnp.float32) + vecd[vb + 5, :, :]
        x = _layernorm(x1 + ff, vecd[vb + 2, :, :], vecd[vb + 3, :, :])
    return x


# =========================== the single fused kernel ===========================
def _fused_kernel(a_ref, v_ref, pe_ref, mask_ref, cw_ref, cb_ref,
                  wqkv_ref, bqkv_ref, wout_ref, wff1_ref, wff2_ref,
                  bff1_ref, vecd_ref, jcw_ref, jcb_ref, ocw_ref, ocb_ref,
                  o_ref):
    mask = mask_ref[...]
    pe = pe_ref[...]
    refs = (wqkv_ref, bqkv_ref, wout_ref, wff1_ref, wff2_ref, bff1_ref,
            vecd_ref)

    # ---- audio front-end: Conv1d(321, D, k=4, s=4) as one lane-padded matmul ----
    xa = jnp.dot(a_ref[...], cw_ref[...],
                 preferred_element_type=jnp.float32) + cb_ref[...]
    # ---- positional encoding + the two encoder stacks ----
    xa = _encoder_stack(xa + pe, 0, mask, refs)              # audioEncoder
    xv = _encoder_stack(v_ref[...] + pe, 1, mask, refs)      # videoEncoder

    # ---- jointConv(cat([audio, video], feat)) via split weight halves ----
    xj = (jnp.dot(xa, jcw_ref[0, :, :], preferred_element_type=jnp.float32)
          + jnp.dot(xv, jcw_ref[1, :, :], preferred_element_type=jnp.float32)
          + jcb_ref[...])
    xj = _encoder_stack(xj, 2, mask, refs)                   # jointDecoder

    # ---- outputConv (1x1) + log_softmax over classes ----
    logits = jnp.dot(xj, ocw_ref[...],
                     preferred_element_type=jnp.float32) + ocb_ref[...]
    m = jnp.max(logits, axis=-1, keepdims=True)
    s = logits - m
    lse = jnp.log(jnp.sum(jnp.exp(s), axis=-1, keepdims=True))
    o_ref[...] = s - lse


# =========================== glue / forward ===========================
def make_positional_encoding(max_len, d_model):
    position = jnp.arange(max_len, dtype=jnp.float32)[:, None]
    denom = jnp.exp(jnp.arange(0, d_model, 2, dtype=jnp.float32)
                    * (math.log(10000.0) / d_model))
    pe = jnp.zeros((max_len, d_model), jnp.float32)
    pe = pe.at[:, 0::2].set(jnp.sin(position / denom))
    pe = pe.at[:, 1::2].set(jnp.cos(position / denom))
    return pe                                  # (maxLen, d_model)


def forward(params, audio, video):
    """audio: (Ta, B, 321) with Ta % 4 == 0; video: (Tv, B, D), Tv == Ta // 4."""
    Ta, B, C = audio.shape
    assert C == AUDIO_FEAT
    T = Ta // 4
    assert Ta == 4 * T and video.shape == (T, B, D_MODEL) and T <= PE_MAXLEN
    N = T * B

    # --- im2col for the strided conv (single wrapper copy), t-major rows ---
    # row r = t*B + b ; col = c*4 + k ; C zero-padded to 352 so K = 1408 = 11*128
    a = jnp.pad(audio, ((0, 0), (0, 0), (0, C_PAD - AUDIO_FEAT)))
    a = a.reshape(T, 4, B, C_PAD).transpose(0, 2, 3, 1).reshape(N, C_PAD * 4)

    # --- video in native layout: (T, B, D) -> (T*B, D) is a free bitcast ---
    v2 = video.reshape(N, D_MODEL)

    # --- compile-time constants (concrete at trace time -> zero runtime cost) ---
    pe_slab = jnp.repeat(make_positional_encoding(PE_MAXLEN, D_MODEL)[:T],
                         B, axis=0)                              # (N, D)
    seq_id = jnp.arange(N) % B                                   # row r -> batch b
    mask = jnp.where(seq_id[:, None] == seq_id[None, :],
                     0.0, -1e9).astype(jnp.float32)              # (N, N)

    out2d = pl.pallas_call(
        _fused_kernel,
        out_shape=jax.ShapeDtypeStruct((N, NUM_CLASSES), jnp.float32),
    )(a, v2, pe_slab, mask,
      params['conv_w'], params['conv_b'],
      params['wqkv'], params['bqkv'], params['wout'],
      params['wff1'], params['wff2'], params['bff1'], params['vecd'],
      params['joint_w'], params['joint_b'],
      params['out_w'], params['out_b'])

    return out2d.reshape(T, B, NUM_CLASSES)       # free reshape (leading split)


# =========================== parameter packing / init ===========================
def pack_layer_params(stacks):
    """stacks: [audioEncoder, videoEncoder, jointDecoder], each a list of
    NUM_LAYERS dicts of PyTorch-layout tensors.  Returns the stacked kernel
    arrays (per-head pre-split QKV / out-proj blocks, packed small vectors)."""
    scale = 1.0 / math.sqrt(DH)
    wqkv, bqkv, wout, wff1, wff2, bff1, vecd = [], [], [], [], [], [], []
    for st in stacks:
        for lp in st:
            inw_t = lp['in_w'].T                     # (D, 3D)
            inb = lp['in_b']                         # (3D,)
            for m in range(3):                       # 0=q, 1=k, 2=v
                for h in range(NUM_HEADS):
                    c0 = m * D_MODEL + h * DH
                    w = inw_t[:, c0:c0 + DH]
                    b = inb[c0:c0 + DH].reshape(1, DH)
                    if m == 0:                       # bake softmax scale into Q
                        w = w * scale
                        b = b * scale
                    wqkv.append(w)
                    bqkv.append(b)
            outw_t = lp['out_w'].T                   # (D, D)
            for h in range(NUM_HEADS):
                wout.append(outw_t[h * DH:(h + 1) * DH, :])     # (dh, D)
            wff1.append(lp['ff1_w'].T)               # (D, HIDDEN)
            wff2.append(lp['ff2_w'].T)               # (HIDDEN, D)
            bff1.append(lp['ff1_b'].reshape(1, -1))
            vecd += [lp['ln1_g'].reshape(1, -1), lp['ln1_b'].reshape(1, -1),
                     lp['ln2_g'].reshape(1, -1), lp['ln2_b'].reshape(1, -1),
                     lp['out_b'].reshape(1, -1), lp['ff2_b'].reshape(1, -1)]
    return {
        'wqkv': jnp.stack(wqkv),   # (S*L*3*H, D, dh)
        'bqkv': jnp.stack(bqkv),   # (S*L*3*H, 1, dh)
        'wout': jnp.stack(wout),   # (S*L*H, dh, D)
        'wff1': jnp.stack(wff1),   # (S*L, D, HIDDEN)
        'wff2': jnp.stack(wff2),   # (S*L, HIDDEN, D)
        'bff1': jnp.stack(bff1),   # (S*L, 1, HIDDEN)
        'vecd': jnp.stack(vecd),   # (S*L*6, 1, D): ln1_g/b, ln2_g/b, out_b, ff2_b
    }


def init_params(key):
    keys = jax.random.split(key, 12)

    def u(k, shape, fan_in):
        bound = 1.0 / math.sqrt(fan_in)
        return jax.random.uniform(k, shape, jnp.float32, -bound, bound)

    # PyTorch-layout weights (converted ONCE to kernel layout below)
    audio_conv_w = u(keys[0], (D_MODEL, AUDIO_FEAT, 4), AUDIO_FEAT * 4)
    audio_conv_b = u(keys[1], (D_MODEL,), AUDIO_FEAT * 4)
    base_layer = {
        'in_w':  u(keys[2], (3 * D_MODEL, D_MODEL), D_MODEL),
        'in_b':  jnp.zeros((3 * D_MODEL,), jnp.float32),
        'out_w': u(keys[3], (D_MODEL, D_MODEL), D_MODEL),
        'out_b': jnp.zeros((D_MODEL,), jnp.float32),
        'ff1_w': u(keys[4], (HIDDEN, D_MODEL), D_MODEL),
        'ff1_b': u(keys[5], (HIDDEN,), D_MODEL),
        'ff2_w': u(keys[6], (D_MODEL, HIDDEN), HIDDEN),
        'ff2_b': u(keys[7], (D_MODEL,), HIDDEN),
        'ln1_g': jnp.ones((D_MODEL,), jnp.float32),
        'ln1_b': jnp.zeros((D_MODEL,), jnp.float32),
        'ln2_g': jnp.ones((D_MODEL,), jnp.float32),
        'ln2_b': jnp.zeros((D_MODEL,), jnp.float32),
    }
    joint_conv_w = u(keys[8], (D_MODEL, 2 * D_MODEL, 1), 2 * D_MODEL)
    joint_conv_b = u(keys[9], (D_MODEL,), 2 * D_MODEL)
    out_conv_w = u(keys[10], (NUM_CLASSES, D_MODEL, 1), D_MODEL)
    out_conv_b = u(keys[11], (NUM_CLASSES,), D_MODEL)

    # nn.TransformerEncoder deep-copies the single encoderLayer into every layer
    # of all three stacks: identical values at init, but each (stack, layer)
    # slot is a distinct parameter set (so distinct trained weights pack too).
    stacks = [[dict(base_layer) for _ in range(NUM_LAYERS)]
              for _ in range(NUM_STACKS)]

    # audio conv weight -> lane-padded im2col layout (C_PAD*4, D), cols (c, k)
    wc = jnp.pad(audio_conv_w, ((0, 0), (0, C_PAD - AUDIO_FEAT), (0, 0)))
    wc = wc.reshape(D_MODEL, C_PAD * 4).T

    jw = joint_conv_w[:, :, 0].T                     # (2D, D)
    params = {
        'conv_w': wc,                                            # (C_PAD*4, D)
        'conv_b': audio_conv_b.reshape(1, -1),
        'joint_w': jnp.stack([jw[:D_MODEL], jw[D_MODEL:]], axis=0),  # (2, D, D)
        'joint_b': joint_conv_b.reshape(1, -1),
        'out_w': out_conv_w[:, :, 0].T,                          # (D, NC)
        'out_b': out_conv_b.reshape(1, -1),
        **pack_layer_params(stacks),
    }
    return params


# =========================== main ===========================
if __name__ == "__main__":
    key = jax.random.PRNGKey(0)
    kp, ka, kv = jax.random.split(key, 3)
    params = init_params(kp)

    B = 2
    Ta = 32          # audio STFT frames -> stride-4 conv gives 8 steps
    Tv = 8           # video frames aligned with audio/4
    audio = jax.random.normal(ka, (Ta, B, AUDIO_FEAT), jnp.float32)
    video = jax.random.normal(kv, (Tv, B, D_MODEL), jnp.float32)

    out = jax.jit(forward)(params, audio, video)
    out = jax.block_until_ready(out)

    assert out.shape == (Tv, B, NUM_CLASSES), out.shape
    assert bool(jnp.all(jnp.isfinite(out)))
    # log_softmax sanity: probabilities sum to 1 per (t, b)
    assert bool(jnp.allclose(jnp.sum(jnp.exp(out), axis=-1), 1.0, atol=1e-3))
    print("KERNEL_OK")
</pallas_src>

<mosaic_0001>
module attributes {stable_mosaic.version = 11 : i64} {
  func.func @_fused_kernel(%arg0: memref<16x1408xf32, #tpu.memory_space<vmem>>, %arg1: memref<16x32xf32, #tpu.memory_space<vmem>>, %arg2: memref<16x32xf32, #tpu.memory_space<vmem>>, %arg3: memref<16x16xf32, #tpu.memory_space<vmem>>, %arg4: memref<1408x32xf32, #tpu.memory_space<vmem>>, %arg5: memref<1x32xf32, #tpu.memory_space<vmem>>, %arg6: memref<72x32x8xf32, #tpu.memory_space<vmem>>, %arg7: memref<72x1x8xf32, #tpu.memory_space<vmem>>, %arg8: memref<24x8x32xf32, #tpu.memory_space<vmem>>, %arg9: memref<6x32x64xf32, #tpu.memory_space<vmem>>, %arg10: memref<6x64x32xf32, #tpu.memory_space<vmem>>, %arg11: memref<6x1x64xf32, #tpu.memory_space<vmem>>, %arg12: memref<36x1x32xf32, #tpu.memory_space<vmem>>, %arg13: memref<2x32x32xf32, #tpu.memory_space<vmem>>, %arg14: memref<1x32xf32, #tpu.memory_space<vmem>>, %arg15: memref<32x40xf32, #tpu.memory_space<vmem>>, %arg16: memref<1x40xf32, #tpu.memory_space<vmem>>, %arg17: memref<16x40xf32, #tpu.memory_space<vmem>>) attributes {dimension_semantics = [], scalar_prefetch = 0 : i64, scratch_operands = 0 : i64, tpu.core_type = #tpu.core_type<tc>} {
    %c0 = arith.constant 0 : index
    %c0_0 = arith.constant 0 : index
    %0 = vector.load %arg3[%c0, %c0_0] : memref<16x16xf32, #tpu.memory_space<vmem>>, vector<16x16xf32>
    %c0_1 = arith.constant 0 : index
    %c0_2 = arith.constant 0 : index
    %1 = vector.load %arg2[%c0_1, %c0_2] : memref<16x32xf32, #tpu.memory_space<vmem>>, vector<16x32xf32>
    %c0_3 = arith.constant 0 : index
    %c0_4 = arith.constant 0 : index
    %2 = vector.load %arg0[%c0_3, %c0_4] : memref<16x1408xf32, #tpu.memory_space<vmem>>, vector<16x1408xf32>
    %c0_5 = arith.constant 0 : index
    %c0_6 = arith.constant 0 : index
    %3 = vector.load %arg4[%c0_5, %c0_6] : memref<1408x32xf32, #tpu.memory_space<vmem>>, vector<1408x32xf32>
    %cst = arith.constant dense<0.000000e+00> : vector<16x32xf32>
    %4 = tpu.matmul %2, %3, %cst {dimension_numbers = #tpu.dot_dimension_numbers<[1], [0], [0], [1], [0, 0, 1, 1], [], []>} : vector<16x1408xf32>, vector<1408x32xf32>, vector<16x32xf32> -> vector<16x32xf32>
    %c0_7 = arith.constant 0 : index
    %c0_8 = arith.constant 0 : index
    %5 = vector.load %arg5[%c0_7, %c0_8] : memref<1x32xf32, #tpu.memory_space<vmem>>, vector<1x32xf32>
    %6 = vector.broadcast %5 : vector<1x32xf32> to vector<16x32xf32>
    %7 = arith.addf %4, %6 : vector<16x32xf32>
    %8 = arith.addf %7, %1 : vector<16x32xf32>
    %c0_9 = arith.constant 0 : index
    %c0_10 = arith.constant 0 : index
    %c0_11 = arith.constant 0 : index
    %9 = vector.load %arg6[%c0_9, %c0_10, %c0_11] : memref<72x32x8xf32, #tpu.memory_space<vmem>>, vector<1x32x8xf32>
    %10 = vector.shape_cast %9 : vector<1x32x8xf32> to vector<32x8xf32>
    %cst_12 = arith.constant dense<0.000000e+00> : vector<16x8xf32>
    %11 = tpu.matmul %8, %10, %cst_12 {dimension_numbers = #tpu.dot_dimension_numbers<[1], [0], [0], [1], [0, 0, 1, 1], [], []>} : vector<16x32xf32>, vector<32x8xf32>, vector<16x8xf32> -> vector<16x8xf32>
    %c0_13 = arith.constant 0 : index
    %c0_14 = arith.constant 0 : index
    %c0_15 = arith.constant 0 : index
    %12 = vector.load %arg7[%c0_13, %c0_14, %c0_15] : memref<72x1x8xf32, #tpu.memory_space<vmem>>, vector<1x1x8xf32>
    %13 = vector.shape_cast %12 : vector<1x1x8xf32> to vector<1x8xf32>
    %14 = vector.broadcast %13 : vector<1x8xf32> to vector<16x8xf32>
    %15 = arith.addf %11, %14 : vector<16x8xf32>
    %c4 = arith.constant 4 : index
    %c0_16 = arith.constant 0 : index
    %c0_17 = arith.constant 0 : index
    %16 = vector.load %arg6[%c4, %c0_16, %c0_17] : memref<72x32x8xf32, #tpu.memory_space<vmem>>, vector<1x32x8xf32>
    %17 = vector.shape_cast %16 : vector<1x32x8xf32> to vector<32x8xf32>
    %cst_18 = arith.constant dense<0.000000e+00> : vector<16x8xf32>
    %18 = tpu.matmul %8, %17, %cst_18 {dimension_numbers = #tpu.dot_dimension_numbers<[1], [0], [0], [1], [0, 0, 1, 1], [], []>} : vector<16x32xf32>, vector<32x8xf32>, vector<16x8xf32> -> vector<16x8xf32>
    %c4_19 = arith.constant 4 : index
    %c0_20 = arith.constant 0 : index
    %c0_21 = arith.constant 0 : index
    %19 = vector.load %arg7[%c4_19, %c0_20, %c0_21] : memref<72x1x8xf32, #tpu.memory_space<vmem>>, vector<1x1x8xf32>
    %20 = vector.shape_cast %19 : vector<1x1x8xf32> to vector<1x8xf32>
    %21 = vector.broadcast %20 : vector<1x8xf32> to vector<16x8xf32>
    %22 = arith.addf %18, %21 : vector<16x8xf32>
    %c8 = arith.constant 8 : index
    %c0_22 = arith.constant 0 : index
    %c0_23 = arith.constant 0 : index
    %23 = vector.load %arg6[%c8, %c0_22, %c0_23] : memref<72x32x8xf32, #tpu.memory_space<vmem>>, vector<1x32x8xf32>
    %24 = vector.shape_cast %23 : vector<1x32x8xf32> to vector<32x8xf32>
    %cst_24 = arith.constant dense<0.000000e+00> : vector<16x8xf32>
    %25 = tpu.matmul %8, %24, %cst_24 {dimension_numbers = #tpu.dot_dimension_numbers<[1], [0], [0], [1], [0, 0, 1, 1], [], []>} : vector<16x32xf32>, vector<32x8xf32>, vector<16x8xf32> -> vector<16x8xf32>
    %c8_25 = arith.constant 8 : index
    %c0_26 = arith.constant 0 : index
    %c0_27 = arith.constant 0 : index
    %26 = vector.load %arg7[%c8_25, %c0_26, %c0_27] : memref<72x1x8xf32, #tpu.memory_space<vmem>>, vector<1x1x8xf32>
    %27 = vector.shape_cast %26 : vector<1x1x8xf32> to vector<1x8xf32>
    %28 = vector.broadcast %27 : vector<1x8xf32> to vector<16x8xf32>
    %29 = arith.addf %25, %28 : vector<16x8xf32>
    %cst_28 = arith.constant dense<0.000000e+00> : vector<16x16xf32>
    %30 = tpu.matmul %15, %22, %cst_28 {dimension_numbers = #tpu.dot_dimension_numbers<[1], [1], [0], [0], [0, 0, 1, 0], [], []>} : vector<16x8xf32>, vector<16x8xf32>, vector<16x16xf32> -> vector<16x16xf32>
    %31 = arith.addf %30, %0 : vector<16x16xf32>
    %cst_29 = arith.constant dense<0xFF800000> : vector<16xf32>
    %32 = vector.multi_reduction <maximumf>, %31, %cst_29 [1] : vector<16x16xf32> to vector<16xf32>
    %33 = vector.shape_cast %32 : vector<16xf32> to vector<16x1xf32>
    %34 = vector.broadcast %33 : vector<16x1xf32> to vector<16x16xf32>
    %35 = arith.subf %31, %34 : vector<16x16xf32>
    %36 = math.exp %35 : vector<16x16xf32>
    %cst_30 = arith.constant dense<0.000000e+00> : vector<16xf32>
    %37 = vector.multi_reduction <add>, %36, %cst_30 [1] : vector<16x16xf32> to vector<16xf32>
    %38 = vector.shape_cast %37 : vector<16xf32> to vector<16x1xf32>
    %39 = tpu.reciprocal %38 {approx = true} : vector<16x1xf32> -> vector<16x1xf32>
    %40 = vector.broadcast %39 : vector<16x1xf32> to vector<16x16xf32>
    %41 = arith.mulf %36, %40 : vector<16x16xf32>
    %cst_31 = arith.constant dense<0.000000e+00> : vector<16x8xf32>
    %42 = tpu.matmul %41, %29, %cst_31 {dimension_numbers = #tpu.dot_dimension_numbers<[1], [0], [0], [1], [0, 0, 1, 1], [], []>} : vector<16x16xf32>, vector<16x8xf32>, vector<16x8xf32> -> vector<16x8xf32>
    %c0_32 = arith.constant 0 : index
    %c0_33 = arith.constant 0 : index
    %c0_34 = arith.constant 0 : index
    %43 = vector.load %arg8[%c0_32, %c0_33, %c0_34] : memref<24x8x32xf32, #tpu.memory_space<vmem>>, vector<1x8x32xf32>
    %44 = vector.shape_cast %43 : vector<1x8x32xf32> to vector<8x32xf32>
    %cst_35 = arith.constant dense<0.000000e+00> : vector<16x32xf32>
    %45 = tpu.matmul %42, %44, %cst_35 {dimension_numbers = #tpu.dot_dimension_numbers<[1], [0], [0], [1], [0, 0, 1, 1], [], []>} : vector<16x8xf32>, vector<8x32xf32>, vector<16x32xf32> -> vector<16x32xf32>
    %c1 = arith.constant 1 : index
    %c0_36 = arith.constant 0 : index
    %c0_37 = arith.constant 0 : index
    %46 = vector.load %arg6[%c1, %c0_36, %c0_37] : memref<72x32x8xf32, #tpu.memory_space<vmem>>, vector<1x32x8xf32>
    %47 = vector.shape_cast %46 : vector<1x32x8xf32> to vector<32x8xf32>
    %cst_38 = arith.constant dense<0.000000e+00> : vector<16x8xf32>
    %48 = tpu.matmul %8, %47, %cst_38 {dimension_numbers = #tpu.dot_dimension_numbers<[1], [0], [0], [1], [0, 0, 1, 1], [], []>} : vector<16x32xf32>, vector<32x8xf32>, vector<16x8xf32> -> vector<16x8xf32>
    %c1_39 = arith.constant 1 : index
    %c0_40 = arith.constant 0 : index
    %c0_41 = arith.constant 0 : index
    %49 = vector.load %arg7[%c1_39, %c0_40, %c0_41] : memref<72x1x8xf32, #tpu.memory_space<vmem>>, vector<1x1x8xf32>
    %50 = vector.shape_cast %49 : vector<1x1x8xf32> to vector<1x8xf32>
    %51 = vector.broadcast %50 : vector<1x8xf32> to vector<16x8xf32>
    %52 = arith.addf %48, %51 : vector<16x8xf32>
    %c5 = arith.constant 5 : index
    %c0_42 = arith.constant 0 : index
    %c0_43 = arith.constant 0 : index
    %53 = vector.load %arg6[%c5, %c0_42, %c0_43] : memref<72x32x8xf32, #tpu.memory_space<vmem>>, vector<1x32x8xf32>
    %54 = vector.shape_cast %53 : vector<1x32x8xf32> to vector<32x8xf32>
    %cst_44 = arith.constant dense<0.000000e+00> : vector<16x8xf32>
    %55 = tpu.matmul %8, %54, %cst_44 {dimension_numbers = #tpu.dot_dimension_numbers<[1], [0], [0], [1], [0, 0, 1, 1], [], []>} : vector<16x32xf32>, vector<32x8xf32>, vector<16x8xf32> -> vector<16x8xf32>
    %c5_45 = arith.constant 5 : index
    %c0_46 = arith.constant 0 : index
    %c0_47 = arith.constant 0 : index
    %56 = vector.load %arg7[%c5_45, %c0_46, %c0_47] : memref<72x1x8xf32, #tpu.memory_space<vmem>>, vector<1x1x8xf32>
    %57 = vector.shape_cast %56 : vector<1x1x8xf32> to vector<1x8xf32>
    %58 = vector.broadcast %57 : vector<1x8xf32> to vector<16x8xf32>
    %59 = arith.addf %55, %58 : vector<16x8xf32>
    %c9 = arith.constant 9 : index
    %c0_48 = arith.constant 0 : index
    %c0_49 = arith.constant 0 : index
    %60 = vector.load %arg6[%c9, %c0_48, %c0_49] : memref<72x32x8xf32, #tpu.memory_space<vmem>>, vector<1x32x8xf32>
    %61 = vector.shape_cast %60 : vector<1x32x8xf32> to vector<32x8xf32>
    %cst_50 = arith.constant dense<0.000000e+00> : vector<16x8xf32>
    %62 = tpu.matmul %8, %61, %cst_50 {dimension_numbers = #tpu.dot_dimension_numbers<[1], [0], [0], [1], [0, 0, 1, 1], [], []>} : vector<16x32xf32>, vector<32x8xf32>, vector<16x8xf32> -> vector<16x8xf32>
    %c9_51 = arith.constant 9 : index
    %c0_52 = arith.constant 0 : index
    %c0_53 = arith.constant 0 : index
    %63 = vector.load %arg7[%c9_51, %c0_52, %c0_53] : memref<72x1x8xf32, #tpu.memory_space<vmem>>, vector<1x1x8xf32>
    %64 = vector.shape_cast %63 : vector<1x1x8xf32> to vector<1x8xf32>
    %65 = vector.broadcast %64 : vector<1x8xf32> to vector<16x8xf32>
    %66 = arith.addf %62, %65 : vector<16x8xf32>
    %cst_54 = arith.constant dense<0.000000e+00> : vector<16x16xf32>
    %67 = tpu.matmul %52, %59, %cst_54 {dimension_numbers = #tpu.dot_dimension_numbers<[1], [1], [0], [0], [0, 0, 1, 0], [], []>} : vector<16x8xf32>, vector<16x8xf32>, vector<16x16xf32> -> vector<16x16xf32>
    %68 = arith.addf %67, %0 : vector<16x16xf32>
    %cst_55 = arith.constant dense<0xFF800000> : vector<16xf32>
    %69 = vector.multi_reduction <maximumf>, %68, %cst_55 [1] : vector<16x16xf32> to vector<16xf32>
    %70 = vector.shape_cast %69 : vector<16xf32> to vector<16x1xf32>
    %71 = vector.broadcast %70 : vector<16x1xf32> to vector<16x16xf32>
    %72 = arith.subf %68, %71 : vector<16x16xf32>
    %73 = math.exp %72 : vector<16x16xf32>
    %cst_56 = arith.constant dense<0.000000e+00> : vector<16xf32>
    %74 = vector.multi_reduction <add>, %73, %cst_56 [1] : vector<16x16xf32> to vector<16xf32>
    %75 = vector.shape_cast %74 : vector<16xf32> to vector<16x1xf32>
    %76 = tpu.reciprocal %75 {approx = true} : vector<16x1xf32> -> vector<16x1xf32>
    %77 = vector.broadcast %76 : vector<16x1xf32> to vector<16x16xf32>
    %78 = arith.mulf %73, %77 : vector<16x16xf32>
    %cst_57 = arith.constant dense<0.000000e+00> : vector<16x8xf32>
    %79 = tpu.matmul %78, %66, %cst_57 {dimension_numbers = #tpu.dot_dimension_numbers<[1], [0], [0], [1], [0, 0, 1, 1], [], []>} : vector<16x16xf32>, vector<16x8xf32>, vector<16x8xf32> -> vector<16x8xf32>
    %c1_58 = arith.constant 1 : index
    %c0_59 = arith.constant 0 : index
    %c0_60 = arith.constant 0 : index
    %80 = vector.load %arg8[%c1_58, %c0_59, %c0_60] : memref<24x8x32xf32, #tpu.memory_space<vmem>>, vector<1x8x32xf32>
    %81 = vector.shape_cast %80 : vector<1x8x32xf32> to vector<8x32xf32>
    %cst_61 = arith.constant dense<0.000000e+00> : vector<16x32xf32>
    %82 = tpu.matmul %79, %81, %cst_61 {dimension_numbers = #tpu.dot_dimension_numbers<[1], [0], [0], [1], [0, 0, 1, 1], [], []>} : vector<16x8xf32>, vector<8x32xf32>, vector<16x32xf32> -> vector<16x32xf32>
    %83 = arith.addf %45, %82 : vector<16x32xf32>
    %c2 = arith.constant 2 : index
    %c0_62 = arith.constant 0 : index
    %c0_63 = arith.constant 0 : index
    %84 = vector.load %arg6[%c2, %c0_62, %c0_63] : memref<72x32x8xf32, #tpu.memory_space<vmem>>, vector<1x32x8xf32>
    %85 = vector.shape_cast %84 : vector<1x32x8xf32> to vector<32x8xf32>
    %cst_64 = arith.constant dense<0.000000e+00> : vector<16x8xf32>
    %86 = tpu.matmul %8, %85, %cst_64 {dimension_numbers = #tpu.dot_dimension_numbers<[1], [0], [0], [1], [0, 0, 1, 1], [], []>} : vector<16x32xf32>, vector<32x8xf32>, vector<16x8xf32> -> vector<16x8xf32>
    %c2_65 = arith.constant 2 : index
    %c0_66 = arith.constant 0 : index
    %c0_67 = arith.constant 0 : index
    %87 = vector.load %arg7[%c2_65, %c0_66, %c0_67] : memref<72x1x8xf32, #tpu.memory_space<vmem>>, vector<1x1x8xf32>
    %88 = vector.shape_cast %87 : vector<1x1x8xf32> to vector<1x8xf32>
    %89 = vector.broadcast %88 : vector<1x8xf32> to vector<16x8xf32>
    %90 = arith.addf %86, %89 : vector<16x8xf32>
    %c6 = arith.constant 6 : index
    %c0_68 = arith.constant 0 : index
    %c0_69 = arith.constant 0 : index
    %91 = vector.load %arg6[%c6, %c0_68, %c0_69] : memref<72x32x8xf32, #tpu.memory_space<vmem>>, vector<1x32x8xf32>
    %92 = vector.shape_cast %91 : vector<1x32x8xf32> to vector<32x8xf32>
    %cst_70 = arith.constant dense<0.000000e+00> : vector<16x8xf32>
    %93 = tpu.matmul %8, %92, %cst_70 {dimension_numbers = #tpu.dot_dimension_numbers<[1], [0], [0], [1], [0, 0, 1, 1], [], []>} : vector<16x32xf32>, vector<32x8xf32>, vector<16x8xf32> -> vector<16x8xf32>
    %c6_71 = arith.constant 6 : index
    %c0_72 = arith.constant 0 : index
    %c0_73 = arith.constant 0 : index
    %94 = vector.load %arg7[%c6_71, %c0_72, %c0_73] : memref<72x1x8xf32, #tpu.memory_space<vmem>>, vector<1x1x8xf32>
    %95 = vector.shape_cast %94 : vector<1x1x8xf32> to vector<1x8xf32>
    %96 = vector.broadcast %95 : vector<1x8xf32> to vector<16x8xf32>
    %97 = arith.addf %93, %96 : vector<16x8xf32>
    %c10 = arith.constant 10 : index
    %c0_74 = arith.constant 0 : index
    %c0_75 = arith.constant 0 : index
    %98 = vector.load %arg6[%c10, %c0_74, %c0_75] : memref<72x32x8xf32, #tpu.memory_space<vmem>>, vector<1x32x8xf32>
    %99 = vector.shape_cast %98 : vector<1x32x8xf32> to vector<32x8xf32>
    %cst_76 = arith.constant dense<0.000000e+00> : vector<16x8xf32>
    %100 = tpu.matmul %8, %99, %cst_76 {dimension_numbers = #tpu.dot_dimension_numbers<[1], [0], [0], [1], [0, 0, 1, 1], [], []>} : vector<16x32xf32>, vector<32x8xf32>, vector<16x8xf32> -> vector<16x8xf32>
    %c10_77 = arith.constant 10 : index
    %c0_78 = arith.constant 0 : index
    %c0_79 = arith.constant 0 : index
    %101 = vector.load %arg7[%c10_77, %c0_78, %c0_79] : memref<72x1x8xf32, #tpu.memory_space<vmem>>, vector<1x1x8xf32>
    %102 = vector.shape_cast %101 : vector<1x1x8xf32> to vector<1x8xf32>
    %103 = vector.broadcast %102 : vector<1x8xf32> to vector<16x8xf32>
    %104 = arith.addf %100, %103 : vector<16x8xf32>
    %cst_80 = arith.constant dense<0.000000e+00> : vector<16x16xf32>
    %105 = tpu.matmul %90, %97, %cst_80 {dimension_numbers = #tpu.dot_dimension_numbers<[1], [1], [0], [0], [0, 0, 1, 0], [], []>} : vector<16x8xf32>, vector<16x8xf32>, vector<16x16xf32> -> vector<16x16xf32>
    %106 = arith.addf %105, %0 : vector<16x16xf32>
    %cst_81 = arith.constant dense<0xFF800000> : vector<16xf32>
    %107 = vector.multi_reduction <maximumf>, %106, %cst_81 [1] : vector<16x16xf32> to vector<16xf32>
    %108 = vector.shape_cast %107 : vector<16xf32> to vector<16x1xf32>
    %109 = vector.broadcast %108 : vector<16x1xf32> to vector<16x16xf32>
    %110 = arith.subf %106, %109 : vector<16x16xf32>
    %111 = math.exp %110 : vector<16x16xf32>
    %cst_82 = arith.constant dense<0.000000e+00> : vector<16xf32>
    %112 = vector.multi_reduction <add>, %111, %cst_82 [1] : vector<16x16xf32> to vector<16xf32>
    %113 = vector.shape_cast %112 : vector<16xf32> to vector<16x1xf32>
    %114 = tpu.reciprocal %113 {approx = true} : vector<16x1xf32> -> vector<16x1xf32>
    %115 = vector.broadcast %114 : vector<16x1xf32> to vector<16x16xf32>
    %116 = arith.mulf %111, %115 : vector<16x16xf32>
    %cst_83 = arith.constant dense<0.000000e+00> : vector<16x8xf32>
    %117 = tpu.matmul %116, %104, %cst_83 {dimension_numbers = #tpu.dot_dimension_numbers<[1], [0], [0], [1], [0, 0, 1, 1], [], []>} : vector<16x16xf32>, vector<16x8xf32>, vector<16x8xf32> -> vector<16x8xf32>
    %c2_84 = arith.constant 2 : index
    %c0_85 = arith.constant 0 : index
    %c0_86 = arith.constant 0 : index
    %118 = vector.load %arg8[%c2_84, %c0_85, %c0_86] : memref<24x8x32xf32, #tpu.memory_space<vmem>>, vector<1x8x32xf32>
    %119 = vector.shape_cast %118 : vector<1x8x32xf32> to vector<8x32xf32>
    %cst_87 = arith.constant dense<0.000000e+00> : vector<16x32xf32>
    %120 = tpu.matmul %117, %119, %cst_87 {dimension_numbers = #tpu.dot_dimension_numbers<[1], [0], [0], [1], [0, 0, 1, 1], [], []>} : vector<16x8xf32>, vector<8x32xf32>, vector<16x32xf32> -> vector<16x32xf32>
    %121 = arith.addf %83, %120 : vector<16x32xf32>
    %c3 = arith.constant 3 : index
    %c0_88 = arith.constant 0 : index
    %c0_89 = arith.constant 0 : index
    %122 = vector.load %arg6[%c3, %c0_88, %c0_89] : memref<72x32x8xf32, #tpu.memory_space<vmem>>, vector<1x32x8xf32>
    %123 = vector.shape_cast %122 : vector<1x32x8xf32> to vector<32x8xf32>
    %cst_90 = arith.constant dense<0.000000e+00> : vector<16x8xf32>
    %124 = tpu.matmul %8, %123, %cst_90 {dimension_numbers = #tpu.dot_dimension_numbers<[1], [0], [0], [1], [0, 0, 1, 1], [], []>} : vector<16x32xf32>, vector<32x8xf32>, vector<16x8xf32> -> vector<16x8xf32>
    %c3_91 = arith.constant 3 : index
    %c0_92 = arith.constant 0 : index
    %c0_93 = arith.constant 0 : index
    %125 = vector.load %arg7[%c3_91, %c0_92, %c0_93] : memref<72x1x8xf32, #tpu.memory_space<vmem>>, vector<1x1x8xf32>
    %126 = vector.shape_cast %125 : vector<1x1x8xf32> to vector<1x8xf32>
    %127 = vector.broadcast %126 : vector<1x8xf32> to vector<16x8xf32>
    %128 = arith.addf %124, %127 : vector<16x8xf32>
    %c7 = arith.constant 7 : index
    %c0_94 = arith.constant 0 : index
    %c0_95 = arith.constant 0 : index
    %129 = vector.load %arg6[%c7, %c0_94, %c0_95] : memref<72x32x8xf32, #tpu.memory_space<vmem>>, vector<1x32x8xf32>
    %130 = vector.shape_cast %129 : vector<1x32x8xf32> to vector<32x8xf32>
    %cst_96 = arith.constant dense<0.000000e+00> : vector<16x8xf32>
    %131 = tpu.matmul %8, %130, %cst_96 {dimension_numbers = #tpu.dot_dimension_numbers<[1], [0], [0], [1], [0, 0, 1, 1], [], []>} : vector<16x32xf32>, vector<32x8xf32>, vector<16x8xf32> -> vector<16x8xf32>
    %c7_97 = arith.constant 7 : index
    %c0_98 = arith.constant 0 : index
    %c0_99 = arith.constant 0 : index
    %132 = vector.load %arg7[%c7_97, %c0_98, %c0_99] : memref<72x1x8xf32, #tpu.memory_space<vmem>>, vector<1x1x8xf32>
    %133 = vector.shape_cast %132 : vector<1x1x8xf32> to vector<1x8xf32>
    %134 = vector.broadcast %133 : vector<1x8xf32> to vector<16x8xf32>
    %135 = arith.addf %131, %134 : vector<16x8xf32>
    %c11 = arith.constant 11 : index
    %c0_100 = arith.constant 0 : index
    %c0_101 = arith.constant 0 : index
    %136 = vector.load %arg6[%c11, %c0_100, %c0_101] : memref<72x32x8xf32, #tpu.memory_space<vmem>>, vector<1x32x8xf32>
    %137 = vector.shape_cast %136 : vector<1x32x8xf32> to vector<32x8xf32>
    %cst_102 = arith.constant dense<0.000000e+00> : vector<16x8xf32>
    %138 = tpu.matmul %8, %137, %cst_102 {dimension_numbers = #tpu.dot_dimension_numbers<[1], [0], [0], [1], [0, 0, 1, 1], [], []>} : vector<16x32xf32>, vector<32x8xf32>, vector<16x8xf32> -> vector<16x8xf32>
    %c11_103 = arith.constant 11 : index
    %c0_104 = arith.constant 0 : index
    %c0_105 = arith.constant 0 : index
    %139 = vector.load %arg7[%c11_103, %c0_104, %c0_105] : memref<72x1x8xf32, #tpu.memory_space<vmem>>, vector<1x1x8xf32>
    %140 = vector.shape_cast %139 : vector<1x1x8xf32> to vector<1x8xf32>
    %141 = vector.broadcast %140 : vector<1x8xf32> to vector<16x8xf32>
    %142 = arith.addf %138, %141 : vector<16x8xf32>
    %cst_106 = arith.constant dense<0.000000e+00> : vector<16x16xf32>
    %143 = tpu.matmul %128, %135, %cst_106 {dimension_numbers = #tpu.dot_dimension_numbers<[1], [1], [0], [0], [0, 0, 1, 0], [], []>} : vector<16x8xf32>, vector<16x8xf32>, vector<16x16xf32> -> vector<16x16xf32>
    %144 = arith.addf %143, %0 : vector<16x16xf32>
    %cst_107 = arith.constant dense<0xFF800000> : vector<16xf32>
    %145 = vector.multi_reduction <maximumf>, %144, %cst_107 [1] : vector<16x16xf32> to vector<16xf32>
    %146 = vector.shape_cast %145 : vector<16xf32> to vector<16x1xf32>
    %147 = vector.broadcast %146 : vector<16x1xf32> to vector<16x16xf32>
    %148 = arith.subf %144, %147 : vector<16x16xf32>
    %149 = math.exp %148 : vector<16x16xf32>
    %cst_108 = arith.constant dense<0.000000e+00> : vector<16xf32>
    %150 = vector.multi_reduction <add>, %149, %cst_108 [1] : vector<16x16xf32> to vector<16xf32>
    %151 = vector.shape_cast %150 : vector<16xf32> to vector<16x1xf32>
    %152 = tpu.reciprocal %151 {approx = true} : vector<16x1xf32> -> vector<16x1xf32>
    %153 = vector.broadcast %152 : vector<16x1xf32> to vector<16x16xf32>
    %154 = arith.mulf %149, %153 : vector<16x16xf32>
    %cst_109 = arith.constant dense<0.000000e+00> : vector<16x8xf32>
    %155 = tpu.matmul %154, %142, %cst_109 {dimension_numbers = #tpu.dot_dimension_numbers<[1], [0], [0], [1], [0, 0, 1, 1], [], []>} : vector<16x16xf32>, vector<16x8xf32>, vector<16x8xf32> -> vector<16x8xf32>
    %c3_110 = arith.constant 3 : index
    %c0_111 = arith.constant 0 : index
    %c0_112 = arith.constant 0 : index
    %156 = vector.load %arg8[%c3_110, %c0_111, %c0_112] : memref<24x8x32xf32, #tpu.memory_space<vmem>>, vector<1x8x32xf32>
    %157 = vector.shape_cast %156 : vector<1x8x32xf32> to vector<8x32xf32>
    %cst_113 = arith.constant dense<0.000000e+00> : vector<16x32xf32>
    %158 = tpu.matmul %155, %157, %cst_113 {dimension_numbers = #tpu.dot_dimension_numbers<[1], [0], [0], [1], [0, 0, 1, 1], [], []>} : vector<16x8xf32>, vector<8x32xf32>, vector<16x32xf32> -> vector<16x32xf32>
    %159 = arith.addf %121, %158 : vector<16x32xf32>
    %c4_114 = arith.constant 4 : index
    %c0_115 = arith.constant 0 : index
    %c0_116 = arith.constant 0 : index
    %160 = vector.load %arg12[%c4_114, %c0_115, %c0_116] : memref<36x1x32xf32, #tpu.memory_space<vmem>>, vector<1x1x32xf32>
    %161 = vector.shape_cast %160 : vector<1x1x32xf32> to vector<1x32xf32>
    %162 = vector.broadcast %161 : vector<1x32xf32> to vector<16x32xf32>
    %163 = arith.addf %159, %162 : vector<16x32xf32>
    %164 = arith.addf %8, %163 : vector<16x32xf32>
    %c0_117 = arith.constant 0 : index
    %c0_118 = arith.constant 0 : index
    %c0_119 = arith.constant 0 : index
    %165 = vector.load %arg12[%c0_117, %c0_118, %c0_119] : memref<36x1x32xf32, #tpu.memory_space<vmem>>, vector<1x1x32xf32>
    %166 = vector.shape_cast %165 : vector<1x1x32xf32> to vector<1x32xf32>
    %c1_120 = arith.constant 1 : index
    %c0_121 = arith.constant 0 : index
    %c0_122 = arith.constant 0 : index
    %167 = vector.load %arg12[%c1_120, %c0_121, %c0_122] : memref<36x1x32xf32, #tpu.memory_space<vmem>>, vector<1x1x32xf32>
    %168 = vector.shape_cast %167 : vector<1x1x32xf32> to vector<1x32xf32>
    %cst_123 = arith.constant dense<0.000000e+00> : vector<16xf32>
    %169 = vector.multi_reduction <add>, %164, %cst_123 [1] : vector<16x32xf32> to vector<16xf32>
    %170 = vector.shape_cast %169 : vector<16xf32> to vector<16x1xf32>
    %cst_124 = arith.constant 3.200000e+01 : f32
    %171 = vector.broadcast %cst_124 : f32 to vector<16x1xf32>
    %172 = arith.divf %170, %171 : vector<16x1xf32>
    %173 = vector.broadcast %172 : vector<16x1xf32> to vector<16x32xf32>
    %174 = arith.subf %164, %173 : vector<16x32xf32>
    %175 = arith.mulf %174, %174 : vector<16x32xf32>
    %cst_125 = arith.constant dense<0.000000e+00> : vector<16xf32>
    %176 = vector.multi_reduction <add>, %175, %cst_125 [1] : vector<16x32xf32> to vector<16xf32>
    %177 = vector.shape_cast %176 : vector<16xf32> to vector<16x1xf32>
    %cst_126 = arith.constant 3.200000e+01 : f32
    %178 = vector.broadcast %cst_126 : f32 to vector<16x1xf32>
    %179 = arith.divf %177, %178 : vector<16x1xf32>
    %180 = vector.broadcast %172 : vector<16x1xf32> to vector<16x32xf32>
    %181 = arith.subf %164, %180 : vector<16x32xf32>
    %cst_127 = arith.constant 9.99999974E-6 : f32
    %182 = vector.broadcast %cst_127 : f32 to vector<16x1xf32>
    %183 = arith.addf %179, %182 : vector<16x1xf32>
    %184 = math.rsqrt %183 : vector<16x1xf32>
    %185 = vector.broadcast %184 : vector<16x1xf32> to vector<16x32xf32>
    %186 = arith.mulf %181, %185 : vector<16x32xf32>
    %187 = vector.broadcast %166 : vector<1x32xf32> to vector<16x32xf32>
    %188 = arith.mulf %186, %187 : vector<16x32xf32>
    %189 = vector.broadcast %168 : vector<1x32xf32> to vector<16x32xf32>
    %190 = arith.addf %188, %189 : vector<16x32xf32>
    %c0_128 = arith.constant 0 : index
    %c0_129 = arith.constant 0 : index
    %c0_130 = arith.constant 0 : index
    %191 = vector.load %arg9[%c0_128, %c0_129, %c0_130] : memref<6x32x64xf32, #tpu.memory_space<vmem>>, vector<1x32x64xf32>
    %192 = vector.shape_cast %191 : vector<1x32x64xf32> to vector<32x64xf32>
    %cst_131 = arith.constant dense<0.000000e+00> : vector<16x64xf32>
    %193 = tpu.matmul %190, %192, %cst_131 {dimension_numbers = #tpu.dot_dimension_numbers<[1], [0], [0], [1], [0, 0, 1, 1], [], []>} : vector<16x32xf32>, vector<32x64xf32>, vector<16x64xf32> -> vector<16x64xf32>
    %c0_132 = arith.constant 0 : index
    %c0_133 = arith.constant 0 : index
    %c0_134 = arith.constant 0 : index
    %194 = vector.load %arg11[%c0_132, %c0_133, %c0_134] : memref<6x1x64xf32, #tpu.memory_space<vmem>>, vector<1x1x64xf32>
    %195 = vector.shape_cast %194 : vector<1x1x64xf32> to vector<1x64xf32>
    %196 = vector.broadcast %195 : vector<1x64xf32> to vector<16x64xf32>
    %197 = arith.addf %193, %196 : vector<16x64xf32>
    %cst_135 = arith.constant 0.000000e+00 : f32
    %198 = vector.broadcast %cst_135 : f32 to vector<16x64xf32>
    %199 = arith.maximumf %197, %198 : vector<16x64xf32>
    %c0_136 = arith.constant 0 : index
    %c0_137 = arith.constant 0 : index
    %c0_138 = arith.constant 0 : index
    %200 = vector.load %arg10[%c0_136, %c0_137, %c0_138] : memref<6x64x32xf32, #tpu.memory_space<vmem>>, vector<1x64x32xf32>
    %201 = vector.shape_cast %200 : vector<1x64x32xf32> to vector<64x32xf32>
    %cst_139 = arith.constant dense<0.000000e+00> : vector<16x32xf32>
    %202 = tpu.matmul %199, %201, %cst_139 {dimension_numbers = #tpu.dot_dimension_numbers<[1], [0], [0], [1], [0, 0, 1, 1], [], []>} : vector<16x64xf32>, vector<64x32xf32>, vector<16x32xf32> -> vector<16x32xf32>
    %c5_140 = arith.constant 5 : index
    %c0_141 = arith.constant 0 : index
    %c0_142 = arith.constant 0 : index
    %203 = vector.load %arg12[%c5_140, %c0_141, %c0_142] : memref<36x1x32xf32, #tpu.memory_space<vmem>>, vector<1x1x32xf32>
    %204 = vector.shape_cast %203 : vector<1x1x32xf32> to vector<1x32xf32>
    %205 = vector.broadcast %204 : vector<1x32xf32> to vector<16x32xf32>
    %206 = arith.addf %202, %205 : vector<16x32xf32>
    %207 = arith.addf %190, %206 : vector<16x32xf32>
    %c2_143 = arith.constant 2 : index
    %c0_144 = arith.constant 0 : index
    %c0_145 = arith.constant 0 : index
    %208 = vector.load %arg12[%c2_143, %c0_144, %c0_145] : memref<36x1x32xf32, #tpu.memory_space<vmem>>, vector<1x1x32xf32>
    %209 = vector.shape_cast %208 : vector<1x1x32xf32> to vector<1x32xf32>
    %c3_146 = arith.constant 3 : index
    %c0_147 = arith.constant 0 : index
    %c0_148 = arith.constant 0 : index
    %210 = vector.load %arg12[%c3_146, %c0_147, %c0_148] : memref<36x1x32xf32, #tpu.memory_space<vmem>>, vector<1x1x32xf32>
    %211 = vector.shape_cast %210 : vector<1x1x32xf32> to vector<1x32xf32>
    %cst_149 = arith.constant dense<0.000000e+00> : vector<16xf32>
    %212 = vector.multi_reduction <add>, %207, %cst_149 [1] : vector<16x32xf32> to vector<16xf32>
    %213 = vector.shape_cast %212 : vector<16xf32> to vector<16x1xf32>
    %cst_150 = arith.constant 3.200000e+01 : f32
    %214 = vector.broadcast %cst_150 : f32 to vector<16x1xf32>
    %215 = arith.divf %213, %214 : vector<16x1xf32>
    %216 = vector.broadcast %215 : vector<16x1xf32> to vector<16x32xf32>
    %217 = arith.subf %207, %216 : vector<16x32xf32>
    %218 = arith.mulf %217, %217 : vector<16x32xf32>
    %cst_151 = arith.constant dense<0.000000e+00> : vector<16xf32>
    %219 = vector.multi_reduction <add>, %218, %cst_151 [1] : vector<16x32xf32> to vector<16xf32>
    %220 = vector.shape_cast %219 : vector<16xf32> to vector<16x1xf32>
    %cst_152 = arith.constant 3.200000e+01 : f32
    %221 = vector.broadcast %cst_152 : f32 to vector<16x1xf32>
    %222 = arith.divf %220, %221 : vector<16x1xf32>
    %223 = vector.broadcast %215 : vector<16x1xf32> to vector<16x32xf32>
    %224 = arith.subf %207, %223 : vector<16x32xf32>
    %cst_153 = arith.constant 9.99999974E-6 : f32
    %225 = vector.broadcast %cst_153 : f32 to vector<16x1xf32>
    %226 = arith.addf %222, %225 : vector<16x1xf32>
    %227 = math.rsqrt %226 : vector<16x1xf32>
    %228 = vector.broadcast %227 : vector<16x1xf32> to vector<16x32xf32>
    %229 = arith.mulf %224, %228 : vector<16x32xf32>
    %230 = vector.broadcast %209 : vector<1x32xf32> to vector<16x32xf32>
    %231 = arith.mulf %229, %230 : vector<16x32xf32>
    %232 = vector.broadcast %211 : vector<1x32xf32> to vector<16x32xf32>
    %233 = arith.addf %231, %232 : vector<16x32xf32>
    %c12 = arith.constant 12 : index
    %c0_154 = arith.constant 0 : index
    %c0_155 = arith.constant 0 : index
    %234 = vector.load %arg6[%c12, %c0_154, %c0_155] : memref<72x32x8xf32, #tpu.memory_space<vmem>>, vector<1x32x8xf32>
    %235 = vector.shape_cast %234 : vector<1x32x8xf32> to vector<32x8xf32>
    %cst_156 = arith.constant dense<0.000000e+00> : vector<16x8xf32>
    %236 = tpu.matmul %233, %235, %cst_156 {dimension_numbers = #tpu.dot_dimension_numbers<[1], [0], [0], [1], [0, 0, 1, 1], [], []>} : vector<16x32xf32>, vector<32x8xf32>, vector<16x8xf32> -> vector<16x8xf32>
    %c12_157 = arith.constant 12 : index
    %c0_158 = arith.constant 0 : index
    %c0_159 = arith.constant 0 : index
    %237 = vector.load %arg7[%c12_157, %c0_158, %c0_159] : memref<72x1x8xf32, #tpu.memory_space<vmem>>, vector<1x1x8xf32>
    %238 = vector.shape_cast %237 : vector<1x1x8xf32> to vector<1x8xf32>
    %239 = vector.broadcast %238 : vector<1x8xf32> to vector<16x8xf32>
    %240 = arith.addf %236, %239 : vector<16x8xf32>
    %c16 = arith.constant 16 : index
    %c0_160 = arith.constant 0 : index
    %c0_161 = arith.constant 0 : index
    %241 = vector.load %arg6[%c16, %c0_160, %c0_161] : memref<72x32x8xf32, #tpu.memory_space<vmem>>, vector<1x32x8xf32>
    %242 = vector.shape_cast %241 : vector<1x32x8xf32> to vector<32x8xf32>
    %cst_162 = arith.constant dense<0.000000e+00> : vector<16x8xf32>
    %243 = tpu.matmul %233, %242, %cst_162 {dimension_numbers = #tpu.dot_dimension_numbers<[1], [0], [0], [1], [0, 0, 1, 1], [], []>} : vector<16x32xf32>, vector<32x8xf32>, vector<16x8xf32> -> vector<16x8xf32>
    %c16_163 = arith.constant 16 : index
    %c0_164 = arith.constant 0 : index
    %c0_165 = arith.constant 0 : index
    %244 = vector.load %arg7[%c16_163, %c0_164, %c0_165] : memref<72x1x8xf32, #tpu.memory_space<vmem>>, vector<1x1x8xf32>
    %245 = vector.shape_cast %244 : vector<1x1x8xf32> to vector<1x8xf32>
    %246 = vector.broadcast %245 : vector<1x8xf32> to vector<16x8xf32>
    %247 = arith.addf %243, %246 : vector<16x8xf32>
    %c20 = arith.constant 20 : index
    %c0_166 = arith.constant 0 : index
    %c0_167 = arith.constant 0 : index
    %248 = vector.load %arg6[%c20, %c0_166, %c0_167] : memref<72x32x8xf32, #tpu.memory_space<vmem>>, vector<1x32x8xf32>
    %249 = vector.shape_cast %248 : vector<1x32x8xf32> to vector<32x8xf32>
    %cst_168 = arith.constant dense<0.000000e+00> : vector<16x8xf32>
    %250 = tpu.matmul %233, %249, %cst_168 {dimension_numbers = #tpu.dot_dimension_numbers<[1], [0], [0], [1], [0, 0, 1, 1], [], []>} : vector<16x32xf32>, vector<32x8xf32>, vector<16x8xf32> -> vector<16x8xf32>
    %c20_169 = arith.constant 20 : index
    %c0_170 = arith.constant 0 : index
    %c0_171 = arith.constant 0 : index
    %251 = vector.load %arg7[%c20_169, %c0_170, %c0_171] : memref<72x1x8xf32, #tpu.memory_space<vmem>>, vector<1x1x8xf32>
    %252 = vector.shape_cast %251 : vector<1x1x8xf32> to vector<1x8xf32>
    %253 = vector.broadcast %252 : vector<1x8xf32> to vector<16x8xf32>
    %254 = arith.addf %250, %253 : vector<16x8xf32>
    %cst_172 = arith.constant dense<0.000000e+00> : vector<16x16xf32>
    %255 = tpu.matmul %240, %247, %cst_172 {dimension_numbers = #tpu.dot_dimension_numbers<[1], [1], [0], [0], [0, 0, 1, 0], [], []>} : vector<16x8xf32>, vector<16x8xf32>, vector<16x16xf32> -> vector<16x16xf32>
    %256 = arith.addf %255, %0 : vector<16x16xf32>
    %cst_173 = arith.constant dense<0xFF800000> : vector<16xf32>
    %257 = vector.multi_reduction <maximumf>, %256, %cst_173 [1] : vector<16x16xf32> to vector<16xf32>
    %258 = vector.shape_cast %257 : vector<16xf32> to vector<16x1xf32>
    %259 = vector.broadcast %258 : vector<16x1xf32> to vector<16x16xf32>
    %260 = arith.subf %256, %259 : vector<16x16xf32>
    %261 = math.exp %260 : vector<16x16xf32>
    %cst_174 = arith.constant dense<0.000000e+00> : vector<16xf32>
    %262 = vector.multi_reduction <add>, %261, %cst_174 [1] : vector<16x16xf32> to vector<16xf32>
    %263 = vector.shape_cast %262 : vector<16xf32> to vector<16x1xf32>
    %264 = tpu.reciprocal %263 {approx = true} : vector<16x1xf32> -> vector<16x1xf32>
    %265 = vector.broadcast %264 : vector<16x1xf32> to vector<16x16xf32>
    %266 = arith.mulf %261, %265 : vector<16x16xf32>
    %cst_175 = arith.constant dense<0.000000e+00> : vector<16x8xf32>
    %267 = tpu.matmul %266, %254, %cst_175 {dimension_numbers = #tpu.dot_dimension_numbers<[1], [0], [0], [1], [0, 0, 1, 1], [], []>} : vector<16x16xf32>, vector<16x8xf32>, vector<16x8xf32> -> vector<16x8xf32>
    %c4_176 = arith.constant 4 : index
    %c0_177 = arith.constant 0 : index
    %c0_178 = arith.constant 0 : index
    %268 = vector.load %arg8[%c4_176, %c0_177, %c0_178] : memref<24x8x32xf32, #tpu.memory_space<vmem>>, vector<1x8x32xf32>
    %269 = vector.shape_cast %268 : vector<1x8x32xf32> to vector<8x32xf32>
    %cst_179 = arith.constant dense<0.000000e+00> : vector<16x32xf32>
    %270 = tpu.matmul %267, %269, %cst_179 {dimension_numbers = #tpu.dot_dimension_numbers<[1], [0], [0], [1], [0, 0, 1, 1], [], []>} : vector<16x8xf32>, vector<8x32xf32>, vector<16x32xf32> -> vector<16x32xf32>
    %c13 = arith.constant 13 : index
    %c0_180 = arith.constant 0 : index
    %c0_181 = arith.constant 0 : index
    %271 = vector.load %arg6[%c13, %c0_180, %c0_181] : memref<72x32x8xf32, #tpu.memory_space<vmem>>, vector<1x32x8xf32>
    %272 = vector.shape_cast %271 : vector<1x32x8xf32> to vector<32x8xf32>
    %cst_182 = arith.constant dense<0.000000e+00> : vector<16x8xf32>
    %273 = tpu.matmul %233, %272, %cst_182 {dimension_numbers = #tpu.dot_dimension_numbers<[1], [0], [0], [1], [0, 0, 1, 1], [], []>} : vector<16x32xf32>, vector<32x8xf32>, vector<16x8xf32> -> vector<16x8xf32>
    %c13_183 = arith.constant 13 : index
    %c0_184 = arith.constant 0 : index
    %c0_185 = arith.constant 0 : index
    %274 = vector.load %arg7[%c13_183, %c0_184, %c0_185] : memref<72x1x8xf32, #tpu.memory_space<vmem>>, vector<1x1x8xf32>
    %275 = vector.shape_cast %274 : vector<1x1x8xf32> to vector<1x8xf32>
    %276 = vector.broadcast %275 : vector<1x8xf32> to vector<16x8xf32>
    %277 = arith.addf %273, %276 : vector<16x8xf32>
    %c17 = arith.constant 17 : index
    %c0_186 = arith.constant 0 : index
    %c0_187 = arith.constant 0 : index
    %278 = vector.load %arg6[%c17, %c0_186, %c0_187] : memref<72x32x8xf32, #tpu.memory_space<vmem>>, vector<1x32x8xf32>
    %279 = vector.shape_cast %278 : vector<1x32x8xf32> to vector<32x8xf32>
    %cst_188 = arith.constant dense<0.000000e+00> : vector<16x8xf32>
    %280 = tpu.matmul %233, %279, %cst_188 {dimension_numbers = #tpu.dot_dimension_numbers<[1], [0], [0], [1], [0, 0, 1, 1], [], []>} : vector<16x32xf32>, vector<32x8xf32>, vector<16x8xf32> -> vector<16x8xf32>
    %c17_189 = arith.constant 17 : index
    %c0_190 = arith.constant 0 : index
    %c0_191 = arith.constant 0 : index
    %281 = vector.load %arg7[%c17_189, %c0_190, %c0_191] : memref<72x1x8xf32, #tpu.memory_space<vmem>>, vector<1x1x8xf32>
    %282 = vector.shape_cast %281 : vector<1x1x8xf32> to vector<1x8xf32>
    %283 = vector.broadcast %282 : vector<1x8xf32> to vector<16x8xf32>
    %284 = arith.addf %280, %283 : vector<16x8xf32>
    %c21 = arith.constant 21 : index
    %c0_192 = arith.constant 0 : index
    %c0_193 = arith.constant 0 : index
    %285 = vector.load %arg6[%c21, %c0_192, %c0_193] : memref<72x32x8xf32, #tpu.memory_space<vmem>>, vector<1x32x8xf32>
    %286 = vector.shape_cast %285 : vector<1x32x8xf32> to vector<32x8xf32>
    %cst_194 = arith.constant dense<0.000000e+00> : vector<16x8xf32>
    %287 = tpu.matmul %233, %286, %cst_194 {dimension_numbers = #tpu.dot_dimension_numbers<[1], [0], [0], [1], [0, 0, 1, 1], [], []>} : vector<16x32xf32>, vector<32x8xf32>, vector<16x8xf32> -> vector<16x8xf32>
    %c21_195 = arith.constant 21 : index
    %c0_196 = arith.constant 0 : index
    %c0_197 = arith.constant 0 : index
    %288 = vector.load %arg7[%c21_195, %c0_196, %c0_197] : memref<72x1x8xf32, #tpu.memory_space<vmem>>, vector<1x1x8xf32>
    %289 = vector.shape_cast %288 : vector<1x1x8xf32> to vector<1x8xf32>
    %290 = vector.broadcast %289 : vector<1x8xf32> to vector<16x8xf32>
    %291 = arith.addf %287, %290 : vector<16x8xf32>
    %cst_198 = arith.constant dense<0.000000e+00> : vector<16x16xf32>
    %292 = tpu.matmul %277, %284, %cst_198 {dimension_numbers = #tpu.dot_dimension_numbers<[1], [1], [0], [0], [0, 0, 1, 0], [], []>} : vector<16x8xf32>, vector<16x8xf32>, vector<16x16xf32> -> vector<16x16xf32>
    %293 = arith.addf %292, %0 : vector<16x16xf32>
    %cst_199 = arith.constant dense<0xFF800000> : vector<16xf32>
    %294 = vector.multi_reduction <maximumf>, %293, %cst_199 [1] : vector<16x16xf32> to vector<16xf32>
    %295 = vector.shape_cast %294 : vector<16xf32> to vector<16x1xf32>
    %296 = vector.broadcast %295 : vector<16x1xf32> to vector<16x16xf32>
    %297 = arith.subf %293, %296 : vector<16x16xf32>
    %298 = math.exp %297 : vector<16x16xf32>
    %cst_200 = arith.constant dense<0.000000e+00> : vector<16xf32>
    %299 = vector.multi_reduction <add>, %298, %cst_200 [1] : vector<16x16xf32> to vector<16xf32>
    %300 = vector.shape_cast %299 : vector<16xf32> to vector<16x1xf32>
    %301 = tpu.reciprocal %300 {approx = true} : vector<16x1xf32> -> vector<16x1xf32>
    %302 = vector.broadcast %301 : vector<16x1xf32> to vector<16x16xf32>
    %303 = arith.mulf %298, %302 : vector<16x16xf32>
    %cst_201 = arith.constant dense<0.000000e+00> : vector<16x8xf32>
    %304 = tpu.matmul %303, %291, %cst_201 {dimension_numbers = #tpu.dot_dimension_numbers<[1], [0], [0], [1], [0, 0, 1, 1], [], []>} : vector<16x16xf32>, vector<16x8xf32>, vector<16x8xf32> -> vector<16x8xf32>
    %c5_202 = arith.constant 5 : index
    %c0_203 = arith.constant 0 : index
    %c0_204 = arith.constant 0 : index
    %305 = vector.load %arg8[%c5_202, %c0_203, %c0_204] : memref<24x8x32xf32, #tpu.memory_space<vmem>>, vector<1x8x32xf32>
    %306 = vector.shape_cast %305 : vector<1x8x32xf32> to vector<8x32xf32>
    %cst_205 = arith.constant dense<0.000000e+00> : vector<16x32xf32>
    %307 = tpu.matmul %304, %306, %cst_205 {dimension_numbers = #tpu.dot_dimension_numbers<[1], [0], [0], [1], [0, 0, 1, 1], [], []>} : vector<16x8xf32>, vector<8x32xf32>, vector<16x32xf32> -> vector<16x32xf32>
    %308 = arith.addf %270, %307 : vector<16x32xf32>
    %c14 = arith.constant 14 : index
    %c0_206 = arith.constant 0 : index
    %c0_207 = arith.constant 0 : index
    %309 = vector.load %arg6[%c14, %c0_206, %c0_207] : memref<72x32x8xf32, #tpu.memory_space<vmem>>, vector<1x32x8xf32>
    %310 = vector.shape_cast %309 : vector<1x32x8xf32> to vector<32x8xf32>
    %cst_208 = arith.constant dense<0.000000e+00> : vector<16x8xf32>
    %311 = tpu.matmul %233, %310, %cst_208 {dimension_numbers = #tpu.dot_dimension_numbers<[1], [0], [0], [1], [0, 0, 1, 1], [], []>} : vector<16x32xf32>, vector<32x8xf32>, vector<16x8xf32> -> vector<16x8xf32>
    %c14_209 = arith.constant 14 : index
    %c0_210 = arith.constant 0 : index
    %c0_211 = arith.constant 0 : index
    %312 = vector.load %arg7[%c14_209, %c0_210, %c0_211] : memref<72x1x8xf32, #tpu.memory_space<vmem>>, vector<1x1x8xf32>
    %313 = vector.shape_cast %312 : vector<1x1x8xf32> to vector<1x8xf32>
    %314 = vector.broadcast %313 : vector<1x8xf32> to vector<16x8xf32>
    %315 = arith.addf %311, %314 : vector<16x8xf32>
    %c18 = arith.constant 18 : index
    %c0_212 = arith.constant 0 : index
    %c0_213 = arith.constant 0 : index
    %316 = vector.load %arg6[%c18, %c0_212, %c0_213] : memref<72x32x8xf32, #tpu.memory_space<vmem>>, vector<1x32x8xf32>
    %317 = vector.shape_cast %316 : vector<1x32x8xf32> to vector<32x8xf32>
    %cst_214 = arith.constant dense<0.000000e+00> : vector<16x8xf32>
    %318 = tpu.matmul %233, %317, %cst_214 {dimension_numbers = #tpu.dot_dimension_numbers<[1], [0], [0], [1], [0, 0, 1, 1], [], []>} : vector<16x32xf32>, vector<32x8xf32>, vector<16x8xf32> -> vector<16x8xf32>
    %c18_215 = arith.constant 18 : index
    %c0_216 = arith.constant 0 : index
    %c0_217 = arith.constant 0 : index
    %319 = vector.load %arg7[%c18_215, %c0_216, %c0_217] : memref<72x1x8xf32, #tpu.memory_space<vmem>>, vector<1x1x8xf32>
    %320 = vector.shape_cast %319 : vector<1x1x8xf32> to vector<1x8xf32>
    %321 = vector.broadcast %320 : vector<1x8xf32> to vector<16x8xf32>
    %322 = arith.addf %318, %321 : vector<16x8xf32>
    %c22 = arith.constant 22 : index
    %c0_218 = arith.constant 0 : index
    %c0_219 = arith.constant 0 : index
    %323 = vector.load %arg6[%c22, %c0_218, %c0_219] : memref<72x32x8xf32, #tpu.memory_space<vmem>>, vector<1x32x8xf32>
    %324 = vector.shape_cast %323 : vector<1x32x8xf32> to vector<32x8xf32>
    %cst_220 = arith.constant dense<0.000000e+00> : vector<16x8xf32>
    %325 = tpu.matmul %233, %324, %cst_220 {dimension_numbers = #tpu.dot_dimension_numbers<[1], [0], [0], [1], [0, 0, 1, 1], [], []>} : vector<16x32xf32>, vector<32x8xf32>, vector<16x8xf32> -> vector<16x8xf32>
    %c22_221 = arith.constant 22 : index
    %c0_222 = arith.constant 0 : index
    %c0_223 = arith.constant 0 : index
    %326 = vector.load %arg7[%c22_221, %c0_222, %c0_223] : memref<72x1x8xf32, #tpu.memory_space<vmem>>, vector<1x1x8xf32>
    %327 = vector.shape_cast %326 : vector<1x1x8xf32> to vector<1x8xf32>
    %328 = vector.broadcast %327 : vector<1x8xf32> to vector<16x8xf32>
    %329 = arith.addf %325, %328 : vector<16x8xf32>
    %cst_224 = arith.constant dense<0.000000e+00> : vector<16x16xf32>
    %330 = tpu.matmul %315, %322, %cst_224 {dimension_numbers = #tpu.dot_dimension_numbers<[1], [1], [0], [0], [0, 0, 1, 0], [], []>} : vector<16x8xf32>, vector<16x8xf32>, vector<16x16xf32> -> vector<16x16xf32>
    %331 = arith.addf %330, %0 : vector<16x16xf32>
    %cst_225 = arith.constant dense<0xFF800000> : vector<16xf32>
    %332 = vector.multi_reduction <maximumf>, %331, %cst_225 [1] : vector<16x16xf32> to vector<16xf32>
    %333 = vector.shape_cast %332 : vector<16xf32> to vector<16x1xf32>
    %334 = vector.broadcast %333 : vector<16x1xf32> to vector<16x16xf32>
    %335 = arith.subf %331, %334 : vector<16x16xf32>
    %336 = math.exp %335 : vector<16x16xf32>
    %cst_226 = arith.constant dense<0.000000e+00> : vector<16xf32>
    %337 = vector.multi_reduction <add>, %336, %cst_226 [1] : vector<16x16xf32> to vector<16xf32>
    %338 = vector.shape_cast %337 : vector<16xf32> to vector<16x1xf32>
    %339 = tpu.reciprocal %338 {approx = true} : vector<16x1xf32> -> vector<16x1xf32>
    %340 = vector.broadcast %339 : vector<16x1xf32> to vector<16x16xf32>
    %341 = arith.mulf %336, %340 : vector<16x16xf32>
    %cst_227 = arith.constant dense<0.000000e+00> : vector<16x8xf32>
    %342 = tpu.matmul %341, %329, %cst_227 {dimension_numbers = #tpu.dot_dimension_numbers<[1], [0], [0], [1], [0, 0, 1, 1], [], []>} : vector<16x16xf32>, vector<16x8xf32>, vector<16x8xf32> -> vector<16x8xf32>
    %c6_228 = arith.constant 6 : index
    %c0_229 = arith.constant 0 : index
    %c0_230 = arith.constant 0 : index
    %343 = vector.load %arg8[%c6_228, %c0_229, %c0_230] : memref<24x8x32xf32, #tpu.memory_space<vmem>>, vector<1x8x32xf32>
    %344 = vector.shape_cast %343 : vector<1x8x32xf32> to vector<8x32xf32>
    %cst_231 = arith.constant dense<0.000000e+00> : vector<16x32xf32>
    %345 = tpu.matmul %342, %344, %cst_231 {dimension_numbers = #tpu.dot_dimension_numbers<[1], [0], [0], [1], [0, 0, 1, 1], [], []>} : vector<16x8xf32>, vector<8x32xf32>, vector<16x32xf32> -> vector<16x32xf32>
    %346 = arith.addf %308, %345 : vector<16x32xf32>
    %c15 = arith.constant 15 : index
    %c0_232 = arith.constant 0 : index
    %c0_233 = arith.constant 0 : index
    %347 = vector.load %arg6[%c15, %c0_232, %c0_233] : memref<72x32x8xf32, #tpu.memory_space<vmem>>, vector<1x32x8xf32>
    %348 = vector.shape_cast %347 : vector<1x32x8xf32> to vector<32x8xf32>
    %cst_234 = arith.constant dense<0.000000e+00> : vector<16x8xf32>
    %349 = tpu.matmul %233, %348, %cst_234 {dimension_numbers = #tpu.dot_dimension_numbers<[1], [0], [0], [1], [0, 0, 1, 1], [], []>} : vector<16x32xf32>, vector<32x8xf32>, vector<16x8xf32> -> vector<16x8xf32>
    %c15_235 = arith.constant 15 : index
    %c0_236 = arith.constant 0 : index
    %c0_237 = arith.constant 0 : index
    %350 = vector.load %arg7[%c15_235, %c0_236, %c0_237] : memref<72x1x8xf32, #tpu.memory_space<vmem>>, vector<1x1x8xf32>
    %351 = vector.shape_cast %350 : vector<1x1x8xf32> to vector<1x8xf32>
    %352 = vector.broadcast %351 : vector<1x8xf32> to vector<16x8xf32>
    %353 = arith.addf %349, %352 : vector<16x8xf32>
    %c19 = arith.constant 19 : index
    %c0_238 = arith.constant 0 : index
    %c0_239 = arith.constant 0 : index
    %354 = vector.load %arg6[%c19, %c0_238, %c0_239] : memref<72x32x8xf32, #tpu.memory_space<vmem>>, vector<1x32x8xf32>
    %355 = vector.shape_cast %354 : vector<1x32x8xf32> to vector<32x8xf32>
    %cst_240 = arith.constant dense<0.000000e+00> : vector<16x8xf32>
    %356 = tpu.matmul %233, %355, %cst_240 {dimension_numbers = #tpu.dot_dimension_numbers<[1], [0], [0], [1], [0, 0, 1, 1], [], []>} : vector<16x32xf32>, vector<32x8xf32>, vector<16x8xf32> -> vector<16x8xf32>
    %c19_241 = arith.constant 19 : index
    %c0_242 = arith.constant 0 : index
    %c0_243 = arith.constant 0 : index
    %357 = vector.load %arg7[%c19_241, %c0_242, %c0_243] : memref<72x1x8xf32, #tpu.memory_space<vmem>>, vector<1x1x8xf32>
    %358 = vector.shape_cast %357 : vector<1x1x8xf32> to vector<1x8xf32>
    %359 = vector.broadcast %358 : vector<1x8xf32> to vector<16x8xf32>
    %360 = arith.addf %356, %359 : vector<16x8xf32>
    %c23 = arith.constant 23 : index
    %c0_244 = arith.constant 0 : index
    %c0_245 = arith.constant 0 : index
    %361 = vector.load %arg6[%c23, %c0_244, %c0_245] : memref<72x32x8xf32, #tpu.memory_space<vmem>>, vector<1x32x8xf32>
    %362 = vector.shape_cast %361 : vector<1x32x8xf32> to vector<32x8xf32>
    %cst_246 = arith.constant dense<0.000000e+00> : vector<16x8xf32>
    %363 = tpu.matmul %233, %362, %cst_246 {dimension_numbers = #tpu.dot_dimension_numbers<[1], [0], [0], [1], [0, 0, 1, 1], [], []>} : vector<16x32xf32>, vector<32x8xf32>, vector<16x8xf32> -> vector<16x8xf32>
    %c23_247 = arith.constant 23 : index
    %c0_248 = arith.constant 0 : index
    %c0_249 = arith.constant 0 : index
    %364 = vector.load %arg7[%c23_247, %c0_248, %c0_249] : memref<72x1x8xf32, #tpu.memory_space<vmem>>, vector<1x1x8xf32>
    %365 = vector.shape_cast %364 : vector<1x1x8xf32> to vector<1x8xf32>
    %366 = vector.broadcast %365 : vector<1x8xf32> to vector<16x8xf32>
    %367 = arith.addf %363, %366 : vector<16x8xf32>
    %cst_250 = arith.constant dense<0.000000e+00> : vector<16x16xf32>
    %368 = tpu.matmul %353, %360, %cst_250 {dimension_numbers = #tpu.dot_dimension_numbers<[1], [1], [0], [0], [0, 0, 1, 0], [], []>} : vector<16x8xf32>, vector<16x8xf32>, vector<16x16xf32> -> vector<16x16xf32>
    %369 = arith.addf %368, %0 : vector<16x16xf32>
    %cst_251 = arith.constant dense<0xFF800000> : vector<16xf32>
    %370 = vector.multi_reduction <maximumf>, %369, %cst_251 [1] : vector<16x16xf32> to vector<16xf32>
    %371 = vector.shape_cast %370 : vector<16xf32> to vector<16x1xf32>
    %372 = vector.broadcast %371 : vector<16x1xf32> to vector<16x16xf32>
    %373 = arith.subf %369, %372 : vector<16x16xf32>
    %374 = math.exp %373 : vector<16x16xf32>
    %cst_252 = arith.constant dense<0.000000e+00> : vector<16xf32>
    %375 = vector.multi_reduction <add>, %374, %cst_252 [1] : vector<16x16xf32> to vector<16xf32>
    %376 = vector.shape_cast %375 : vector<16xf32> to vector<16x1xf32>
    %377 = tpu.reciprocal %376 {approx = true} : vector<16x1xf32> -> vector<16x1xf32>
    %378 = vector.broadcast %377 : vector<16x1xf32> to vector<16x16xf32>
    %379 = arith.mulf %374, %378 : vector<16x16xf32>
    %cst_253 = arith.constant dense<0.000000e+00> : vector<16x8xf32>
    %380 = tpu.matmul %379, %367, %cst_253 {dimension_numbers = #tpu.dot_dimension_numbers<[1], [0], [0], [1], [0, 0, 1, 1], [], []>} : vector<16x16xf32>, vector<16x8xf32>, vector<16x8xf32> -> vector<16x8xf32>
    %c7_254 = arith.constant 7 : index
    %c0_255 = arith.constant 0 : index
    %c0_256 = arith.constant 0 : index
    %381 = vector.load %arg8[%c7_254, %c0_255, %c0_256] : memref<24x8x32xf32, #tpu.memory_space<vmem>>, vector<1x8x32xf32>
    %382 = vector.shape_cast %381 : vector<1x8x32xf32> to vector<8x32xf32>
    %cst_257 = arith.constant dense<0.000000e+00> : vector<16x32xf32>
    %383 = tpu.matmul %380, %382, %cst_257 {dimension_numbers = #tpu.dot_dimension_numbers<[1], [0], [0], [1], [0, 0, 1, 1], [], []>} : vector<16x8xf32>, vector<8x32xf32>, vector<16x32xf32> -> vector<16x32xf32>
    %384 = arith.addf %346, %383 : vector<16x32xf32>
    %c10_258 = arith.constant 10 : index
    %c0_259 = arith.constant 0 : index
    %c0_260 = arith.constant 0 : index
    %385 = vector.load %arg12[%c10_258, %c0_259, %c0_260] : memref<36x1x32xf32, #tpu.memory_space<vmem>>, vector<1x1x32xf32>
    %386 = vector.shape_cast %385 : vector<1x1x32xf32> to vector<1x32xf32>
    %387 = vector.broadcast %386 : vector<1x32xf32> to vector<16x32xf32>
    %388 = arith.addf %384, %387 : vector<16x32xf32>
    %389 = arith.addf %233, %388 : vector<16x32xf32>
    %c6_261 = arith.constant 6 : index
    %c0_262 = arith.constant 0 : index
    %c0_263 = arith.constant 0 : index
    %390 = vector.load %arg12[%c6_261, %c0_262, %c0_263] : memref<36x1x32xf32, #tpu.memory_space<vmem>>, vector<1x1x32xf32>
    %391 = vector.shape_cast %390 : vector<1x1x32xf32> to vector<1x32xf32>
    %c7_264 = arith.constant 7 : index
    %c0_265 = arith.constant 0 : index
    %c0_266 = arith.constant 0 : index
    %392 = vector.load %arg12[%c7_264, %c0_265, %c0_266] : memref<36x1x32xf32, #tpu.memory_space<vmem>>, vector<1x1x32xf32>
    %393 = vector.shape_cast %392 : vector<1x1x32xf32> to vector<1x32xf32>
    %cst_267 = arith.constant dense<0.000000e+00> : vector<16xf32>
    %394 = vector.multi_reduction <add>, %389, %cst_267 [1] : vector<16x32xf32> to vector<16xf32>
    %395 = vector.shape_cast %394 : vector<16xf32> to vector<16x1xf32>
    %cst_268 = arith.constant 3.200000e+01 : f32
    %396 = vector.broadcast %cst_268 : f32 to vector<16x1xf32>
    %397 = arith.divf %395, %396 : vector<16x1xf32>
    %398 = vector.broadcast %397 : vector<16x1xf32> to vector<16x32xf32>
    %399 = arith.subf %389, %398 : vector<16x32xf32>
    %400 = arith.mulf %399, %399 : vector<16x32xf32>
    %cst_269 = arith.constant dense<0.000000e+00> : vector<16xf32>
    %401 = vector.multi_reduction <add>, %400, %cst_269 [1] : vector<16x32xf32> to vector<16xf32>
    %402 = vector.shape_cast %401 : vector<16xf32> to vector<16x1xf32>
    %cst_270 = arith.constant 3.200000e+01 : f32
    %403 = vector.broadcast %cst_270 : f32 to vector<16x1xf32>
    %404 = arith.divf %402, %403 : vector<16x1xf32>
    %405 = vector.broadcast %397 : vector<16x1xf32> to vector<16x32xf32>
    %406 = arith.subf %389, %405 : vector<16x32xf32>
    %cst_271 = arith.constant 9.99999974E-6 : f32
    %407 = vector.broadcast %cst_271 : f32 to vector<16x1xf32>
    %408 = arith.addf %404, %407 : vector<16x1xf32>
    %409 = math.rsqrt %408 : vector<16x1xf32>
    %410 = vector.broadcast %409 : vector<16x1xf32> to vector<16x32xf32>
    %411 = arith.mulf %406, %410 : vector<16x32xf32>
    %412 = vector.broadcast %391 : vector<1x32xf32> to vector<16x32xf32>
    %413 = arith.mulf %411, %412 : vector<16x32xf32>
    %414 = vector.broadcast %393 : vector<1x32xf32> to vector<16x32xf32>
    %415 = arith.addf %413, %414 : vector<16x32xf32>
    %c1_272 = arith.constant 1 : index
    %c0_273 = arith.constant 0 : index
    %c0_274 = arith.constant 0 : index
    %416 = vector.load %arg9[%c1_272, %c0_273, %c0_274] : memref<6x32x64xf32, #tpu.memory_space<vmem>>, vector<1x32x64xf32>
    %417 = vector.shape_cast %416 : vector<1x32x64xf32> to vector<32x64xf32>
    %cst_275 = arith.constant dense<0.000000e+00> : vector<16x64xf32>
    %418 = tpu.matmul %415, %417, %cst_275 {dimension_numbers = #tpu.dot_dimension_numbers<[1], [0], [0], [1], [0, 0, 1, 1], [], []>} : vector<16x32xf32>, vector<32x64xf32>, vector<16x64xf32> -> vector<16x64xf32>
    %c1_276 = arith.constant 1 : index
    %c0_277 = arith.constant 0 : index
    %c0_278 = arith.constant 0 : index
    %419 = vector.load %arg11[%c1_276, %c0_277, %c0_278] : memref<6x1x64xf32, #tpu.memory_space<vmem>>, vector<1x1x64xf32>
    %420 = vector.shape_cast %419 : vector<1x1x64xf32> to vector<1x64xf32>
    %421 = vector.broadcast %420 : vector<1x64xf32> to vector<16x64xf32>
    %422 = arith.addf %418, %421 : vector<16x64xf32>
    %cst_279 = arith.constant 0.000000e+00 : f32
    %423 = vector.broadcast %cst_279 : f32 to vector<16x64xf32>
    %424 = arith.maximumf %422, %423 : vector<16x64xf32>
    %c1_280 = arith.constant 1 : index
    %c0_281 = arith.constant 0 : index
    %c0_282 = arith.constant 0 : index
    %425 = vector.load %arg10[%c1_280, %c0_281, %c0_282] : memref<6x64x32xf32, #tpu.memory_space<vmem>>, vector<1x64x32xf32>
    %426 = vector.shape_cast %425 : vector<1x64x32xf32> to vector<64x32xf32>
    %cst_283 = arith.constant dense<0.000000e+00> : vector<16x32xf32>
    %427 = tpu.matmul %424, %426, %cst_283 {dimension_numbers = #tpu.dot_dimension_numbers<[1], [0], [0], [1], [0, 0, 1, 1], [], []>} : vector<16x64xf32>, vector<64x32xf32>, vector<16x32xf32> -> vector<16x32xf32>
    %c11_284 = arith.constant 11 : index
    %c0_285 = arith.constant 0 : index
    %c0_286 = arith.constant 0 : index
    %428 = vector.load %arg12[%c11_284, %c0_285, %c0_286] : memref<36x1x32xf32, #tpu.memory_space<vmem>>, vector<1x1x32xf32>
    %429 = vector.shape_cast %428 : vector<1x1x32xf32> to vector<1x32xf32>
    %430 = vector.broadcast %429 : vector<1x32xf32> to vector<16x32xf32>
    %431 = arith.addf %427, %430 : vector<16x32xf32>
    %432 = arith.addf %415, %431 : vector<16x32xf32>
    %c8_287 = arith.constant 8 : index
    %c0_288 = arith.constant 0 : index
    %c0_289 = arith.constant 0 : index
    %433 = vector.load %arg12[%c8_287, %c0_288, %c0_289] : memref<36x1x32xf32, #tpu.memory_space<vmem>>, vector<1x1x32xf32>
    %434 = vector.shape_cast %433 : vector<1x1x32xf32> to vector<1x32xf32>
    %c9_290 = arith.constant 9 : index
    %c0_291 = arith.constant 0 : index
    %c0_292 = arith.constant 0 : index
    %435 = vector.load %arg12[%c9_290, %c0_291, %c0_292] : memref<36x1x32xf32, #tpu.memory_space<vmem>>, vector<1x1x32xf32>
    %436 = vector.shape_cast %435 : vector<1x1x32xf32> to vector<1x32xf32>
    %cst_293 = arith.constant dense<0.000000e+00> : vector<16xf32>
    %437 = vector.multi_reduction <add>, %432, %cst_293 [1] : vector<16x32xf32> to vector<16xf32>
    %438 = vector.shape_cast %437 : vector<16xf32> to vector<16x1xf32>
    %cst_294 = arith.constant 3.200000e+01 : f32
    %439 = vector.broadcast %cst_294 : f32 to vector<16x1xf32>
    %440 = arith.divf %438, %439 : vector<16x1xf32>
    %441 = vector.broadcast %440 : vector<16x1xf32> to vector<16x32xf32>
    %442 = arith.subf %432, %441 : vector<16x32xf32>
    %443 = arith.mulf %442, %442 : vector<16x32xf32>
    %cst_295 = arith.constant dense<0.000000e+00> : vector<16xf32>
    %444 = vector.multi_reduction <add>, %443, %cst_295 [1] : vector<16x32xf32> to vector<16xf32>
    %445 = vector.shape_cast %444 : vector<16xf32> to vector<16x1xf32>
    %cst_296 = arith.constant 3.200000e+01 : f32
    %446 = vector.broadcast %cst_296 : f32 to vector<16x1xf32>
    %447 = arith.divf %445, %446 : vector<16x1xf32>
    %448 = vector.broadcast %440 : vector<16x1xf32> to vector<16x32xf32>
    %449 = arith.subf %432, %448 : vector<16x32xf32>
    %cst_297 = arith.constant 9.99999974E-6 : f32
    %450 = vector.broadcast %cst_297 : f32 to vector<16x1xf32>
    %451 = arith.addf %447, %450 : vector<16x1xf32>
    %452 = math.rsqrt %451 : vector<16x1xf32>
    %453 = vector.broadcast %452 : vector<16x1xf32> to vector<16x32xf32>
    %454 = arith.mulf %449, %453 : vector<16x32xf32>
    %455 = vector.broadcast %434 : vector<1x32xf32> to vector<16x32xf32>
    %456 = arith.mulf %454, %455 : vector<16x32xf32>
    %457 = vector.broadcast %436 : vector<1x32xf32> to vector<16x32xf32>
    %458 = arith.addf %456, %457 : vector<16x32xf32>
    %c0_298 = arith.constant 0 : index
    %c0_299 = arith.constant 0 : index
    %459 = vector.load %arg1[%c0_298, %c0_299] : memref<16x32xf32, #tpu.memory_space<vmem>>, vector<16x32xf32>
    %460 = arith.addf %459, %1 : vector<16x32xf32>
    %c24 = arith.constant 24 : index
    %c0_300 = arith.constant 0 : index
    %c0_301 = arith.constant 0 : index
    %461 = vector.load %arg6[%c24, %c0_300, %c0_301] : memref<72x32x8xf32, #tpu.memory_space<vmem>>, vector<1x32x8xf32>
    %462 = vector.shape_cast %461 : vector<1x32x8xf32> to vector<32x8xf32>
    %cst_302 = arith.constant dense<0.000000e+00> : vector<16x8xf32>
    %463 = tpu.matmul %460, %462, %cst_302 {dimension_numbers = #tpu.dot_dimension_numbers<[1], [0], [0], [1], [0, 0, 1, 1], [], []>} : vector<16x32xf32>, vector<32x8xf32>, vector<16x8xf32> -> vector<16x8xf32>
    %c24_303 = arith.constant 24 : index
    %c0_304 = arith.constant 0 : index
    %c0_305 = arith.constant 0 : index
    %464 = vector.load %arg7[%c24_303, %c0_304, %c0_305] : memref<72x1x8xf32, #tpu.memory_space<vmem>>, vector<1x1x8xf32>
    %465 = vector.shape_cast %464 : vector<1x1x8xf32> to vector<1x8xf32>
    %466 = vector.broadcast %465 : vector<1x8xf32> to vector<16x8xf32>
    %467 = arith.addf %463, %466 : vector<16x8xf32>
    %c28 = arith.constant 28 : index
    %c0_306 = arith.constant 0 : index
    %c0_307 = arith.constant 0 : index
    %468 = vector.load %arg6[%c28, %c0_306, %c0_307] : memref<72x32x8xf32, #tpu.memory_space<vmem>>, vector<1x32x8xf32>
    %469 = vector.shape_cast %468 : vector<1x32x8xf32> to vector<32x8xf32>
    %cst_308 = arith.constant dense<0.000000e+00> : vector<16x8xf32>
    %470 = tpu.matmul %460, %469, %cst_308 {dimension_numbers = #tpu.dot_dimension_numbers<[1], [0], [0], [1], [0, 0, 1, 1], [], []>} : vector<16x32xf32>, vector<32x8xf32>, vector<16x8xf32> -> vector<16x8xf32>
    %c28_309 = arith.constant 28 : index
    %c0_310 = arith.constant 0 : index
    %c0_311 = arith.constant 0 : index
    %471 = vector.load %arg7[%c28_309, %c0_310, %c0_311] : memref<72x1x8xf32, #tpu.memory_space<vmem>>, vector<1x1x8xf32>
    %472 = vector.shape_cast %471 : vector<1x1x8xf32> to vector<1x8xf32>
    %473 = vector.broadcast %472 : vector<1x8xf32> to vector<16x8xf32>
    %474 = arith.addf %470, %473 : vector<16x8xf32>
    %c32 = arith.constant 32 : index
    %c0_312 = arith.constant 0 : index
    %c0_313 = arith.constant 0 : index
    %475 = vector.load %arg6[%c32, %c0_312, %c0_313] : memref<72x32x8xf32, #tpu.memory_space<vmem>>, vector<1x32x8xf32>
    %476 = vector.shape_cast %475 : vector<1x32x8xf32> to vector<32x8xf32>
    %cst_314 = arith.constant dense<0.000000e+00> : vector<16x8xf32>
    %477 = tpu.matmul %460, %476, %cst_314 {dimension_numbers = #tpu.dot_dimension_numbers<[1], [0], [0], [1], [0, 0, 1, 1], [], []>} : vector<16x32xf32>, vector<32x8xf32>, vector<16x8xf32> -> vector<16x8xf32>
    %c32_315 = arith.constant 32 : index
    %c0_316 = arith.constant 0 : index
    %c0_317 = arith.constant 0 : index
    %478 = vector.load %arg7[%c32_315, %c0_316, %c0_317] : memref<72x1x8xf32, #tpu.memory_space<vmem>>, vector<1x1x8xf32>
    %479 = vector.shape_cast %478 : vector<1x1x8xf32> to vector<1x8xf32>
    %480 = vector.broadcast %479 : vector<1x8xf32> to vector<16x8xf32>
    %481 = arith.addf %477, %480 : vector<16x8xf32>
    %cst_318 = arith.constant dense<0.000000e+00> : vector<16x16xf32>
    %482 = tpu.matmul %467, %474, %cst_318 {dimension_numbers = #tpu.dot_dimension_numbers<[1], [1], [0], [0], [0, 0, 1, 0], [], []>} : vector<16x8xf32>, vector<16x8xf32>, vector<16x16xf32> -> vector<16x16xf32>
    %483 = arith.addf %482, %0 : vector<16x16xf32>
    %cst_319 = arith.constant dense<0xFF800000> : vector<16xf32>
    %484 = vector.multi_reduction <maximumf>, %483, %cst_319 [1] : vector<16x16xf32> to vector<16xf32>
    %485 = vector.shape_cast %484 : vector<16xf32> to vector<16x1xf32>
    %486 = vector.broadcast %485 : vector<16x1xf32> to vector<16x16xf32>
    %487 = arith.subf %483, %486 : vector<16x16xf32>
    %488 = math.exp %487 : vector<16x16xf32>
    %cst_320 = arith.constant dense<0.000000e+00> : vector<16xf32>
    %489 = vector.multi_reduction <add>, %488, %cst_320 [1] : vector<16x16xf32> to vector<16xf32>
    %490 = vector.shape_cast %489 : vector<16xf32> to vector<16x1xf32>
    %491 = tpu.reciprocal %490 {approx = true} : vector<16x1xf32> -> vector<16x1xf32>
    %492 = vector.broadcast %491 : vector<16x1xf32> to vector<16x16xf32>
    %493 = arith.mulf %488, %492 : vector<16x16xf32>
    %cst_321 = arith.constant dense<0.000000e+00> : vector<16x8xf32>
    %494 = tpu.matmul %493, %481, %cst_321 {dimension_numbers = #tpu.dot_dimension_numbers<[1], [0], [0], [1], [0, 0, 1, 1], [], []>} : vector<16x16xf32>, vector<16x8xf32>, vector<16x8xf32> -> vector<16x8xf32>
    %c8_322 = arith.constant 8 : index
    %c0_323 = arith.constant 0 : index
    %c0_324 = arith.constant 0 : index
    %495 = vector.load %arg8[%c8_322, %c0_323, %c0_324] : memref<24x8x32xf32, #tpu.memory_space<vmem>>, vector<1x8x32xf32>
    %496 = vector.shape_cast %495 : vector<1x8x32xf32> to vector<8x32xf32>
    %cst_325 = arith.constant dense<0.000000e+00> : vector<16x32xf32>
    %497 = tpu.matmul %494, %496, %cst_325 {dimension_numbers = #tpu.dot_dimension_numbers<[1], [0], [0], [1], [0, 0, 1, 1], [], []>} : vector<16x8xf32>, vector<8x32xf32>, vector<16x32xf32> -> vector<16x32xf32>
    %c25 = arith.constant 25 : index
    %c0_326 = arith.constant 0 : index
    %c0_327 = arith.constant 0 : index
    %498 = vector.load %arg6[%c25, %c0_326, %c0_327] : memref<72x32x8xf32, #tpu.memory_space<vmem>>, vector<1x32x8xf32>
    %499 = vector.shape_cast %498 : vector<1x32x8xf32> to vector<32x8xf32>
    %cst_328 = arith.constant dense<0.000000e+00> : vector<16x8xf32>
    %500 = tpu.matmul %460, %499, %cst_328 {dimension_numbers = #tpu.dot_dimension_numbers<[1], [0], [0], [1], [0, 0, 1, 1], [], []>} : vector<16x32xf32>, vector<32x8xf32>, vector<16x8xf32> -> vector<16x8xf32>
    %c25_329 = arith.constant 25 : index
    %c0_330 = arith.constant 0 : index
    %c0_331 = arith.constant 0 : index
    %501 = vector.load %arg7[%c25_329, %c0_330, %c0_331] : memref<72x1x8xf32, #tpu.memory_space<vmem>>, vector<1x1x8xf32>
    %502 = vector.shape_cast %501 : vector<1x1x8xf32> to vector<1x8xf32>
    %503 = vector.broadcast %502 : vector<1x8xf32> to vector<16x8xf32>
    %504 = arith.addf %500, %503 : vector<16x8xf32>
    %c29 = arith.constant 29 : index
    %c0_332 = arith.constant 0 : index
    %c0_333 = arith.constant 0 : index
    %505 = vector.load %arg6[%c29, %c0_332, %c0_333] : memref<72x32x8xf32, #tpu.memory_space<vmem>>, vector<1x32x8xf32>
    %506 = vector.shape_cast %505 : vector<1x32x8xf32> to vector<32x8xf32>
    %cst_334 = arith.constant dense<0.000000e+00> : vector<16x8xf32>
    %507 = tpu.matmul %460, %506, %cst_334 {dimension_numbers = #tpu.dot_dimension_numbers<[1], [0], [0], [1], [0, 0, 1, 1], [], []>} : vector<16x32xf32>, vector<32x8xf32>, vector<16x8xf32> -> vector<16x8xf32>
    %c29_335 = arith.constant 29 : index
    %c0_336 = arith.constant 0 : index
    %c0_337 = arith.constant 0 : index
    %508 = vector.load %arg7[%c29_335, %c0_336, %c0_337] : memref<72x1x8xf32, #tpu.memory_space<vmem>>, vector<1x1x8xf32>
    %509 = vector.shape_cast %508 : vector<1x1x8xf32> to vector<1x8xf32>
    %510 = vector.broadcast %509 : vector<1x8xf32> to vector<16x8xf32>
    %511 = arith.addf %507, %510 : vector<16x8xf32>
    %c33 = arith.constant 33 : index
    %c0_338 = arith.constant 0 : index
    %c0_339 = arith.constant 0 : index
    %512 = vector.load %arg6[%c33, %c0_338, %c0_339] : memref<72x32x8xf32, #tpu.memory_space<vmem>>, vector<1x32x8xf32>
    %513 = vector.shape_cast %512 : vector<1x32x8xf32> to vector<32x8xf32>
    %cst_340 = arith.constant dense<0.000000e+00> : vector<16x8xf32>
    %514 = tpu.matmul %460, %513, %cst_340 {dimension_numbers = #tpu.dot_dimension_numbers<[1], [0], [0], [1], [0, 0, 1, 1], [], []>} : vector<16x32xf32>, vector<32x8xf32>, vector<16x8xf32> -> vector<16x8xf32>
    %c33_341 = arith.constant 33 : index
    %c0_342 = arith.constant 0 : index
    %c0_343 = arith.constant 0 : index
    %515 = vector.load %arg7[%c33_341, %c0_342, %c0_343] : memref<72x1x8xf32, #tpu.memory_space<vmem>>, vector<1x1x8xf32>
    %516 = vector.shape_cast %515 : vector<1x1x8xf32> to vector<1x8xf32>
    %517 = vector.broadcast %516 : vector<1x8xf32> to vector<16x8xf32>
    %518 = arith.addf %514, %517 : vector<16x8xf32>
    %cst_344 = arith.constant dense<0.000000e+00> : vector<16x16xf32>
    %519 = tpu.matmul %504, %511, %cst_344 {dimension_numbers = #tpu.dot_dimension_numbers<[1], [1], [0], [0], [0, 0, 1, 0], [], []>} : vector<16x8xf32>, vector<16x8xf32>, vector<16x16xf32> -> vector<16x16xf32>
    %520 = arith.addf %519, %0 : vector<16x16xf32>
    %cst_345 = arith.constant dense<0xFF800000> : vector<16xf32>
    %521 = vector.multi_reduction <maximumf>, %520, %cst_345 [1] : vector<16x16xf32> to vector<16xf32>
    %522 = vector.shape_cast %521 : vector<16xf32> to vector<16x1xf32>
    %523 = vector.broadcast %522 : vector<16x1xf32> to vector<16x16xf32>
    %524 = arith.subf %520, %523 : vector<16x16xf32>
    %525 = math.exp %524 : vector<16x16xf32>
    %cst_346 = arith.constant dense<0.000000e+00> : vector<16xf32>
    %526 = vector.multi_reduction <add>, %525, %cst_346 [1] : vector<16x16xf32> to vector<16xf32>
    %527 = vector.shape_cast %526 : vector<16xf32> to vector<16x1xf32>
    %528 = tpu.reciprocal %527 {approx = true} : vector<16x1xf32> -> vector<16x1xf32>
    %529 = vector.broadcast %528 : vector<16x1xf32> to vector<16x16xf32>
    %530 = arith.mulf %525, %529 : vector<16x16xf32>
    %cst_347 = arith.constant dense<0.000000e+00> : vector<16x8xf32>
    %531 = tpu.matmul %530, %518, %cst_347 {dimension_numbers = #tpu.dot_dimension_numbers<[1], [0], [0], [1], [0, 0, 1, 1], [], []>} : vector<16x16xf32>, vector<16x8xf32>, vector<16x8xf32> -> vector<16x8xf32>
    %c9_348 = arith.constant 9 : index
    %c0_349 = arith.constant 0 : index
    %c0_350 = arith.constant 0 : index
    %532 = vector.load %arg8[%c9_348, %c0_349, %c0_350] : memref<24x8x32xf32, #tpu.memory_space<vmem>>, vector<1x8x32xf32>
    %533 = vector.shape_cast %532 : vector<1x8x32xf32> to vector<8x32xf32>
    %cst_351 = arith.constant dense<0.000000e+00> : vector<16x32xf32>
    %534 = tpu.matmul %531, %533, %cst_351 {dimension_numbers = #tpu.dot_dimension_numbers<[1], [0], [0], [1], [0, 0, 1, 1], [], []>} : vector<16x8xf32>, vector<8x32xf32>, vector<16x32xf32> -> vector<16x32xf32>
    %535 = arith.addf %497, %534 : vector<16x32xf32>
    %c26 = arith.constant 26 : index
    %c0_352 = arith.constant 0 : index
    %c0_353 = arith.constant 0 : index
    %536 = vector.load %arg6[%c26, %c0_352, %c0_353] : memref<72x32x8xf32, #tpu.memory_space<vmem>>, vector<1x32x8xf32>
    %537 = vector.shape_cast %536 : vector<1x32x8xf32> to vector<32x8xf32>
    %cst_354 = arith.constant dense<0.000000e+00> : vector<16x8xf32>
    %538 = tpu.matmul %460, %537, %cst_354 {dimension_numbers = #tpu.dot_dimension_numbers<[1], [0], [0], [1], [0, 0, 1, 1], [], []>} : vector<16x32xf32>, vector<32x8xf32>, vector<16x8xf32> -> vector<16x8xf32>
    %c26_355 = arith.constant 26 : index
    %c0_356 = arith.constant 0 : index
    %c0_357 = arith.constant 0 : index
    %539 = vector.load %arg7[%c26_355, %c0_356, %c0_357] : memref<72x1x8xf32, #tpu.memory_space<vmem>>, vector<1x1x8xf32>
    %540 = vector.shape_cast %539 : vector<1x1x8xf32> to vector<1x8xf32>
    %541 = vector.broadcast %540 : vector<1x8xf32> to vector<16x8xf32>
    %542 = arith.addf %538, %541 : vector<16x8xf32>
    %c30 = arith.constant 30 : index
    %c0_358 = arith.constant 0 : index
    %c0_359 = arith.constant 0 : index
    %543 = vector.load %arg6[%c30, %c0_358, %c0_359] : memref<72x32x8xf32, #tpu.memory_space<vmem>>, vector<1x32x8xf32>
    %544 = vector.shape_cast %543 : vector<1x32x8xf32> to vector<32x8xf32>
    %cst_360 = arith.constant dense<0.000000e+00> : vector<16x8xf32>
    %545 = tpu.matmul %460, %544, %cst_360 {dimension_numbers = #tpu.dot_dimension_numbers<[1], [0], [0], [1], [0, 0, 1, 1], [], []>} : vector<16x32xf32>, vector<32x8xf32>, vector<16x8xf32> -> vector<16x8xf32>
    %c30_361 = arith.constant 30 : index
    %c0_362 = arith.constant 0 : index
    %c0_363 = arith.constant 0 : index
    %546 = vector.load %arg7[%c30_361, %c0_362, %c0_363] : memref<72x1x8xf32, #tpu.memory_space<vmem>>, vector<1x1x8xf32>
    %547 = vector.shape_cast %546 : vector<1x1x8xf32> to vector<1x8xf32>
    %548 = vector.broadcast %547 : vector<1x8xf32> to vector<16x8xf32>
    %549 = arith.addf %545, %548 : vector<16x8xf32>
    %c34 = arith.constant 34 : index
    %c0_364 = arith.constant 0 : index
    %c0_365 = arith.constant 0 : index
    %550 = vector.load %arg6[%c34, %c0_364, %c0_365] : memref<72x32x8xf32, #tpu.memory_space<vmem>>, vector<1x32x8xf32>
    %551 = vector.shape_cast %550 : vector<1x32x8xf32> to vector<32x8xf32>
    %cst_366 = arith.constant dense<0.000000e+00> : vector<16x8xf32>
    %552 = tpu.matmul %460, %551, %cst_366 {dimension_numbers = #tpu.dot_dimension_numbers<[1], [0], [0], [1], [0, 0, 1, 1], [], []>} : vector<16x32xf32>, vector<32x8xf32>, vector<16x8xf32> -> vector<16x8xf32>
    %c34_367 = arith.constant 34 : index
    %c0_368 = arith.constant 0 : index
    %c0_369 = arith.constant 0 : index
    %553 = vector.load %arg7[%c34_367, %c0_368, %c0_369] : memref<72x1x8xf32, #tpu.memory_space<vmem>>, vector<1x1x8xf32>
    %554 = vector.shape_cast %553 : vector<1x1x8xf32> to vector<1x8xf32>
    %555 = vector.broadcast %554 : vector<1x8xf32> to vector<16x8xf32>
    %556 = arith.addf %552, %555 : vector<16x8xf32>
    %cst_370 = arith.constant dense<0.000000e+00> : vector<16x16xf32>
    %557 = tpu.matmul %542, %549, %cst_370 {dimension_numbers = #tpu.dot_dimension_numbers<[1], [1], [0], [0], [0, 0, 1, 0], [], []>} : vector<16x8xf32>, vector<16x8xf32>, vector<16x16xf32> -> vector<16x16xf32>
    %558 = arith.addf %557, %0 : vector<16x16xf32>
    %cst_371 = arith.constant dense<0xFF800000> : vector<16xf32>
    %559 = vector.multi_reduction <maximumf>, %558, %cst_371 [1] : vector<16x16xf32> to vector<16xf32>
    %560 = vector.shape_cast %559 : vector<16xf32> to vector<16x1xf32>
    %561 = vector.broadcast %560 : vector<16x1xf32> to vector<16x16xf32>
    %562 = arith.subf %558, %561 : vector<16x16xf32>
    %563 = math.exp %562 : vector<16x16xf32>
    %cst_372 = arith.constant dense<0.000000e+00> : vector<16xf32>
    %564 = vector.multi_reduction <add>, %563, %cst_372 [1] : vector<16x16xf32> to vector<16xf32>
    %565 = vector.shape_cast %564 : vector<16xf32> to vector<16x1xf32>
    %566 = tpu.reciprocal %565 {approx = true} : vector<16x1xf32> -> vector<16x1xf32>
    %567 = vector.broadcast %566 : vector<16x1xf32> to vector<16x16xf32>
    %568 = arith.mulf %563, %567 : vector<16x16xf32>
    %cst_373 = arith.constant dense<0.000000e+00> : vector<16x8xf32>
    %569 = tpu.matmul %568, %556, %cst_373 {dimension_numbers = #tpu.dot_dimension_numbers<[1], [0], [0], [1], [0, 0, 1, 1], [], []>} : vector<16x16xf32>, vector<16x8xf32>, vector<16x8xf32> -> vector<16x8xf32>
    %c10_374 = arith.constant 10 : index
    %c0_375 = arith.constant 0 : index
    %c0_376 = arith.constant 0 : index
    %570 = vector.load %arg8[%c10_374, %c0_375, %c0_376] : memref<24x8x32xf32, #tpu.memory_space<vmem>>, vector<1x8x32xf32>
    %571 = vector.shape_cast %570 : vector<1x8x32xf32> to vector<8x32xf32>
    %cst_377 = arith.constant dense<0.000000e+00> : vector<16x32xf32>
    %572 = tpu.matmul %569, %571, %cst_377 {dimension_numbers = #tpu.dot_dimension_numbers<[1], [0], [0], [1], [0, 0, 1, 1], [], []>} : vector<16x8xf32>, vector<8x32xf32>, vector<16x32xf32> -> vector<16x32xf32>
    %573 = arith.addf %535, %572 : vector<16x32xf32>
    %c27 = arith.constant 27 : index
    %c0_378 = arith.constant 0 : index
    %c0_379 = arith.constant 0 : index
    %574 = vector.load %arg6[%c27, %c0_378, %c0_379] : memref<72x32x8xf32, #tpu.memory_space<vmem>>, vector<1x32x8xf32>
    %575 = vector.shape_cast %574 : vector<1x32x8xf32> to vector<32x8xf32>
    %cst_380 = arith.constant dense<0.000000e+00> : vector<16x8xf32>
    %576 = tpu.matmul %460, %575, %cst_380 {dimension_numbers = #tpu.dot_dimension_numbers<[1], [0], [0], [1], [0, 0, 1, 1], [], []>} : vector<16x32xf32>, vector<32x8xf32>, vector<16x8xf32> -> vector<16x8xf32>
    %c27_381 = arith.constant 27 : index
    %c0_382 = arith.constant 0 : index
    %c0_383 = arith.constant 0 : index
    %577 = vector.load %arg7[%c27_381, %c0_382, %c0_383] : memref<72x1x8xf32, #tpu.memory_space<vmem>>, vector<1x1x8xf32>
    %578 = vector.shape_cast %577 : vector<1x1x8xf32> to vector<1x8xf32>
    %579 = vector.broadcast %578 : vector<1x8xf32> to vector<16x8xf32>
    %580 = arith.addf %576, %579 : vector<16x8xf32>
    %c31 = arith.constant 31 : index
    %c0_384 = arith.constant 0 : index
    %c0_385 = arith.constant 0 : index
    %581 = vector.load %arg6[%c31, %c0_384, %c0_385] : memref<72x32x8xf32, #tpu.memory_space<vmem>>, vector<1x32x8xf32>
    %582 = vector.shape_cast %581 : vector<1x32x8xf32> to vector<32x8xf32>
    %cst_386 = arith.constant dense<0.000000e+00> : vector<16x8xf32>
    %583 = tpu.matmul %460, %582, %cst_386 {dimension_numbers = #tpu.dot_dimension_numbers<[1], [0], [0], [1], [0, 0, 1, 1], [], []>} : vector<16x32xf32>, vector<32x8xf32>, vector<16x8xf32> -> vector<16x8xf32>
    %c31_387 = arith.constant 31 : index
    %c0_388 = arith.constant 0 : index
    %c0_389 = arith.constant 0 : index
    %584 = vector.load %arg7[%c31_387, %c0_388, %c0_389] : memref<72x1x8xf32, #tpu.memory_space<vmem>>, vector<1x1x8xf32>
    %585 = vector.shape_cast %584 : vector<1x1x8xf32> to vector<1x8xf32>
    %586 = vector.broadcast %585 : vector<1x8xf32> to vector<16x8xf32>
    %587 = arith.addf %583, %586 : vector<16x8xf32>
    %c35 = arith.constant 35 : index
    %c0_390 = arith.constant 0 : index
    %c0_391 = arith.constant 0 : index
    %588 = vector.load %arg6[%c35, %c0_390, %c0_391] : memref<72x32x8xf32, #tpu.memory_space<vmem>>, vector<1x32x8xf32>
    %589 = vector.shape_cast %588 : vector<1x32x8xf32> to vector<32x8xf32>
    %cst_392 = arith.constant dense<0.000000e+00> : vector<16x8xf32>
    %590 = tpu.matmul %460, %589, %cst_392 {dimension_numbers = #tpu.dot_dimension_numbers<[1], [0], [0], [1], [0, 0, 1, 1], [], []>} : vector<16x32xf32>, vector<32x8xf32>, vector<16x8xf32> -> vector<16x8xf32>
    %c35_393 = arith.constant 35 : index
    %c0_394 = arith.constant 0 : index
    %c0_395 = arith.constant 0 : index
    %591 = vector.load %arg7[%c35_393, %c0_394, %c0_395] : memref<72x1x8xf32, #tpu.memory_space<vmem>>, vector<1x1x8xf32>
    %592 = vector.shape_cast %591 : vector<1x1x8xf32> to vector<1x8xf32>
    %593 = vector.broadcast %592 : vector<1x8xf32> to vector<16x8xf32>
    %594 = arith.addf %590, %593 : vector<16x8xf32>
    %cst_396 = arith.constant dense<0.000000e+00> : vector<16x16xf32>
    %595 = tpu.matmul %580, %587, %cst_396 {dimension_numbers = #tpu.dot_dimension_numbers<[1], [1], [0], [0], [0, 0, 1, 0], [], []>} : vector<16x8xf32>, vector<16x8xf32>, vector<16x16xf32> -> vector<16x16xf32>
    %596 = arith.addf %595, %0 : vector<16x16xf32>
    %cst_397 = arith.constant dense<0xFF800000> : vector<16xf32>
    %597 = vector.multi_reduction <maximumf>, %596, %cst_397 [1] : vector<16x16xf32> to vector<16xf32>
    %598 = vector.shape_cast %597 : vector<16xf32> to vector<16x1xf32>
    %599 = vector.broadcast %598 : vector<16x1xf32> to vector<16x16xf32>
    %600 = arith.subf %596, %599 : vector<16x16xf32>
    %601 = math.exp %600 : vector<16x16xf32>
    %cst_398 = arith.constant dense<0.000000e+00> : vector<16xf32>
    %602 = vector.multi_reduction <add>, %601, %cst_398 [1] : vector<16x16xf32> to vector<16xf32>
    %603 = vector.shape_cast %602 : vector<16xf32> to vector<16x1xf32>
    %604 = tpu.reciprocal %603 {approx = true} : vector<16x1xf32> -> vector<16x1xf32>
    %605 = vector.broadcast %604 : vector<16x1xf32> to vector<16x16xf32>
    %606 = arith.mulf %601, %605 : vector<16x16xf32>
    %cst_399 = arith.constant dense<0.000000e+00> : vector<16x8xf32>
    %607 = tpu.matmul %606, %594, %cst_399 {dimension_numbers = #tpu.dot_dimension_numbers<[1], [0], [0], [1], [0, 0, 1, 1], [], []>} : vector<16x16xf32>, vector<16x8xf32>, vector<16x8xf32> -> vector<16x8xf32>
    %c11_400 = arith.constant 11 : index
    %c0_401 = arith.constant 0 : index
    %c0_402 = arith.constant 0 : index
    %608 = vector.load %arg8[%c11_400, %c0_401, %c0_402] : memref<24x8x32xf32, #tpu.memory_space<vmem>>, vector<1x8x32xf32>
    %609 = vector.shape_cast %608 : vector<1x8x32xf32> to vector<8x32xf32>
    %cst_403 = arith.constant dense<0.000000e+00> : vector<16x32xf32>
    %610 = tpu.matmul %607, %609, %cst_403 {dimension_numbers = #tpu.dot_dimension_numbers<[1], [0], [0], [1], [0, 0, 1, 1], [], []>} : vector<16x8xf32>, vector<8x32xf32>, vector<16x32xf32> -> vector<16x32xf32>
    %611 = arith.addf %573, %610 : vector<16x32xf32>
    %c16_404 = arith.constant 16 : index
    %c0_405 = arith.constant 0 : index
    %c0_406 = arith.constant 0 : index
    %612 = vector.load %arg12[%c16_404, %c0_405, %c0_406] : memref<36x1x32xf32, #tpu.memory_space<vmem>>, vector<1x1x32xf32>
    %613 = vector.shape_cast %612 : vector<1x1x32xf32> to vector<1x32xf32>
    %614 = vector.broadcast %613 : vector<1x32xf32> to vector<16x32xf32>
    %615 = arith.addf %611, %614 : vector<16x32xf32>
    %616 = arith.addf %460, %615 : vector<16x32xf32>
    %c12_407 = arith.constant 12 : index
    %c0_408 = arith.constant 0 : index
    %c0_409 = arith.constant 0 : index
    %617 = vector.load %arg12[%c12_407, %c0_408, %c0_409] : memref<36x1x32xf32, #tpu.memory_space<vmem>>, vector<1x1x32xf32>
    %618 = vector.shape_cast %617 : vector<1x1x32xf32> to vector<1x32xf32>
    %c13_410 = arith.constant 13 : index
    %c0_411 = arith.constant 0 : index
    %c0_412 = arith.constant 0 : index
    %619 = vector.load %arg12[%c13_410, %c0_411, %c0_412] : memref<36x1x32xf32, #tpu.memory_space<vmem>>, vector<1x1x32xf32>
    %620 = vector.shape_cast %619 : vector<1x1x32xf32> to vector<1x32xf32>
    %cst_413 = arith.constant dense<0.000000e+00> : vector<16xf32>
    %621 = vector.multi_reduction <add>, %616, %cst_413 [1] : vector<16x32xf32> to vector<16xf32>
    %622 = vector.shape_cast %621 : vector<16xf32> to vector<16x1xf32>
    %cst_414 = arith.constant 3.200000e+01 : f32
    %623 = vector.broadcast %cst_414 : f32 to vector<16x1xf32>
    %624 = arith.divf %622, %623 : vector<16x1xf32>
    %625 = vector.broadcast %624 : vector<16x1xf32> to vector<16x32xf32>
    %626 = arith.subf %616, %625 : vector<16x32xf32>
    %627 = arith.mulf %626, %626 : vector<16x32xf32>
    %cst_415 = arith.constant dense<0.000000e+00> : vector<16xf32>
    %628 = vector.multi_reduction <add>, %627, %cst_415 [1] : vector<16x32xf32> to vector<16xf32>
    %629 = vector.shape_cast %628 : vector<16xf32> to vector<16x1xf32>
    %cst_416 = arith.constant 3.200000e+01 : f32
    %630 = vector.broadcast %cst_416 : f32 to vector<16x1xf32>
    %631 = arith.divf %629, %630 : vector<16x1xf32>
    %632 = vector.broadcast %624 : vector<16x1xf32> to vector<16x32xf32>
    %633 = arith.subf %616, %632 : vector<16x32xf32>
    %cst_417 = arith.constant 9.99999974E-6 : f32
    %634 = vector.broadcast %cst_417 : f32 to vector<16x1xf32>
    %635 = arith.addf %631, %634 : vector<16x1xf32>
    %636 = math.rsqrt %635 : vector<16x1xf32>
    %637 = vector.broadcast %636 : vector<16x1xf32> to vector<16x32xf32>
    %638 = arith.mulf %633, %637 : vector<16x32xf32>
    %639 = vector.broadcast %618 : vector<1x32xf32> to vector<16x32xf32>
    %640 = arith.mulf %638, %639 : vector<16x32xf32>
    %641 = vector.broadcast %620 : vector<1x32xf32> to vector<16x32xf32>
    %642 = arith.addf %640, %641 : vector<16x32xf32>
    %c2_418 = arith.constant 2 : index
    %c0_419 = arith.constant 0 : index
    %c0_420 = arith.constant 0 : index
    %643 = vector.load %arg9[%c2_418, %c0_419, %c0_420] : memref<6x32x64xf32, #tpu.memory_space<vmem>>, vector<1x32x64xf32>
    %644 = vector.shape_cast %643 : vector<1x32x64xf32> to vector<32x64xf32>
    %cst_421 = arith.constant dense<0.000000e+00> : vector<16x64xf32>
    %645 = tpu.matmul %642, %644, %cst_421 {dimension_numbers = #tpu.dot_dimension_numbers<[1], [0], [0], [1], [0, 0, 1, 1], [], []>} : vector<16x32xf32>, vector<32x64xf32>, vector<16x64xf32> -> vector<16x64xf32>
    %c2_422 = arith.constant 2 : index
    %c0_423 = arith.constant 0 : index
    %c0_424 = arith.constant 0 : index
    %646 = vector.load %arg11[%c2_422, %c0_423, %c0_424] : memref<6x1x64xf32, #tpu.memory_space<vmem>>, vector<1x1x64xf32>
    %647 = vector.shape_cast %646 : vector<1x1x64xf32> to vector<1x64xf32>
    %648 = vector.broadcast %647 : vector<1x64xf32> to vector<16x64xf32>
    %649 = arith.addf %645, %648 : vector<16x64xf32>
    %cst_425 = arith.constant 0.000000e+00 : f32
    %650 = vector.broadcast %cst_425 : f32 to vector<16x64xf32>
    %651 = arith.maximumf %649, %650 : vector<16x64xf32>
    %c2_426 = arith.constant 2 : index
    %c0_427 = arith.constant 0 : index
    %c0_428 = arith.constant 0 : index
    %652 = vector.load %arg10[%c2_426, %c0_427, %c0_428] : memref<6x64x32xf32, #tpu.memory_space<vmem>>, vector<1x64x32xf32>
    %653 = vector.shape_cast %652 : vector<1x64x32xf32> to vector<64x32xf32>
    %cst_429 = arith.constant dense<0.000000e+00> : vector<16x32xf32>
    %654 = tpu.matmul %651, %653, %cst_429 {dimension_numbers = #tpu.dot_dimension_numbers<[1], [0], [0], [1], [0, 0, 1, 1], [], []>} : vector<16x64xf32>, vector<64x32xf32>, vector<16x32xf32> -> vector<16x32xf32>
    %c17_430 = arith.constant 17 : index
    %c0_431 = arith.constant 0 : index
    %c0_432 = arith.constant 0 : index
    %655 = vector.load %arg12[%c17_430, %c0_431, %c0_432] : memref<36x1x32xf32, #tpu.memory_space<vmem>>, vector<1x1x32xf32>
    %656 = vector.shape_cast %655 : vector<1x1x32xf32> to vector<1x32xf32>
    %657 = vector.broadcast %656 : vector<1x32xf32> to vector<16x32xf32>
    %658 = arith.addf %654, %657 : vector<16x32xf32>
    %659 = arith.addf %642, %658 : vector<16x32xf32>
    %c14_433 = arith.constant 14 : index
    %c0_434 = arith.constant 0 : index
    %c0_435 = arith.constant 0 : index
    %660 = vector.load %arg12[%c14_433, %c0_434, %c0_435] : memref<36x1x32xf32, #tpu.memory_space<vmem>>, vector<1x1x32xf32>
    %661 = vector.shape_cast %660 : vector<1x1x32xf32> to vector<1x32xf32>
    %c15_436 = arith.constant 15 : index
    %c0_437 = arith.constant 0 : index
    %c0_438 = arith.constant 0 : index
    %662 = vector.load %arg12[%c15_436, %c0_437, %c0_438] : memref<36x1x32xf32, #tpu.memory_space<vmem>>, vector<1x1x32xf32>
    %663 = vector.shape_cast %662 : vector<1x1x32xf32> to vector<1x32xf32>
    %cst_439 = arith.constant dense<0.000000e+00> : vector<16xf32>
    %664 = vector.multi_reduction <add>, %659, %cst_439 [1] : vector<16x32xf32> to vector<16xf32>
    %665 = vector.shape_cast %664 : vector<16xf32> to vector<16x1xf32>
    %cst_440 = arith.constant 3.200000e+01 : f32
    %666 = vector.broadcast %cst_440 : f32 to vector<16x1xf32>
    %667 = arith.divf %665, %666 : vector<16x1xf32>
    %668 = vector.broadcast %667 : vector<16x1xf32> to vector<16x32xf32>
    %669 = arith.subf %659, %668 : vector<16x32xf32>
    %670 = arith.mulf %669, %669 : vector<16x32xf32>
    %cst_441 = arith.constant dense<0.000000e+00> : vector<16xf32>
    %671 = vector.multi_reduction <add>, %670, %cst_441 [1] : vector<16x32xf32> to vector<16xf32>
    %672 = vector.shape_cast %671 : vector<16xf32> to vector<16x1xf32>
    %cst_442 = arith.constant 3.200000e+01 : f32
    %673 = vector.broadcast %cst_442 : f32 to vector<16x1xf32>
    %674 = arith.divf %672, %673 : vector<16x1xf32>
    %675 = vector.broadcast %667 : vector<16x1xf32> to vector<16x32xf32>
    %676 = arith.subf %659, %675 : vector<16x32xf32>
    %cst_443 = arith.constant 9.99999974E-6 : f32
    %677 = vector.broadcast %cst_443 : f32 to vector<16x1xf32>
    %678 = arith.addf %674, %677 : vector<16x1xf32>
    %679 = math.rsqrt %678 : vector<16x1xf32>
    %680 = vector.broadcast %679 : vector<16x1xf32> to vector<16x32xf32>
    %681 = arith.mulf %676, %680 : vector<16x32xf32>
    %682 = vector.broadcast %661 : vector<1x32xf32> to vector<16x32xf32>
    %683 = arith.mulf %681, %682 : vector<16x32xf32>
    %684 = vector.broadcast %663 : vector<1x32xf32> to vector<16x32xf32>
    %685 = arith.addf %683, %684 : vector<16x32xf32>
    %c36 = arith.constant 36 : index
    %c0_444 = arith.constant 0 : index
    %c0_445 = arith.constant 0 : index
    %686 = vector.load %arg6[%c36, %c0_444, %c0_445] : memref<72x32x8xf32, #tpu.memory_space<vmem>>, vector<1x32x8xf32>
    %687 = vector.shape_cast %686 : vector<1x32x8xf32> to vector<32x8xf32>
    %cst_446 = arith.constant dense<0.000000e+00> : vector<16x8xf32>
    %688 = tpu.matmul %685, %687, %cst_446 {dimension_numbers = #tpu.dot_dimension_numbers<[1], [0], [0], [1], [0, 0, 1, 1], [], []>} : vector<16x32xf32>, vector<32x8xf32>, vector<16x8xf32> -> vector<16x8xf32>
    %c36_447 = arith.constant 36 : index
    %c0_448 = arith.constant 0 : index
    %c0_449 = arith.constant 0 : index
    %689 = vector.load %arg7[%c36_447, %c0_448, %c0_449] : memref<72x1x8xf32, #tpu.memory_space<vmem>>, vector<1x1x8xf32>
    %690 = vector.shape_cast %689 : vector<1x1x8xf32> to vector<1x8xf32>
    %691 = vector.broadcast %690 : vector<1x8xf32> to vector<16x8xf32>
    %692 = arith.addf %688, %691 : vector<16x8xf32>
    %c40 = arith.constant 40 : index
    %c0_450 = arith.constant 0 : index
    %c0_451 = arith.constant 0 : index
    %693 = vector.load %arg6[%c40, %c0_450, %c0_451] : memref<72x32x8xf32, #tpu.memory_space<vmem>>, vector<1x32x8xf32>
    %694 = vector.shape_cast %693 : vector<1x32x8xf32> to vector<32x8xf32>
    %cst_452 = arith.constant dense<0.000000e+00> : vector<16x8xf32>
    %695 = tpu.matmul %685, %694, %cst_452 {dimension_numbers = #tpu.dot_dimension_numbers<[1], [0], [0], [1], [0, 0, 1, 1], [], []>} : vector<16x32xf32>, vector<32x8xf32>, vector<16x8xf32> -> vector<16x8xf32>
    %c40_453 = arith.constant 40 : index
    %c0_454 = arith.constant 0 : index
    %c0_455 = arith.constant 0 : index
    %696 = vector.load %arg7[%c40_453, %c0_454, %c0_455] : memref<72x1x8xf32, #tpu.memory_space<vmem>>, vector<1x1x8xf32>
    %697 = vector.shape_cast %696 : vector<1x1x8xf32> to vector<1x8xf32>
    %698 = vector.broadcast %697 : vector<1x8xf32> to vector<16x8xf32>
    %699 = arith.addf %695, %698 : vector<16x8xf32>
    %c44 = arith.constant 44 : index
    %c0_456 = arith.constant 0 : index
    %c0_457 = arith.constant 0 : index
    %700 = vector.load %arg6[%c44, %c0_456, %c0_457] : memref<72x32x8xf32, #tpu.memory_space<vmem>>, vector<1x32x8xf32>
    %701 = vector.shape_cast %700 : vector<1x32x8xf32> to vector<32x8xf32>
    %cst_458 = arith.constant dense<0.000000e+00> : vector<16x8xf32>
    %702 = tpu.matmul %685, %701, %cst_458 {dimension_numbers = #tpu.dot_dimension_numbers<[1], [0], [0], [1], [0, 0, 1, 1], [], []>} : vector<16x32xf32>, vector<32x8xf32>, vector<16x8xf32> -> vector<16x8xf32>
    %c44_459 = arith.constant 44 : index
    %c0_460 = arith.constant 0 : index
    %c0_461 = arith.constant 0 : index
    %703 = vector.load %arg7[%c44_459, %c0_460, %c0_461] : memref<72x1x8xf32, #tpu.memory_space<vmem>>, vector<1x1x8xf32>
    %704 = vector.shape_cast %703 : vector<1x1x8xf32> to vector<1x8xf32>
    %705 = vector.broadcast %704 : vector<1x8xf32> to vector<16x8xf32>
    %706 = arith.addf %702, %705 : vector<16x8xf32>
    %cst_462 = arith.constant dense<0.000000e+00> : vector<16x16xf32>
    %707 = tpu.matmul %692, %699, %cst_462 {dimension_numbers = #tpu.dot_dimension_numbers<[1], [1], [0], [0], [0, 0, 1, 0], [], []>} : vector<16x8xf32>, vector<16x8xf32>, vector<16x16xf32> -> vector<16x16xf32>
    %708 = arith.addf %707, %0 : vector<16x16xf32>
    %cst_463 = arith.constant dense<0xFF800000> : vector<16xf32>
    %709 = vector.multi_reduction <maximumf>, %708, %cst_463 [1] : vector<16x16xf32> to vector<16xf32>
    %710 = vector.shape_cast %709 : vector<16xf32> to vector<16x1xf32>
    %711 = vector.broadcast %710 : vector<16x1xf32> to vector<16x16xf32>
    %712 = arith.subf %708, %711 : vector<16x16xf32>
    %713 = math.exp %712 : vector<16x16xf32>
    %cst_464 = arith.constant dense<0.000000e+00> : vector<16xf32>
    %714 = vector.multi_reduction <add>, %713, %cst_464 [1] : vector<16x16xf32> to vector<16xf32>
    %715 = vector.shape_cast %714 : vector<16xf32> to vector<16x1xf32>
    %716 = tpu.reciprocal %715 {approx = true} : vector<16x1xf32> -> vector<16x1xf32>
    %717 = vector.broadcast %716 : vector<16x1xf32> to vector<16x16xf32>
    %718 = arith.mulf %713, %717 : vector<16x16xf32>
    %cst_465 = arith.constant dense<0.000000e+00> : vector<16x8xf32>
    %719 = tpu.matmul %718, %706, %cst_465 {dimension_numbers = #tpu.dot_dimension_numbers<[1], [0], [0], [1], [0, 0, 1, 1], [], []>} : vector<16x16xf32>, vector<16x8xf32>, vector<16x8xf32> -> vector<16x8xf32>
    %c12_466 = arith.constant 12 : index
    %c0_467 = arith.constant 0 : index
    %c0_468 = arith.constant 0 : index
    %720 = vector.load %arg8[%c12_466, %c0_467, %c0_468] : memref<24x8x32xf32, #tpu.memory_space<vmem>>, vector<1x8x32xf32>
    %721 = vector.shape_cast %720 : vector<1x8x32xf32> to vector<8x32xf32>
    %cst_469 = arith.constant dense<0.000000e+00> : vector<16x32xf32>
    %722 = tpu.matmul %719, %721, %cst_469 {dimension_numbers = #tpu.dot_dimension_numbers<[1], [0], [0], [1], [0, 0, 1, 1], [], []>} : vector<16x8xf32>, vector<8x32xf32>, vector<16x32xf32> -> vector<16x32xf32>
    %c37 = arith.constant 37 : index
    %c0_470 = arith.constant 0 : index
    %c0_471 = arith.constant 0 : index
    %723 = vector.load %arg6[%c37, %c0_470, %c0_471] : memref<72x32x8xf32, #tpu.memory_space<vmem>>, vector<1x32x8xf32>
    %724 = vector.shape_cast %723 : vector<1x32x8xf32> to vector<32x8xf32>
    %cst_472 = arith.constant dense<0.000000e+00> : vector<16x8xf32>
    %725 = tpu.matmul %685, %724, %cst_472 {dimension_numbers = #tpu.dot_dimension_numbers<[1], [0], [0], [1], [0, 0, 1, 1], [], []>} : vector<16x32xf32>, vector<32x8xf32>, vector<16x8xf32> -> vector<16x8xf32>
    %c37_473 = arith.constant 37 : index
    %c0_474 = arith.constant 0 : index
    %c0_475 = arith.constant 0 : index
    %726 = vector.load %arg7[%c37_473, %c0_474, %c0_475] : memref<72x1x8xf32, #tpu.memory_space<vmem>>, vector<1x1x8xf32>
    %727 = vector.shape_cast %726 : vector<1x1x8xf32> to vector<1x8xf32>
    %728 = vector.broadcast %727 : vector<1x8xf32> to vector<16x8xf32>
    %729 = arith.addf %725, %728 : vector<16x8xf32>
    %c41 = arith.constant 41 : index
    %c0_476 = arith.constant 0 : index
    %c0_477 = arith.constant 0 : index
    %730 = vector.load %arg6[%c41, %c0_476, %c0_477] : memref<72x32x8xf32, #tpu.memory_space<vmem>>, vector<1x32x8xf32>
    %731 = vector.shape_cast %730 : vector<1x32x8xf32> to vector<32x8xf32>
    %cst_478 = arith.constant dense<0.000000e+00> : vector<16x8xf32>
    %732 = tpu.matmul %685, %731, %cst_478 {dimension_numbers = #tpu.dot_dimension_numbers<[1], [0], [0], [1], [0, 0, 1, 1], [], []>} : vector<16x32xf32>, vector<32x8xf32>, vector<16x8xf32> -> vector<16x8xf32>
    %c41_479 = arith.constant 41 : index
    %c0_480 = arith.constant 0 : index
    %c0_481 = arith.constant 0 : index
    %733 = vector.load %arg7[%c41_479, %c0_480, %c0_481] : memref<72x1x8xf32, #tpu.memory_space<vmem>>, vector<1x1x8xf32>
    %734 = vector.shape_cast %733 : vector<1x1x8xf32> to vector<1x8xf32>
    %735 = vector.broadcast %734 : vector<1x8xf32> to vector<16x8xf32>
    %736 = arith.addf %732, %735 : vector<16x8xf32>
    %c45 = arith.constant 45 : index
    %c0_482 = arith.constant 0 : index
    %c0_483 = arith.constant 0 : index
    %737 = vector.load %arg6[%c45, %c0_482, %c0_483] : memref<72x32x8xf32, #tpu.memory_space<vmem>>, vector<1x32x8xf32>
    %738 = vector.shape_cast %737 : vector<1x32x8xf32> to vector<32x8xf32>
    %cst_484 = arith.constant dense<0.000000e+00> : vector<16x8xf32>
    %739 = tpu.matmul %685, %738, %cst_484 {dimension_numbers = #tpu.dot_dimension_numbers<[1], [0], [0], [1], [0, 0, 1, 1], [], []>} : vector<16x32xf32>, vector<32x8xf32>, vector<16x8xf32> -> vector<16x8xf32>
    %c45_485 = arith.constant 45 : index
    %c0_486 = arith.constant 0 : index
    %c0_487 = arith.constant 0 : index
    %740 = vector.load %arg7[%c45_485, %c0_486, %c0_487] : memref<72x1x8xf32, #tpu.memory_space<vmem>>, vector<1x1x8xf32>
    %741 = vector.shape_cast %740 : vector<1x1x8xf32> to vector<1x8xf32>
    %742 = vector.broadcast %741 : vector<1x8xf32> to vector<16x8xf32>
    %743 = arith.addf %739, %742 : vector<16x8xf32>
    %cst_488 = arith.constant dense<0.000000e+00> : vector<16x16xf32>
    %744 = tpu.matmul %729, %736, %cst_488 {dimension_numbers = #tpu.dot_dimension_numbers<[1], [1], [0], [0], [0, 0, 1, 0], [], []>} : vector<16x8xf32>, vector<16x8xf32>, vector<16x16xf32> -> vector<16x16xf32>
    %745 = arith.addf %744, %0 : vector<16x16xf32>
    %cst_489 = arith.constant dense<0xFF800000> : vector<16xf32>
    %746 = vector.multi_reduction <maximumf>, %745, %cst_489 [1] : vector<16x16xf32> to vector<16xf32>
    %747 = vector.shape_cast %746 : vector<16xf32> to vector<16x1xf32>
    %748 = vector.broadcast %747 : vector<16x1xf32> to vector<16x16xf32>
    %749 = arith.subf %745, %748 : vector<16x16xf32>
    %750 = math.exp %749 : vector<16x16xf32>
    %cst_490 = arith.constant dense<0.000000e+00> : vector<16xf32>
    %751 = vector.multi_reduction <add>, %750, %cst_490 [1] : vector<16x16xf32> to vector<16xf32>
    %752 = vector.shape_cast %751 : vector<16xf32> to vector<16x1xf32>
    %753 = tpu.reciprocal %752 {approx = true} : vector<16x1xf32> -> vector<16x1xf32>
    %754 = vector.broadcast %753 : vector<16x1xf32> to vector<16x16xf32>
    %755 = arith.mulf %750, %754 : vector<16x16xf32>
    %cst_491 = arith.constant dense<0.000000e+00> : vector<16x8xf32>
    %756 = tpu.matmul %755, %743, %cst_491 {dimension_numbers = #tpu.dot_dimension_numbers<[1], [0], [0], [1], [0, 0, 1, 1], [], []>} : vector<16x16xf32>, vector<16x8xf32>, vector<16x8xf32> -> vector<16x8xf32>
    %c13_492 = arith.constant 13 : index
    %c0_493 = arith.constant 0 : index
    %c0_494 = arith.constant 0 : index
    %757 = vector.load %arg8[%c13_492, %c0_493, %c0_494] : memref<24x8x32xf32, #tpu.memory_space<vmem>>, vector<1x8x32xf32>
    %758 = vector.shape_cast %757 : vector<1x8x32xf32> to vector<8x32xf32>
    %cst_495 = arith.constant dense<0.000000e+00> : vector<16x32xf32>
    %759 = tpu.matmul %756, %758, %cst_495 {dimension_numbers = #tpu.dot_dimension_numbers<[1], [0], [0], [1], [0, 0, 1, 1], [], []>} : vector<16x8xf32>, vector<8x32xf32>, vector<16x32xf32> -> vector<16x32xf32>
    %760 = arith.addf %722, %759 : vector<16x32xf32>
    %c38 = arith.constant 38 : index
    %c0_496 = arith.constant 0 : index
    %c0_497 = arith.constant 0 : index
    %761 = vector.load %arg6[%c38, %c0_496, %c0_497] : memref<72x32x8xf32, #tpu.memory_space<vmem>>, vector<1x32x8xf32>
    %762 = vector.shape_cast %761 : vector<1x32x8xf32> to vector<32x8xf32>
    %cst_498 = arith.constant dense<0.000000e+00> : vector<16x8xf32>
    %763 = tpu.matmul %685, %762, %cst_498 {dimension_numbers = #tpu.dot_dimension_numbers<[1], [0], [0], [1], [0, 0, 1, 1], [], []>} : vector<16x32xf32>, vector<32x8xf32>, vector<16x8xf32> -> vector<16x8xf32>
    %c38_499 = arith.constant 38 : index
    %c0_500 = arith.constant 0 : index
    %c0_501 = arith.constant 0 : index
    %764 = vector.load %arg7[%c38_499, %c0_500, %c0_501] : memref<72x1x8xf32, #tpu.memory_space<vmem>>, vector<1x1x8xf32>
    %765 = vector.shape_cast %764 : vector<1x1x8xf32> to vector<1x8xf32>
    %766 = vector.broadcast %765 : vector<1x8xf32> to vector<16x8xf32>
    %767 = arith.addf %763, %766 : vector<16x8xf32>
    %c42 = arith.constant 42 : index
    %c0_502 = arith.constant 0 : index
    %c0_503 = arith.constant 0 : index
    %768 = vector.load %arg6[%c42, %c0_502, %c0_503] : memref<72x32x8xf32, #tpu.memory_space<vmem>>, vector<1x32x8xf32>
    %769 = vector.shape_cast %768 : vector<1x32x8xf32> to vector<32x8xf32>
    %cst_504 = arith.constant dense<0.000000e+00> : vector<16x8xf32>
    %770 = tpu.matmul %685, %769, %cst_504 {dimension_numbers = #tpu.dot_dimension_numbers<[1], [0], [0], [1], [0, 0, 1, 1], [], []>} : vector<16x32xf32>, vector<32x8xf32>, vector<16x8xf32> -> vector<16x8xf32>
    %c42_505 = arith.constant 42 : index
    %c0_506 = arith.constant 0 : index
    %c0_507 = arith.constant 0 : index
    %771 = vector.load %arg7[%c42_505, %c0_506, %c0_507] : memref<72x1x8xf32, #tpu.memory_space<vmem>>, vector<1x1x8xf32>
    %772 = vector.shape_cast %771 : vector<1x1x8xf32> to vector<1x8xf32>
    %773 = vector.broadcast %772 : vector<1x8xf32> to vector<16x8xf32>
    %774 = arith.addf %770, %773 : vector<16x8xf32>
    %c46 = arith.constant 46 : index
    %c0_508 = arith.constant 0 : index
    %c0_509 = arith.constant 0 : index
    %775 = vector.load %arg6[%c46, %c0_508, %c0_509] : memref<72x32x8xf32, #tpu.memory_space<vmem>>, vector<1x32x8xf32>
    %776 = vector.shape_cast %775 : vector<1x32x8xf32> to vector<32x8xf32>
    %cst_510 = arith.constant dense<0.000000e+00> : vector<16x8xf32>
    %777 = tpu.matmul %685, %776, %cst_510 {dimension_numbers = #tpu.dot_dimension_numbers<[1], [0], [0], [1], [0, 0, 1, 1], [], []>} : vector<16x32xf32>, vector<32x8xf32>, vector<16x8xf32> -> vector<16x8xf32>
    %c46_511 = arith.constant 46 : index
    %c0_512 = arith.constant 0 : index
    %c0_513 = arith.constant 0 : index
    %778 = vector.load %arg7[%c46_511, %c0_512, %c0_513] : memref<72x1x8xf32, #tpu.memory_space<vmem>>, vector<1x1x8xf32>
    %779 = vector.shape_cast %778 : vector<1x1x8xf32> to vector<1x8xf32>
    %780 = vector.broadcast %779 : vector<1x8xf32> to vector<16x8xf32>
    %781 = arith.addf %777, %780 : vector<16x8xf32>
    %cst_514 = arith.constant dense<0.000000e+00> : vector<16x16xf32>
    %782 = tpu.matmul %767, %774, %cst_514 {dimension_numbers = #tpu.dot_dimension_numbers<[1], [1], [0], [0], [0, 0, 1, 0], [], []>} : vector<16x8xf32>, vector<16x8xf32>, vector<16x16xf32> -> vector<16x16xf32>
    %783 = arith.addf %782, %0 : vector<16x16xf32>
    %cst_515 = arith.constant dense<0xFF800000> : vector<16xf32>
    %784 = vector.multi_reduction <maximumf>, %783, %cst_515 [1] : vector<16x16xf32> to vector<16xf32>
    %785 = vector.shape_cast %784 : vector<16xf32> to vector<16x1xf32>
    %786 = vector.broadcast %785 : vector<16x1xf32> to vector<16x16xf32>
    %787 = arith.subf %783, %786 : vector<16x16xf32>
    %788 = math.exp %787 : vector<16x16xf32>
    %cst_516 = arith.constant dense<0.000000e+00> : vector<16xf32>
    %789 = vector.multi_reduction <add>, %788, %cst_516 [1] : vector<16x16xf32> to vector<16xf32>
    %790 = vector.shape_cast %789 : vector<16xf32> to vector<16x1xf32>
    %791 = tpu.reciprocal %790 {approx = true} : vector<16x1xf32> -> vector<16x1xf32>
    %792 = vector.broadcast %791 : vector<16x1xf32> to vector<16x16xf32>
    %793 = arith.mulf %788, %792 : vector<16x16xf32>
    %cst_517 = arith.constant dense<0.000000e+00> : vector<16x8xf32>
    %794 = tpu.matmul %793, %781, %cst_517 {dimension_numbers = #tpu.dot_dimension_numbers<[1], [0], [0], [1], [0, 0, 1, 1], [], []>} : vector<16x16xf32>, vector<16x8xf32>, vector<16x8xf32> -> vector<16x8xf32>
    %c14_518 = arith.constant 14 : index
    %c0_519 = arith.constant 0 : index
    %c0_520 = arith.constant 0 : index
    %795 = vector.load %arg8[%c14_518, %c0_519, %c0_520] : memref<24x8x32xf32, #tpu.memory_space<vmem>>, vector<1x8x32xf32>
    %796 = vector.shape_cast %795 : vector<1x8x32xf32> to vector<8x32xf32>
    %cst_521 = arith.constant dense<0.000000e+00> : vector<16x32xf32>
    %797 = tpu.matmul %794, %796, %cst_521 {dimension_numbers = #tpu.dot_dimension_numbers<[1], [0], [0], [1], [0, 0, 1, 1], [], []>} : vector<16x8xf32>, vector<8x32xf32>, vector<16x32xf32> -> vector<16x32xf32>
    %798 = arith.addf %760, %797 : vector<16x32xf32>
    %c39 = arith.constant 39 : index
    %c0_522 = arith.constant 0 : index
    %c0_523 = arith.constant 0 : index
    %799 = vector.load %arg6[%c39, %c0_522, %c0_523] : memref<72x32x8xf32, #tpu.memory_space<vmem>>, vector<1x32x8xf32>
    %800 = vector.shape_cast %799 : vector<1x32x8xf32> to vector<32x8xf32>
    %cst_524 = arith.constant dense<0.000000e+00> : vector<16x8xf32>
    %801 = tpu.matmul %685, %800, %cst_524 {dimension_numbers = #tpu.dot_dimension_numbers<[1], [0], [0], [1], [0, 0, 1, 1], [], []>} : vector<16x32xf32>, vector<32x8xf32>, vector<16x8xf32> -> vector<16x8xf32>
    %c39_525 = arith.constant 39 : index
    %c0_526 = arith.constant 0 : index
    %c0_527 = arith.constant 0 : index
    %802 = vector.load %arg7[%c39_525, %c0_526, %c0_527] : memref<72x1x8xf32, #tpu.memory_space<vmem>>, vector<1x1x8xf32>
    %803 = vector.shape_cast %802 : vector<1x1x8xf32> to vector<1x8xf32>
    %804 = vector.broadcast %803 : vector<1x8xf32> to vector<16x8xf32>
    %805 = arith.addf %801, %804 : vector<16x8xf32>
    %c43 = arith.constant 43 : index
    %c0_528 = arith.constant 0 : index
    %c0_529 = arith.constant 0 : index
    %806 = vector.load %arg6[%c43, %c0_528, %c0_529] : memref<72x32x8xf32, #tpu.memory_space<vmem>>, vector<1x32x8xf32>
    %807 = vector.shape_cast %806 : vector<1x32x8xf32> to vector<32x8xf32>
    %cst_530 = arith.constant dense<0.000000e+00> : vector<16x8xf32>
    %808 = tpu.matmul %685, %807, %cst_530 {dimension_numbers = #tpu.dot_dimension_numbers<[1], [0], [0], [1], [0, 0, 1, 1], [], []>} : vector<16x32xf32>, vector<32x8xf32>, vector<16x8xf32> -> vector<16x8xf32>
    %c43_531 = arith.constant 43 : index
    %c0_532 = arith.constant 0 : index
    %c0_533 = arith.constant 0 : index
    %809 = vector.load %arg7[%c43_531, %c0_532, %c0_533] : memref<72x1x8xf32, #tpu.memory_space<vmem>>, vector<1x1x8xf32>
    %810 = vector.shape_cast %809 : vector<1x1x8xf32> to vector<1x8xf32>
    %811 = vector.broadcast %810 : vector<1x8xf32> to vector<16x8xf32>
    %812 = arith.addf %808, %811 : vector<16x8xf32>
    %c47 = arith.constant 47 : index
    %c0_534 = arith.constant 0 : index
    %c0_535 = arith.constant 0 : index
    %813 = vector.load %arg6[%c47, %c0_534, %c0_535] : memref<72x32x8xf32, #tpu.memory_space<vmem>>, vector<1x32x8xf32>
    %814 = vector.shape_cast %813 : vector<1x32x8xf32> to vector<32x8xf32>
    %cst_536 = arith.constant dense<0.000000e+00> : vector<16x8xf32>
    %815 = tpu.matmul %685, %814, %cst_536 {dimension_numbers = #tpu.dot_dimension_numbers<[1], [0], [0], [1], [0, 0, 1, 1], [], []>} : vector<16x32xf32>, vector<32x8xf32>, vector<16x8xf32> -> vector<16x8xf32>
    %c47_537 = arith.constant 47 : index
    %c0_538 = arith.constant 0 : index
    %c0_539 = arith.constant 0 : index
    %816 = vector.load %arg7[%c47_537, %c0_538, %c0_539] : memref<72x1x8xf32, #tpu.memory_space<vmem>>, vector<1x1x8xf32>
    %817 = vector.shape_cast %816 : vector<1x1x8xf32> to vector<1x8xf32>
    %818 = vector.broadcast %817 : vector<1x8xf32> to vector<16x8xf32>
    %819 = arith.addf %815, %818 : vector<16x8xf32>
    %cst_540 = arith.constant dense<0.000000e+00> : vector<16x16xf32>
    %820 = tpu.matmul %805, %812, %cst_540 {dimension_numbers = #tpu.dot_dimension_numbers<[1], [1], [0], [0], [0, 0, 1, 0], [], []>} : vector<16x8xf32>, vector<16x8xf32>, vector<16x16xf32> -> vector<16x16xf32>
    %821 = arith.addf %820, %0 : vector<16x16xf32>
    %cst_541 = arith.constant dense<0xFF800000> : vector<16xf32>
    %822 = vector.multi_reduction <maximumf>, %821, %cst_541 [1] : vector<16x16xf32> to vector<16xf32>
    %823 = vector.shape_cast %822 : vector<16xf32> to vector<16x1xf32>
    %824 = vector.broadcast %823 : vector<16x1xf32> to vector<16x16xf32>
    %825 = arith.subf %821, %824 : vector<16x16xf32>
    %826 = math.exp %825 : vector<16x16xf32>
    %cst_542 = arith.constant dense<0.000000e+00> : vector<16xf32>
    %827 = vector.multi_reduction <add>, %826, %cst_542 [1] : vector<16x16xf32> to vector<16xf32>
    %828 = vector.shape_cast %827 : vector<16xf32> to vector<16x1xf32>
    %829 = tpu.reciprocal %828 {approx = true} : vector<16x1xf32> -> vector<16x1xf32>
    %830 = vector.broadcast %829 : vector<16x1xf32> to vector<16x16xf32>
    %831 = arith.mulf %826, %830 : vector<16x16xf32>
    %cst_543 = arith.constant dense<0.000000e+00> : vector<16x8xf32>
    %832 = tpu.matmul %831, %819, %cst_543 {dimension_numbers = #tpu.dot_dimension_numbers<[1], [0], [0], [1], [0, 0, 1, 1], [], []>} : vector<16x16xf32>, vector<16x8xf32>, vector<16x8xf32> -> vector<16x8xf32>
    %c15_544 = arith.constant 15 : index
    %c0_545 = arith.constant 0 : index
    %c0_546 = arith.constant 0 : index
    %833 = vector.load %arg8[%c15_544, %c0_545, %c0_546] : memref<24x8x32xf32, #tpu.memory_space<vmem>>, vector<1x8x32xf32>
    %834 = vector.shape_cast %833 : vector<1x8x32xf32> to vector<8x32xf32>
    %cst_547 = arith.constant dense<0.000000e+00> : vector<16x32xf32>
    %835 = tpu.matmul %832, %834, %cst_547 {dimension_numbers = #tpu.dot_dimension_numbers<[1], [0], [0], [1], [0, 0, 1, 1], [], []>} : vector<16x8xf32>, vector<8x32xf32>, vector<16x32xf32> -> vector<16x32xf32>
    %836 = arith.addf %798, %835 : vector<16x32xf32>
    %c22_548 = arith.constant 22 : index
    %c0_549 = arith.constant 0 : index
    %c0_550 = arith.constant 0 : index
    %837 = vector.load %arg12[%c22_548, %c0_549, %c0_550] : memref<36x1x32xf32, #tpu.memory_space<vmem>>, vector<1x1x32xf32>
    %838 = vector.shape_cast %837 : vector<1x1x32xf32> to vector<1x32xf32>
    %839 = vector.broadcast %838 : vector<1x32xf32> to vector<16x32xf32>
    %840 = arith.addf %836, %839 : vector<16x32xf32>
    %841 = arith.addf %685, %840 : vector<16x32xf32>
    %c18_551 = arith.constant 18 : index
    %c0_552 = arith.constant 0 : index
    %c0_553 = arith.constant 0 : index
    %842 = vector.load %arg12[%c18_551, %c0_552, %c0_553] : memref<36x1x32xf32, #tpu.memory_space<vmem>>, vector<1x1x32xf32>
    %843 = vector.shape_cast %842 : vector<1x1x32xf32> to vector<1x32xf32>
    %c19_554 = arith.constant 19 : index
    %c0_555 = arith.constant 0 : index
    %c0_556 = arith.constant 0 : index
    %844 = vector.load %arg12[%c19_554, %c0_555, %c0_556] : memref<36x1x32xf32, #tpu.memory_space<vmem>>, vector<1x1x32xf32>
    %845 = vector.shape_cast %844 : vector<1x1x32xf32> to vector<1x32xf32>
    %cst_557 = arith.constant dense<0.000000e+00> : vector<16xf32>
    %846 = vector.multi_reduction <add>, %841, %cst_557 [1] : vector<16x32xf32> to vector<16xf32>
    %847 = vector.shape_cast %846 : vector<16xf32> to vector<16x1xf32>
    %cst_558 = arith.constant 3.200000e+01 : f32
    %848 = vector.broadcast %cst_558 : f32 to vector<16x1xf32>
    %849 = arith.divf %847, %848 : vector<16x1xf32>
    %850 = vector.broadcast %849 : vector<16x1xf32> to vector<16x32xf32>
    %851 = arith.subf %841, %850 : vector<16x32xf32>
    %852 = arith.mulf %851, %851 : vector<16x32xf32>
    %cst_559 = arith.constant dense<0.000000e+00> : vector<16xf32>
    %853 = vector.multi_reduction <add>, %852, %cst_559 [1] : vector<16x32xf32> to vector<16xf32>
    %854 = vector.shape_cast %853 : vector<16xf32> to vector<16x1xf32>
    %cst_560 = arith.constant 3.200000e+01 : f32
    %855 = vector.broadcast %cst_560 : f32 to vector<16x1xf32>
    %856 = arith.divf %854, %855 : vector<16x1xf32>
    %857 = vector.broadcast %849 : vector<16x1xf32> to vector<16x32xf32>
    %858 = arith.subf %841, %857 : vector<16x32xf32>
    %cst_561 = arith.constant 9.99999974E-6 : f32
    %859 = vector.broadcast %cst_561 : f32 to vector<16x1xf32>
    %860 = arith.addf %856, %859 : vector<16x1xf32>
    %861 = math.rsqrt %860 : vector<16x1xf32>
    %862 = vector.broadcast %861 : vector<16x1xf32> to vector<16x32xf32>
    %863 = arith.mulf %858, %862 : vector<16x32xf32>
    %864 = vector.broadcast %843 : vector<1x32xf32> to vector<16x32xf32>
    %865 = arith.mulf %863, %864 : vector<16x32xf32>
    %866 = vector.broadcast %845 : vector<1x32xf32> to vector<16x32xf32>
    %867 = arith.addf %865, %866 : vector<16x32xf32>
    %c3_562 = arith.constant 3 : index
    %c0_563 = arith.constant 0 : index
    %c0_564 = arith.constant 0 : index
    %868 = vector.load %arg9[%c3_562, %c0_563, %c0_564] : memref<6x32x64xf32, #tpu.memory_space<vmem>>, vector<1x32x64xf32>
    %869 = vector.shape_cast %868 : vector<1x32x64xf32> to vector<32x64xf32>
    %cst_565 = arith.constant dense<0.000000e+00> : vector<16x64xf32>
    %870 = tpu.matmul %867, %869, %cst_565 {dimension_numbers = #tpu.dot_dimension_numbers<[1], [0], [0], [1], [0, 0, 1, 1], [], []>} : vector<16x32xf32>, vector<32x64xf32>, vector<16x64xf32> -> vector<16x64xf32>
    %c3_566 = arith.constant 3 : index
    %c0_567 = arith.constant 0 : index
    %c0_568 = arith.constant 0 : index
    %871 = vector.load %arg11[%c3_566, %c0_567, %c0_568] : memref<6x1x64xf32, #tpu.memory_space<vmem>>, vector<1x1x64xf32>
    %872 = vector.shape_cast %871 : vector<1x1x64xf32> to vector<1x64xf32>
    %873 = vector.broadcast %872 : vector<1x64xf32> to vector<16x64xf32>
    %874 = arith.addf %870, %873 : vector<16x64xf32>
    %cst_569 = arith.constant 0.000000e+00 : f32
    %875 = vector.broadcast %cst_569 : f32 to vector<16x64xf32>
    %876 = arith.maximumf %874, %875 : vector<16x64xf32>
    %c3_570 = arith.constant 3 : index
    %c0_571 = arith.constant 0 : index
    %c0_572 = arith.constant 0 : index
    %877 = vector.load %arg10[%c3_570, %c0_571, %c0_572] : memref<6x64x32xf32, #tpu.memory_space<vmem>>, vector<1x64x32xf32>
    %878 = vector.shape_cast %877 : vector<1x64x32xf32> to vector<64x32xf32>
    %cst_573 = arith.constant dense<0.000000e+00> : vector<16x32xf32>
    %879 = tpu.matmul %876, %878, %cst_573 {dimension_numbers = #tpu.dot_dimension_numbers<[1], [0], [0], [1], [0, 0, 1, 1], [], []>} : vector<16x64xf32>, vector<64x32xf32>, vector<16x32xf32> -> vector<16x32xf32>
    %c23_574 = arith.constant 23 : index
    %c0_575 = arith.constant 0 : index
    %c0_576 = arith.constant 0 : index
    %880 = vector.load %arg12[%c23_574, %c0_575, %c0_576] : memref<36x1x32xf32, #tpu.memory_space<vmem>>, vector<1x1x32xf32>
    %881 = vector.shape_cast %880 : vector<1x1x32xf32> to vector<1x32xf32>
    %882 = vector.broadcast %881 : vector<1x32xf32> to vector<16x32xf32>
    %883 = arith.addf %879, %882 : vector<16x32xf32>
    %884 = arith.addf %867, %883 : vector<16x32xf32>
    %c20_577 = arith.constant 20 : index
    %c0_578 = arith.constant 0 : index
    %c0_579 = arith.constant 0 : index
    %885 = vector.load %arg12[%c20_577, %c0_578, %c0_579] : memref<36x1x32xf32, #tpu.memory_space<vmem>>, vector<1x1x32xf32>
    %886 = vector.shape_cast %885 : vector<1x1x32xf32> to vector<1x32xf32>
    %c21_580 = arith.constant 21 : index
    %c0_581 = arith.constant 0 : index
    %c0_582 = arith.constant 0 : index
    %887 = vector.load %arg12[%c21_580, %c0_581, %c0_582] : memref<36x1x32xf32, #tpu.memory_space<vmem>>, vector<1x1x32xf32>
    %888 = vector.shape_cast %887 : vector<1x1x32xf32> to vector<1x32xf32>
    %cst_583 = arith.constant dense<0.000000e+00> : vector<16xf32>
    %889 = vector.multi_reduction <add>, %884, %cst_583 [1] : vector<16x32xf32> to vector<16xf32>
    %890 = vector.shape_cast %889 : vector<16xf32> to vector<16x1xf32>
    %cst_584 = arith.constant 3.200000e+01 : f32
    %891 = vector.broadcast %cst_584 : f32 to vector<16x1xf32>
    %892 = arith.divf %890, %891 : vector<16x1xf32>
    %893 = vector.broadcast %892 : vector<16x1xf32> to vector<16x32xf32>
    %894 = arith.subf %884, %893 : vector<16x32xf32>
    %895 = arith.mulf %894, %894 : vector<16x32xf32>
    %cst_585 = arith.constant dense<0.000000e+00> : vector<16xf32>
    %896 = vector.multi_reduction <add>, %895, %cst_585 [1] : vector<16x32xf32> to vector<16xf32>
    %897 = vector.shape_cast %896 : vector<16xf32> to vector<16x1xf32>
    %cst_586 = arith.constant 3.200000e+01 : f32
    %898 = vector.broadcast %cst_586 : f32 to vector<16x1xf32>
    %899 = arith.divf %897, %898 : vector<16x1xf32>
    %900 = vector.broadcast %892 : vector<16x1xf32> to vector<16x32xf32>
    %901 = arith.subf %884, %900 : vector<16x32xf32>
    %cst_587 = arith.constant 9.99999974E-6 : f32
    %902 = vector.broadcast %cst_587 : f32 to vector<16x1xf32>
    %903 = arith.addf %899, %902 : vector<16x1xf32>
    %904 = math.rsqrt %903 : vector<16x1xf32>
    %905 = vector.broadcast %904 : vector<16x1xf32> to vector<16x32xf32>
    %906 = arith.mulf %901, %905 : vector<16x32xf32>
    %907 = vector.broadcast %886 : vector<1x32xf32> to vector<16x32xf32>
    %908 = arith.mulf %906, %907 : vector<16x32xf32>
    %909 = vector.broadcast %888 : vector<1x32xf32> to vector<16x32xf32>
    %910 = arith.addf %908, %909 : vector<16x32xf32>
    %c0_588 = arith.constant 0 : index
    %c0_589 = arith.constant 0 : index
    %c0_590 = arith.constant 0 : index
    %911 = vector.load %arg13[%c0_588, %c0_589, %c0_590] : memref<2x32x32xf32, #tpu.memory_space<vmem>>, vector<1x32x32xf32>
    %912 = vector.shape_cast %911 : vector<1x32x32xf32> to vector<32x32xf32>
    %cst_591 = arith.constant dense<0.000000e+00> : vector<16x32xf32>
    %913 = tpu.matmul %458, %912, %cst_591 {dimension_numbers = #tpu.dot_dimension_numbers<[1], [0], [0], [1], [0, 0, 1, 1], [], []>} : vector<16x32xf32>, vector<32x32xf32>, vector<16x32xf32> -> vector<16x32xf32>
    %c1_592 = arith.constant 1 : index
    %c0_593 = arith.constant 0 : index
    %c0_594 = arith.constant 0 : index
    %914 = vector.load %arg13[%c1_592, %c0_593, %c0_594] : memref<2x32x32xf32, #tpu.memory_space<vmem>>, vector<1x32x32xf32>
    %915 = vector.shape_cast %914 : vector<1x32x32xf32> to vector<32x32xf32>
    %cst_595 = arith.constant dense<0.000000e+00> : vector<16x32xf32>
    %916 = tpu.matmul %910, %915, %cst_595 {dimension_numbers = #tpu.dot_dimension_numbers<[1], [0], [0], [1], [0, 0, 1, 1], [], []>} : vector<16x32xf32>, vector<32x32xf32>, vector<16x32xf32> -> vector<16x32xf32>
    %917 = arith.addf %913, %916 : vector<16x32xf32>
    %c0_596 = arith.constant 0 : index
    %c0_597 = arith.constant 0 : index
    %918 = vector.load %arg14[%c0_596, %c0_597] : memref<1x32xf32, #tpu.memory_space<vmem>>, vector<1x32xf32>
    %919 = vector.broadcast %918 : vector<1x32xf32> to vector<16x32xf32>
    %920 = arith.addf %917, %919 : vector<16x32xf32>
    %c48 = arith.constant 48 : index
    %c0_598 = arith.constant 0 : index
    %c0_599 = arith.constant 0 : index
    %921 = vector.load %arg6[%c48, %c0_598, %c0_599] : memref<72x32x8xf32, #tpu.memory_space<vmem>>, vector<1x32x8xf32>
    %922 = vector.shape_cast %921 : vector<1x32x8xf32> to vector<32x8xf32>
    %cst_600 = arith.constant dense<0.000000e+00> : vector<16x8xf32>
    %923 = tpu.matmul %920, %922, %cst_600 {dimension_numbers = #tpu.dot_dimension_numbers<[1], [0], [0], [1], [0, 0, 1, 1], [], []>} : vector<16x32xf32>, vector<32x8xf32>, vector<16x8xf32> -> vector<16x8xf32>
    %c48_601 = arith.constant 48 : index
    %c0_602 = arith.constant 0 : index
    %c0_603 = arith.constant 0 : index
    %924 = vector.load %arg7[%c48_601, %c0_602, %c0_603] : memref<72x1x8xf32, #tpu.memory_space<vmem>>, vector<1x1x8xf32>
    %925 = vector.shape_cast %924 : vector<1x1x8xf32> to vector<1x8xf32>
    %926 = vector.broadcast %925 : vector<1x8xf32> to vector<16x8xf32>
    %927 = arith.addf %923, %926 : vector<16x8xf32>
    %c52 = arith.constant 52 : index
    %c0_604 = arith.constant 0 : index
    %c0_605 = arith.constant 0 : index
    %928 = vector.load %arg6[%c52, %c0_604, %c0_605] : memref<72x32x8xf32, #tpu.memory_space<vmem>>, vector<1x32x8xf32>
    %929 = vector.shape_cast %928 : vector<1x32x8xf32> to vector<32x8xf32>
    %cst_606 = arith.constant dense<0.000000e+00> : vector<16x8xf32>
    %930 = tpu.matmul %920, %929, %cst_606 {dimension_numbers = #tpu.dot_dimension_numbers<[1], [0], [0], [1], [0, 0, 1, 1], [], []>} : vector<16x32xf32>, vector<32x8xf32>, vector<16x8xf32> -> vector<16x8xf32>
    %c52_607 = arith.constant 52 : index
    %c0_608 = arith.constant 0 : index
    %c0_609 = arith.constant 0 : index
    %931 = vector.load %arg7[%c52_607, %c0_608, %c0_609] : memref<72x1x8xf32, #tpu.memory_space<vmem>>, vector<1x1x8xf32>
    %932 = vector.shape_cast %931 : vector<1x1x8xf32> to vector<1x8xf32>
    %933 = vector.broadcast %932 : vector<1x8xf32> to vector<16x8xf32>
    %934 = arith.addf %930, %933 : vector<16x8xf32>
    %c56 = arith.constant 56 : index
    %c0_610 = arith.constant 0 : index
    %c0_611 = arith.constant 0 : index
    %935 = vector.load %arg6[%c56, %c0_610, %c0_611] : memref<72x32x8xf32, #tpu.memory_space<vmem>>, vector<1x32x8xf32>
    %936 = vector.shape_cast %935 : vector<1x32x8xf32> to vector<32x8xf32>
    %cst_612 = arith.constant dense<0.000000e+00> : vector<16x8xf32>
    %937 = tpu.matmul %920, %936, %cst_612 {dimension_numbers = #tpu.dot_dimension_numbers<[1], [0], [0], [1], [0, 0, 1, 1], [], []>} : vector<16x32xf32>, vector<32x8xf32>, vector<16x8xf32> -> vector<16x8xf32>
    %c56_613 = arith.constant 56 : index
    %c0_614 = arith.constant 0 : index
    %c0_615 = arith.constant 0 : index
    %938 = vector.load %arg7[%c56_613, %c0_614, %c0_615] : memref<72x1x8xf32, #tpu.memory_space<vmem>>, vector<1x1x8xf32>
    %939 = vector.shape_cast %938 : vector<1x1x8xf32> to vector<1x8xf32>
    %940 = vector.broadcast %939 : vector<1x8xf32> to vector<16x8xf32>
    %941 = arith.addf %937, %940 : vector<16x8xf32>
    %cst_616 = arith.constant dense<0.000000e+00> : vector<16x16xf32>
    %942 = tpu.matmul %927, %934, %cst_616 {dimension_numbers = #tpu.dot_dimension_numbers<[1], [1], [0], [0], [0, 0, 1, 0], [], []>} : vector<16x8xf32>, vector<16x8xf32>, vector<16x16xf32> -> vector<16x16xf32>
    %943 = arith.addf %942, %0 : vector<16x16xf32>
    %cst_617 = arith.constant dense<0xFF800000> : vector<16xf32>
    %944 = vector.multi_reduction <maximumf>, %943, %cst_617 [1] : vector<16x16xf32> to vector<16xf32>
    %945 = vector.shape_cast %944 : vector<16xf32> to vector<16x1xf32>
    %946 = vector.broadcast %945 : vector<16x1xf32> to vector<16x16xf32>
    %947 = arith.subf %943, %946 : vector<16x16xf32>
    %948 = math.exp %947 : vector<16x16xf32>
    %cst_618 = arith.constant dense<0.000000e+00> : vector<16xf32>
    %949 = vector.multi_reduction <add>, %948, %cst_618 [1] : vector<16x16xf32> to vector<16xf32>
    %950 = vector.shape_cast %949 : vector<16xf32> to vector<16x1xf32>
    %951 = tpu.reciprocal %950 {approx = true} : vector<16x1xf32> -> vector<16x1xf32>
    %952 = vector.broadcast %951 : vector<16x1xf32> to vector<16x16xf32>
    %953 = arith.mulf %948, %952 : vector<16x16xf32>
    %cst_619 = arith.constant dense<0.000000e+00> : vector<16x8xf32>
    %954 = tpu.matmul %953, %941, %cst_619 {dimension_numbers = #tpu.dot_dimension_numbers<[1], [0], [0], [1], [0, 0, 1, 1], [], []>} : vector<16x16xf32>, vector<16x8xf32>, vector<16x8xf32> -> vector<16x8xf32>
    %c16_620 = arith.constant 16 : index
    %c0_621 = arith.constant 0 : index
    %c0_622 = arith.constant 0 : index
    %955 = vector.load %arg8[%c16_620, %c0_621, %c0_622] : memref<24x8x32xf32, #tpu.memory_space<vmem>>, vector<1x8x32xf32>
    %956 = vector.shape_cast %955 : vector<1x8x32xf32> to vector<8x32xf32>
    %cst_623 = arith.constant dense<0.000000e+00> : vector<16x32xf32>
    %957 = tpu.matmul %954, %956, %cst_623 {dimension_numbers = #tpu.dot_dimension_numbers<[1], [0], [0], [1], [0, 0, 1, 1], [], []>} : vector<16x8xf32>, vector<8x32xf32>, vector<16x32xf32> -> vector<16x32xf32>
    %c49 = arith.constant 49 : index
    %c0_624 = arith.constant 0 : index
    %c0_625 = arith.constant 0 : index
    %958 = vector.load %arg6[%c49, %c0_624, %c0_625] : memref<72x32x8xf32, #tpu.memory_space<vmem>>, vector<1x32x8xf32>
    %959 = vector.shape_cast %958 : vector<1x32x8xf32> to vector<32x8xf32>
    %cst_626 = arith.constant dense<0.000000e+00> : vector<16x8xf32>
    %960 = tpu.matmul %920, %959, %cst_626 {dimension_numbers = #tpu.dot_dimension_numbers<[1], [0], [0], [1], [0, 0, 1, 1], [], []>} : vector<16x32xf32>, vector<32x8xf32>, vector<16x8xf32> -> vector<16x8xf32>
    %c49_627 = arith.constant 49 : index
    %c0_628 = arith.constant 0 : index
    %c0_629 = arith.constant 0 : index
    %961 = vector.load %arg7[%c49_627, %c0_628, %c0_629] : memref<72x1x8xf32, #tpu.memory_space<vmem>>, vector<1x1x8xf32>
    %962 = vector.shape_cast %961 : vector<1x1x8xf32> to vector<1x8xf32>
    %963 = vector.broadcast %962 : vector<1x8xf32> to vector<16x8xf32>
    %964 = arith.addf %960, %963 : vector<16x8xf32>
    %c53 = arith.constant 53 : index
    %c0_630 = arith.constant 0 : index
    %c0_631 = arith.constant 0 : index
    %965 = vector.load %arg6[%c53, %c0_630, %c0_631] : memref<72x32x8xf32, #tpu.memory_space<vmem>>, vector<1x32x8xf32>
    %966 = vector.shape_cast %965 : vector<1x32x8xf32> to vector<32x8xf32>
    %cst_632 = arith.constant dense<0.000000e+00> : vector<16x8xf32>
    %967 = tpu.matmul %920, %966, %cst_632 {dimension_numbers = #tpu.dot_dimension_numbers<[1], [0], [0], [1], [0, 0, 1, 1], [], []>} : vector<16x32xf32>, vector<32x8xf32>, vector<16x8xf32> -> vector<16x8xf32>
    %c53_633 = arith.constant 53 : index
    %c0_634 = arith.constant 0 : index
    %c0_635 = arith.constant 0 : index
    %968 = vector.load %arg7[%c53_633, %c0_634, %c0_635] : memref<72x1x8xf32, #tpu.memory_space<vmem>>, vector<1x1x8xf32>
    %969 = vector.shape_cast %968 : vector<1x1x8xf32> to vector<1x8xf32>
    %970 = vector.broadcast %969 : vector<1x8xf32> to vector<16x8xf32>
    %971 = arith.addf %967, %970 : vector<16x8xf32>
    %c57 = arith.constant 57 : index
    %c0_636 = arith.constant 0 : index
    %c0_637 = arith.constant 0 : index
    %972 = vector.load %arg6[%c57, %c0_636, %c0_637] : memref<72x32x8xf32, #tpu.memory_space<vmem>>, vector<1x32x8xf32>
    %973 = vector.shape_cast %972 : vector<1x32x8xf32> to vector<32x8xf32>
    %cst_638 = arith.constant dense<0.000000e+00> : vector<16x8xf32>
    %974 = tpu.matmul %920, %973, %cst_638 {dimension_numbers = #tpu.dot_dimension_numbers<[1], [0], [0], [1], [0, 0, 1, 1], [], []>} : vector<16x32xf32>, vector<32x8xf32>, vector<16x8xf32> -> vector<16x8xf32>
    %c57_639 = arith.constant 57 : index
    %c0_640 = arith.constant 0 : index
    %c0_641 = arith.constant 0 : index
    %975 = vector.load %arg7[%c57_639, %c0_640, %c0_641] : memref<72x1x8xf32, #tpu.memory_space<vmem>>, vector<1x1x8xf32>
    %976 = vector.shape_cast %975 : vector<1x1x8xf32> to vector<1x8xf32>
    %977 = vector.broadcast %976 : vector<1x8xf32> to vector<16x8xf32>
    %978 = arith.addf %974, %977 : vector<16x8xf32>
    %cst_642 = arith.constant dense<0.000000e+00> : vector<16x16xf32>
    %979 = tpu.matmul %964, %971, %cst_642 {dimension_numbers = #tpu.dot_dimension_numbers<[1], [1], [0], [0], [0, 0, 1, 0], [], []>} : vector<16x8xf32>, vector<16x8xf32>, vector<16x16xf32> -> vector<16x16xf32>
    %980 = arith.addf %979, %0 : vector<16x16xf32>
    %cst_643 = arith.constant dense<0xFF800000> : vector<16xf32>
    %981 = vector.multi_reduction <maximumf>, %980, %cst_643 [1] : vector<16x16xf32> to vector<16xf32>
    %982 = vector.shape_cast %981 : vector<16xf32> to vector<16x1xf32>
    %983 = vector.broadcast %982 : vector<16x1xf32> to vector<16x16xf32>
    %984 = arith.subf %980, %983 : vector<16x16xf32>
    %985 = math.exp %984 : vector<16x16xf32>
    %cst_644 = arith.constant dense<0.000000e+00> : vector<16xf32>
    %986 = vector.multi_reduction <add>, %985, %cst_644 [1] : vector<16x16xf32> to vector<16xf32>
    %987 = vector.shape_cast %986 : vector<16xf32> to vector<16x1xf32>
    %988 = tpu.reciprocal %987 {approx = true} : vector<16x1xf32> -> vector<16x1xf32>
    %989 = vector.broadcast %988 : vector<16x1xf32> to vector<16x16xf32>
    %990 = arith.mulf %985, %989 : vector<16x16xf32>
    %cst_645 = arith.constant dense<0.000000e+00> : vector<16x8xf32>
    %991 = tpu.matmul %990, %978, %cst_645 {dimension_numbers = #tpu.dot_dimension_numbers<[1], [0], [0], [1], [0, 0, 1, 1], [], []>} : vector<16x16xf32>, vector<16x8xf32>, vector<16x8xf32> -> vector<16x8xf32>
    %c17_646 = arith.constant 17 : index
    %c0_647 = arith.constant 0 : index
    %c0_648 = arith.constant 0 : index
    %992 = vector.load %arg8[%c17_646, %c0_647, %c0_648] : memref<24x8x32xf32, #tpu.memory_space<vmem>>, vector<1x8x32xf32>
    %993 = vector.shape_cast %992 : vector<1x8x32xf32> to vector<8x32xf32>
    %cst_649 = arith.constant dense<0.000000e+00> : vector<16x32xf32>
    %994 = tpu.matmul %991, %993, %cst_649 {dimension_numbers = #tpu.dot_dimension_numbers<[1], [0], [0], [1], [0, 0, 1, 1], [], []>} : vector<16x8xf32>, vector<8x32xf32>, vector<16x32xf32> -> vector<16x32xf32>
    %995 = arith.addf %957, %994 : vector<16x32xf32>
    %c50 = arith.constant 50 : index
    %c0_650 = arith.constant 0 : index
    %c0_651 = arith.constant 0 : index
    %996 = vector.load %arg6[%c50, %c0_650, %c0_651] : memref<72x32x8xf32, #tpu.memory_space<vmem>>, vector<1x32x8xf32>
    %997 = vector.shape_cast %996 : vector<1x32x8xf32> to vector<32x8xf32>
    %cst_652 = arith.constant dense<0.000000e+00> : vector<16x8xf32>
    %998 = tpu.matmul %920, %997, %cst_652 {dimension_numbers = #tpu.dot_dimension_numbers<[1], [0], [0], [1], [0, 0, 1, 1], [], []>} : vector<16x32xf32>, vector<32x8xf32>, vector<16x8xf32> -> vector<16x8xf32>
    %c50_653 = arith.constant 50 : index
    %c0_654 = arith.constant 0 : index
    %c0_655 = arith.constant 0 : index
    %999 = vector.load %arg7[%c50_653, %c0_654, %c0_655] : memref<72x1x8xf32, #tpu.memory_space<vmem>>, vector<1x1x8xf32>
    %1000 = vector.shape_cast %999 : vector<1x1x8xf32> to vector<1x8xf32>
    %1001 = vector.broadcast %1000 : vector<1x8xf32> to vector<16x8xf32>
    %1002 = arith.addf %998, %1001 : vector<16x8xf32>
    %c54 = arith.constant 54 : index
    %c0_656 = arith.constant 0 : index
    %c0_657 = arith.constant 0 : index
    %1003 = vector.load %arg6[%c54, %c0_656, %c0_657] : memref<72x32x8xf32, #tpu.memory_space<vmem>>, vector<1x32x8xf32>
    %1004 = vector.shape_cast %1003 : vector<1x32x8xf32> to vector<32x8xf32>
    %cst_658 = arith.constant dense<0.000000e+00> : vector<16x8xf32>
    %1005 = tpu.matmul %920, %1004, %cst_658 {dimension_numbers = #tpu.dot_dimension_numbers<[1], [0], [0], [1], [0, 0, 1, 1], [], []>} : vector<16x32xf32>, vector<32x8xf32>, vector<16x8xf32> -> vector<16x8xf32>
    %c54_659 = arith.constant 54 : index
    %c0_660 = arith.constant 0 : index
    %c0_661 = arith.constant 0 : index
    %1006 = vector.load %arg7[%c54_659, %c0_660, %c0_661] : memref<72x1x8xf32, #tpu.memory_space<vmem>>, vector<1x1x8xf32>
    %1007 = vector.shape_cast %1006 : vector<1x1x8xf32> to vector<1x8xf32>
    %1008 = vector.broadcast %1007 : vector<1x8xf32> to vector<16x8xf32>
    %1009 = arith.addf %1005, %1008 : vector<16x8xf32>
    %c58 = arith.constant 58 : index
    %c0_662 = arith.constant 0 : index
    %c0_663 = arith.constant 0 : index
    %1010 = vector.load %arg6[%c58, %c0_662, %c0_663] : memref<72x32x8xf32, #tpu.memory_space<vmem>>, vector<1x32x8xf32>
    %1011 = vector.shape_cast %1010 : vector<1x32x8xf32> to vector<32x8xf32>
    %cst_664 = arith.constant dense<0.000000e+00> : vector<16x8xf32>
    %1012 = tpu.matmul %920, %1011, %cst_664 {dimension_numbers = #tpu.dot_dimension_numbers<[1], [0], [0], [1], [0, 0, 1, 1], [], []>} : vector<16x32xf32>, vector<32x8xf32>, vector<16x8xf32> -> vector<16x8xf32>
    %c58_665 = arith.constant 58 : index
    %c0_666 = arith.constant 0 : index
    %c0_667 = arith.constant 0 : index
    %1013 = vector.load %arg7[%c58_665, %c0_666, %c0_667] : memref<72x1x8xf32, #tpu.memory_space<vmem>>, vector<1x1x8xf32>
    %1014 = vector.shape_cast %1013 : vector<1x1x8xf32> to vector<1x8xf32>
    %1015 = vector.broadcast %1014 : vector<1x8xf32> to vector<16x8xf32>
    %1016 = arith.addf %1012, %1015 : vector<16x8xf32>
    %cst_668 = arith.constant dense<0.000000e+00> : vector<16x16xf32>
    %1017 = tpu.matmul %1002, %1009, %cst_668 {dimension_numbers = #tpu.dot_dimension_numbers<[1], [1], [0], [0], [0, 0, 1, 0], [], []>} : vector<16x8xf32>, vector<16x8xf32>, vector<16x16xf32> -> vector<16x16xf32>
    %1018 = arith.addf %1017, %0 : vector<16x16xf32>
    %cst_669 = arith.constant dense<0xFF800000> : vector<16xf32>
    %1019 = vector.multi_reduction <maximumf>, %1018, %cst_669 [1] : vector<16x16xf32> to vector<16xf32>
    %1020 = vector.shape_cast %1019 : vector<16xf32> to vector<16x1xf32>
    %1021 = vector.broadcast %1020 : vector<16x1xf32> to vector<16x16xf32>
    %1022 = arith.subf %1018, %1021 : vector<16x16xf32>
    %1023 = math.exp %1022 : vector<16x16xf32>
    %cst_670 = arith.constant dense<0.000000e+00> : vector<16xf32>
    %1024 = vector.multi_reduction <add>, %1023, %cst_670 [1] : vector<16x16xf32> to vector<16xf32>
    %1025 = vector.shape_cast %1024 : vector<16xf32> to vector<16x1xf32>
    %1026 = tpu.reciprocal %1025 {approx = true} : vector<16x1xf32> -> vector<16x1xf32>
    %1027 = vector.broadcast %1026 : vector<16x1xf32> to vector<16x16xf32>
    %1028 = arith.mulf %1023, %1027 : vector<16x16xf32>
    %cst_671 = arith.constant dense<0.000000e+00> : vector<16x8xf32>
    %1029 = tpu.matmul %1028, %1016, %cst_671 {dimension_numbers = #tpu.dot_dimension_numbers<[1], [0], [0], [1], [0, 0, 1, 1], [], []>} : vector<16x16xf32>, vector<16x8xf32>, vector<16x8xf32> -> vector<16x8xf32>
    %c18_672 = arith.constant 18 : index
    %c0_673 = arith.constant 0 : index
    %c0_674 = arith.constant 0 : index
    %1030 = vector.load %arg8[%c18_672, %c0_673, %c0_674] : memref<24x8x32xf32, #tpu.memory_space<vmem>>, vector<1x8x32xf32>
    %1031 = vector.shape_cast %1030 : vector<1x8x32xf32> to vector<8x32xf32>
    %cst_675 = arith.constant dense<0.000000e+00> : vector<16x32xf32>
    %1032 = tpu.matmul %1029, %1031, %cst_675 {dimension_numbers = #tpu.dot_dimension_numbers<[1], [0], [0], [1], [0, 0, 1, 1], [], []>} : vector<16x8xf32>, vector<8x32xf32>, vector<16x32xf32> -> vector<16x32xf32>
    %1033 = arith.addf %995, %1032 : vector<16x32xf32>
    %c51 = arith.constant 51 : index
    %c0_676 = arith.constant 0 : index
    %c0_677 = arith.constant 0 : index
    %1034 = vector.load %arg6[%c51, %c0_676, %c0_677] : memref<72x32x8xf32, #tpu.memory_space<vmem>>, vector<1x32x8xf32>
    %1035 = vector.shape_cast %1034 : vector<1x32x8xf32> to vector<32x8xf32>
    %cst_678 = arith.constant dense<0.000000e+00> : vector<16x8xf32>
    %1036 = tpu.matmul %920, %1035, %cst_678 {dimension_numbers = #tpu.dot_dimension_numbers<[1], [0], [0], [1], [0, 0, 1, 1], [], []>} : vector<16x32xf32>, vector<32x8xf32>, vector<16x8xf32> -> vector<16x8xf32>
    %c51_679 = arith.constant 51 : index
    %c0_680 = arith.constant 0 : index
    %c0_681 = arith.constant 0 : index
    %1037 = vector.load %arg7[%c51_679, %c0_680, %c0_681] : memref<72x1x8xf32, #tpu.memory_space<vmem>>, vector<1x1x8xf32>
    %1038 = vector.shape_cast %1037 : vector<1x1x8xf32> to vector<1x8xf32>
    %1039 = vector.broadcast %1038 : vector<1x8xf32> to vector<16x8xf32>
    %1040 = arith.addf %1036, %1039 : vector<16x8xf32>
    %c55 = arith.constant 55 : index
    %c0_682 = arith.constant 0 : index
    %c0_683 = arith.constant 0 : index
    %1041 = vector.load %arg6[%c55, %c0_682, %c0_683] : memref<72x32x8xf32, #tpu.memory_space<vmem>>, vector<1x32x8xf32>
    %1042 = vector.shape_cast %1041 : vector<1x32x8xf32> to vector<32x8xf32>
    %cst_684 = arith.constant dense<0.000000e+00> : vector<16x8xf32>
    %1043 = tpu.matmul %920, %1042, %cst_684 {dimension_numbers = #tpu.dot_dimension_numbers<[1], [0], [0], [1], [0, 0, 1, 1], [], []>} : vector<16x32xf32>, vector<32x8xf32>, vector<16x8xf32> -> vector<16x8xf32>
    %c55_685 = arith.constant 55 : index
    %c0_686 = arith.constant 0 : index
    %c0_687 = arith.constant 0 : index
    %1044 = vector.load %arg7[%c55_685, %c0_686, %c0_687] : memref<72x1x8xf32, #tpu.memory_space<vmem>>, vector<1x1x8xf32>
    %1045 = vector.shape_cast %1044 : vector<1x1x8xf32> to vector<1x8xf32>
    %1046 = vector.broadcast %1045 : vector<1x8xf32> to vector<16x8xf32>
    %1047 = arith.addf %1043, %1046 : vector<16x8xf32>
    %c59 = arith.constant 59 : index
    %c0_688 = arith.constant 0 : index
    %c0_689 = arith.constant 0 : index
    %1048 = vector.load %arg6[%c59, %c0_688, %c0_689] : memref<72x32x8xf32, #tpu.memory_space<vmem>>, vector<1x32x8xf32>
    %1049 = vector.shape_cast %1048 : vector<1x32x8xf32> to vector<32x8xf32>
    %cst_690 = arith.constant dense<0.000000e+00> : vector<16x8xf32>
    %1050 = tpu.matmul %920, %1049, %cst_690 {dimension_numbers = #tpu.dot_dimension_numbers<[1], [0], [0], [1], [0, 0, 1, 1], [], []>} : vector<16x32xf32>, vector<32x8xf32>, vector<16x8xf32> -> vector<16x8xf32>
    %c59_691 = arith.constant 59 : index
    %c0_692 = arith.constant 0 : index
    %c0_693 = arith.constant 0 : index
    %1051 = vector.load %arg7[%c59_691, %c0_692, %c0_693] : memref<72x1x8xf32, #tpu.memory_space<vmem>>, vector<1x1x8xf32>
    %1052 = vector.shape_cast %1051 : vector<1x1x8xf32> to vector<1x8xf32>
    %1053 = vector.broadcast %1052 : vector<1x8xf32> to vector<16x8xf32>
    %1054 = arith.addf %1050, %1053 : vector<16x8xf32>
    %cst_694 = arith.constant dense<0.000000e+00> : vector<16x16xf32>
    %1055 = tpu.matmul %1040, %1047, %cst_694 {dimension_numbers = #tpu.dot_dimension_numbers<[1], [1], [0], [0], [0, 0, 1, 0], [], []>} : vector<16x8xf32>, vector<16x8xf32>, vector<16x16xf32> -> vector<16x16xf32>
    %1056 = arith.addf %1055, %0 : vector<16x16xf32>
    %cst_695 = arith.constant dense<0xFF800000> : vector<16xf32>
    %1057 = vector.multi_reduction <maximumf>, %1056, %cst_695 [1] : vector<16x16xf32> to vector<16xf32>
    %1058 = vector.shape_cast %1057 : vector<16xf32> to vector<16x1xf32>
    %1059 = vector.broadcast %1058 : vector<16x1xf32> to vector<16x16xf32>
    %1060 = arith.subf %1056, %1059 : vector<16x16xf32>
    %1061 = math.exp %1060 : vector<16x16xf32>
    %cst_696 = arith.constant dense<0.000000e+00> : vector<16xf32>
    %1062 = vector.multi_reduction <add>, %1061, %cst_696 [1] : vector<16x16xf32> to vector<16xf32>
    %1063 = vector.shape_cast %1062 : vector<16xf32> to vector<16x1xf32>
    %1064 = tpu.reciprocal %1063 {approx = true} : vector<16x1xf32> -> vector<16x1xf32>
    %1065 = vector.broadcast %1064 : vector<16x1xf32> to vector<16x16xf32>
    %1066 = arith.mulf %1061, %1065 : vector<16x16xf32>
    %cst_697 = arith.constant dense<0.000000e+00> : vector<16x8xf32>
    %1067 = tpu.matmul %1066, %1054, %cst_697 {dimension_numbers = #tpu.dot_dimension_numbers<[1], [0], [0], [1], [0, 0, 1, 1], [], []>} : vector<16x16xf32>, vector<16x8xf32>, vector<16x8xf32> -> vector<16x8xf32>
    %c19_698 = arith.constant 19 : index
    %c0_699 = arith.constant 0 : index
    %c0_700 = arith.constant 0 : index
    %1068 = vector.load %arg8[%c19_698, %c0_699, %c0_700] : memref<24x8x32xf32, #tpu.memory_space<vmem>>, vector<1x8x32xf32>
    %1069 = vector.shape_cast %1068 : vector<1x8x32xf32> to vector<8x32xf32>
    %cst_701 = arith.constant dense<0.000000e+00> : vector<16x32xf32>
    %1070 = tpu.matmul %1067, %1069, %cst_701 {dimension_numbers = #tpu.dot_dimension_numbers<[1], [0], [0], [1], [0, 0, 1, 1], [], []>} : vector<16x8xf32>, vector<8x32xf32>, vector<16x32xf32> -> vector<16x32xf32>
    %1071 = arith.addf %1033, %1070 : vector<16x32xf32>
    %c28_702 = arith.constant 28 : index
    %c0_703 = arith.constant 0 : index
    %c0_704 = arith.constant 0 : index
    %1072 = vector.load %arg12[%c28_702, %c0_703, %c0_704] : memref<36x1x32xf32, #tpu.memory_space<vmem>>, vector<1x1x32xf32>
    %1073 = vector.shape_cast %1072 : vector<1x1x32xf32> to vector<1x32xf32>
    %1074 = vector.broadcast %1073 : vector<1x32xf32> to vector<16x32xf32>
    %1075 = arith.addf %1071, %1074 : vector<16x32xf32>
    %1076 = arith.addf %920, %1075 : vector<16x32xf32>
    %c24_705 = arith.constant 24 : index
    %c0_706 = arith.constant 0 : index
    %c0_707 = arith.constant 0 : index
    %1077 = vector.load %arg12[%c24_705, %c0_706, %c0_707] : memref<36x1x32xf32, #tpu.memory_space<vmem>>, vector<1x1x32xf32>
    %1078 = vector.shape_cast %1077 : vector<1x1x32xf32> to vector<1x32xf32>
    %c25_708 = arith.constant 25 : index
    %c0_709 = arith.constant 0 : index
    %c0_710 = arith.constant 0 : index
    %1079 = vector.load %arg12[%c25_708, %c0_709, %c0_710] : memref<36x1x32xf32, #tpu.memory_space<vmem>>, vector<1x1x32xf32>
    %1080 = vector.shape_cast %1079 : vector<1x1x32xf32> to vector<1x32xf32>
    %cst_711 = arith.constant dense<0.000000e+00> : vector<16xf32>
    %1081 = vector.multi_reduction <add>, %1076, %cst_711 [1] : vector<16x32xf32> to vector<16xf32>
    %1082 = vector.shape_cast %1081 : vector<16xf32> to vector<16x1xf32>
    %cst_712 = arith.constant 3.200000e+01 : f32
    %1083 = vector.broadcast %cst_712 : f32 to vector<16x1xf32>
    %1084 = arith.divf %1082, %1083 : vector<16x1xf32>
    %1085 = vector.broadcast %1084 : vector<16x1xf32> to vector<16x32xf32>
    %1086 = arith.subf %1076, %1085 : vector<16x32xf32>
    %1087 = arith.mulf %1086, %1086 : vector<16x32xf32>
    %cst_713 = arith.constant dense<0.000000e+00> : vector<16xf32>
    %1088 = vector.multi_reduction <add>, %1087, %cst_713 [1] : vector<16x32xf32> to vector<16xf32>
    %1089 = vector.shape_cast %1088 : vector<16xf32> to vector<16x1xf32>
    %cst_714 = arith.constant 3.200000e+01 : f32
    %1090 = vector.broadcast %cst_714 : f32 to vector<16x1xf32>
    %1091 = arith.divf %1089, %1090 : vector<16x1xf32>
    %1092 = vector.broadcast %1084 : vector<16x1xf32> to vector<16x32xf32>
    %1093 = arith.subf %1076, %1092 : vector<16x32xf32>
    %cst_715 = arith.constant 9.99999974E-6 : f32
    %1094 = vector.broadcast %cst_715 : f32 to vector<16x1xf32>
    %1095 = arith.addf %1091, %1094 : vector<16x1xf32>
    %1096 = math.rsqrt %1095 : vector<16x1xf32>
    %1097 = vector.broadcast %1096 : vector<16x1xf32> to vector<16x32xf32>
    %1098 = arith.mulf %1093, %1097 : vector<16x32xf32>
    %1099 = vector.broadcast %1078 : vector<1x32xf32> to vector<16x32xf32>
    %1100 = arith.mulf %1098, %1099 : vector<16x32xf32>
    %1101 = vector.broadcast %1080 : vector<1x32xf32> to vector<16x32xf32>
    %1102 = arith.addf %1100, %1101 : vector<16x32xf32>
    %c4_716 = arith.constant 4 : index
    %c0_717 = arith.constant 0 : index
    %c0_718 = arith.constant 0 : index
    %1103 = vector.load %arg9[%c4_716, %c0_717, %c0_718] : memref<6x32x64xf32, #tpu.memory_space<vmem>>, vector<1x32x64xf32>
    %1104 = vector.shape_cast %1103 : vector<1x32x64xf32> to vector<32x64xf32>
    %cst_719 = arith.constant dense<0.000000e+00> : vector<16x64xf32>
    %1105 = tpu.matmul %1102, %1104, %cst_719 {dimension_numbers = #tpu.dot_dimension_numbers<[1], [0], [0], [1], [0, 0, 1, 1], [], []>} : vector<16x32xf32>, vector<32x64xf32>, vector<16x64xf32> -> vector<16x64xf32>
    %c4_720 = arith.constant 4 : index
    %c0_721 = arith.constant 0 : index
    %c0_722 = arith.constant 0 : index
    %1106 = vector.load %arg11[%c4_720, %c0_721, %c0_722] : memref<6x1x64xf32, #tpu.memory_space<vmem>>, vector<1x1x64xf32>
    %1107 = vector.shape_cast %1106 : vector<1x1x64xf32> to vector<1x64xf32>
    %1108 = vector.broadcast %1107 : vector<1x64xf32> to vector<16x64xf32>
    %1109 = arith.addf %1105, %1108 : vector<16x64xf32>
    %cst_723 = arith.constant 0.000000e+00 : f32
    %1110 = vector.broadcast %cst_723 : f32 to vector<16x64xf32>
    %1111 = arith.maximumf %1109, %1110 : vector<16x64xf32>
    %c4_724 = arith.constant 4 : index
    %c0_725 = arith.constant 0 : index
    %c0_726 = arith.constant 0 : index
    %1112 = vector.load %arg10[%c4_724, %c0_725, %c0_726] : memref<6x64x32xf32, #tpu.memory_space<vmem>>, vector<1x64x32xf32>
    %1113 = vector.shape_cast %1112 : vector<1x64x32xf32> to vector<64x32xf32>
    %cst_727 = arith.constant dense<0.000000e+00> : vector<16x32xf32>
    %1114 = tpu.matmul %1111, %1113, %cst_727 {dimension_numbers = #tpu.dot_dimension_numbers<[1], [0], [0], [1], [0, 0, 1, 1], [], []>} : vector<16x64xf32>, vector<64x32xf32>, vector<16x32xf32> -> vector<16x32xf32>
    %c29_728 = arith.constant 29 : index
    %c0_729 = arith.constant 0 : index
    %c0_730 = arith.constant 0 : index
    %1115 = vector.load %arg12[%c29_728, %c0_729, %c0_730] : memref<36x1x32xf32, #tpu.memory_space<vmem>>, vector<1x1x32xf32>
    %1116 = vector.shape_cast %1115 : vector<1x1x32xf32> to vector<1x32xf32>
    %1117 = vector.broadcast %1116 : vector<1x32xf32> to vector<16x32xf32>
    %1118 = arith.addf %1114, %1117 : vector<16x32xf32>
    %1119 = arith.addf %1102, %1118 : vector<16x32xf32>
    %c26_731 = arith.constant 26 : index
    %c0_732 = arith.constant 0 : index
    %c0_733 = arith.constant 0 : index
    %1120 = vector.load %arg12[%c26_731, %c0_732, %c0_733] : memref<36x1x32xf32, #tpu.memory_space<vmem>>, vector<1x1x32xf32>
    %1121 = vector.shape_cast %1120 : vector<1x1x32xf32> to vector<1x32xf32>
    %c27_734 = arith.constant 27 : index
    %c0_735 = arith.constant 0 : index
    %c0_736 = arith.constant 0 : index
    %1122 = vector.load %arg12[%c27_734, %c0_735, %c0_736] : memref<36x1x32xf32, #tpu.memory_space<vmem>>, vector<1x1x32xf32>
    %1123 = vector.shape_cast %1122 : vector<1x1x32xf32> to vector<1x32xf32>
    %cst_737 = arith.constant dense<0.000000e+00> : vector<16xf32>
    %1124 = vector.multi_reduction <add>, %1119, %cst_737 [1] : vector<16x32xf32> to vector<16xf32>
    %1125 = vector.shape_cast %1124 : vector<16xf32> to vector<16x1xf32>
    %cst_738 = arith.constant 3.200000e+01 : f32
    %1126 = vector.broadcast %cst_738 : f32 to vector<16x1xf32>
    %1127 = arith.divf %1125, %1126 : vector<16x1xf32>
    %1128 = vector.broadcast %1127 : vector<16x1xf32> to vector<16x32xf32>
    %1129 = arith.subf %1119, %1128 : vector<16x32xf32>
    %1130 = arith.mulf %1129, %1129 : vector<16x32xf32>
    %cst_739 = arith.constant dense<0.000000e+00> : vector<16xf32>
    %1131 = vector.multi_reduction <add>, %1130, %cst_739 [1] : vector<16x32xf32> to vector<16xf32>
    %1132 = vector.shape_cast %1131 : vector<16xf32> to vector<16x1xf32>
    %cst_740 = arith.constant 3.200000e+01 : f32
    %1133 = vector.broadcast %cst_740 : f32 to vector<16x1xf32>
    %1134 = arith.divf %1132, %1133 : vector<16x1xf32>
    %1135 = vector.broadcast %1127 : vector<16x1xf32> to vector<16x32xf32>
    %1136 = arith.subf %1119, %1135 : vector<16x32xf32>
    %cst_741 = arith.constant 9.99999974E-6 : f32
    %1137 = vector.broadcast %cst_741 : f32 to vector<16x1xf32>
    %1138 = arith.addf %1134, %1137 : vector<16x1xf32>
    %1139 = math.rsqrt %1138 : vector<16x1xf32>
    %1140 = vector.broadcast %1139 : vector<16x1xf32> to vector<16x32xf32>
    %1141 = arith.mulf %1136, %1140 : vector<16x32xf32>
    %1142 = vector.broadcast %1121 : vector<1x32xf32> to vector<16x32xf32>
    %1143 = arith.mulf %1141, %1142 : vector<16x32xf32>
    %1144 = vector.broadcast %1123 : vector<1x32xf32> to vector<16x32xf32>
    %1145 = arith.addf %1143, %1144 : vector<16x32xf32>
    %c60 = arith.constant 60 : index
    %c0_742 = arith.constant 0 : index
    %c0_743 = arith.constant 0 : index
    %1146 = vector.load %arg6[%c60, %c0_742, %c0_743] : memref<72x32x8xf32, #tpu.memory_space<vmem>>, vector<1x32x8xf32>
    %1147 = vector.shape_cast %1146 : vector<1x32x8xf32> to vector<32x8xf32>
    %cst_744 = arith.constant dense<0.000000e+00> : vector<16x8xf32>
    %1148 = tpu.matmul %1145, %1147, %cst_744 {dimension_numbers = #tpu.dot_dimension_numbers<[1], [0], [0], [1], [0, 0, 1, 1], [], []>} : vector<16x32xf32>, vector<32x8xf32>, vector<16x8xf32> -> vector<16x8xf32>
    %c60_745 = arith.constant 60 : index
    %c0_746 = arith.constant 0 : index
    %c0_747 = arith.constant 0 : index
    %1149 = vector.load %arg7[%c60_745, %c0_746, %c0_747] : memref<72x1x8xf32, #tpu.memory_space<vmem>>, vector<1x1x8xf32>
    %1150 = vector.shape_cast %1149 : vector<1x1x8xf32> to vector<1x8xf32>
    %1151 = vector.broadcast %1150 : vector<1x8xf32> to vector<16x8xf32>
    %1152 = arith.addf %1148, %1151 : vector<16x8xf32>
    %c64 = arith.constant 64 : index
    %c0_748 = arith.constant 0 : index
    %c0_749 = arith.constant 0 : index
    %1153 = vector.load %arg6[%c64, %c0_748, %c0_749] : memref<72x32x8xf32, #tpu.memory_space<vmem>>, vector<1x32x8xf32>
    %1154 = vector.shape_cast %1153 : vector<1x32x8xf32> to vector<32x8xf32>
    %cst_750 = arith.constant dense<0.000000e+00> : vector<16x8xf32>
    %1155 = tpu.matmul %1145, %1154, %cst_750 {dimension_numbers = #tpu.dot_dimension_numbers<[1], [0], [0], [1], [0, 0, 1, 1], [], []>} : vector<16x32xf32>, vector<32x8xf32>, vector<16x8xf32> -> vector<16x8xf32>
    %c64_751 = arith.constant 64 : index
    %c0_752 = arith.constant 0 : index
    %c0_753 = arith.constant 0 : index
    %1156 = vector.load %arg7[%c64_751, %c0_752, %c0_753] : memref<72x1x8xf32, #tpu.memory_space<vmem>>, vector<1x1x8xf32>
    %1157 = vector.shape_cast %1156 : vector<1x1x8xf32> to vector<1x8xf32>
    %1158 = vector.broadcast %1157 : vector<1x8xf32> to vector<16x8xf32>
    %1159 = arith.addf %1155, %1158 : vector<16x8xf32>
    %c68 = arith.constant 68 : index
    %c0_754 = arith.constant 0 : index
    %c0_755 = arith.constant 0 : index
    %1160 = vector.load %arg6[%c68, %c0_754, %c0_755] : memref<72x32x8xf32, #tpu.memory_space<vmem>>, vector<1x32x8xf32>
    %1161 = vector.shape_cast %1160 : vector<1x32x8xf32> to vector<32x8xf32>
    %cst_756 = arith.constant dense<0.000000e+00> : vector<16x8xf32>
    %1162 = tpu.matmul %1145, %1161, %cst_756 {dimension_numbers = #tpu.dot_dimension_numbers<[1], [0], [0], [1], [0, 0, 1, 1], [], []>} : vector<16x32xf32>, vector<32x8xf32>, vector<16x8xf32> -> vector<16x8xf32>
    %c68_757 = arith.constant 68 : index
    %c0_758 = arith.constant 0 : index
    %c0_759 = arith.constant 0 : index
    %1163 = vector.load %arg7[%c68_757, %c0_758, %c0_759] : memref<72x1x8xf32, #tpu.memory_space<vmem>>, vector<1x1x8xf32>
    %1164 = vector.shape_cast %1163 : vector<1x1x8xf32> to vector<1x8xf32>
    %1165 = vector.broadcast %1164 : vector<1x8xf32> to vector<16x8xf32>
    %1166 = arith.addf %1162, %1165 : vector<16x8xf32>
    %cst_760 = arith.constant dense<0.000000e+00> : vector<16x16xf32>
    %1167 = tpu.matmul %1152, %1159, %cst_760 {dimension_numbers = #tpu.dot_dimension_numbers<[1], [1], [0], [0], [0, 0, 1, 0], [], []>} : vector<16x8xf32>, vector<16x8xf32>, vector<16x16xf32> -> vector<16x16xf32>
    %1168 = arith.addf %1167, %0 : vector<16x16xf32>
    %cst_761 = arith.constant dense<0xFF800000> : vector<16xf32>
    %1169 = vector.multi_reduction <maximumf>, %1168, %cst_761 [1] : vector<16x16xf32> to vector<16xf32>
    %1170 = vector.shape_cast %1169 : vector<16xf32> to vector<16x1xf32>
    %1171 = vector.broadcast %1170 : vector<16x1xf32> to vector<16x16xf32>
    %1172 = arith.subf %1168, %1171 : vector<16x16xf32>
    %1173 = math.exp %1172 : vector<16x16xf32>
    %cst_762 = arith.constant dense<0.000000e+00> : vector<16xf32>
    %1174 = vector.multi_reduction <add>, %1173, %cst_762 [1] : vector<16x16xf32> to vector<16xf32>
    %1175 = vector.shape_cast %1174 : vector<16xf32> to vector<16x1xf32>
    %1176 = tpu.reciprocal %1175 {approx = true} : vector<16x1xf32> -> vector<16x1xf32>
    %1177 = vector.broadcast %1176 : vector<16x1xf32> to vector<16x16xf32>
    %1178 = arith.mulf %1173, %1177 : vector<16x16xf32>
    %cst_763 = arith.constant dense<0.000000e+00> : vector<16x8xf32>
    %1179 = tpu.matmul %1178, %1166, %cst_763 {dimension_numbers = #tpu.dot_dimension_numbers<[1], [0], [0], [1], [0, 0, 1, 1], [], []>} : vector<16x16xf32>, vector<16x8xf32>, vector<16x8xf32> -> vector<16x8xf32>
    %c20_764 = arith.constant 20 : index
    %c0_765 = arith.constant 0 : index
    %c0_766 = arith.constant 0 : index
    %1180 = vector.load %arg8[%c20_764, %c0_765, %c0_766] : memref<24x8x32xf32, #tpu.memory_space<vmem>>, vector<1x8x32xf32>
    %1181 = vector.shape_cast %1180 : vector<1x8x32xf32> to vector<8x32xf32>
    %cst_767 = arith.constant dense<0.000000e+00> : vector<16x32xf32>
    %1182 = tpu.matmul %1179, %1181, %cst_767 {dimension_numbers = #tpu.dot_dimension_numbers<[1], [0], [0], [1], [0, 0, 1, 1], [], []>} : vector<16x8xf32>, vector<8x32xf32>, vector<16x32xf32> -> vector<16x32xf32>
    %c61 = arith.constant 61 : index
    %c0_768 = arith.constant 0 : index
    %c0_769 = arith.constant 0 : index
    %1183 = vector.load %arg6[%c61, %c0_768, %c0_769] : memref<72x32x8xf32, #tpu.memory_space<vmem>>, vector<1x32x8xf32>
    %1184 = vector.shape_cast %1183 : vector<1x32x8xf32> to vector<32x8xf32>
    %cst_770 = arith.constant dense<0.000000e+00> : vector<16x8xf32>
    %1185 = tpu.matmul %1145, %1184, %cst_770 {dimension_numbers = #tpu.dot_dimension_numbers<[1], [0], [0], [1], [0, 0, 1, 1], [], []>} : vector<16x32xf32>, vector<32x8xf32>, vector<16x8xf32> -> vector<16x8xf32>
    %c61_771 = arith.constant 61 : index
    %c0_772 = arith.constant 0 : index
    %c0_773 = arith.constant 0 : index
    %1186 = vector.load %arg7[%c61_771, %c0_772, %c0_773] : memref<72x1x8xf32, #tpu.memory_space<vmem>>, vector<1x1x8xf32>
    %1187 = vector.shape_cast %1186 : vector<1x1x8xf32> to vector<1x8xf32>
    %1188 = vector.broadcast %1187 : vector<1x8xf32> to vector<16x8xf32>
    %1189 = arith.addf %1185, %1188 : vector<16x8xf32>
    %c65 = arith.constant 65 : index
    %c0_774 = arith.constant 0 : index
    %c0_775 = arith.constant 0 : index
    %1190 = vector.load %arg6[%c65, %c0_774, %c0_775] : memref<72x32x8xf32, #tpu.memory_space<vmem>>, vector<1x32x8xf32>
    %1191 = vector.shape_cast %1190 : vector<1x32x8xf32> to vector<32x8xf32>
    %cst_776 = arith.constant dense<0.000000e+00> : vector<16x8xf32>
    %1192 = tpu.matmul %1145, %1191, %cst_776 {dimension_numbers = #tpu.dot_dimension_numbers<[1], [0], [0], [1], [0, 0, 1, 1], [], []>} : vector<16x32xf32>, vector<32x8xf32>, vector<16x8xf32> -> vector<16x8xf32>
    %c65_777 = arith.constant 65 : index
    %c0_778 = arith.constant 0 : index
    %c0_779 = arith.constant 0 : index
    %1193 = vector.load %arg7[%c65_777, %c0_778, %c0_779] : memref<72x1x8xf32, #tpu.memory_space<vmem>>, vector<1x1x8xf32>
    %1194 = vector.shape_cast %1193 : vector<1x1x8xf32> to vector<1x8xf32>
    %1195 = vector.broadcast %1194 : vector<1x8xf32> to vector<16x8xf32>
    %1196 = arith.addf %1192, %1195 : vector<16x8xf32>
    %c69 = arith.constant 69 : index
    %c0_780 = arith.constant 0 : index
    %c0_781 = arith.constant 0 : index
    %1197 = vector.load %arg6[%c69, %c0_780, %c0_781] : memref<72x32x8xf32, #tpu.memory_space<vmem>>, vector<1x32x8xf32>
    %1198 = vector.shape_cast %1197 : vector<1x32x8xf32> to vector<32x8xf32>
    %cst_782 = arith.constant dense<0.000000e+00> : vector<16x8xf32>
    %1199 = tpu.matmul %1145, %1198, %cst_782 {dimension_numbers = #tpu.dot_dimension_numbers<[1], [0], [0], [1], [0, 0, 1, 1], [], []>} : vector<16x32xf32>, vector<32x8xf32>, vector<16x8xf32> -> vector<16x8xf32>
    %c69_783 = arith.constant 69 : index
    %c0_784 = arith.constant 0 : index
    %c0_785 = arith.constant 0 : index
    %1200 = vector.load %arg7[%c69_783, %c0_784, %c0_785] : memref<72x1x8xf32, #tpu.memory_space<vmem>>, vector<1x1x8xf32>
    %1201 = vector.shape_cast %1200 : vector<1x1x8xf32> to vector<1x8xf32>
    %1202 = vector.broadcast %1201 : vector<1x8xf32> to vector<16x8xf32>
    %1203 = arith.addf %1199, %1202 : vector<16x8xf32>
    %cst_786 = arith.constant dense<0.000000e+00> : vector<16x16xf32>
    %1204 = tpu.matmul %1189, %1196, %cst_786 {dimension_numbers = #tpu.dot_dimension_numbers<[1], [1], [0], [0], [0, 0, 1, 0], [], []>} : vector<16x8xf32>, vector<16x8xf32>, vector<16x16xf32> -> vector<16x16xf32>
    %1205 = arith.addf %1204, %0 : vector<16x16xf32>
    %cst_787 = arith.constant dense<0xFF800000> : vector<16xf32>
    %1206 = vector.multi_reduction <maximumf>, %1205, %cst_787 [1] : vector<16x16xf32> to vector<16xf32>
    %1207 = vector.shape_cast %1206 : vector<16xf32> to vector<16x1xf32>
    %1208 = vector.broadcast %1207 : vector<16x1xf32> to vector<16x16xf32>
    %1209 = arith.subf %1205, %1208 : vector<16x16xf32>
    %1210 = math.exp %1209 : vector<16x16xf32>
    %cst_788 = arith.constant dense<0.000000e+00> : vector<16xf32>
    %1211 = vector.multi_reduction <add>, %1210, %cst_788 [1] : vector<16x16xf32> to vector<16xf32>
    %1212 = vector.shape_cast %1211 : vector<16xf32> to vector<16x1xf32>
    %1213 = tpu.reciprocal %1212 {approx = true} : vector<16x1xf32> -> vector<16x1xf32>
    %1214 = vector.broadcast %1213 : vector<16x1xf32> to vector<16x16xf32>
    %1215 = arith.mulf %1210, %1214 : vector<16x16xf32>
    %cst_789 = arith.constant dense<0.000000e+00> : vector<16x8xf32>
    %1216 = tpu.matmul %1215, %1203, %cst_789 {dimension_numbers = #tpu.dot_dimension_numbers<[1], [0], [0], [1], [0, 0, 1, 1], [], []>} : vector<16x16xf32>, vector<16x8xf32>, vector<16x8xf32> -> vector<16x8xf32>
    %c21_790 = arith.constant 21 : index
    %c0_791 = arith.constant 0 : index
    %c0_792 = arith.constant 0 : index
    %1217 = vector.load %arg8[%c21_790, %c0_791, %c0_792] : memref<24x8x32xf32, #tpu.memory_space<vmem>>, vector<1x8x32xf32>
    %1218 = vector.shape_cast %1217 : vector<1x8x32xf32> to vector<8x32xf32>
    %cst_793 = arith.constant dense<0.000000e+00> : vector<16x32xf32>
    %1219 = tpu.matmul %1216, %1218, %cst_793 {dimension_numbers = #tpu.dot_dimension_numbers<[1], [0], [0], [1], [0, 0, 1, 1], [], []>} : vector<16x8xf32>, vector<8x32xf32>, vector<16x32xf32> -> vector<16x32xf32>
    %1220 = arith.addf %1182, %1219 : vector<16x32xf32>
    %c62 = arith.constant 62 : index
    %c0_794 = arith.constant 0 : index
    %c0_795 = arith.constant 0 : index
    %1221 = vector.load %arg6[%c62, %c0_794, %c0_795] : memref<72x32x8xf32, #tpu.memory_space<vmem>>, vector<1x32x8xf32>
    %1222 = vector.shape_cast %1221 : vector<1x32x8xf32> to vector<32x8xf32>
    %cst_796 = arith.constant dense<0.000000e+00> : vector<16x8xf32>
    %1223 = tpu.matmul %1145, %1222, %cst_796 {dimension_numbers = #tpu.dot_dimension_numbers<[1], [0], [0], [1], [0, 0, 1, 1], [], []>} : vector<16x32xf32>, vector<32x8xf32>, vector<16x8xf32> -> vector<16x8xf32>
    %c62_797 = arith.constant 62 : index
    %c0_798 = arith.constant 0 : index
    %c0_799 = arith.constant 0 : index
    %1224 = vector.load %arg7[%c62_797, %c0_798, %c0_799] : memref<72x1x8xf32, #tpu.memory_space<vmem>>, vector<1x1x8xf32>
    %1225 = vector.shape_cast %1224 : vector<1x1x8xf32> to vector<1x8xf32>
    %1226 = vector.broadcast %1225 : vector<1x8xf32> to vector<16x8xf32>
    %1227 = arith.addf %1223, %1226 : vector<16x8xf32>
    %c66 = arith.constant 66 : index
    %c0_800 = arith.constant 0 : index
    %c0_801 = arith.constant 0 : index
    %1228 = vector.load %arg6[%c66, %c0_800, %c0_801] : memref<72x32x8xf32, #tpu.memory_space<vmem>>, vector<1x32x8xf32>
    %1229 = vector.shape_cast %1228 : vector<1x32x8xf32> to vector<32x8xf32>
    %cst_802 = arith.constant dense<0.000000e+00> : vector<16x8xf32>
    %1230 = tpu.matmul %1145, %1229, %cst_802 {dimension_numbers = #tpu.dot_dimension_numbers<[1], [0], [0], [1], [0, 0, 1, 1], [], []>} : vector<16x32xf32>, vector<32x8xf32>, vector<16x8xf32> -> vector<16x8xf32>
    %c66_803 = arith.constant 66 : index
    %c0_804 = arith.constant 0 : index
    %c0_805 = arith.constant 0 : index
    %1231 = vector.load %arg7[%c66_803, %c0_804, %c0_805] : memref<72x1x8xf32, #tpu.memory_space<vmem>>, vector<1x1x8xf32>
    %1232 = vector.shape_cast %1231 : vector<1x1x8xf32> to vector<1x8xf32>
    %1233 = vector.broadcast %1232 : vector<1x8xf32> to vector<16x8xf32>
    %1234 = arith.addf %1230, %1233 : vector<16x8xf32>
    %c70 = arith.constant 70 : index
    %c0_806 = arith.constant 0 : index
    %c0_807 = arith.constant 0 : index
    %1235 = vector.load %arg6[%c70, %c0_806, %c0_807] : memref<72x32x8xf32, #tpu.memory_space<vmem>>, vector<1x32x8xf32>
    %1236 = vector.shape_cast %1235 : vector<1x32x8xf32> to vector<32x8xf32>
    %cst_808 = arith.constant dense<0.000000e+00> : vector<16x8xf32>
    %1237 = tpu.matmul %1145, %1236, %cst_808 {dimension_numbers = #tpu.dot_dimension_numbers<[1], [0], [0], [1], [0, 0, 1, 1], [], []>} : vector<16x32xf32>, vector<32x8xf32>, vector<16x8xf32> -> vector<16x8xf32>
    %c70_809 = arith.constant 70 : index
    %c0_810 = arith.constant 0 : index
    %c0_811 = arith.constant 0 : index
    %1238 = vector.load %arg7[%c70_809, %c0_810, %c0_811] : memref<72x1x8xf32, #tpu.memory_space<vmem>>, vector<1x1x8xf32>
    %1239 = vector.shape_cast %1238 : vector<1x1x8xf32> to vector<1x8xf32>
    %1240 = vector.broadcast %1239 : vector<1x8xf32> to vector<16x8xf32>
    %1241 = arith.addf %1237, %1240 : vector<16x8xf32>
    %cst_812 = arith.constant dense<0.000000e+00> : vector<16x16xf32>
    %1242 = tpu.matmul %1227, %1234, %cst_812 {dimension_numbers = #tpu.dot_dimension_numbers<[1], [1], [0], [0], [0, 0, 1, 0], [], []>} : vector<16x8xf32>, vector<16x8xf32>, vector<16x16xf32> -> vector<16x16xf32>
    %1243 = arith.addf %1242, %0 : vector<16x16xf32>
    %cst_813 = arith.constant dense<0xFF800000> : vector<16xf32>
    %1244 = vector.multi_reduction <maximumf>, %1243, %cst_813 [1] : vector<16x16xf32> to vector<16xf32>
    %1245 = vector.shape_cast %1244 : vector<16xf32> to vector<16x1xf32>
    %1246 = vector.broadcast %1245 : vector<16x1xf32> to vector<16x16xf32>
    %1247 = arith.subf %1243, %1246 : vector<16x16xf32>
    %1248 = math.exp %1247 : vector<16x16xf32>
    %cst_814 = arith.constant dense<0.000000e+00> : vector<16xf32>
    %1249 = vector.multi_reduction <add>, %1248, %cst_814 [1] : vector<16x16xf32> to vector<16xf32>
    %1250 = vector.shape_cast %1249 : vector<16xf32> to vector<16x1xf32>
    %1251 = tpu.reciprocal %1250 {approx = true} : vector<16x1xf32> -> vector<16x1xf32>
    %1252 = vector.broadcast %1251 : vector<16x1xf32> to vector<16x16xf32>
    %1253 = arith.mulf %1248, %1252 : vector<16x16xf32>
    %cst_815 = arith.constant dense<0.000000e+00> : vector<16x8xf32>
    %1254 = tpu.matmul %1253, %1241, %cst_815 {dimension_numbers = #tpu.dot_dimension_numbers<[1], [0], [0], [1], [0, 0, 1, 1], [], []>} : vector<16x16xf32>, vector<16x8xf32>, vector<16x8xf32> -> vector<16x8xf32>
    %c22_816 = arith.constant 22 : index
    %c0_817 = arith.constant 0 : index
    %c0_818 = arith.constant 0 : index
    %1255 = vector.load %arg8[%c22_816, %c0_817, %c0_818] : memref<24x8x32xf32, #tpu.memory_space<vmem>>, vector<1x8x32xf32>
    %1256 = vector.shape_cast %1255 : vector<1x8x32xf32> to vector<8x32xf32>
    %cst_819 = arith.constant dense<0.000000e+00> : vector<16x32xf32>
    %1257 = tpu.matmul %1254, %1256, %cst_819 {dimension_numbers = #tpu.dot_dimension_numbers<[1], [0], [0], [1], [0, 0, 1, 1], [], []>} : vector<16x8xf32>, vector<8x32xf32>, vector<16x32xf32> -> vector<16x32xf32>
    %1258 = arith.addf %1220, %1257 : vector<16x32xf32>
    %c63 = arith.constant 63 : index
    %c0_820 = arith.constant 0 : index
    %c0_821 = arith.constant 0 : index
    %1259 = vector.load %arg6[%c63, %c0_820, %c0_821] : memref<72x32x8xf32, #tpu.memory_space<vmem>>, vector<1x32x8xf32>
    %1260 = vector.shape_cast %1259 : vector<1x32x8xf32> to vector<32x8xf32>
    %cst_822 = arith.constant dense<0.000000e+00> : vector<16x8xf32>
    %1261 = tpu.matmul %1145, %1260, %cst_822 {dimension_numbers = #tpu.dot_dimension_numbers<[1], [0], [0], [1], [0, 0, 1, 1], [], []>} : vector<16x32xf32>, vector<32x8xf32>, vector<16x8xf32> -> vector<16x8xf32>
    %c63_823 = arith.constant 63 : index
    %c0_824 = arith.constant 0 : index
    %c0_825 = arith.constant 0 : index
    %1262 = vector.load %arg7[%c63_823, %c0_824, %c0_825] : memref<72x1x8xf32, #tpu.memory_space<vmem>>, vector<1x1x8xf32>
    %1263 = vector.shape_cast %1262 : vector<1x1x8xf32> to vector<1x8xf32>
    %1264 = vector.broadcast %1263 : vector<1x8xf32> to vector<16x8xf32>
    %1265 = arith.addf %1261, %1264 : vector<16x8xf32>
    %c67 = arith.constant 67 : index
    %c0_826 = arith.constant 0 : index
    %c0_827 = arith.constant 0 : index
    %1266 = vector.load %arg6[%c67, %c0_826, %c0_827] : memref<72x32x8xf32, #tpu.memory_space<vmem>>, vector<1x32x8xf32>
    %1267 = vector.shape_cast %1266 : vector<1x32x8xf32> to vector<32x8xf32>
    %cst_828 = arith.constant dense<0.000000e+00> : vector<16x8xf32>
    %1268 = tpu.matmul %1145, %1267, %cst_828 {dimension_numbers = #tpu.dot_dimension_numbers<[1], [0], [0], [1], [0, 0, 1, 1], [], []>} : vector<16x32xf32>, vector<32x8xf32>, vector<16x8xf32> -> vector<16x8xf32>
    %c67_829 = arith.constant 67 : index
    %c0_830 = arith.constant 0 : index
    %c0_831 = arith.constant 0 : index
    %1269 = vector.load %arg7[%c67_829, %c0_830, %c0_831] : memref<72x1x8xf32, #tpu.memory_space<vmem>>, vector<1x1x8xf32>
    %1270 = vector.shape_cast %1269 : vector<1x1x8xf32> to vector<1x8xf32>
    %1271 = vector.broadcast %1270 : vector<1x8xf32> to vector<16x8xf32>
    %1272 = arith.addf %1268, %1271 : vector<16x8xf32>
    %c71 = arith.constant 71 : index
    %c0_832 = arith.constant 0 : index
    %c0_833 = arith.constant 0 : index
    %1273 = vector.load %arg6[%c71, %c0_832, %c0_833] : memref<72x32x8xf32, #tpu.memory_space<vmem>>, vector<1x32x8xf32>
    %1274 = vector.shape_cast %1273 : vector<1x32x8xf32> to vector<32x8xf32>
    %cst_834 = arith.constant dense<0.000000e+00> : vector<16x8xf32>
    %1275 = tpu.matmul %1145, %1274, %cst_834 {dimension_numbers = #tpu.dot_dimension_numbers<[1], [0], [0], [1], [0, 0, 1, 1], [], []>} : vector<16x32xf32>, vector<32x8xf32>, vector<16x8xf32> -> vector<16x8xf32>
    %c71_835 = arith.constant 71 : index
    %c0_836 = arith.constant 0 : index
    %c0_837 = arith.constant 0 : index
    %1276 = vector.load %arg7[%c71_835, %c0_836, %c0_837] : memref<72x1x8xf32, #tpu.memory_space<vmem>>, vector<1x1x8xf32>
    %1277 = vector.shape_cast %1276 : vector<1x1x8xf32> to vector<1x8xf32>
    %1278 = vector.broadcast %1277 : vector<1x8xf32> to vector<16x8xf32>
    %1279 = arith.addf %1275, %1278 : vector<16x8xf32>
    %cst_838 = arith.constant dense<0.000000e+00> : vector<16x16xf32>
    %1280 = tpu.matmul %1265, %1272, %cst_838 {dimension_numbers = #tpu.dot_dimension_numbers<[1], [1], [0], [0], [0, 0, 1, 0], [], []>} : vector<16x8xf32>, vector<16x8xf32>, vector<16x16xf32> -> vector<16x16xf32>
    %1281 = arith.addf %1280, %0 : vector<16x16xf32>
    %cst_839 = arith.constant dense<0xFF800000> : vector<16xf32>
    %1282 = vector.multi_reduction <maximumf>, %1281, %cst_839 [1] : vector<16x16xf32> to vector<16xf32>
    %1283 = vector.shape_cast %1282 : vector<16xf32> to vector<16x1xf32>
    %1284 = vector.broadcast %1283 : vector<16x1xf32> to vector<16x16xf32>
    %1285 = arith.subf %1281, %1284 : vector<16x16xf32>
    %1286 = math.exp %1285 : vector<16x16xf32>
    %cst_840 = arith.constant dense<0.000000e+00> : vector<16xf32>
    %1287 = vector.multi_reduction <add>, %1286, %cst_840 [1] : vector<16x16xf32> to vector<16xf32>
    %1288 = vector.shape_cast %1287 : vector<16xf32> to vector<16x1xf32>
    %1289 = tpu.reciprocal %1288 {approx = true} : vector<16x1xf32> -> vector<16x1xf32>
    %1290 = vector.broadcast %1289 : vector<16x1xf32> to vector<16x16xf32>
    %1291 = arith.mulf %1286, %1290 : vector<16x16xf32>
    %cst_841 = arith.constant dense<0.000000e+00> : vector<16x8xf32>
    %1292 = tpu.matmul %1291, %1279, %cst_841 {dimension_numbers = #tpu.dot_dimension_numbers<[1], [0], [0], [1], [0, 0, 1, 1], [], []>} : vector<16x16xf32>, vector<16x8xf32>, vector<16x8xf32> -> vector<16x8xf32>
    %c23_842 = arith.constant 23 : index
    %c0_843 = arith.constant 0 : index
    %c0_844 = arith.constant 0 : index
    %1293 = vector.load %arg8[%c23_842, %c0_843, %c0_844] : memref<24x8x32xf32, #tpu.memory_space<vmem>>, vector<1x8x32xf32>
    %1294 = vector.shape_cast %1293 : vector<1x8x32xf32> to vector<8x32xf32>
    %cst_845 = arith.constant dense<0.000000e+00> : vector<16x32xf32>
    %1295 = tpu.matmul %1292, %1294, %cst_845 {dimension_numbers = #tpu.dot_dimension_numbers<[1], [0], [0], [1], [0, 0, 1, 1], [], []>} : vector<16x8xf32>, vector<8x32xf32>, vector<16x32xf32> -> vector<16x32xf32>
    %1296 = arith.addf %1258, %1295 : vector<16x32xf32>
    %c34_846 = arith.constant 34 : index
    %c0_847 = arith.constant 0 : index
    %c0_848 = arith.constant 0 : index
    %1297 = vector.load %arg12[%c34_846, %c0_847, %c0_848] : memref<36x1x32xf32, #tpu.memory_space<vmem>>, vector<1x1x32xf32>
    %1298 = vector.shape_cast %1297 : vector<1x1x32xf32> to vector<1x32xf32>
    %1299 = vector.broadcast %1298 : vector<1x32xf32> to vector<16x32xf32>
    %1300 = arith.addf %1296, %1299 : vector<16x32xf32>
    %1301 = arith.addf %1145, %1300 : vector<16x32xf32>
    %c30_849 = arith.constant 30 : index
    %c0_850 = arith.constant 0 : index
    %c0_851 = arith.constant 0 : index
    %1302 = vector.load %arg12[%c30_849, %c0_850, %c0_851] : memref<36x1x32xf32, #tpu.memory_space<vmem>>, vector<1x1x32xf32>
    %1303 = vector.shape_cast %1302 : vector<1x1x32xf32> to vector<1x32xf32>
    %c31_852 = arith.constant 31 : index
    %c0_853 = arith.constant 0 : index
    %c0_854 = arith.constant 0 : index
    %1304 = vector.load %arg12[%c31_852, %c0_853, %c0_854] : memref<36x1x32xf32, #tpu.memory_space<vmem>>, vector<1x1x32xf32>
    %1305 = vector.shape_cast %1304 : vector<1x1x32xf32> to vector<1x32xf32>
    %cst_855 = arith.constant dense<0.000000e+00> : vector<16xf32>
    %1306 = vector.multi_reduction <add>, %1301, %cst_855 [1] : vector<16x32xf32> to vector<16xf32>
    %1307 = vector.shape_cast %1306 : vector<16xf32> to vector<16x1xf32>
    %cst_856 = arith.constant 3.200000e+01 : f32
    %1308 = vector.broadcast %cst_856 : f32 to vector<16x1xf32>
    %1309 = arith.divf %1307, %1308 : vector<16x1xf32>
    %1310 = vector.broadcast %1309 : vector<16x1xf32> to vector<16x32xf32>
    %1311 = arith.subf %1301, %1310 : vector<16x32xf32>
    %1312 = arith.mulf %1311, %1311 : vector<16x32xf32>
    %cst_857 = arith.constant dense<0.000000e+00> : vector<16xf32>
    %1313 = vector.multi_reduction <add>, %1312, %cst_857 [1] : vector<16x32xf32> to vector<16xf32>
    %1314 = vector.shape_cast %1313 : vector<16xf32> to vector<16x1xf32>
    %cst_858 = arith.constant 3.200000e+01 : f32
    %1315 = vector.broadcast %cst_858 : f32 to vector<16x1xf32>
    %1316 = arith.divf %1314, %1315 : vector<16x1xf32>
    %1317 = vector.broadcast %1309 : vector<16x1xf32> to vector<16x32xf32>
    %1318 = arith.subf %1301, %1317 : vector<16x32xf32>
    %cst_859 = arith.constant 9.99999974E-6 : f32
    %1319 = vector.broadcast %cst_859 : f32 to vector<16x1xf32>
    %1320 = arith.addf %1316, %1319 : vector<16x1xf32>
    %1321 = math.rsqrt %1320 : vector<16x1xf32>
    %1322 = vector.broadcast %1321 : vector<16x1xf32> to vector<16x32xf32>
    %1323 = arith.mulf %1318, %1322 : vector<16x32xf32>
    %1324 = vector.broadcast %1303 : vector<1x32xf32> to vector<16x32xf32>
    %1325 = arith.mulf %1323, %1324 : vector<16x32xf32>
    %1326 = vector.broadcast %1305 : vector<1x32xf32> to vector<16x32xf32>
    %1327 = arith.addf %1325, %1326 : vector<16x32xf32>
    %c5_860 = arith.constant 5 : index
    %c0_861 = arith.constant 0 : index
    %c0_862 = arith.constant 0 : index
    %1328 = vector.load %arg9[%c5_860, %c0_861, %c0_862] : memref<6x32x64xf32, #tpu.memory_space<vmem>>, vector<1x32x64xf32>
    %1329 = vector.shape_cast %1328 : vector<1x32x64xf32> to vector<32x64xf32>
    %cst_863 = arith.constant dense<0.000000e+00> : vector<16x64xf32>
    %1330 = tpu.matmul %1327, %1329, %cst_863 {dimension_numbers = #tpu.dot_dimension_numbers<[1], [0], [0], [1], [0, 0, 1, 1], [], []>} : vector<16x32xf32>, vector<32x64xf32>, vector<16x64xf32> -> vector<16x64xf32>
    %c5_864 = arith.constant 5 : index
    %c0_865 = arith.constant 0 : index
    %c0_866 = arith.constant 0 : index
    %1331 = vector.load %arg11[%c5_864, %c0_865, %c0_866] : memref<6x1x64xf32, #tpu.memory_space<vmem>>, vector<1x1x64xf32>
    %1332 = vector.shape_cast %1331 : vector<1x1x64xf32> to vector<1x64xf32>
    %1333 = vector.broadcast %1332 : vector<1x64xf32> to vector<16x64xf32>
    %1334 = arith.addf %1330, %1333 : vector<16x64xf32>
    %cst_867 = arith.constant 0.000000e+00 : f32
    %1335 = vector.broadcast %cst_867 : f32 to vector<16x64xf32>
    %1336 = arith.maximumf %1334, %1335 : vector<16x64xf32>
    %c5_868 = arith.constant 5 : index
    %c0_869 = arith.constant 0 : index
    %c0_870 = arith.constant 0 : index
    %1337 = vector.load %arg10[%c5_868, %c0_869, %c0_870] : memref<6x64x32xf32, #tpu.memory_space<vmem>>, vector<1x64x32xf32>
    %1338 = vector.shape_cast %1337 : vector<1x64x32xf32> to vector<64x32xf32>
    %cst_871 = arith.constant dense<0.000000e+00> : vector<16x32xf32>
    %1339 = tpu.matmul %1336, %1338, %cst_871 {dimension_numbers = #tpu.dot_dimension_numbers<[1], [0], [0], [1], [0, 0, 1, 1], [], []>} : vector<16x64xf32>, vector<64x32xf32>, vector<16x32xf32> -> vector<16x32xf32>
    %c35_872 = arith.constant 35 : index
    %c0_873 = arith.constant 0 : index
    %c0_874 = arith.constant 0 : index
    %1340 = vector.load %arg12[%c35_872, %c0_873, %c0_874] : memref<36x1x32xf32, #tpu.memory_space<vmem>>, vector<1x1x32xf32>
    %1341 = vector.shape_cast %1340 : vector<1x1x32xf32> to vector<1x32xf32>
    %1342 = vector.broadcast %1341 : vector<1x32xf32> to vector<16x32xf32>
    %1343 = arith.addf %1339, %1342 : vector<16x32xf32>
    %1344 = arith.addf %1327, %1343 : vector<16x32xf32>
    %c32_875 = arith.constant 32 : index
    %c0_876 = arith.constant 0 : index
    %c0_877 = arith.constant 0 : index
    %1345 = vector.load %arg12[%c32_875, %c0_876, %c0_877] : memref<36x1x32xf32, #tpu.memory_space<vmem>>, vector<1x1x32xf32>
    %1346 = vector.shape_cast %1345 : vector<1x1x32xf32> to vector<1x32xf32>
    %c33_878 = arith.constant 33 : index
    %c0_879 = arith.constant 0 : index
    %c0_880 = arith.constant 0 : index
    %1347 = vector.load %arg12[%c33_878, %c0_879, %c0_880] : memref<36x1x32xf32, #tpu.memory_space<vmem>>, vector<1x1x32xf32>
    %1348 = vector.shape_cast %1347 : vector<1x1x32xf32> to vector<1x32xf32>
    %cst_881 = arith.constant dense<0.000000e+00> : vector<16xf32>
    %1349 = vector.multi_reduction <add>, %1344, %cst_881 [1] : vector<16x32xf32> to vector<16xf32>
    %1350 = vector.shape_cast %1349 : vector<16xf32> to vector<16x1xf32>
    %cst_882 = arith.constant 3.200000e+01 : f32
    %1351 = vector.broadcast %cst_882 : f32 to vector<16x1xf32>
    %1352 = arith.divf %1350, %1351 : vector<16x1xf32>
    %1353 = vector.broadcast %1352 : vector<16x1xf32> to vector<16x32xf32>
    %1354 = arith.subf %1344, %1353 : vector<16x32xf32>
    %1355 = arith.mulf %1354, %1354 : vector<16x32xf32>
    %cst_883 = arith.constant dense<0.000000e+00> : vector<16xf32>
    %1356 = vector.multi_reduction <add>, %1355, %cst_883 [1] : vector<16x32xf32> to vector<16xf32>
    %1357 = vector.shape_cast %1356 : vector<16xf32> to vector<16x1xf32>
    %cst_884 = arith.constant 3.200000e+01 : f32
    %1358 = vector.broadcast %cst_884 : f32 to vector<16x1xf32>
    %1359 = arith.divf %1357, %1358 : vector<16x1xf32>
    %1360 = vector.broadcast %1352 : vector<16x1xf32> to vector<16x32xf32>
    %1361 = arith.subf %1344, %1360 : vector<16x32xf32>
    %cst_885 = arith.constant 9.99999974E-6 : f32
    %1362 = vector.broadcast %cst_885 : f32 to vector<16x1xf32>
    %1363 = arith.addf %1359, %1362 : vector<16x1xf32>
    %1364 = math.rsqrt %1363 : vector<16x1xf32>
    %1365 = vector.broadcast %1364 : vector<16x1xf32> to vector<16x32xf32>
    %1366 = arith.mulf %1361, %1365 : vector<16x32xf32>
    %1367 = vector.broadcast %1346 : vector<1x32xf32> to vector<16x32xf32>
    %1368 = arith.mulf %1366, %1367 : vector<16x32xf32>
    %1369 = vector.broadcast %1348 : vector<1x32xf32> to vector<16x32xf32>
    %1370 = arith.addf %1368, %1369 : vector<16x32xf32>
    %c0_886 = arith.constant 0 : index
    %c0_887 = arith.constant 0 : index
    %1371 = vector.load %arg15[%c0_886, %c0_887] : memref<32x40xf32, #tpu.memory_space<vmem>>, vector<32x40xf32>
    %cst_888 = arith.constant dense<0.000000e+00> : vector<16x40xf32>
    %1372 = tpu.matmul %1370, %1371, %cst_888 {dimension_numbers = #tpu.dot_dimension_numbers<[1], [0], [0], [1], [0, 0, 1, 1], [], []>} : vector<16x32xf32>, vector<32x40xf32>, vector<16x40xf32> -> vector<16x40xf32>
    %c0_889 = arith.constant 0 : index
    %c0_890 = arith.constant 0 : index
    %1373 = vector.load %arg16[%c0_889, %c0_890] : memref<1x40xf32, #tpu.memory_space<vmem>>, vector<1x40xf32>
    %1374 = vector.broadcast %1373 : vector<1x40xf32> to vector<16x40xf32>
    %1375 = arith.addf %1372, %1374 : vector<16x40xf32>
    %cst_891 = arith.constant dense<0xFF800000> : vector<16xf32>
    %1376 = vector.multi_reduction <maximumf>, %1375, %cst_891 [1] : vector<16x40xf32> to vector<16xf32>
    %1377 = vector.shape_cast %1376 : vector<16xf32> to vector<16x1xf32>
    %1378 = vector.broadcast %1377 : vector<16x1xf32> to vector<16x40xf32>
    %1379 = arith.subf %1375, %1378 : vector<16x40xf32>
    %1380 = math.exp %1379 : vector<16x40xf32>
    %cst_892 = arith.constant dense<0.000000e+00> : vector<16xf32>
    %1381 = vector.multi_reduction <add>, %1380, %cst_892 [1] : vector<16x40xf32> to vector<16xf32>
    %1382 = vector.shape_cast %1381 : vector<16xf32> to vector<16x1xf32>
    %1383 = math.log %1382 : vector<16x1xf32>
    %1384 = vector.broadcast %1383 : vector<16x1xf32> to vector<16x40xf32>
    %1385 = arith.subf %1379, %1384 : vector<16x40xf32>
    %c0_893 = arith.constant 0 : index
    %c0_894 = arith.constant 0 : index
    %1386 = vector.load %arg17[%c0_893, %c0_894] : memref<16x40xf32, #tpu.memory_space<vmem>>, vector<16x40xf32>
    tpu.vector_store %arg17[%c0_893, %c0_894], %1385 {strides = array<i32>} : memref<16x40xf32, #tpu.memory_space<vmem>>, vector<16x40xf32>,
    return
  }
}

</mosaic_0001>

<bundles_post_ra>
// kernel: forward.1
= control target key start
LH: loop header
LB: loop body
LE: loop exit
PB: predicated region body
PF: predicated region fallthrough
CT: control target
= control target key end

     0   :  { %s11697_s0 = inlined_call_operand.vmem [shape: f32[16,1408], index: 0, kind: input, shape index: {}]   ;;  %s11698_s1 = inlined_call_operand.vmem [shape: f32[16,32], index: 1, kind: input, shape index: {}]   ;;  %s11699_s2 = inlined_call_operand.vmem [shape: f32[16,32], index: 2, kind: input, shape index: {}]   ;;  %s11700_s3 = inlined_call_operand.vmem [shape: f32[16,16], index: 3, kind: input, shape index: {}]   ;;  %s11701_s4 = inlined_call_operand.vmem [shape: f32[1408,32], index: 4, kind: input, shape index: {}]   ;;  %s11702_s5 = inlined_call_operand.vmem [shape: f32[1,32], index: 5, kind: input, shape index: {}]   ;;  %s11703_s6 = inlined_call_operand.vmem [shape: f32[72,32,8], index: 6, kind: input, shape index: {}]   ;;  %s11704_s7 = inlined_call_operand.vmem [shape: f32[72,1,8], index: 7, kind: input, shape index: {}]   ;;  %s11705_s8 = inlined_call_operand.vmem [shape: f32[24,8,32], index: 8, kind: input, shape index: {}]   ;;  %s11706_s9 = inlined_call_operand.vmem [shape: f32[6,32,64], index: 9, kind: input, shape index: {}]   ;;  %s11707_s10 = inlined_call_operand.vmem [shape: f32[6,64,32], index: 10, kind: input, shape index: {}]   ;;  %s11708_s11 = inlined_call_operand.vmem [shape: f32[6,1,64], index: 11, kind: input, shape index: {}]   ;;  %s11709_s12 = inlined_call_operand.vmem [shape: f32[36,1,32], index: 12, kind: input, shape index: {}]   ;;  %s11710_s13 = inlined_call_operand.vmem [shape: f32[2,32,32], index: 13, kind: input, shape index: {}]   ;;  %s11711_s14 = inlined_call_operand.vmem [shape: f32[1,32], index: 14, kind: input, shape index: {}]   ;;  %s11712_s15 = inlined_call_operand.vmem [shape: f32[32,40], index: 15, kind: input, shape index: {}]   ;;  %s11713_s16 = inlined_call_operand.vmem [shape: f32[1,40], index: 16, kind: input, shape index: {}]   ;;  %s11714_s17 = inlined_call_operand.hbm [shape: f32[16,40], index: 17, kind: output, shape index: {}]  }
   0x1   :  { %11717 = sst [smem:[#allocation5_spill]] %s11697_s0 }
   0x2   :  { %11718 = sst [smem:[#allocation6_spill]] %s11698_s1 }
   0x3   :  { %v98_v0 = vld [vmem:[%s11701_s4 + $0x78] sm:$0xff]  ;;  %v97_v2 = vld [vmem:[%s11701_s4 + $0x70] sm:$0xff]  ;;  %v96_v5 = vld [vmem:[%s11701_s4 + $0x68] sm:$0xff]  ;;  %s11719_s24 = sld [smem:[#allocation5_spill]] }
   0x4   :  { %v130_v1 = vld [vmem:[%s11701_s4 + $0x178] sm:$0xff]  ;;  %263 = vmatpush.msra.mxu0 %v98_v0  ;;  %v129_v4 = vld [vmem:[%s11701_s4 + $0x170] sm:$0xff]  ;;  %v128_v7 = vld [vmem:[%s11701_s4 + $0x168] sm:$0xff] }
   0x5   :  { %309 = vmatpush.msra.mxu2 %v130_v1  ;;  %v114_v3 = vld [vmem:[%s11701_s4 + $0xf8] sm:$0xff]  ;;  %v113_v6 = vld [vmem:[%s11701_s4 + $0xf0] sm:$0xff]  ;;  %v112_v8 = vld [vmem:[%s11701_s4 + $0xe8] sm:$0xff] }
   0x6   :  { %286 = vmatpush.msra.mxu1 %v114_v3  ;;  %264 = vmatpush.msra.mxu0 %v97_v2  ;;  %v95_v9 = vld [vmem:[%s11701_s4 + $0x60] sm:$0xff]  ;;  %v146_v11 = vld [vmem:[%s11701_s4 + $0x1f8] sm:$0xff]  ;;  %v145_v15 = vld [vmem:[%s11701_s4 + $0x1f0] sm:$0xff] }
   0x7   :  { %310 = vmatpush.msra.mxu2 %v129_v4  ;;  %v127_v10 = vld [vmem:[%s11701_s4 + $0x160] sm:$0xff]  ;;  %v94_v13 = vld [vmem:[%s11701_s4 + $0x58] sm:$0xff]  ;;  %332 = vmatpush.msra.mxu3 %v146_v11  ;;  %v144_v17 = vld [vmem:[%s11701_s4 + $0x1e8] sm:$0xff] }
   0x8   :  { %287 = vmatpush.msra.mxu1 %v113_v6  ;;  %265 = vmatpush.msra.mxu0 %v96_v5  ;;  %v111_v12 = vld [vmem:[%s11701_s4 + $0xe0] sm:$0xff]  ;;  %v126_v14 = vld [vmem:[%s11701_s4 + $0x158] sm:$0xff]  ;;  %v93_v18 = vld [vmem:[%s11701_s4 + $0x50] sm:$0xff] }
   0x9   :  { %311 = vmatpush.msra.mxu2 %v128_v7  ;;  %v110_v16 = vld [vmem:[%s11701_s4 + $0xd8] sm:$0xff]  ;;  %v125_v19 = vld [vmem:[%s11701_s4 + $0x150] sm:$0xff]  ;;  %333 = vmatpush.msra.mxu3 %v145_v15  ;;  %v143_v21 = vld [vmem:[%s11701_s4 + $0x1e0] sm:$0xff] }
   0xa   :  { %288 = vmatpush.msra.mxu1 %v112_v8  ;;  %266 = vmatpush.msra.mxu0 %v95_v9  ;;  %v109_v20 = vld [vmem:[%s11701_s4 + $0xd0] sm:$0xff]  ;;  %v92_v22 = vld [vmem:[%s11701_s4 + $0x48] sm:$0xff]  ;;  %v142_v25 = vld [vmem:[%s11701_s4 + $0x1d8] sm:$0xff] }
   0xb   :  { %312 = vmatpush.msra.mxu2 %v127_v10  ;;  %v124_v23 = vld [vmem:[%s11701_s4 + $0x148] sm:$0xff]  ;;  %334 = vmatpush.msra.mxu3 %v144_v17  ;;  %v91_v26 = vld [vmem:[%s11701_s4 + $0x40] sm:$0xff]  ;;  %v141_v29 = vld [vmem:[%s11701_s4 + $0x1d0] sm:$0xff] }
   0xc   :  { %289 = vmatpush.msra.mxu1 %v111_v12  ;;  %267 = vmatpush.msra.mxu0 %v94_v13  ;;  %v108_v24 = vld [vmem:[%s11701_s4 + $0xc8] sm:$0xff]  ;;  %v123_v27 = vld [vmem:[%s11701_s4 + $0x140] sm:$0xff]  ;;  %v90_v30 = vld [vmem:[%s11701_s4 + $0x38] sm:$0xff] }
   0xd   :  { %313 = vmatpush.msra.mxu2 %v126_v14  ;;  %335 = vmatpush.msra.mxu3 %v143_v21  ;;  %v107_v28 = vld [vmem:[%s11701_s4 + $0xc0] sm:$0xff]  ;;  %v122_v31 = vld [vmem:[%s11701_s4 + $0x138] sm:$0xff]  ;;  %v140_v33 = vld [vmem:[%s11701_s4 + $0x1c8] sm:$0xff] }
   0xe   :  { %290 = vmatpush.msra.mxu1 %v110_v16  ;;  %268 = vmatpush.msra.mxu0 %v93_v18  ;;  %v106_v32 = vld [vmem:[%s11701_s4 + $0xb8] sm:$0xff]  ;;  %v89_v34 = vld [vmem:[%s11701_s4 + $0x30] sm:$0xff]  ;;  %v139_v37 = vld [vmem:[%s11701_s4 + $0x1c0] sm:$0xff] }
   0xf   :  { %314 = vmatpush.msra.mxu2 %v125_v19  ;;  %336 = vmatpush.msra.mxu3 %v142_v25  ;;  %v121_v35 = vld [vmem:[%s11701_s4 + $0x130] sm:$0xff]  ;;  %v88_v38 = vld [vmem:[%s11701_s4 + $0x28] sm:$0xff]  ;;  %v138_v41 = vld [vmem:[%s11701_s4 + $0x1b8] sm:$0xff] }
  0x10   :  { %291 = vmatpush.msra.mxu1 %v109_v20  ;;  %269 = vmatpush.msra.mxu0 %v92_v22  ;;  %v105_v36 = vld [vmem:[%s11701_s4 + $0xb0] sm:$0xff]  ;;  %v120_v39 = vld [vmem:[%s11701_s4 + $0x128] sm:$0xff]  ;;  %v87_v42 = vld [vmem:[%s11701_s4 + $0x20] sm:$0xff] }
  0x11   :  { %315 = vmatpush.msra.mxu2 %v124_v23  ;;  %337 = vmatpush.msra.mxu3 %v141_v29  ;;  %v104_v40 = vld [vmem:[%s11701_s4 + $0xa8] sm:$0xff]  ;;  %v119_v43 = vld [vmem:[%s11701_s4 + $0x120] sm:$0xff]  ;;  %v137_v45 = vld [vmem:[%s11701_s4 + $0x1b0] sm:$0xff] }
  0x12   :  { %292 = vmatpush.msra.mxu1 %v108_v24  ;;  %270 = vmatpush.msra.mxu0 %v91_v26  ;;  %v103_v44 = vld [vmem:[%s11701_s4 + $0xa0] sm:$0xff]  ;;  %v86_v46 = vld [vmem:[%s11701_s4 + $0x18] sm:$0xff]  ;;  %v136_v49 = vld [vmem:[%s11701_s4 + $0x1a8] sm:$0xff] }
  0x13   :  { %316 = vmatpush.msra.mxu2 %v123_v27  ;;  %338 = vmatpush.msra.mxu3 %v140_v33  ;;  %v118_v47 = vld [vmem:[%s11701_s4 + $0x118] sm:$0xff]  ;;  %v85_v50 = vld [vmem:[%s11701_s4 + $0x10] sm:$0xff]  ;;  %v135_v53 = vld [vmem:[%s11701_s4 + $0x1a0] sm:$0xff] }
  0x14   :  { %293 = vmatpush.msra.mxu1 %v107_v28  ;;  %271 = vmatpush.msra.mxu0 %v90_v30  ;;  %v102_v48 = vld [vmem:[%s11701_s4 + $0x98] sm:$0xff]  ;;  %v117_v51 = vld [vmem:[%s11701_s4 + $0x110] sm:$0xff]  ;;  %v84_v54 = vld [vmem:[%s11701_s4 + $0x8] sm:$0xff] }
  0x15   :  { %317 = vmatpush.msra.mxu2 %v122_v31  ;;  %339 = vmatpush.msra.mxu3 %v139_v37  ;;  %v101_v52 = vld [vmem:[%s11701_s4 + $0x90] sm:$0xff]  ;;  %v116_v55 = vld [vmem:[%s11701_s4 + $0x108] sm:$0xff]  ;;  %v134_v57 = vld [vmem:[%s11701_s4 + $0x198] sm:$0xff] }
  0x16   :  { %294 = vmatpush.msra.mxu1 %v106_v32  ;;  %272 = vmatpush.msra.mxu0 %v89_v34  ;;  %v100_v56 = vld [vmem:[%s11701_s4 + $0x88] sm:$0xff]  ;;  %v83_v58 = vld [vmem:[%s11701_s4] sm:$0xff]  ;;  %v162_v60 = vld [vmem:[%s11701_s4 + $0x278] sm:$0xff] }
  0x17   :  { %318 = vmatpush.msra.mxu2 %v121_v35  ;;  %340 = vmatpush.msra.mxu3 %v138_v41  ;;  %v115_v59 = vld [vmem:[%s11701_s4 + $0x100] sm:$0xff]  ;;  %v194_v61 = vld [vmem:[%s11701_s4 + $0x378] sm:$0xff]  ;;  %v133_v63 = vld [vmem:[%s11701_s4 + $0x190] sm:$0xff] }
  0x18   :  { %295 = vmatpush.msra.mxu1 %v105_v36  ;;  %273 = vmatpush.msra.mxu0 %v88_v38  ;;  %v99_v62 = vld [vmem:[%s11701_s4 + $0x80] sm:$0xff]  ;;  %v161_v0 = vld [vmem:[%s11701_s4 + $0x270] sm:$0xff]  ;;  %v178_v1 = vld [vmem:[%s11701_s4 + $0x2f8] sm:$0xff] }
  0x19   :  { %319 = vmatpush.msra.mxu2 %v120_v39  ;;  %341 = vmatpush.msra.mxu3 %v137_v45  ;;  %v193_v2 = vld [vmem:[%s11701_s4 + $0x370] sm:$0xff]  ;;  %v132_v3 = vld [vmem:[%s11701_s4 + $0x188] sm:$0xff]  ;;  %v131_v7 = vld [vmem:[%s11701_s4 + $0x180] sm:$0xff] }
  0x1a   :  { %296 = vmatpush.msra.mxu1 %v104_v40  ;;  %274 = vmatpush.msra.mxu0 %v87_v42  ;;  %v160_v4 = vld [vmem:[%s11701_s4 + $0x268] sm:$0xff]  ;;  %v177_v5 = vld [vmem:[%s11701_s4 + $0x2f0] sm:$0xff]  ;;  %v159_v8 = vld [vmem:[%s11701_s4 + $0x260] sm:$0xff] }
  0x1b   :  { %320 = vmatpush.msra.mxu2 %v119_v43  ;;  %342 = vmatpush.msra.mxu3 %v136_v49  ;;  %v192_v6 = vld [vmem:[%s11701_s4 + $0x368] sm:$0xff]  ;;  %v191_v10 = vld [vmem:[%s11701_s4 + $0x360] sm:$0xff]  ;;  %v210_v11 = vld [vmem:[%s11701_s4 + $0x3f8] sm:$0xff] }
  0x1c   :  { %297 = vmatpush.msra.mxu1 %v103_v44  ;;  %275 = vmatpush.msra.mxu0 %v86_v46  ;;  %v176_v9 = vld [vmem:[%s11701_s4 + $0x2e8] sm:$0xff]  ;;  %v158_v12 = vld [vmem:[%s11701_s4 + $0x258] sm:$0xff]  ;;  %v175_v13 = vld [vmem:[%s11701_s4 + $0x2e0] sm:$0xff] }
  0x1d   :  { %321 = vmatpush.msra.mxu2 %v118_v47  ;;  %343 = vmatpush.msra.mxu3 %v135_v53  ;;  %v190_v14 = vld [vmem:[%s11701_s4 + $0x358] sm:$0xff]  ;;  %v209_v15 = vld [vmem:[%s11701_s4 + $0x3f0] sm:$0xff]  ;;  %v208_v19 = vld [vmem:[%s11701_s4 + $0x3e8] sm:$0xff] }
  0x1e   :  { %298 = vmatpush.msra.mxu1 %v102_v48  ;;  %276 = vmatpush.msra.mxu0 %v85_v50  ;;  %v157_v16 = vld [vmem:[%s11701_s4 + $0x250] sm:$0xff]  ;;  %v174_v17 = vld [vmem:[%s11701_s4 + $0x2d8] sm:$0xff]  ;;  %v156_v20 = vld [vmem:[%s11701_s4 + $0x248] sm:$0xff] }
  0x1f   :  { %322 = vmatpush.msra.mxu2 %v117_v51  ;;  %344 = vmatpush.msra.mxu3 %v134_v57  ;;  %v189_v18 = vld [vmem:[%s11701_s4 + $0x350] sm:$0xff]  ;;  %v188_v22 = vld [vmem:[%s11701_s4 + $0x348] sm:$0xff]  ;;  %v207_v23 = vld [vmem:[%s11701_s4 + $0x3e0] sm:$0xff] }
  0x20   :  { %299 = vmatpush.msra.mxu1 %v101_v52  ;;  %277 = vmatpush.msra.mxu0 %v84_v54  ;;  %v173_v21 = vld [vmem:[%s11701_s4 + $0x2d0] sm:$0xff]  ;;  %v155_v24 = vld [vmem:[%s11701_s4 + $0x240] sm:$0xff]  ;;  %v172_v25 = vld [vmem:[%s11701_s4 + $0x2c8] sm:$0xff] }
  0x21   :  { %323 = vmatpush.msra.mxu2 %v116_v55  ;;  %345 = vmatpush.msra.mxu3 %v133_v63  ;;  %v187_v26 = vld [vmem:[%s11701_s4 + $0x340] sm:$0xff]  ;;  %v206_v27 = vld [vmem:[%s11701_s4 + $0x3d8] sm:$0xff]  ;;  %v205_v31 = vld [vmem:[%s11701_s4 + $0x3d0] sm:$0xff] }
  0x22   :  { %300 = vmatpush.msra.mxu1 %v100_v56  ;;  %278 = vmatpush.msra.mxu0 %v83_v58  ;;  %v154_v28 = vld [vmem:[%s11701_s4 + $0x238] sm:$0xff]  ;;  %v171_v29 = vld [vmem:[%s11701_s4 + $0x2c0] sm:$0xff]  ;;  %v153_v32 = vld [vmem:[%s11701_s4 + $0x230] sm:$0xff] }
  0x23   :  { %324 = vmatpush.msra.mxu2 %v115_v59  ;;  %346 = vmatpush.msra.mxu3 %v132_v3  ;;  %v186_v30 = vld [vmem:[%s11701_s4 + $0x338] sm:$0xff]  ;;  %v185_v34 = vld [vmem:[%s11701_s4 + $0x330] sm:$0xff]  ;;  %v204_v35 = vld [vmem:[%s11701_s4 + $0x3c8] sm:$0xff] }
  0x24   :  { %355 = vmatpush.msrb.mxu0 %v162_v60  ;;  %301 = vmatpush.msra.mxu1 %v99_v62  ;;  %v170_v33 = vld [vmem:[%s11701_s4 + $0x2b8] sm:$0xff]  ;;  %v152_v36 = vld [vmem:[%s11701_s4 + $0x228] sm:$0xff]  ;;  %v169_v37 = vld [vmem:[%s11701_s4 + $0x2b0] sm:$0xff] }
  0x25   :  { %401 = vmatpush.msrb.mxu2 %v194_v61  ;;  %347 = vmatpush.msra.mxu3 %v131_v7  ;;  %v184_v38 = vld [vmem:[%s11701_s4 + $0x328] sm:$0xff]  ;;  %v203_v39 = vld [vmem:[%s11701_s4 + $0x3c0] sm:$0xff]  ;;  %v63_v40 = vld [vmem:[%s11719_s24 + $0x10] sm:$0xff] }
  0x26   :  { %356 = vmatpush.msrb.mxu0 %v161_v0  ;;  %378 = vmatpush.msrb.mxu1 %v178_v1  ;;  %v151_v41 = vld [vmem:[%s11701_s4 + $0x220] sm:$0xff]  ;;  %v168_v42 = vld [vmem:[%s11701_s4 + $0x2a8] sm:$0xff]  ;;  %v64_v45 = vld [vmem:[%s11719_s24 + $0x18] sm:$0xff] }
  0x27   :  { %402 = vmatpush.msrb.mxu2 %v193_v2  ;;  %424 = vmatpush.msrb.mxu3 %v210_v11  ;;  %v183_v43 = vld [vmem:[%s11701_s4 + $0x320] sm:$0xff]  ;;  %v150_v46 = vld [vmem:[%s11701_s4 + $0x218] sm:$0xff]  ;;  %v62_v50 = vld [vmem:[%s11719_s24 + $0x8] sm:$0xff] }
  0x28   :  { %357 = vmatpush.msrb.mxu0 %v160_v4  ;;  %379 = vmatpush.msrb.mxu1 %v177_v5  ;;  %v61_v44 = vld [vmem:[%s11719_s24] sm:$0xff]  ;;  %v182_v48 = vld [vmem:[%s11701_s4 + $0x318] sm:$0xff]  ;;  %v149_v51 = vld [vmem:[%s11701_s4 + $0x210] sm:$0xff] }
  0x29   :  { %403 = vmatpush.msrb.mxu2 %v192_v6  ;;  %425 = vmatpush.msrb.mxu3 %v209_v15  ;;  %v167_v47 = vld [vmem:[%s11701_s4 + $0x2a0] sm:$0xff]  ;;  %v202_v49 = vld [vmem:[%s11701_s4 + $0x3b8] sm:$0xff]  ;;  %v181_v53 = vld [vmem:[%s11701_s4 + $0x310] sm:$0xff] }
  0x2a   :  { %358 = vmatpush.msrb.mxu0 %v159_v8  ;;  %380 = vmatpush.msrb.mxu1 %v176_v9  ;;  %v166_v52 = vld [vmem:[%s11701_s4 + $0x298] sm:$0xff]  ;;  %v201_v54 = vld [vmem:[%s11701_s4 + $0x3b0] sm:$0xff]  ;;  %v148_v55 = vld [vmem:[%s11701_s4 + $0x208] sm:$0xff] }
  0x2b   :  { %404 = vmatpush.msrb.mxu2 %v191_v10  ;;  %426 = vmatpush.msrb.mxu3 %v208_v19  ;;  %v165_v56 = vld [vmem:[%s11701_s4 + $0x290] sm:$0xff]  ;;  %v180_v57 = vld [vmem:[%s11701_s4 + $0x308] sm:$0xff]  ;;  %v147_v60 = vld [vmem:[%s11701_s4 + $0x200] sm:$0xff] }
  0x2c   :  { %359 = vmatpush.msrb.mxu0 %v158_v12  ;;  %381 = vmatpush.msrb.mxu1 %v175_v13  ;;  %v200_v58 = vld [vmem:[%s11701_s4 + $0x3a8] sm:$0xff]  ;;  %v179_v62 = vld [vmem:[%s11701_s4 + $0x300] sm:$0xff]  ;;  %v226_v0 = vld [vmem:[%s11701_s4 + $0x478] sm:$0xff] }
  0x2d   :  { %405 = vmatpush.msrb.mxu2 %v190_v14  ;;  %427 = vmatpush.msrb.mxu3 %v207_v23  ;;  %v74_v59 = vld [vmem:[%s11719_s24 + $0x68] sm:$0xff]  ;;  %v199_v63 = vld [vmem:[%s11701_s4 + $0x3a0] sm:$0xff]  ;;  %v258_v1 = vld [vmem:[%s11701_s4 + $0x578] sm:$0xff] }
  0x2e   :  { %360 = vmatpush.msrb.mxu0 %v157_v16  ;;  %382 = vmatpush.msrb.mxu1 %v174_v17  ;;  %v164_v61 = vld [vmem:[%s11701_s4 + $0x288] sm:$0xff]  ;;  %v72_v2 = vld [vmem:[%s11719_s24 + $0x58] sm:$0xff]  ;;  %v75_v3 = vld [vmem:[%s11719_s24 + $0x70] sm:$0xff] }
  0x2f   :  { %406 = vmatpush.msrb.mxu2 %v189_v18  ;;  %428 = vmatpush.msrb.mxu3 %v206_v27  ;;  %v163_v4 = vld [vmem:[%s11701_s4 + $0x280] sm:$0xff]  ;;  %v198_v5 = vld [vmem:[%s11701_s4 + $0x398] sm:$0xff]  ;;  %v225_v6 = vld [vmem:[%s11701_s4 + $0x470] sm:$0xff] }
  0x30   :  { %361 = vmatpush.msrb.mxu0 %v156_v20  ;;  %383 = vmatpush.msrb.mxu1 %v173_v21  ;;  %v242_v7 = vld [vmem:[%s11701_s4 + $0x4f8] sm:$0xff]  ;;  %v257_v8 = vld [vmem:[%s11701_s4 + $0x570] sm:$0xff]  ;;  %v73_v9 = vld [vmem:[%s11719_s24 + $0x60] sm:$0xff] }
  0x31   :  { %407 = vmatpush.msrb.mxu2 %v188_v22  ;;  %429 = vmatpush.msrb.mxu3 %v205_v31  ;;  %v197_v10 = vld [vmem:[%s11701_s4 + $0x390] sm:$0xff]  ;;  %v224_v11 = vld [vmem:[%s11701_s4 + $0x468] sm:$0xff]  ;;  %v223_v15 = vld [vmem:[%s11701_s4 + $0x460] sm:$0xff] }
  0x32   :  { %362 = vmatpush.msrb.mxu0 %v155_v24  ;;  %384 = vmatpush.msrb.mxu1 %v172_v25  ;;  %v241_v12 = vld [vmem:[%s11701_s4 + $0x4f0] sm:$0xff]  ;;  %v256_v13 = vld [vmem:[%s11701_s4 + $0x568] sm:$0xff]  ;;  %v255_v17 = vld [vmem:[%s11701_s4 + $0x560] sm:$0xff] }
  0x33   :  { %408 = vmatpush.msrb.mxu2 %v187_v26  ;;  %430 = vmatpush.msrb.mxu3 %v204_v35  ;;  %v196_v14 = vld [vmem:[%s11701_s4 + $0x388] sm:$0xff]  ;;  %v67_v18 = vld [vmem:[%s11719_s24 + $0x30] sm:$0xff]  ;;  %v195_v19 = vld [vmem:[%s11701_s4 + $0x380] sm:$0xff] }
  0x34   :  { %363 = vmatpush.msrb.mxu0 %v154_v28  ;;  %385 = vmatpush.msrb.mxu1 %v171_v29  ;;  %v240_v16 = vld [vmem:[%s11701_s4 + $0x4e8] sm:$0xff]  ;;  %v222_v20 = vld [vmem:[%s11701_s4 + $0x458] sm:$0xff]  ;;  %v239_v21 = vld [vmem:[%s11701_s4 + $0x4e0] sm:$0xff] }
  0x35   :  { %409 = vmatpush.msrb.mxu2 %v186_v30  ;;  %431 = vmatpush.msrb.mxu3 %v203_v39  ;;  %v254_v22 = vld [vmem:[%s11701_s4 + $0x558] sm:$0xff]  ;;  %v65_v23 = vld [vmem:[%s11719_s24 + $0x20] sm:$0xff]  ;;  %v221_v25 = vld [vmem:[%s11701_s4 + $0x450] sm:$0xff] }
  0x36   :  { %364 = vmatpush.msrb.mxu0 %v153_v32  ;;  %386 = vmatpush.msrb.mxu1 %v170_v33  ;;  %v68_v24 = vld [vmem:[%s11719_s24 + $0x38] sm:$0xff]  ;;  %v253_v27 = vld [vmem:[%s11701_s4 + $0x550] sm:$0xff]  ;;  %v66_v28 = vld [vmem:[%s11719_s24 + $0x28] sm:$0xff] }
  0x37   :  { %410 = vmatpush.msrb.mxu2 %v185_v34  ;;  %279 = vmatmul.f32.vlgmr.msra.gmra.mxu0 %v61_v44  ;;  %v238_v26 = vld [vmem:[%s11701_s4 + $0x4d8] sm:$0xff]  ;;  %v220_v29 = vld [vmem:[%s11701_s4 + $0x448] sm:$0xff]  ;;  %v237_v30 = vld [vmem:[%s11701_s4 + $0x4d0] sm:$0xff] }
  0x38   :  { %365 = vmatpush.msrb.mxu0 %v152_v36  ;;  %387 = vmatpush.msrb.mxu1 %v169_v37  ;;  %v252_v31 = vld [vmem:[%s11701_s4 + $0x548] sm:$0xff]  ;;  %v219_v32 = vld [vmem:[%s11701_s4 + $0x440] sm:$0xff]  ;;  %v218_v36 = vld [vmem:[%s11701_s4 + $0x438] sm:$0xff] }
  0x39   :  { %411 = vmatpush.msrb.mxu2 %v184_v38  ;;  %348 = vmatmul.f32.vlgmr.msra.gmra.mxu3 %v64_v45  ;;  %v236_v33 = vld [vmem:[%s11701_s4 + $0x4c8] sm:$0xff]  ;;  %v251_v34 = vld [vmem:[%s11701_s4 + $0x540] sm:$0xff]  ;;  %v250_v38 = vld [vmem:[%s11701_s4 + $0x538] sm:$0xff] }
  0x3a   :  { %325 = vmatmul.f32.vlgmr.msra.gmra.mxu2 %v63_v40  ;;  %366 = vmatpush.msrb.mxu0 %v151_v41  ;;  %v78_v35 = vld [vmem:[%s11719_s24 + $0x88] sm:$0xff]  ;;  %v235_v37 = vld [vmem:[%s11701_s4 + $0x4c0] sm:$0xff]  ;;  %v76_v39 = vld [vmem:[%s11719_s24 + $0x78] sm:$0xff] }
  0x3b   :  { %388 = vmatpush.msrb.mxu1 %v168_v42  ;;  %412 = vmatpush.msrb.mxu2 %v183_v43  ;;  %v79_v40 = vld [vmem:[%s11719_s24 + $0x90] sm:$0xff]  ;;  %v234_v42 = vld [vmem:[%s11701_s4 + $0x4b8] sm:$0xff]  ;;  %v77_v44 = vld [vmem:[%s11719_s24 + $0x80] sm:$0xff] }
  0x3c   :  { %367 = vmatpush.msrb.mxu0 %v150_v46  ;;  %432 = vmatpush.msrb.mxu3 %v202_v49  ;;  %v217_v41 = vld [vmem:[%s11701_s4 + $0x430] sm:$0xff]  ;;  %v216_v45 = vld [vmem:[%s11701_s4 + $0x428] sm:$0xff] }
  0x3d   :  { %389 = vmatpush.msrb.mxu1 %v167_v47  ;;  %413 = vmatpush.msrb.mxu2 %v182_v48  ;;  %v249_v43 = vld [vmem:[%s11701_s4 + $0x530] sm:$0xff]  ;;  %v248_v47 = vld [vmem:[%s11701_s4 + $0x528] sm:$0xff]  ;;  %v215_v48 = vld [vmem:[%s11701_s4 + $0x420] sm:$0xff] }
  0x3e   :  { %302 = vmatmul.f32.vlgmr.msra.gmra.mxu1 %v62_v50  ;;  %368 = vmatpush.msrb.mxu0 %v149_v51  ;;  %v233_v46 = vld [vmem:[%s11701_s4 + $0x4b0] sm:$0xff]  ;;  %v232_v49 = vld [vmem:[%s11701_s4 + $0x4a8] sm:$0xff]  ;;  %v247_v50 = vld [vmem:[%s11701_s4 + $0x520] sm:$0xff] }
  0x3f   :  { %390 = vmatpush.msrb.mxu1 %v166_v52  ;;  %414 = vmatpush.msrb.mxu2 %v181_v53  ;;  %v214_v51 = vld [vmem:[%s11701_s4 + $0x418] sm:$0xff]  ;;  %v231_v52 = vld [vmem:[%s11701_s4 + $0x4a0] sm:$0xff] }
  0x40   :  { %433 = vmatpush.msrb.mxu3 %v201_v54  ;;  %369 = vmatpush.msrb.mxu0 %v148_v55  ;;  %v246_v53 = vld [vmem:[%s11701_s4 + $0x518] sm:$0xff]  ;;  %v213_v54 = vld [vmem:[%s11701_s4 + $0x410] sm:$0xff] }
  0x41   :  { %391 = vmatpush.msrb.mxu1 %v165_v56  ;;  %415 = vmatpush.msrb.mxu2 %v180_v57  ;;  %v230_v55 = vld [vmem:[%s11701_s4 + $0x498] sm:$0xff]  ;;  %v245_v56 = vld [vmem:[%s11701_s4 + $0x510] sm:$0xff]  ;;  %v212_v57 = vld [vmem:[%s11701_s4 + $0x408] sm:$0xff] }
  0x42   :  { %434 = vmatpush.msrb.mxu3 %v200_v58  ;;  %328 = vmatmul.f32.gmra.mxu2 %v74_v59  ;;  %v229_v58 = vld [vmem:[%s11701_s4 + $0x490] sm:$0xff]  ;;  %v244_v59 = vld [vmem:[%s11701_s4 + $0x508] sm:$0xff] }
  0x43   :  { %370 = vmatpush.msrb.mxu0 %v147_v60  ;;  %392 = vmatpush.msrb.mxu1 %v164_v61  ;;  %v211_v60 = vld [vmem:[%s11701_s4 + $0x400] sm:$0xff]  ;;  %v228_v61 = vld [vmem:[%s11701_s4 + $0x488] sm:$0xff] }
  0x44   :  { %416 = vmatpush.msrb.mxu2 %v179_v62  ;;  %435 = vmatpush.msrb.mxu3 %v199_v63  ;;  %v243_v62 = vld [vmem:[%s11701_s4 + $0x500] sm:$0xff] }
  0x45   :  { %447 = vmatpush.msra.mxu0 %v226_v0  ;;  %351 = vmatmul.f32.gmra.mxu3 %v75_v3  ;;  %v69_v63 = vld [vmem:[%s11719_s24 + $0x40] sm:$0xff]  ;;  %v71_v0 = vld [vmem:[%s11719_s24 + $0x50] sm:$0xff]  ;;  %v80_v3 = vld [vmem:[%s11719_s24 + $0x98] sm:$0xff] }
  0x46   :  { %493 = vmatpush.msra.mxu2 %v258_v1  ;;  %282 = vmatmul.f32.gmra.mxu0 %v72_v2  ;;  %v227_v1 = vld [vmem:[%s11701_s4 + $0x480] sm:$0xff]  ;;  %v70_v2 = vld [vmem:[%s11719_s24 + $0x48] sm:$0xff] }
  0x47   :  { %393 = vmatpush.msrb.mxu1 %v163_v4  ;;  %436 = vmatpush.msrb.mxu3 %v198_v5 }
  0x48   :  { %448 = vmatpush.msra.mxu0 %v225_v6  ;;  %494 = vmatpush.msra.mxu2 %v257_v8 }
  0x49   :  { %470 = vmatpush.msra.mxu1 %v242_v7  ;;  %437 = vmatpush.msrb.mxu3 %v197_v10 }
  0x4a   :  { %305 = vmatmul.f32.gmra.mxu1 %v73_v9  ;;  %449 = vmatpush.msra.mxu0 %v224_v11 }
  0x4b   :  { %471 = vmatpush.msra.mxu1 %v241_v12  ;;  %495 = vmatpush.msra.mxu2 %v256_v13 }
  0x4c   :  { %438 = vmatpush.msrb.mxu3 %v196_v14  ;;  %450 = vmatpush.msra.mxu0 %v223_v15 }
  0x4d   :  { %472 = vmatpush.msra.mxu1 %v240_v16  ;;  %496 = vmatpush.msra.mxu2 %v255_v17 }
  0x4e   :  { %417 = vmatmul.f32.vlgmr.msrb.gmra.mxu2 %v67_v18  ;;  %439 = vmatpush.msrb.mxu3 %v195_v19 }
  0x4f   :  { %451 = vmatpush.msra.mxu0 %v222_v20  ;;  %473 = vmatpush.msra.mxu1 %v239_v21 }
  0x50   :  { %497 = vmatpush.msra.mxu2 %v254_v22  ;;  %371 = vmatmul.f32.vlgmr.msrb.gmra.mxu0 %v65_v23 }
  0x51   :  { %440 = vmatmul.f32.vlgmr.msrb.gmra.mxu3 %v68_v24  ;;  %452 = vmatpush.msra.mxu0 %v221_v25 }
  0x52   :  { %474 = vmatpush.msra.mxu1 %v238_v26  ;;  %498 = vmatpush.msra.mxu2 %v253_v27 }
  0x53   :  { %394 = vmatmul.f32.vlgmr.msrb.gmra.mxu1 %v66_v28  ;;  %453 = vmatpush.msra.mxu0 %v220_v29 }
  0x54   :  { %475 = vmatpush.msra.mxu1 %v237_v30  ;;  %499 = vmatpush.msra.mxu2 %v252_v31 }
  0x55   :  { %454 = vmatpush.msra.mxu0 %v219_v32 }
  0x56   :  { %476 = vmatpush.msra.mxu1 %v236_v33  ;;  %500 = vmatpush.msra.mxu2 %v251_v34 }
  0x57   :  { %420 = vmatmul.f32.gmra.mxu2 %v78_v35  ;;  %455 = vmatpush.msra.mxu0 %v218_v36 }
  0x58   :  { %477 = vmatpush.msra.mxu1 %v235_v37  ;;  %501 = vmatpush.msra.mxu2 %v250_v38 }
  0x59   :  { %374 = vmatmul.f32.gmra.mxu0 %v76_v39  ;;  %443 = vmatmul.f32.gmra.mxu3 %v79_v40 }
  0x5a   :  { %456 = vmatpush.msra.mxu0 %v217_v41  ;;  %478 = vmatpush.msra.mxu1 %v234_v42 }
  0x5b   :  { %502 = vmatpush.msra.mxu2 %v249_v43  ;;  %397 = vmatmul.f32.gmra.mxu1 %v77_v44 }
  0x5c   :  { %457 = vmatpush.msra.mxu0 %v216_v45  ;;  %479 = vmatpush.msra.mxu1 %v233_v46 }
  0x5d   :  { %503 = vmatpush.msra.mxu2 %v248_v47 }
  0x5e   :  { %458 = vmatpush.msra.mxu0 %v215_v48  ;;  %480 = vmatpush.msra.mxu1 %v232_v49 }
  0x5f   :  { %504 = vmatpush.msra.mxu2 %v247_v50 }
  0x60   :  { %459 = vmatpush.msra.mxu0 %v214_v51  ;;  %481 = vmatpush.msra.mxu1 %v231_v52 }
  0x61   :  { %505 = vmatpush.msra.mxu2 %v246_v53 }
  0x62   :  { %460 = vmatpush.msra.mxu0 %v213_v54  ;;  %482 = vmatpush.msra.mxu1 %v230_v55 }
  0x63   :  { %506 = vmatpush.msra.mxu2 %v245_v56 }
  0x64   :  { %461 = vmatpush.msra.mxu0 %v212_v57  ;;  %483 = vmatpush.msra.mxu1 %v229_v58 }
  0x65   :  { %507 = vmatpush.msra.mxu2 %v244_v59 }
  0x66   :  { %462 = vmatpush.msra.mxu0 %v211_v60  ;;  %484 = vmatpush.msra.mxu1 %v228_v61 }
  0x67   :  { %508 = vmatpush.msra.mxu2 %v243_v62  ;;  %463 = vmatmul.f32.vlgmr.msra.gmra.mxu0 %v69_v63 }
  0x68   :  { %509 = vmatmul.f32.vlgmr.msra.gmra.mxu2 %v71_v0  ;;  %485 = vmatpush.msra.mxu1 %v227_v1 }
  0x69   :  { %486 = vmatmul.f32.vlgmr.msra.gmra.mxu1 %v70_v2 }
  0x6a   :  { %22 = vsyncpa [#allocation3], 0  ;;  %v82_v4 = vld [vmem:[%s11719_s24 + $0xa8] sm:$0xff]  ;;  %v81_v5 = vld [vmem:[%s11719_s24 + $0xa0] sm:$0xff]  ;;  %vm526_vm0 = vcmask 261120   ;;  %vm622_vm1 = vcmask 64512  }
  0x6b   :  { %v8047_v8 = vld [vmem:[%s11702_s5] ss:$0 sm:$0xff]  ;;  %v521_v10 = vld [vmem:[%s11703_s6 + $0x18] sm:$0xff]  ;;  %v520_v15 = vld [vmem:[%s11703_s6 + $0x10] sm:$0xff]  ;;  %vm658_vm2 = vcmask 130048   ;;  %vm1517_vm10 = vcmask 523264  }
  0x6c   :  { %v7203_v11 = vld [vmem:[%s11703_s6 + $0x118] sm:$0xff]  ;;  %545 = vmatpush.msra.mxu3 %v521_v10  ;;  %v7202_v16 = vld [vmem:[%s11703_s6 + $0x110] sm:$0xff]  ;;  %v519_v19 = vld [vmem:[%s11703_s6 + $0x8] sm:$0xff]  ;;  %s11720_s5 = sld [smem:[#allocation6_spill]]  ;;  %s7179_s1 = sshll.u32 %s11714_s17, 4  ;;  %s7180_s1 = int_to_ptr.hbm [resolvable:$true] %s7179_s1 }
  0x6d   :  { %611 = vmatpush.msrb.mxu0 %v7203_v11  ;;  %8039 = vmatpush.msrb.mxu1 %v7203_v11  ;;  %v7201_v20 = vld [vmem:[%s11703_s6 + $0x108] sm:$0xff]  ;;  %v518_v21 = vld [vmem:[%s11703_s6] sm:$0xff]  ;;  %v7223_v26 = vld [vmem:[%s11703_s6 + $0xb8] sm:$0xff] }
  0x6e   :  { %546 = vmatpush.msra.mxu3 %v520_v15  ;;  %v7200_v22 = vld [vmem:[%s11703_s6 + $0x100] sm:$0xff]  ;;  %v7222_v28 = vld [vmem:[%s11703_s6 + $0xb0] sm:$0xff]  ;;  %v7221_v32 = vld [vmem:[%s11703_s6 + $0xa8] sm:$0xff] }
  0x6f   :  { %466 = vmatmul.f32.gmra.mxu0 %v80_v3  ;;  %8040 = vmatpush.msrb.mxu1 %v7202_v16  ;;  %v7220_v34 = vld [vmem:[%s11703_s6 + $0xa0] sm:$0xff]  ;;  %v7196_v38 = vld [vmem:[%s11703_s6 + $0x98] sm:$0xff]  ;;  %v7195_v39 = vld [vmem:[%s11703_s6 + $0x90] sm:$0xff] }
  0x70   :  { %512 = vmatmul.f32.gmra.mxu2 %v82_v4  ;;  %612 = vmatpush.msrb.mxu0 %v7202_v16  ;;  %v7194_v40 = vld [vmem:[%s11703_s6 + $0x88] sm:$0xff]  ;;  %v7193_v44 = vld [vmem:[%s11703_s6 + $0x80] sm:$0xff]  ;;  %v7216_v1 = vld [vmem:[%s11703_s6 + $0x38] sm:$0xff] }
  0x71   :  { %489 = vmatmul.f32.gmra.mxu1 %v81_v5  ;;  %547 = vmatpush.msra.mxu3 %v519_v19  ;;  %v59_v58 = vld [vmem:[%s11699_s2] sm:$0xff]  ;;  %v7215_v3 = vld [vmem:[%s11703_s6 + $0x30] sm:$0xff]  ;;  %v7214_v5 = vld [vmem:[%s11703_s6 + $0x28] sm:$0xff] }
  0x72   :  { %613 = vmatpush.msrb.mxu0 %v7201_v20  ;;  %8041 = vmatpush.msrb.mxu1 %v7201_v20  ;;  %v8050_v19 = vld [vmem:[%s11704_s7 + $0x5] ss:$0 sm:$0xff] }
  0x73   :  { %548 = vmatpush.msra.mxu3 %v518_v21 }
  0x74   :  { %614 = vmatpush.msrb.mxu0 %v7200_v22  ;;  %8042 = vmatpush.msrb.mxu1 %v7200_v22 }
  0x75   :  { %578 = vmatpush.msrb.mxu3 %v7196_v38 }
  0x76   :  { %766 = vmatpush.msra.mxu0 %v7223_v26 }
  0x77   :  { %579 = vmatpush.msrb.mxu3 %v7195_v39  ;;  %v9277_v39 = vld [vmem:[%s11700_s3 + $0x8] sm:$0xff] }
  0x78   :  { %767 = vmatpush.msra.mxu0 %v7222_v28 }
  0x79   :  { %580 = vmatpush.msrb.mxu3 %v7194_v40 }
  0x7a   :  { %768 = vmatpush.msra.mxu0 %v7221_v32  ;;  %v7228_v32 = vld [vmem:[%s11703_s6 + $0x128] sm:$0xff] }
  0x7b   :  { %581 = vmatpush.msrb.mxu3 %v7193_v44  ;;  %v8053_v44 = vld [vmem:[%s11704_s7 + $0x9] ss:$0 sm:$0xff] }
  0x7c   :  { %769 = vmatpush.msra.mxu0 %v7220_v34 }
  0xb4   :  { %v280_v6 = vpop.f32.mrf.mxu0 }
  0xb5   :  { %v281_v12 = vadd.f32 %v8047_v8, %v280_v6  ;;  %v60_v6 = vld [vmem:[%s11699_s2 + $0x8] sm:$0xff] }
  0xbb   :  { %v303_v7 = vpop.f32.mrf.mxu1 }
  0xbc   :  { %v349_v17 = vpop.f32.mrf.mxu3  ;;  %v304_v18 = vadd.f32 %v303_v7, %v281_v12 }
  0xbd   :  { %v326_v9 = vpop.f32.mrf.mxu2 }
  0xbe   :  { %v327_v24 = vadd.f32 %v326_v9, %v304_v18  ;;  %v7213_v9 = vld [vmem:[%s11703_s6 + $0x20] sm:$0xff] }
  0xc0   :  { %v350_v29 = vadd.f32 %v349_v17, %v327_v24  ;;  %v8051_v24 = vld [vmem:[%s11704_s7 + $0x4] ss:$0 sm:$0xff] }
  0xc3   :  { %v283_v13 = vpop.f32.mrf.mxu0 }
  0xc4   :  { %v284_v25 = vadd.f32 %v8047_v8, %v283_v13  ;;  %v8048_v13 = vld [vmem:[%s11704_s7 + $0x8] ss:$0 sm:$0xff] }
  0xc5   :  { %v329_v23 = vpop.f32.mrf.mxu2 }
  0xc7   :  { %v306_v14 = vpop.f32.mrf.mxu1 }
  0xc8   :  { %v307_v30 = vadd.f32 %v306_v14, %v284_v25  ;;  %v352_v33 = vpop.f32.mrf.mxu3 }
  0xca   :  { %v330_v35 = vadd.f32 %v329_v23, %v307_v30 }
  0xcc   :  { %v353_v41 = vadd.f32 %v352_v33, %v330_v35  ;;  %v7227_v33 = vld [vmem:[%s11703_s6 + $0x120] sm:$0xff] }
  0xcd   :  { %v372_v27 = vpop.f32.mrf.mxu0  ;;  %v9270_v35 = vld [vmem:[%s11700_s3] sm:$0xff] }
  0xce   :  { %v373_v36 = vadd.f32 %v372_v27, %v350_v29  ;;  %v8049_v27 = vld [vmem:[%s11704_s7] ss:$0 sm:$0xff]  ;;  %v7230_v29 = vld [vmem:[%s11703_s6 + $0x138] sm:$0xff] }
  0xd0   :  { %v395_v31 = vpop.f32.mrf.mxu1 }
  0xd1   :  { %v418_v37 = vpop.f32.mrf.mxu2  ;;  %v396_v42 = vadd.f32 %v395_v31, %v373_v36  ;;  %v7229_v31 = vld [vmem:[%s11703_s6 + $0x130] sm:$0xff] }
  0xd3   :  { %v419_v47 = vadd.f32 %v418_v37, %v396_v42 }
  0xd4   :  { %v441_v46 = vpop.f32.mrf.mxu3 }
  0xd5   :  { %v442_v50 = vadd.f32 %v441_v46, %v419_v47 }
  0xd6   :  { %v375_v43 = vpop.f32.mrf.mxu0 }
  0xd7   :  { %v376_v48 = vadd.f32 %v375_v43, %v353_v41 }
  0xd8   :  { %v398_v45 = vpop.f32.mrf.mxu1 }
  0xd9   :  { %v399_v51 = vadd.f32 %v398_v45, %v376_v48 }
  0xda   :  { %v421_v49 = vpop.f32.mrf.mxu2 }
  0xdb   :  { %v422_v55 = vadd.f32 %v421_v49, %v399_v51 }
  0xdc   :  { %v444_v56 = vpop.f32.mrf.mxu3 }
  0xdd   :  { %v445_v60 = vadd.f32 %v444_v56, %v422_v55 }
  0xe4   :  { %v464_v52 = vpop.f32.mrf.mxu0 }
  0xe5   :  { %v465_v53 = vadd.f32 %v464_v52, %v442_v50 }
  0xe6   :  { %v487_v54 = vpop.f32.mrf.mxu1 }
  0xe7   :  { %v488_v57 = vadd.f32 %v487_v54, %v465_v53 }
  0xeb   :  { %v510_v59 = vpop.f32.mrf.mxu2 }
  0xec   :  { %v511_v61 = vadd.f32 %v510_v59, %v488_v57  ;;  %v467_v62 = vpop.f32.mrf.mxu0 }
  0xed   :  { %v468_v0 = vadd.f32 %v467_v62, %v445_v60  ;;  %v7248_v62 = vld [vmem:[%s11703_s6 + $0x58] sm:$0xff] }
  0xee   :  { %v9194_v63 = vadd.f32 %v511_v61, %v59_v58  ;;  %v490_v2 = vpop.f32.mrf.mxu1 }
  0xef   :  { %v491_v4 = vadd.f32 %v490_v2, %v468_v0  ;;  %v7247_v0 = vld [vmem:[%s11703_s6 + $0x50] sm:$0xff]  ;;  %v7245_v2 = vld [vmem:[%s11703_s6 + $0x40] sm:$0xff] }
  0xf0   :  { %7191 = vmatmul.msk.f32.vlgmr.msra.gmra.mxu3 %vm526_vm0, %v9194_v63  ;;  %7205 = vmatmul.msk.f32.vlgmr.msrb.gmra.mxu0 %vm526_vm0, %v9194_v63 }
  0xf1   :  { %733 = vmatpush.msra.mxu3 %v7216_v1  ;;  %v7246_v1 = vld [vmem:[%s11703_s6 + $0x48] sm:$0xff] }
  0xf3   :  { %v513_v7 = vpop.f32.mrf.mxu2  ;;  %734 = vmatpush.msra.mxu3 %v7215_v3 }
  0xf4   :  { %v514_v8 = vadd.f32 %v513_v7, %v491_v4 }
  0xf5   :  { %735 = vmatpush.msra.mxu3 %v7214_v5 }
  0xf6   :  { %v9215_v10 = vadd.f32 %v514_v8, %v60_v6  ;;  %v8052_v6 = vld [vmem:[%s11704_s7 + $0x1] ss:$0 sm:$0xff] }
  0xf7   :  { %736 = vmatpush.msra.mxu3 %v7213_v9 }
  0xf8   :  { %7192 = vmatmul.msk.f32.gmra.mxu3 %vm526_vm0, %v9215_v10  ;;  %7206 = vmatmul.msk.f32.vlgmr.msrb.gmra.mxu1 %vm526_vm0, %v9215_v10 }
  0xf9   :  { %7225 = vmatmul.msk.f32.vlgmr.msra.gmra.mxu0 %vm526_vm0, %v9194_v63 }
 0x100   :  { %7198 = vmatmul.msk.f32.vlgmr.msrb.gmra.mxu3 %vm526_vm0, %v9194_v63 }
 0x101   :  { %7226 = vmatmul.msk.f32.gmra.mxu0 %vm526_vm0, %v9215_v10 }
 0x108   :  { %7199 = vmatmul.msk.f32.gmra.mxu3 %vm526_vm0, %v9215_v10 }
 0x110   :  { %7218 = vmatmul.msk.f32.vlgmr.msra.gmra.mxu3 %vm526_vm0, %v9194_v63 }
 0x118   :  { %7219 = vmatmul.msk.f32.gmra.mxu3 %vm526_vm0, %v9215_v10 }
 0x16d   :  { %v616_v11 = vpop.f32.mrf.mxu0 }
 0x16e   :  { %v617_v17 = vadd.f32 %v8048_v13, %v616_v11  ;;  %v710_v11 = vld [vmem:[%s11705_s8] sm:$0xff] }
 0x173   :  { %v550_v12 = vpop.f32.mrf.mxu3 }
 0x174   :  { %v551_v30 = vadd.f32 %v8049_v27, %v550_v12 }
 0x175   :  { %v619_v14 = vpop.f32.mrf.mxu1 }
 0x176   :  { %v620_v15 = vadd.f32 %v8048_v13, %v619_v14  ;;  %v771_v16 = vpop.f32.mrf.mxu0 }
 0x177   :  { %v772_v22 = vadd.f32 %v8050_v19, %v771_v16 }
 0x178   :  { %701 = vmatpush.msrb.mxu2 %v620_v15 }
 0x17a   :  { %702 = vmatpush.msrb.mxu2 %v617_v17 }
 0x17b   :  { %v553_v18 = vpop.f32.mrf.mxu3 }
 0x17c   :  { %v554_v34 = vadd.f32 %v8049_v27, %v553_v18 }
 0x17e   :  { %v774_v20 = vpop.f32.mrf.mxu0 }
 0x17f   :  { %v775_v21 = vadd.f32 %v8050_v19, %v774_v20 }
 0x181   :  { %7234 = vmatpush.xpose.msk.msra.mxu2 %vm622_vm1, %v775_v21 }
 0x183   :  { %v583_v23 = vpop.f32.mrf.mxu3 }
 0x184   :  { %v584_v28 = vadd.f32 %v8051_v24, %v583_v23 }
 0x185   :  { %7235 = vmatpush.xpose.msk.msra.mxu2 %vm622_vm1, %v772_v22 }
 0x18b   :  { %v586_v25 = vpop.f32.mrf.mxu3 }
 0x18c   :  { %v587_v26 = vadd.f32 %v8051_v24, %v586_v25 }
 0x18e   :  { %7207 = vmatpush.xpose.msk.msra.mxu1 %vm622_vm1, %v587_v26 }
 0x192   :  { %7208 = vmatpush.xpose.msk.msra.mxu1 %vm622_vm1, %v584_v28 }
 0x193   :  { %v738_v5 = vpop.f32.mrf.mxu3 }
 0x194   :  { %v739_v7 = vadd.f32 %v8052_v6, %v738_v5 }
 0x195   :  { %7209 = vmatmul.msk.f32.vlgmr.msra.gmra.mxu1 %vm622_vm1, %v551_v30  ;;  %v7255_v30 = vld [vmem:[%s11703_s6 + $0xd8] sm:$0xff] }
 0x196   :  { %799 = vmatpush.msrb.mxu1 %v7230_v29 }
 0x198   :  { %800 = vmatpush.msrb.mxu1 %v7229_v31  ;;  %v7254_v31 = vld [vmem:[%s11703_s6 + $0xd0] sm:$0xff] }
 0x19a   :  { %801 = vmatpush.msrb.mxu1 %v7228_v32  ;;  %v7253_v32 = vld [vmem:[%s11703_s6 + $0xc8] sm:$0xff] }
 0x19b   :  { %v741_v8 = vpop.f32.mrf.mxu3 }
 0x19c   :  { %802 = vmatpush.msrb.mxu1 %v7227_v33  ;;  %v742_v9 = vadd.f32 %v8052_v6, %v741_v8  ;;  %v7252_v33 = vld [vmem:[%s11703_s6 + $0xc0] sm:$0xff]  ;;  %v8056_v8 = vld [vmem:[%s11704_s7 + $0xa] ss:$0 sm:$0xff] }
 0x19d   :  { %7210 = vmatmul.msk.f32.gmra.mxu1 %vm622_vm1, %v554_v34 }
 0x19e   :  { %948 = vmatpush.msra.mxu1 %v710_v11 }
 0x1a5   :  { %7232 = vmatmul.msk.f32.vlgmr.msrb.gmra.mxu1 %vm526_vm0, %v9194_v63 }
 0x1ad   :  { %7233 = vmatmul.msk.f32.gmra.mxu1 %vm526_vm0, %v9215_v10 }
 0x212   :  { %v652_v36 = vpop.f32.mrf.mxu1 }
 0x213   :  { %v653_v37 = vadd.f32 %v652_v36, %v9270_v35 }
 0x215   :  { %v659_v38 = vsel %vm658_vm2, %v653_v37, -inf }
 0x216   :  { %660 = vmax.xlane.f32.xlu0 %v659_v38 }
 0x21a   :  { %v655_v40 = vpop.f32.mrf.mxu1 }
 0x21b   :  { %v656_v41 = vadd.f32 %v655_v40, %v9277_v39 }
 0x21d   :  { %v662_v42 = vsel %vm658_vm2, %v656_v41, -inf }
 0x21e   :  { %663 = vmax.xlane.f32.xlu0 %v662_v42  ;;  %v7240_v42 = vld [vmem:[%s11705_s8 + $0x8] sm:$0xff] }
 0x21f   :  { %919 = vmatpush.msrb.mxu0 %v7240_v42 }
 0x222   :  { %v804_v43 = vpop.f32.mrf.mxu1 }
 0x223   :  { %v805_v47 = vadd.f32 %v8053_v44, %v804_v43  ;;  %v7262_v43 = vld [vmem:[%s11703_s6 + $0x158] sm:$0xff] }
 0x224   :  { %1044 = vmatpush.msra.mxu0 %v7262_v43 }
 0x22a   :  { %v807_v45 = vpop.f32.mrf.mxu1 }
 0x22b   :  { %v808_v46 = vadd.f32 %v8053_v44, %v807_v45  ;;  %v7261_v44 = vld [vmem:[%s11703_s6 + $0x150] sm:$0xff]  ;;  %v7260_v45 = vld [vmem:[%s11703_s6 + $0x148] sm:$0xff] }
 0x22c   :  { %1045 = vmatpush.msra.mxu0 %v7261_v44 }
 0x22d   :  { %887 = vmatpush.msrb.mxu3 %v808_v46  ;;  %v7259_v46 = vld [vmem:[%s11703_s6 + $0x140] sm:$0xff] }
 0x22e   :  { %1046 = vmatpush.msra.mxu0 %v7260_v45 }
 0x22f   :  { %888 = vmatpush.msrb.mxu3 %v805_v47  ;;  %v7278_v47 = vld [vmem:[%s11703_s6 + $0x78] sm:$0xff] }
 0x230   :  { %1047 = vmatpush.msra.mxu0 %v7259_v46 }
 0x231   :  { %1011 = vmatpush.msra.mxu3 %v7255_v30 }
 0x233   :  { %1012 = vmatpush.msra.mxu3 %v7254_v31 }
 0x235   :  { %1013 = vmatpush.msra.mxu3 %v7253_v32 }
 0x237   :  { %1014 = vmatpush.msra.mxu3 %v7252_v33 }
 0x289   :  { %v661_v48 = vpop.xlane.xlu0 %660 }
 0x28a   :  { %v665_v49 = vsub.f32 %v653_v37, %v661_v48 }
 0x28c   :  { %v667_v50 = vmul.f32 1.442695, %v665_v49  ;;  %v7277_v49 = vld [vmem:[%s11703_s6 + $0x70] sm:$0xff] }
 0x28e   :  { %8164 = vpow2.f32 %v667_v50  ;;  %v7276_v50 = vld [vmem:[%s11703_s6 + $0x68] sm:$0xff] }
 0x291   :  { %v664_v51 = vpop.xlane.xlu0 %663 }
 0x292   :  { %v666_v52 = vsub.f32 %v656_v41, %v664_v51  ;;  %v7275_v51 = vld [vmem:[%s11703_s6 + $0x60] sm:$0xff] }
 0x294   :  { %v8165_v53 = vpop.eup %8164  ;;  %v669_v54 = vmul.f32 1.442695, %v666_v52 }
 0x295   :  { %v671_v55 = vsel %vm658_vm2, %v8165_v53, 0.0 }
 0x296   :  { %8166 = vpow2.f32 %v669_v54  ;;  %672 = vadd.xlane.f32.xlu1 %v671_v55  ;;  %v8055_v54 = vld [vmem:[%s11704_s7 + $0x6] ss:$0 sm:$0xff] }
 0x29c   :  { %v8167_v56 = vpop.eup %8166 }
 0x29d   :  { %v674_v57 = vsel %vm658_vm2, %v8167_v56, 0.0 }
 0x29e   :  { %675 = vadd.xlane.f32.xlu1 %v674_v57 }
 0x309   :  { %v673_v58 = vpop.xlane.xlu1 %672 }
 0x30a   :  { %8168 = vrcp.f32 %v673_v58  ;;  %v8054_v58 = vld [vmem:[%s11704_s7 + $0x2] ss:$0 sm:$0xff] }
 0x310   :  { %v8169_v59 = vpop.eup %8168 }
 0x311   :  { %v679_v60 = vmul.f32 %v8169_v59, %v8165_v53  ;;  %v676_v61 = vpop.xlane.xlu1 %675 }
 0x312   :  { %8170 = vrcp.f32 %v676_v61 }
 0x313   :  { %7211 = vmatmul.msk.f32.vlgmr.msrb.gmra.mxu2 %vm658_vm2, %v679_v60  ;;  %v7285_v60 = vld [vmem:[%s11703_s6 + $0xf8] sm:$0xff] }
 0x314   :  { %978 = vmatpush.msrb.mxu2 %v7248_v62  ;;  %v7284_v62 = vld [vmem:[%s11703_s6 + $0xf0] sm:$0xff] }
 0x316   :  { %979 = vmatpush.msrb.mxu2 %v7247_v0  ;;  %v7283_v0 = vld [vmem:[%s11703_s6 + $0xe8] sm:$0xff] }
 0x318   :  { %v8171_v3 = vpop.eup %8170  ;;  %980 = vmatpush.msrb.mxu2 %v7246_v1  ;;  %v7282_v1 = vld [vmem:[%s11703_s6 + $0xe0] sm:$0xff] }
 0x319   :  { %v680_v4 = vmul.f32 %v8171_v3, %v8167_v56 }
 0x31a   :  { %981 = vmatpush.msrb.mxu2 %v7245_v2 }
 0x31b   :  { %7212 = vmatmul.msk.f32.gmra.mxu2 %vm658_vm2, %v680_v4 }
 0x323   :  { %7236 = vmatmul.msk.f32.vlgmr.msra.gmra.mxu2 %vm622_vm1, %v739_v7 }
 0x32b   :  { %7237 = vmatmul.msk.f32.gmra.mxu2 %vm622_vm1, %v742_v9 }
 0x333   :  { %7250 = vmatmul.msk.f32.vlgmr.msrb.gmra.mxu2 %vm526_vm0, %v9194_v63 }
 0x33b   :  { %7251 = vmatmul.msk.f32.gmra.mxu2 %vm526_vm0, %v9215_v10 }
 0x396   :  { %v704_v12 = vpop.f32.mrf.mxu2 }
 0x397   :  { %7243 = vmatmul.msk.f32.vlgmr.msra.gmra.mxu1 %vm622_vm1, %v704_v12 }
 0x39e   :  { %v707_v13 = vpop.f32.mrf.mxu2 }
 0x39f   :  { %7244 = vmatmul.msk.f32.gmra.mxu1 %vm622_vm1, %v707_v13  ;;  %v7272_v13 = vld [vmem:[%s11705_s8 + $0x10] sm:$0xff] }
 0x3a6   :  { %v839_v14 = vpop.f32.mrf.mxu2 }
 0x3a7   :  { %v840_v15 = vadd.f32 %v839_v14, %v9270_v35 }
 0x3a9   :  { %v845_v16 = vsel %vm658_vm2, %v840_v15, -inf }
 0x3aa   :  { %846 = vmax.xlane.f32.xlu2 %v845_v16 }
 0x3ae   :  { %v842_v17 = vpop.f32.mrf.mxu2 }
 0x3af   :  { %v843_v18 = vadd.f32 %v842_v17, %v9277_v39 }
 0x3b1   :  { %v848_v19 = vsel %vm658_vm2, %v843_v18, -inf }
 0x3b2   :  { %849 = vmax.xlane.f32.xlu2 %v848_v19 }
 0x3b6   :  { %v983_v57 = vpop.f32.mrf.mxu2 }
 0x3b7   :  { %v984_v61 = vadd.f32 %v8054_v58, %v983_v57 }
 0x3be   :  { %v986_v2 = vpop.f32.mrf.mxu2 }
 0x3bf   :  { %v987_v3 = vadd.f32 %v8054_v58, %v986_v2 }
 0x414   :  { %v9405_v6 = vpop.f32.mrf.mxu1 }
 0x41c   :  { %v9410_v11 = vpop.f32.mrf.mxu1 }
 0x41d   :  { %v847_v20 = vpop.xlane.xlu2 %846 }
 0x41e   :  { %v851_v21 = vsub.f32 %v840_v15, %v847_v20 }
 0x420   :  { %v853_v22 = vmul.f32 1.442695, %v851_v21 }
 0x422   :  { %8172 = vpow2.f32 %v853_v22  ;;  %v8058_v22 = vld [vmem:[%s11704_s7 + $0x7] ss:$0 sm:$0xff] }
 0x425   :  { %v850_v23 = vpop.xlane.xlu2 %849 }
 0x426   :  { %v852_v24 = vsub.f32 %v843_v18, %v850_v23 }
 0x428   :  { %v8173_v25 = vpop.eup %8172  ;;  %v855_v26 = vmul.f32 1.442695, %v852_v24 }
 0x429   :  { %v857_v27 = vsel %vm658_vm2, %v8173_v25, 0.0 }
 0x42a   :  { %8174 = vpow2.f32 %v855_v26  ;;  %858 = vadd.xlane.f32.xlu0 %v857_v27 }
 0x430   :  { %v8175_v28 = vpop.eup %8174 }
 0x431   :  { %v860_v29 = vsel %vm658_vm2, %v8175_v28, 0.0 }
 0x432   :  { %861 = vadd.xlane.f32.xlu1 %v860_v29 }
 0x49d   :  { %v859_v34 = vpop.xlane.xlu0 %858 }
 0x49e   :  { %8176 = vrcp.f32 %v859_v34 }
 0x4a4   :  { %v8177_v36 = vpop.eup %8176 }
 0x4a5   :  { %v865_v37 = vmul.f32 %v8177_v36, %v8173_v25  ;;  %v862_v38 = vpop.xlane.xlu1 %861 }
 0x4a6   :  { %8178 = vrcp.f32 %v862_v38  ;;  %v7291_v38 = vld [vmem:[%s11703_s6 + $0x170] sm:$0xff] }
 0x4a7   :  { %7238 = vmatmul.msk.f32.vlgmr.msrb.gmra.mxu3 %vm658_vm2, %v865_v37  ;;  %v7292_v37 = vld [vmem:[%s11703_s6 + $0x178] sm:$0xff] }
 0x4a8   :  { %1164 = vmatpush.msrb.mxu3 %v7272_v13 }
 0x4ac   :  { %v8179_v40 = vpop.eup %8178 }
 0x4ad   :  { %v866_v41 = vmul.f32 %v8179_v40, %v8175_v28  ;;  %v7290_v40 = vld [vmem:[%s11703_s6 + $0x168] sm:$0xff] }
 0x4af   :  { %7239 = vmatmul.msk.f32.gmra.mxu3 %vm658_vm2, %v866_v41  ;;  %v7289_v41 = vld [vmem:[%s11703_s6 + $0x160] sm:$0xff] }
 0x4b7   :  { %7257 = vmatmul.msk.f32.vlgmr.msra.gmra.mxu3 %vm526_vm0, %v9194_v63 }
 0x4bf   :  { %7258 = vmatmul.msk.f32.gmra.mxu3 %vm526_vm0, %v9215_v10 }
 0x52a   :  { %v890_v48 = vpop.f32.mrf.mxu3 }
 0x52b   :  { %7241 = vmatmul.msk.f32.vlgmr.msrb.gmra.mxu0 %vm622_vm1, %v890_v48 }
 0x52c   :  { %1196 = vmatpush.msrb.mxu0 %v7278_v47 }
 0x52e   :  { %1197 = vmatpush.msrb.mxu0 %v7277_v49 }
 0x530   :  { %1198 = vmatpush.msrb.mxu0 %v7276_v50 }
 0x532   :  { %v893_v52 = vpop.f32.mrf.mxu3  ;;  %1199 = vmatpush.msrb.mxu0 %v7275_v51  ;;  %v8057_v51 = vld [vmem:[%s11704_s7 + $0x3] ss:$0 sm:$0xff] }
 0x533   :  { %7242 = vmatmul.msk.f32.gmra.mxu0 %vm622_vm1, %v893_v52 }
 0x53a   :  { %v1016_v53 = vpop.f32.mrf.mxu3 }
 0x53b   :  { %7264 = vmatmul.msk.f32.vlgmr.msra.gmra.mxu0 %vm526_vm0, %v9194_v63  ;;  %v1017_v59 = vadd.f32 %v8055_v54, %v1016_v53 }
 0x542   :  { %v1019_v55 = vpop.f32.mrf.mxu3 }
 0x543   :  { %v1020_v56 = vadd.f32 %v8055_v54, %v1019_v55  ;;  %7265 = vmatmul.msk.f32.gmra.mxu0 %vm526_vm0, %v9215_v10 }
 0x545   :  { %7266 = vmatpush.xpose.msk.msrb.mxu1 %vm622_vm1, %v1020_v56  ;;  %v8059_v56 = vld [vmem:[%s11704_s7 + $0xb] ss:$0 sm:$0xff] }
 0x549   :  { %7267 = vmatpush.xpose.msk.msrb.mxu1 %vm622_vm1, %v1017_v59 }
 0x54b   :  { %7280 = vmatmul.msk.f32.vlgmr.msrb.gmra.mxu0 %vm526_vm0, %v9194_v63 }
 0x54c   :  { %7268 = vmatmul.msk.f32.vlgmr.msrb.gmra.mxu1 %vm622_vm1, %v984_v61 }
 0x54d   :  { %1229 = vmatpush.msra.mxu1 %v7285_v60 }
 0x54f   :  { %1230 = vmatpush.msra.mxu1 %v7284_v62 }
 0x551   :  { %1231 = vmatpush.msra.mxu1 %v7283_v0 }
 0x553   :  { %1232 = vmatpush.msra.mxu1 %v7282_v1  ;;  %7281 = vmatmul.msk.f32.gmra.mxu0 %vm526_vm0, %v9215_v10 }
 0x554   :  { %7269 = vmatmul.msk.f32.gmra.mxu1 %vm622_vm1, %v987_v3 }
 0x55c   :  { %7287 = vmatmul.msk.f32.vlgmr.msra.gmra.mxu1 %vm526_vm0, %v9194_v63 }
 0x564   :  { %7288 = vmatmul.msk.f32.gmra.mxu1 %vm526_vm0, %v9215_v10 }
 0x5a8   :  { %v9401_v4 = vpop.f32.mrf.mxu0 }
 0x5b0   :  { %v9403_v5 = vpop.f32.mrf.mxu0 }
 0x5b8   :  { %v1049_v7 = vpop.f32.mrf.mxu0 }
 0x5b9   :  { %v1050_v14 = vadd.f32 %v8056_v8, %v1049_v7 }
 0x5c0   :  { %v1052_v9 = vpop.f32.mrf.mxu0 }
 0x5c1   :  { %v1053_v12 = vadd.f32 %v8056_v8, %v1052_v9 }
 0x5c3   :  { %1132 = vmatpush.msra.mxu2 %v1053_v12 }
 0x5c5   :  { %1133 = vmatpush.msra.mxu2 %v1050_v14 }
 0x5c7   :  { %1262 = vmatpush.msrb.mxu2 %v7292_v37 }
 0x5c8   :  { %v1201_v50 = vpop.f32.mrf.mxu0 }
 0x5c9   :  { %v1084_v15 = vpop.f32.mrf.mxu1  ;;  %1263 = vmatpush.msrb.mxu2 %v7291_v38  ;;  %v1202_v52 = vadd.f32 %v8057_v51, %v1201_v50 }
 0x5ca   :  { %v1085_v16 = vadd.f32 %v1084_v15, %v9270_v35 }
 0x5cb   :  { %1264 = vmatpush.msrb.mxu2 %v7290_v40 }
 0x5cc   :  { %v1090_v17 = vsel %vm658_vm2, %v1085_v16, -inf }
 0x5cd   :  { %1091 = vmax.xlane.f32.xlu2 %v1090_v17  ;;  %1265 = vmatpush.msrb.mxu2 %v7289_v41 }
 0x5d0   :  { %v1204_v54 = vpop.f32.mrf.mxu0 }
 0x5d1   :  { %v1087_v18 = vpop.f32.mrf.mxu1  ;;  %v1205_v55 = vadd.f32 %v8057_v51, %v1204_v54 }
 0x5d2   :  { %v1088_v19 = vadd.f32 %v1087_v18, %v9277_v39 }
 0x5d4   :  { %v1093_v20 = vsel %vm658_vm2, %v1088_v19, -inf }
 0x5d5   :  { %1094 = vmax.xlane.f32.xlu0 %v1093_v20 }
 0x5d9   :  { %v1234_v21 = vpop.f32.mrf.mxu1 }
 0x5da   :  { %v1235_v25 = vadd.f32 %v8058_v22, %v1234_v21 }
 0x5e1   :  { %v1237_v23 = vpop.f32.mrf.mxu1 }
 0x5e2   :  { %v1238_v24 = vadd.f32 %v8058_v22, %v1237_v23 }
 0x5e4   :  { %7296 = vmatpush.xpose.msk.msra.mxu3 %vm622_vm1, %v1238_v24 }
 0x5e8   :  { %7297 = vmatpush.xpose.msk.msra.mxu3 %vm622_vm1, %v1235_v25 }
 0x640   :  { %v1092_v26 = vpop.xlane.xlu2 %1091 }
 0x641   :  { %v1096_v27 = vsub.f32 %v1085_v16, %v1092_v26 }
 0x643   :  { %v1098_v28 = vmul.f32 1.442695, %v1096_v27  ;;  %v951_v27 = vadd.f32 %v9405_v6, %v9401_v4 }
 0x645   :  { %8180 = vpow2.f32 %v1098_v28 }
 0x648   :  { %v1095_v29 = vpop.xlane.xlu0 %1094 }
 0x649   :  { %v1097_v30 = vsub.f32 %v1088_v19, %v1095_v29  ;;  %v8060_v29 = vld [vmem:[%s11709_s12 + $0x4] ss:$0 sm:$0xff] }
 0x64b   :  { %v8181_v31 = vpop.eup %8180  ;;  %v1100_v32 = vmul.f32 1.442695, %v1097_v30 }
 0x64c   :  { %v1102_v33 = vsel %vm658_vm2, %v8181_v31, 0.0 }
 0x64d   :  { %8182 = vpow2.f32 %v1100_v32  ;;  %1103 = vadd.xlane.f32.xlu1 %v1102_v33  ;;  %v954_v33 = vadd.f32 %v9410_v11, %v9403_v5 }
 0x653   :  { %v8183_v34 = vpop.eup %8182 }
 0x654   :  { %v1105_v36 = vsel %vm658_vm2, %v8183_v34, 0.0 }
 0x655   :  { %1106 = vadd.xlane.f32.xlu2 %v1105_v36 }
 0x6c0   :  { %v1104_v42 = vpop.xlane.xlu1 %1103 }
 0x6c1   :  { %8184 = vrcp.f32 %v1104_v42  ;;  %v8452_v42 = vmov 32.0  }
 0x6c7   :  { %v8185_v43 = vpop.eup %8184 }
 0x6c8   :  { %v1110_v44 = vmul.f32 %v8185_v43, %v8181_v31  ;;  %v1107_v45 = vpop.xlane.xlu2 %1106 }
 0x6c9   :  { %8186 = vrcp.f32 %v1107_v45 }
 0x6ca   :  { %7270 = vmatmul.msk.f32.vlgmr.msra.gmra.mxu2 %vm658_vm2, %v1110_v44 }
 0x6cf   :  { %v8187_v46 = vpop.eup %8186 }
 0x6d0   :  { %v1111_v47 = vmul.f32 %v8187_v46, %v8183_v34 }
 0x6d2   :  { %7271 = vmatmul.msk.f32.gmra.mxu2 %vm658_vm2, %v1111_v47 }
 0x6da   :  { %7294 = vmatmul.msk.f32.vlgmr.msrb.gmra.mxu2 %vm526_vm0, %v9194_v63 }
 0x6e2   :  { %7295 = vmatmul.msk.f32.gmra.mxu2 %vm526_vm0, %v9215_v10 }
 0x74d   :  { %v1135_v48 = vpop.f32.mrf.mxu2 }
 0x74e   :  { %7273 = vmatmul.msk.f32.vlgmr.msrb.gmra.mxu3 %vm622_vm1, %v1135_v48 }
 0x755   :  { %v1138_v49 = vpop.f32.mrf.mxu2 }
 0x756   :  { %7274 = vmatmul.msk.f32.gmra.mxu3 %vm622_vm1, %v1138_v49 }
 0x75d   :  { %v1267_v53 = vpop.f32.mrf.mxu2 }
 0x75e   :  { %7298 = vmatmul.msk.f32.vlgmr.msra.gmra.mxu3 %vm622_vm1, %v1202_v52  ;;  %v1268_v59 = vadd.f32 %v8059_v56, %v1267_v53 }
 0x765   :  { %v1270_v57 = vpop.f32.mrf.mxu2 }
 0x766   :  { %v1271_v58 = vadd.f32 %v8059_v56, %v1270_v57  ;;  %7299 = vmatmul.msk.f32.gmra.mxu3 %vm622_vm1, %v1205_v55  ;;  %v1468_v55 = vld [vmem:[%s11706_s9 + $0x18] sm:$0xff]  ;;  %v1467_v56 = vld [vmem:[%s11706_s9 + $0x10] sm:$0xff]  ;;  %v1466_v57 = vld [vmem:[%s11706_s9 + $0x8] sm:$0xff] }
 0x767   :  { %1491 = vmatpush.msra.mxu2 %v1468_v55 }
 0x768   :  { %1350 = vmatpush.msra.mxu0 %v1271_v58  ;;  %v1465_v58 = vld [vmem:[%s11706_s9] sm:$0xff] }
 0x769   :  { %1492 = vmatpush.msra.mxu2 %v1467_v56 }
 0x76a   :  { %1351 = vmatpush.msra.mxu0 %v1268_v59 }
 0x76b   :  { %1493 = vmatpush.msra.mxu2 %v1466_v57 }
 0x76d   :  { %1494 = vmatpush.msra.mxu2 %v1465_v58  ;;  %v7317_v58 = vld [vmem:[%s11703_s6 + $0x198] sm:$0xff] }
 0x76e   :  { %1635 = vmatpush.msrb.mxu0 %v7317_v58  ;;  %v7357_v58 = vld [vmem:[%s11703_s6 + $0x2a8] sm:$0xff] }
 0x7d1   :  { %v1166_v60 = vpop.f32.mrf.mxu3 }
 0x7d2   :  { %v1172_v28 = vadd.f32 %v1166_v60, %v951_v27 }
 0x7d9   :  { %v1169_v61 = vpop.f32.mrf.mxu3 }
 0x7da   :  { %v1173_v36 = vadd.f32 %v1169_v61, %v954_v33  ;;  %v1505_v33 = vld [vmem:[%s11707_s10 + $0x8] sm:$0xff] }
 0x7e1   :  { %v1302_v62 = vpop.f32.mrf.mxu3 }
 0x7e2   :  { %v1303_v0 = vadd.f32 %v1302_v62, %v9270_v35  ;;  %v1511_v62 = vld [vmem:[%s11707_s10 + $0x38] sm:$0xff] }
 0x7e3   :  { %1532 = vmatpush.msrb.mxu3 %v1511_v62  ;;  %v7323_v62 = vld [vmem:[%s11703_s6 + $0x210] sm:$0xff] }
 0x7e4   :  { %v1308_v1 = vsel %vm658_vm2, %v1303_v0, -inf }
 0x7e5   :  { %1309 = vmax.xlane.f32.xlu0 %v1308_v1  ;;  %v1509_v1 = vld [vmem:[%s11707_s10 + $0x28] sm:$0xff] }
 0x7e9   :  { %v1305_v2 = vpop.f32.mrf.mxu3 }
 0x7ea   :  { %v1306_v3 = vadd.f32 %v1305_v2, %v9277_v39  ;;  %v7302_v39 = vld [vmem:[%s11705_s8 + $0x18] sm:$0xff] }
 0x7eb   :  { %1382 = vmatpush.msrb.mxu1 %v7302_v39  ;;  %v8061_v39 = vld [vmem:[%s11709_s12] ss:$0 sm:$0xff] }
 0x7ec   :  { %v1311_v7 = vsel %vm658_vm2, %v1306_v3, -inf }
 0x7ed   :  { %1312 = vmax.xlane.f32.xlu1 %v1311_v7  ;;  %v1508_v7 = vld [vmem:[%s11707_s10 + $0x20] sm:$0xff] }
 0x858   :  { %v1310_v8 = vpop.xlane.xlu0 %1309 }
 0x859   :  { %v1314_v9 = vsub.f32 %v1303_v0, %v1310_v8  ;;  %v1510_v0 = vld [vmem:[%s11707_s10 + $0x30] sm:$0xff] }
 0x85a   :  { %1533 = vmatpush.msrb.mxu3 %v1510_v0  ;;  %v7330_v0 = vld [vmem:[%s11703_s6 + $0x290] sm:$0xff] }
 0x85b   :  { %v1316_v12 = vmul.f32 1.442695, %v1314_v9 }
 0x85c   :  { %1534 = vmatpush.msrb.mxu3 %v1509_v1  ;;  %v7315_v1 = vld [vmem:[%s11703_s6 + $0x188] sm:$0xff] }
 0x85d   :  { %8188 = vpow2.f32 %v1316_v12  ;;  %v1507_v12 = vld [vmem:[%s11707_s10 + $0x18] sm:$0xff] }
 0x85e   :  { %1535 = vmatpush.msrb.mxu3 %v1508_v7  ;;  %v7314_v7 = vld [vmem:[%s11703_s6 + $0x180] sm:$0xff] }
 0x860   :  { %v1313_v13 = vpop.xlane.xlu1 %1312  ;;  %1536 = vmatpush.msrb.mxu3 %v1507_v12 }
 0x861   :  { %v1315_v14 = vsub.f32 %v1306_v3, %v1313_v13 }
 0x863   :  { %v8189_v15 = vpop.eup %8188  ;;  %v1318_v16 = vmul.f32 1.442695, %v1315_v14 }
 0x864   :  { %v1320_v17 = vsel %vm658_vm2, %v8189_v15, 0.0 }
 0x865   :  { %8190 = vpow2.f32 %v1318_v16  ;;  %1321 = vadd.xlane.f32.xlu2 %v1320_v17 }
 0x86b   :  { %v8191_v35 = vpop.eup %8190 }
 0x86c   :  { %v1323_v18 = vsel %vm658_vm2, %v8191_v35, 0.0 }
 0x86d   :  { %1324 = vadd.xlane.f32.xlu0 %v1323_v18 }
 0x8d8   :  { %v1322_v19 = vpop.xlane.xlu2 %1321 }
 0x8d9   :  { %8192 = vrcp.f32 %v1322_v19 }
 0x8df   :  { %v8193_v20 = vpop.eup %8192 }
 0x8e0   :  { %v1328_v21 = vmul.f32 %v8193_v20, %v8189_v15  ;;  %v1325_v22 = vpop.xlane.xlu0 %1324 }
 0x8e1   :  { %8194 = vrcp.f32 %v1325_v22  ;;  %v8062_v22 = vld [vmem:[%s11709_s12 + $0x1] ss:$0 sm:$0xff] }
 0x8e2   :  { %7300 = vmatmul.msk.f32.vlgmr.msra.gmra.mxu0 %vm658_vm2, %v1328_v21  ;;  %8196 = vrcp.f32 %v8452_v42  ;;  %v8064_v42 = vld [vmem:[%s11709_s12 + $0x5] ss:$0 sm:$0xff] }
 0x8e7   :  { %v8195_v23 = vpop.eup %8194 }
 0x8e8   :  { %v1329_v24 = vmul.f32 %v8195_v23, %v8191_v35  ;;  %v8197_v43 = vpop.eup %8196 }
 0x8e9   :  { %v1411_v44 = vmul.f32 32.0, %v8197_v43  ;;  %vm1415_vm3 = vweird.f32 %v8197_v43 }
 0x8ea   :  { %7301 = vmatmul.msk.f32.gmra.mxu0 %vm658_vm2, %v1329_v24 }
 0x8eb   :  { %v1412_v45 = vsub.f32 1.0, %v1411_v44 }
 0x8ed   :  { %v1413_v5 = vmul.f32 %v8197_v43, %v1412_v45 }
 0x8ef   :  { %v1414_v11 = vadd.f32 %v8197_v43, %v1413_v5 }
 0x95f   :  { %v1353_v25 = vpop.f32.mrf.mxu0 }
 0x960   :  { %7303 = vmatmul.msk.f32.vlgmr.msrb.gmra.mxu1 %vm622_vm1, %v1353_v25 }
 0x967   :  { %v1356_v26 = vpop.f32.mrf.mxu0 }
 0x968   :  { %7304 = vmatmul.msk.f32.gmra.mxu1 %vm622_vm1, %v1356_v26 }
 0x9dd   :  { %v1384_v30 = vpop.f32.mrf.mxu1 }
 0x9de   :  { %v1390_v31 = vadd.f32 %v1384_v30, %v1172_v28 }
 0x9e0   :  { %v1397_v32 = vadd.f32 %v8060_v29, %v1390_v31 }
 0x9e2   :  { %v1399_v34 = vadd.f32 %v1397_v32, %v9194_v63  ;;  %v9478_v63 = vsel %vm1415_vm3, %v8197_v43, %v1414_v11  ;;  %v1506_v32 = vld [vmem:[%s11707_s10 + $0x10] sm:$0xff] }
 0x9e3   :  { %1537 = vmatpush.msrb.mxu3 %v1506_v32  ;;  %v8065_v32 = vld [vmem:[%s11709_s12 + $0x2] ss:$0 sm:$0xff] }
 0x9e4   :  { %v1404_v37 = vsel %vm526_vm0, %v1399_v34, 0.0 }
 0x9e5   :  { %1405 = vadd.xlane.f32.xlu1 %v1404_v37  ;;  %v1387_v38 = vpop.f32.mrf.mxu1  ;;  %1538 = vmatpush.msrb.mxu3 %v1505_v33 }
 0x9e6   :  { %v1391_v40 = vadd.f32 %v1387_v38, %v1173_v36  ;;  %v8063_v36 = vld [vmem:[%s11708_s11] ss:$0 sm:$0xff] }
 0x9e8   :  { %v1398_v4 = vadd.f32 %v8060_v29, %v1391_v40 }
 0x9ea   :  { %v1400_v6 = vadd.f32 %v1398_v4, %v9215_v10 }
 0x9ec   :  { %v1407_v41 = vsel %vm526_vm0, %v1400_v6, 0.0 }
 0x9ed   :  { %1408 = vadd.xlane.f32.xlu2 %v1407_v41 }
 0xa58   :  { %v1406_v46 = vpop.xlane.xlu1 %1405 }
 0xa59   :  { %v1417_v47 = vmul.f32 %v9478_v63, %v1406_v46 }
 0xa5b   :  { %v1419_v48 = vsub.f32 %v1399_v34, %v1417_v47  ;;  %v1504_v34 = vld [vmem:[%s11707_s10] sm:$0xff] }
 0xa5c   :  { %1539 = vmatpush.msrb.mxu3 %v1504_v34 }
 0xa5d   :  { %v1421_v49 = vmul.f32 %v1419_v48, %v1419_v48 }
 0xa5f   :  { %v1423_v10 = vsel %vm526_vm0, %v1421_v49, 0.0 }
 0xa60   :  { %1424 = vadd.xlane.f32.xlu0 %v1423_v10  ;;  %v1409_v50 = vpop.xlane.xlu2 %1408 }
 0xa61   :  { %v1418_v51 = vmul.f32 %v9478_v63, %v1409_v50 }
 0xa63   :  { %v1420_v52 = vsub.f32 %v1400_v6, %v1418_v51 }
 0xa65   :  { %v1422_v53 = vmul.f32 %v1420_v52, %v1420_v52 }
 0xa67   :  { %v1426_v54 = vsel %vm526_vm0, %v1422_v53, 0.0 }
 0xa68   :  { %1427 = vadd.xlane.f32.xlu1 %v1426_v54 }
 0xad3   :  { %v1425_v59 = vpop.xlane.xlu0 %1424 }
 0xad4   :  { %v1429_v60 = vmul.f32 %v1425_v59, %v9478_v63  ;;  %v7324_v59 = vld [vmem:[%s11703_s6 + $0x218] sm:$0xff] }
 0xad5   :  { %1668 = vmatpush.msra.mxu1 %v7324_v59  ;;  %v7356_v59 = vld [vmem:[%s11703_s6 + $0x2a0] sm:$0xff] }
 0xad6   :  { %v1431_v61 = vadd.f32 1e-05, %v1429_v60  ;;  %v7331_v60 = vld [vmem:[%s11703_s6 + $0x298] sm:$0xff] }
 0xad7   :  { %1701 = vmatpush.msrb.mxu2 %v7331_v60  ;;  %1669 = vmatpush.msra.mxu1 %v7323_v62 }
 0xad8   :  { %8198 = vrsqrt.f32 %v1431_v61  ;;  %vm1439_vm5 = vweird.f32 %v1431_v61 }
 0xad9   :  { %1702 = vmatpush.msrb.mxu2 %v7330_v0  ;;  %v8071_v0 = vld [vmem:[%s11704_s7 + $0x11] ss:$0 sm:$0xff] }
 0xadb   :  { %v1428_v2 = vpop.xlane.xlu1 %1427 }
 0xadc   :  { %v1430_v3 = vmul.f32 %v1428_v2, %v9478_v63  ;;  %v7322_v2 = vld [vmem:[%s11703_s6 + $0x208] sm:$0xff] }
 0xadd   :  { %1670 = vmatpush.msra.mxu1 %v7322_v2 }
 0xade   :  { %v8199_v8 = vpop.eup %8198  ;;  %v1432_v9 = vadd.f32 1e-05, %v1430_v3  ;;  %v7329_v3 = vld [vmem:[%s11703_s6 + $0x288] sm:$0xff] }
 0xadf   :  { %v1434_v13 = vmul.f32 %v8199_v8, %v1431_v61  ;;  %vm1440_vm4 = vweird.f32 %v8199_v8  ;;  %v7316_v61 = vld [vmem:[%s11703_s6 + $0x190] sm:$0xff]  ;;  %1703 = vmatpush.msrb.mxu2 %v7329_v3 }
 0xae0   :  { %8200 = vrsqrt.f32 %v1432_v9  ;;  %vm1441_vm6 = vmor %vm1439_vm5, %vm1440_vm4  ;;  %vm1449_vm8 = vweird.f32 %v1432_v9  ;;  %1636 = vmatpush.msrb.mxu0 %v7316_v61 }
 0xae1   :  { %v1435_v14 = vmul.f32 %v8199_v8, %v1434_v13 }
 0xae2   :  { %1637 = vmatpush.msrb.mxu0 %v7315_v1 }
 0xae3   :  { %v1436_v15 = vmul.f32 0.5, %v1435_v14 }
 0xae4   :  { %1638 = vmatpush.msrb.mxu0 %v7314_v7 }
 0xae5   :  { %v1437_v16 = vsub.f32 1.5, %v1436_v15  ;;  %v7345_v15 = vld [vmem:[%s11703_s6 + $0x1b8] sm:$0xff] }
 0xae6   :  { %v8201_v17 = vpop.eup %8200 }
 0xae7   :  { %v1438_v35 = vmul.f32 %v8199_v8, %v1437_v16  ;;  %v1444_v18 = vmul.f32 %v8201_v17, %v1432_v9  ;;  %vm1450_vm7 = vweird.f32 %v8201_v17  ;;  %v7328_v9 = vld [vmem:[%s11703_s6 + $0x280] sm:$0xff]  ;;  %v7352_v16 = vld [vmem:[%s11703_s6 + $0x238] sm:$0xff] }
 0xae8   :  { %vm1451_vm9 = vmor %vm1449_vm8, %vm1450_vm7  ;;  %1704 = vmatpush.msrb.mxu2 %v7328_v9 }
 0xae9   :  { %v1442_v19 = vsel %vm1441_vm6, %v8199_v8, %v1438_v35  ;;  %v1445_v20 = vmul.f32 %v8201_v17, %v1444_v18  ;;  %v7321_v8 = vld [vmem:[%s11703_s6 + $0x200] sm:$0xff]  ;;  %v7351_v35 = vld [vmem:[%s11703_s6 + $0x230] sm:$0xff] }
 0xaea   :  { %v1453_v21 = vmul.f32 %v1442_v19, %v1419_v48  ;;  %1671 = vmatpush.msra.mxu1 %v7321_v8  ;;  %v7350_v19 = vld [vmem:[%s11703_s6 + $0x228] sm:$0xff]  ;;  %v9683_v8 = vld [vmem:[%s11700_s3] sm:$0xff] }
 0xaeb   :  { %v1446_v23 = vmul.f32 0.5, %v1445_v20 }
 0xaec   :  { %v1458_v24 = vmul.f32 %v8061_v39, %v1453_v21  ;;  %1822 = vmatpush.msrb.mxu1 %v7345_v15  ;;  %v7342_v21 = vld [vmem:[%s11703_s6 + $0x1a0] sm:$0xff] }
 0xaed   :  { %v1447_v25 = vsub.f32 1.5, %v1446_v23 }
 0xaee   :  { %v1463_v26 = vadd.f32 %v8062_v22, %v1458_v24 }
 0xaef   :  { %v1448_v27 = vmul.f32 %v8201_v17, %v1447_v25 }
 0xaf0   :  { %7307 = vmatmul.msk.f32.vlgmr.msra.gmra.mxu2 %vm526_vm0, %v1463_v26 }
 0xaf1   :  { %v1452_v28 = vsel %vm1451_vm9, %v8201_v17, %v1448_v27  ;;  %v7344_v17 = vld [vmem:[%s11703_s6 + $0x1b0] sm:$0xff]  ;;  %1855 = vmatpush.msra.mxu2 %v7352_v16 }
 0xaf2   :  { %v1454_v29 = vmul.f32 %v1452_v28, %v1420_v52  ;;  %1823 = vmatpush.msrb.mxu1 %v7344_v17 }
 0xaf3   :  { %1856 = vmatpush.msra.mxu2 %v7351_v35  ;;  %v8072_v35 = vld [vmem:[%s11704_s7 + $0x15] ss:$0 sm:$0xff] }
 0xaf4   :  { %v1459_v30 = vmul.f32 %v8061_v39, %v1454_v29  ;;  %v7343_v39 = vld [vmem:[%s11703_s6 + $0x1a8] sm:$0xff] }
 0xaf5   :  { %1824 = vmatpush.msrb.mxu1 %v7343_v39  ;;  %1857 = vmatpush.msra.mxu2 %v7350_v19 }
 0xaf6   :  { %v1464_v31 = vadd.f32 %v8062_v22, %v1459_v30  ;;  %v7349_v22 = vld [vmem:[%s11703_s6 + $0x220] sm:$0xff] }
 0xaf7   :  { %1825 = vmatpush.msrb.mxu1 %v7342_v21  ;;  %1858 = vmatpush.msra.mxu2 %v7349_v22 }
 0xaf8   :  { %7308 = vmatmul.msk.f32.gmra.mxu2 %vm526_vm0, %v1464_v31 }
 0xb73   :  { %v1496_v37 = vpop.f32.mrf.mxu2 }
 0xb74   :  { %v1497_v38 = vadd.f32 %v8063_v36, %v1496_v37 }
 0xb76   :  { %v1502_v40 = vmax.f32 %v1497_v38, 0.0 }
 0xb78   :  { %7310 = vmatmul.msk.f32.vlgmr.msrb.gmra.mxu3 %vm1517_vm10, %v1502_v40 }
 0xb7b   :  { %v1499_v4 = vpop.f32.mrf.mxu2 }
 0xb7c   :  { %v1500_v6 = vadd.f32 %v8063_v36, %v1499_v4  ;;  %v8066_v36 = vld [vmem:[%s11709_s12 + $0x3] ss:$0 sm:$0xff] }
 0xb7e   :  { %v1503_v41 = vmax.f32 %v1500_v6, 0.0 }
 0xb80   :  { %7311 = vmatmul.msk.f32.gmra.mxu3 %vm1517_vm10, %v1503_v41 }
 0xbfb   :  { %v1541_v43 = vpop.f32.mrf.mxu3 }
 0xbfc   :  { %v1542_v44 = vadd.f32 %v8064_v42, %v1541_v43 }
 0xbfe   :  { %v1547_v45 = vadd.f32 %v1542_v44, %v1463_v26 }
 0xc00   :  { %v1553_v5 = vsel %vm526_vm0, %v1547_v45, 0.0 }
 0xc01   :  { %1554 = vadd.xlane.f32.xlu2 %v1553_v5 }
 0xc03   :  { %v1544_v11 = vpop.f32.mrf.mxu3 }
 0xc04   :  { %v1545_v46 = vadd.f32 %v8064_v42, %v1544_v11  ;;  %v8068_v11 = vld [vmem:[%s11704_s7 + $0x10] ss:$0 sm:$0xff] }
 0xc06   :  { %v1548_v47 = vadd.f32 %v1545_v46, %v1464_v31 }
 0xc08   :  { %v1556_v48 = vsel %vm526_vm0, %v1548_v47, 0.0 }
 0xc09   :  { %1557 = vadd.xlane.f32.xlu0 %v1556_v48 }
 0xc74   :  { %v1555_v49 = vpop.xlane.xlu2 %1554 }
 0xc75   :  { %v1559_v10 = vmul.f32 %v1555_v49, %v9478_v63 }
 0xc77   :  { %v9541_v50 = vsub.f32 %v1547_v45, %v1559_v10  ;;  %v8067_v10 = vld [vmem:[%s11704_s7 + $0xc] ss:$0 sm:$0xff] }
 0xc79   :  { %v1563_v51 = vmul.f32 %v9541_v50, %v9541_v50 }
 0xc7b   :  { %v1565_v52 = vsel %vm526_vm0, %v1563_v51, 0.0  ;;  %v7359_v51 = vld [vmem:[%s11703_s6 + $0x2b8] sm:$0xff] }
 0xc7c   :  { %v1558_v53 = vpop.xlane.xlu0 %1557  ;;  %1566 = vadd.xlane.f32.xlu1 %v1565_v52  ;;  %v8069_v52 = vld [vmem:[%s11704_s7 + $0x14] ss:$0 sm:$0xff] }
 0xc7d   :  { %v1560_v54 = vmul.f32 %v1558_v53, %v9478_v63 }
 0xc7f   :  { %v9547_v55 = vsub.f32 %v1548_v47, %v1560_v54 }
 0xc81   :  { %v1564_v56 = vmul.f32 %v9547_v55, %v9547_v55 }
 0xc83   :  { %v1568_v57 = vsel %vm526_vm0, %v1564_v56, 0.0  ;;  %v7358_v56 = vld [vmem:[%s11703_s6 + $0x2b0] sm:$0xff] }
 0xc84   :  { %1569 = vadd.xlane.f32.xlu2 %v1568_v57 }
 0xcef   :  { %v1567_v12 = vpop.xlane.xlu1 %1566 }
 0xcf0   :  { %v1571_v13 = vmul.f32 %v1567_v12, %v9478_v63 }
 0xcf2   :  { %v1573_v14 = vadd.f32 1e-05, %v1571_v13 }
 0xcf4   :  { %8202 = vrsqrt.f32 %v1573_v14  ;;  %vm1581_vm12 = vweird.f32 %v1573_v14 }
 0xcf7   :  { %v1570_v18 = vpop.xlane.xlu2 %1569 }
 0xcf8   :  { %v1572_v20 = vmul.f32 %v1570_v18, %v9478_v63 }
 0xcfa   :  { %v8203_v23 = vpop.eup %8202  ;;  %v1574_v24 = vadd.f32 1e-05, %v1572_v20 }
 0xcfb   :  { %v1576_v25 = vmul.f32 %v8203_v23, %v1573_v14  ;;  %vm1582_vm11 = vweird.f32 %v8203_v23  ;;  %v9690_v14 = vld [vmem:[%s11700_s3 + $0x8] sm:$0xff] }
 0xcfc   :  { %8204 = vrsqrt.f32 %v1574_v24  ;;  %vm1583_vm13 = vmor %vm1581_vm12, %vm1582_vm11  ;;  %vm1591_vm15 = vweird.f32 %v1574_v24 }
 0xcfd   :  { %v1577_v26 = vmul.f32 %v8203_v23, %v1576_v25 }
 0xcff   :  { %v1578_v27 = vmul.f32 0.5, %v1577_v26 }
 0xd01   :  { %v1579_v28 = vsub.f32 1.5, %v1578_v27 }
 0xd02   :  { %v8205_v29 = vpop.eup %8204 }
 0xd03   :  { %v1580_v30 = vmul.f32 %v8203_v23, %v1579_v28  ;;  %v1586_v31 = vmul.f32 %v8205_v29, %v1574_v24  ;;  %vm1592_vm14 = vweird.f32 %v8205_v29 }
 0xd04   :  { %vm1593_vm3 = vmor %vm1591_vm15, %vm1592_vm14 }
 0xd05   :  { %v1584_v33 = vsel %vm1583_vm13, %v8203_v23, %v1580_v30  ;;  %v1587_v34 = vmul.f32 %v8205_v29, %v1586_v31 }
 0xd06   :  { %v1595_v37 = vmul.f32 %v1584_v33, %v9541_v50 }
 0xd07   :  { %v1588_v38 = vmul.f32 0.5, %v1587_v34  ;;  %v7377_v34 = vld [vmem:[%s11703_s6 + $0x1d8] sm:$0xff] }
 0xd08   :  { %v1600_v40 = vmul.f32 %v8065_v32, %v1595_v37  ;;  %v7375_v37 = vld [vmem:[%s11703_s6 + $0x1c8] sm:$0xff] }
 0xd09   :  { %v1589_v4 = vsub.f32 1.5, %v1588_v38  ;;  %v7374_v38 = vld [vmem:[%s11703_s6 + $0x1c0] sm:$0xff] }
 0xd0a   :  { %v9621_v6 = vadd.f32 %v8066_v36, %v1600_v40 }
 0xd0b   :  { %v1590_v41 = vmul.f32 %v8205_v29, %v1589_v4 }
 0xd0c   :  { %7319 = vmatmul.msk.f32.vlgmr.msrb.gmra.mxu0 %vm526_vm0, %v9621_v6  ;;  %7326 = vmatmul.msk.f32.vlgmr.msra.gmra.mxu1 %vm526_vm0, %v9621_v6 }
 0xd0d   :  { %v1594_v42 = vsel %vm1593_vm3, %v8205_v29, %v1590_v41  ;;  %7333 = vmatmul.msk.f32.vlgmr.msrb.gmra.mxu2 %vm526_vm0, %v9621_v6 }
 0xd0e   :  { %v1596_v43 = vmul.f32 %v1594_v42, %v9547_v55  ;;  %v8070_v42 = vld [vmem:[%s11704_s7 + $0xd] ss:$0 sm:$0xff] }
 0xd10   :  { %v1601_v44 = vmul.f32 %v8065_v32, %v1596_v43 }
 0xd12   :  { %v9630_v45 = vadd.f32 %v8066_v36, %v1601_v44  ;;  %v7376_v36 = vld [vmem:[%s11703_s6 + $0x1d0] sm:$0xff] }
 0xd14   :  { %7320 = vmatmul.msk.f32.gmra.mxu0 %vm526_vm0, %v9630_v45  ;;  %7327 = vmatmul.msk.f32.gmra.mxu1 %vm526_vm0, %v9630_v45 }
 0xd15   :  { %7334 = vmatmul.msk.f32.gmra.mxu2 %vm526_vm0, %v9630_v45 }
 0xd1c   :  { %7347 = vmatmul.msk.f32.vlgmr.msrb.gmra.mxu1 %vm526_vm0, %v9621_v6 }
 0xd1d   :  { %7354 = vmatmul.msk.f32.vlgmr.msra.gmra.mxu2 %vm526_vm0, %v9621_v6 }
 0xd24   :  { %7348 = vmatmul.msk.f32.gmra.mxu1 %vm526_vm0, %v9630_v45 }
 0xd25   :  { %7355 = vmatmul.msk.f32.gmra.mxu2 %vm526_vm0, %v9630_v45 }
 0xd89   :  { %v1673_v5 = vpop.f32.mrf.mxu1  ;;  %v1640_v49 = vpop.f32.mrf.mxu0 }
 0xd8a   :  { %v1674_v50 = vadd.f32 %v8068_v11, %v1673_v5  ;;  %v1641_v54 = vadd.f32 %v8067_v10, %v1640_v49 }
 0xd90   :  { %v1706_v46 = vpop.f32.mrf.mxu2 }
 0xd91   :  { %v1676_v47 = vpop.f32.mrf.mxu1  ;;  %v1707_v57 = vadd.f32 %v8069_v52, %v1706_v46  ;;  %v1643_v60 = vpop.f32.mrf.mxu0 }
 0xd92   :  { %v1677_v48 = vadd.f32 %v8068_v11, %v1676_v47  ;;  %v1644_v62 = vadd.f32 %v8067_v10, %v1643_v60  ;;  %v7341_v11 = vld [vmem:[%s11705_s8 + $0x20] sm:$0xff] }
 0xd94   :  { %7335 = vmatpush.xpose.msk.msra.mxu3 %vm622_vm1, %v1677_v48 }
 0xd98   :  { %v1709_v53 = vpop.f32.mrf.mxu2  ;;  %7336 = vmatpush.xpose.msk.msra.mxu3 %vm622_vm1, %v1674_v50 }
 0xd99   :  { %v1710_v55 = vadd.f32 %v8069_v52, %v1709_v53  ;;  %v1827_v41 = vpop.f32.mrf.mxu1 }
 0xd9a   :  { %v1828_v43 = vadd.f32 %v8070_v42, %v1827_v41 }
 0xd9b   :  { %1789 = vmatpush.msra.mxu0 %v1710_v55  ;;  %7337 = vmatmul.msk.f32.vlgmr.msra.gmra.mxu3 %vm622_vm1, %v1641_v54 }
 0xd9c   :  { %1888 = vmatpush.msrb.mxu3 %v7359_v51 }
 0xd9d   :  { %1790 = vmatpush.msra.mxu0 %v1707_v57 }
 0xd9e   :  { %1889 = vmatpush.msrb.mxu3 %v7358_v56 }
 0xda0   :  { %1890 = vmatpush.msrb.mxu3 %v7357_v58  ;;  %v1860_v61 = vpop.f32.mrf.mxu2 }
 0xda1   :  { %v1861_v3 = vadd.f32 %v8071_v0, %v1860_v61  ;;  %v1830_v44 = vpop.f32.mrf.mxu1 }
 0xda2   :  { %1891 = vmatpush.msrb.mxu3 %v7356_v59  ;;  %v1831_v5 = vadd.f32 %v8070_v42, %v1830_v44 }
 0xda3   :  { %7338 = vmatmul.msk.f32.gmra.mxu3 %vm622_vm1, %v1644_v62 }
 0xda4   :  { %2037 = vmatpush.msra.mxu3 %v7341_v11 }
 0xda8   :  { %v1863_v1 = vpop.f32.mrf.mxu2 }
 0xda9   :  { %v1864_v2 = vadd.f32 %v8071_v0, %v1863_v1  ;;  %v7384_v0 = vld [vmem:[%s11703_s6 + $0x258] sm:$0xff]  ;;  %v7383_v1 = vld [vmem:[%s11703_s6 + $0x250] sm:$0xff] }
 0xdab   :  { %7363 = vmatpush.xpose.msk.msrb.mxu0 %vm622_vm1, %v1864_v2  ;;  %7361 = vmatmul.msk.f32.vlgmr.msrb.gmra.mxu3 %vm526_vm0, %v9621_v6  ;;  %v7382_v2 = vld [vmem:[%s11703_s6 + $0x248] sm:$0xff] }
 0xdaf   :  { %7364 = vmatpush.xpose.msk.msrb.mxu0 %vm622_vm1, %v1861_v3  ;;  %v7381_v3 = vld [vmem:[%s11703_s6 + $0x240] sm:$0xff] }
 0xdb3   :  { %7362 = vmatmul.msk.f32.gmra.mxu3 %vm526_vm0, %v9630_v45 }
 0xe1e   :  { %v1741_v7 = vpop.f32.mrf.mxu3 }
 0xe1f   :  { %v1742_v9 = vadd.f32 %v9683_v8, %v1741_v7 }
 0xe21   :  { %v1747_v12 = vsel %vm658_vm2, %v1742_v9, -inf }
 0xe22   :  { %1748 = vmax.xlane.f32.xlu0 %v1747_v12 }
 0xe26   :  { %v1744_v13 = vpop.f32.mrf.mxu3 }
 0xe27   :  { %v1745_v15 = vadd.f32 %v9690_v14, %v1744_v13 }
 0xe29   :  { %v1750_v16 = vsel %vm658_vm2, %v1745_v15, -inf }
 0xe2a   :  { %1751 = vmax.xlane.f32.xlu1 %v1750_v16 }
 0xe2e   :  { %v1893_v17 = vpop.f32.mrf.mxu3 }
 0xe2f   :  { %v1894_v19 = vadd.f32 %v8072_v35, %v1893_v17  ;;  %v7369_v17 = vld [vmem:[%s11705_s8 + $0x28] sm:$0xff] }
 0xe30   :  { %2008 = vmatpush.msrb.mxu2 %v7369_v17  ;;  %v7418_v17 = vld [vmem:[%s11703_s6 + $0x2e0] sm:$0xff] }
 0xe36   :  { %v1896_v18 = vpop.f32.mrf.mxu3 }
 0xe37   :  { %v1897_v39 = vadd.f32 %v8072_v35, %v1896_v18  ;;  %v7391_v35 = vld [vmem:[%s11703_s6 + $0x2d8] sm:$0xff]  ;;  %v7390_v18 = vld [vmem:[%s11703_s6 + $0x2d0] sm:$0xff] }
 0xe38   :  { %2133 = vmatpush.msra.mxu2 %v7391_v35 }
 0xe39   :  { %1976 = vmatpush.msra.mxu1 %v1897_v39  ;;  %v7389_v39 = vld [vmem:[%s11703_s6 + $0x2c8] sm:$0xff] }
 0xe3a   :  { %2134 = vmatpush.msra.mxu2 %v7390_v18 }
 0xe3b   :  { %1977 = vmatpush.msra.mxu1 %v1894_v19  ;;  %v7388_v19 = vld [vmem:[%s11703_s6 + $0x2c0] sm:$0xff] }
 0xe3c   :  { %2135 = vmatpush.msra.mxu2 %v7389_v39 }
 0xe3d   :  { %2100 = vmatpush.msrb.mxu1 %v7384_v0 }
 0xe3e   :  { %2136 = vmatpush.msra.mxu2 %v7388_v19 }
 0xe3f   :  { %2101 = vmatpush.msrb.mxu1 %v7383_v1 }
 0xe41   :  { %2102 = vmatpush.msrb.mxu1 %v7382_v2 }
 0xe43   :  { %2103 = vmatpush.msrb.mxu1 %v7381_v3 }
 0xe95   :  { %v1749_v20 = vpop.xlane.xlu0 %1748 }
 0xe96   :  { %v1753_v21 = vsub.f32 %v1742_v9, %v1749_v20  ;;  %v7407_v20 = vld [vmem:[%s11703_s6 + $0x1f8] sm:$0xff] }
 0xe98   :  { %v1755_v22 = vmul.f32 1.442695, %v1753_v21 }
 0xe9a   :  { %8206 = vpow2.f32 %v1755_v22  ;;  %v7406_v22 = vld [vmem:[%s11703_s6 + $0x1f0] sm:$0xff] }
 0xe9d   :  { %v1752_v23 = vpop.xlane.xlu1 %1751 }
 0xe9e   :  { %v1754_v24 = vsub.f32 %v1745_v15, %v1752_v23  ;;  %v7405_v23 = vld [vmem:[%s11703_s6 + $0x1e8] sm:$0xff] }
 0xea0   :  { %v8207_v25 = vpop.eup %8206  ;;  %v1757_v26 = vmul.f32 1.442695, %v1754_v24  ;;  %v7404_v24 = vld [vmem:[%s11703_s6 + $0x1e0] sm:$0xff] }
 0xea1   :  { %v1759_v27 = vsel %vm658_vm2, %v8207_v25, 0.0 }
 0xea2   :  { %8208 = vpow2.f32 %v1757_v26  ;;  %1760 = vadd.xlane.f32.xlu2 %v1759_v27  ;;  %v8074_v27 = vld [vmem:[%s11704_s7 + $0x12] ss:$0 sm:$0xff] }
 0xea8   :  { %v8209_v28 = vpop.eup %8208 }
 0xea9   :  { %v1762_v29 = vsel %vm658_vm2, %v8209_v28, 0.0 }
 0xeaa   :  { %1763 = vadd.xlane.f32.xlu0 %v1762_v29 }
 0xf15   :  { %v1761_v30 = vpop.xlane.xlu2 %1760 }
 0xf16   :  { %8210 = vrcp.f32 %v1761_v30 }
 0xf1c   :  { %v8211_v31 = vpop.eup %8210 }
 0xf1d   :  { %v1767_v32 = vmul.f32 %v8211_v31, %v8207_v25  ;;  %v1764_v33 = vpop.xlane.xlu0 %1763  ;;  %v8073_v31 = vld [vmem:[%s11704_s7 + $0xe] ss:$0 sm:$0xff] }
 0xf1e   :  { %8212 = vrcp.f32 %v1764_v33  ;;  %v7414_v33 = vld [vmem:[%s11703_s6 + $0x278] sm:$0xff] }
 0xf1f   :  { %7339 = vmatmul.msk.f32.vlgmr.msra.gmra.mxu0 %vm658_vm2, %v1767_v32 }
 0xf20   :  { %2067 = vmatpush.msra.mxu0 %v7377_v34 }
 0xf22   :  { %2068 = vmatpush.msra.mxu0 %v7376_v36  ;;  %v7413_v36 = vld [vmem:[%s11703_s6 + $0x270] sm:$0xff] }
 0xf24   :  { %v8213_v40 = vpop.eup %8212  ;;  %2069 = vmatpush.msra.mxu0 %v7375_v37  ;;  %v7412_v37 = vld [vmem:[%s11703_s6 + $0x268] sm:$0xff] }
 0xf25   :  { %v1768_v4 = vmul.f32 %v8213_v40, %v8209_v28 }
 0xf26   :  { %2070 = vmatpush.msra.mxu0 %v7374_v38  ;;  %v7411_v38 = vld [vmem:[%s11703_s6 + $0x260] sm:$0xff] }
 0xf27   :  { %7340 = vmatmul.msk.f32.gmra.mxu0 %vm658_vm2, %v1768_v4 }
 0xf2f   :  { %7365 = vmatmul.msk.f32.vlgmr.msrb.gmra.mxu0 %vm622_vm1, %v1828_v43 }
 0xf37   :  { %7366 = vmatmul.msk.f32.gmra.mxu0 %vm622_vm1, %v1831_v5  ;;  %v8075_v5 = vld [vmem:[%s11704_s7 + $0x16] ss:$0 sm:$0xff] }
 0xf3f   :  { %7379 = vmatmul.msk.f32.vlgmr.msra.gmra.mxu0 %vm526_vm0, %v9621_v6 }
 0xf47   :  { %7380 = vmatmul.msk.f32.gmra.mxu0 %vm526_vm0, %v9630_v45 }
 0xf9c   :  { %v1792_v46 = vpop.f32.mrf.mxu0 }
 0xf9d   :  { %7372 = vmatmul.msk.f32.vlgmr.msra.gmra.mxu3 %vm622_vm1, %v1792_v46 }
 0xfa4   :  { %v1795_v47 = vpop.f32.mrf.mxu0 }
 0xfa5   :  { %7373 = vmatmul.msk.f32.gmra.mxu3 %vm622_vm1, %v1795_v47 }
 0xfac   :  { %v1928_v48 = vpop.f32.mrf.mxu0 }
 0xfad   :  { %v1929_v49 = vadd.f32 %v9683_v8, %v1928_v48  ;;  %v7401_v48 = vld [vmem:[%s11705_s8 + $0x30] sm:$0xff] }
 0xfaf   :  { %v1934_v10 = vsel %vm658_vm2, %v1929_v49, -inf }
 0xfb0   :  { %1935 = vmax.xlane.f32.xlu1 %v1934_v10 }
 0xfb4   :  { %v1931_v50 = vpop.f32.mrf.mxu0 }
 0xfb5   :  { %v1932_v51 = vadd.f32 %v9690_v14, %v1931_v50 }
 0xfb7   :  { %v1937_v52 = vsel %vm658_vm2, %v1932_v51, -inf }
 0xfb8   :  { %1938 = vmax.xlane.f32.xlu2 %v1937_v52 }
 0xfbc   :  { %v2072_v30 = vpop.f32.mrf.mxu0 }
 0xfbd   :  { %v2073_v34 = vadd.f32 %v8073_v31, %v2072_v30  ;;  %v8078_v30 = vld [vmem:[%s11704_s7 + $0x17] ss:$0 sm:$0xff] }
 0xfc4   :  { %v2075_v40 = vpop.f32.mrf.mxu0 }
 0xfc5   :  { %v2076_v4 = vadd.f32 %v8073_v31, %v2075_v40 }
0x1020   :  { %v9818_v43 = vpop.f32.mrf.mxu3 }
0x1023   :  { %v1936_v53 = vpop.xlane.xlu1 %1935 }
0x1024   :  { %v1940_v54 = vsub.f32 %v1929_v49, %v1936_v53 }
0x1026   :  { %v1942_v55 = vmul.f32 1.442695, %v1940_v54 }
0x1028   :  { %8214 = vpow2.f32 %v1942_v55  ;;  %v9823_v46 = vpop.f32.mrf.mxu3 }
0x102b   :  { %v1939_v56 = vpop.xlane.xlu2 %1938 }
0x102c   :  { %v1941_v57 = vsub.f32 %v1932_v51, %v1939_v56  ;;  %v8077_v56 = vld [vmem:[%s11704_s7 + $0x13] ss:$0 sm:$0xff] }
0x102e   :  { %v8215_v58 = vpop.eup %8214  ;;  %v1944_v59 = vmul.f32 1.442695, %v1941_v57 }
0x102f   :  { %v1946_v60 = vsel %vm658_vm2, %v8215_v58, 0.0 }
0x1030   :  { %8216 = vpow2.f32 %v1944_v59  ;;  %1947 = vadd.xlane.f32.xlu0 %v1946_v60 }
0x1036   :  { %v8217_v61 = vpop.eup %8216 }
0x1037   :  { %v1949_v62 = vsel %vm658_vm2, %v8217_v61, 0.0 }
0x1038   :  { %1950 = vadd.xlane.f32.xlu1 %v1949_v62 }
0x10a3   :  { %v1948_v7 = vpop.xlane.xlu0 %1947 }
0x10a4   :  { %8218 = vrcp.f32 %v1948_v7 }
0x10aa   :  { %v8219_v9 = vpop.eup %8218 }
0x10ab   :  { %v1954_v12 = vmul.f32 %v8219_v9, %v8215_v58  ;;  %v1951_v13 = vpop.xlane.xlu1 %1950 }
0x10ac   :  { %8220 = vrcp.f32 %v1951_v13  ;;  %v7421_v13 = vld [vmem:[%s11703_s6 + $0x2f8] sm:$0xff] }
0x10ad   :  { %7367 = vmatmul.msk.f32.vlgmr.msra.gmra.mxu1 %vm658_vm2, %v1954_v12 }
0x10ae   :  { %2253 = vmatpush.msra.mxu1 %v7401_v48 }
0x10b2   :  { %v8221_v15 = vpop.eup %8220 }
0x10b3   :  { %v1955_v16 = vmul.f32 %v8221_v15, %v8217_v61  ;;  %v7420_v15 = vld [vmem:[%s11703_s6 + $0x2f0] sm:$0xff] }
0x10b5   :  { %7368 = vmatmul.msk.f32.gmra.mxu1 %vm658_vm2, %v1955_v16  ;;  %v7419_v16 = vld [vmem:[%s11703_s6 + $0x2e8] sm:$0xff] }
0x10bd   :  { %7386 = vmatmul.msk.f32.vlgmr.msrb.gmra.mxu1 %vm526_vm0, %v9621_v6 }
0x10c5   :  { %7387 = vmatmul.msk.f32.gmra.mxu1 %vm526_vm0, %v9630_v45 }
0x112a   :  { %v1979_v21 = vpop.f32.mrf.mxu1 }
0x112b   :  { %7370 = vmatmul.msk.f32.vlgmr.msrb.gmra.mxu2 %vm622_vm1, %v1979_v21 }
0x112c   :  { %2285 = vmatpush.msrb.mxu2 %v7407_v20 }
0x112e   :  { %2286 = vmatpush.msrb.mxu2 %v7406_v22 }
0x1130   :  { %2287 = vmatpush.msrb.mxu2 %v7405_v23 }
0x1132   :  { %v1982_v25 = vpop.f32.mrf.mxu1  ;;  %2288 = vmatpush.msrb.mxu2 %v7404_v24 }
0x1133   :  { %7371 = vmatmul.msk.f32.gmra.mxu2 %vm622_vm1, %v1982_v25  ;;  %v8076_v25 = vld [vmem:[%s11704_s7 + $0xf] ss:$0 sm:$0xff] }
0x113a   :  { %v2105_v26 = vpop.f32.mrf.mxu1 }
0x113b   :  { %7393 = vmatmul.msk.f32.vlgmr.msra.gmra.mxu2 %vm526_vm0, %v9621_v6  ;;  %v2106_v32 = vadd.f32 %v8074_v27, %v2105_v26 }
0x1142   :  { %v2108_v28 = vpop.f32.mrf.mxu1 }
0x1143   :  { %v2109_v29 = vadd.f32 %v8074_v27, %v2108_v28  ;;  %7394 = vmatmul.msk.f32.gmra.mxu2 %vm526_vm0, %v9630_v45 }
0x1145   :  { %7395 = vmatpush.xpose.msk.msrb.mxu3 %vm622_vm1, %v2109_v29 }
0x1149   :  { %7396 = vmatpush.xpose.msk.msrb.mxu3 %vm622_vm1, %v2106_v32 }
0x114b   :  { %7409 = vmatmul.msk.f32.vlgmr.msrb.gmra.mxu2 %vm526_vm0, %v9621_v6 }
0x114c   :  { %7397 = vmatmul.msk.f32.vlgmr.msrb.gmra.mxu3 %vm622_vm1, %v2073_v34 }
0x114d   :  { %2318 = vmatpush.msra.mxu3 %v7414_v33 }
0x114f   :  { %2319 = vmatpush.msra.mxu3 %v7413_v36 }
0x1151   :  { %2320 = vmatpush.msra.mxu3 %v7412_v37 }
0x1153   :  { %2321 = vmatpush.msra.mxu3 %v7411_v38  ;;  %7410 = vmatmul.msk.f32.gmra.mxu2 %vm526_vm0, %v9630_v45 }
0x1154   :  { %7398 = vmatmul.msk.f32.gmra.mxu3 %vm622_vm1, %v2076_v4 }
0x115c   :  { %7416 = vmatmul.msk.f32.vlgmr.msra.gmra.mxu3 %vm526_vm0, %v9621_v6 }
0x1164   :  { %7417 = vmatmul.msk.f32.gmra.mxu3 %vm526_vm0, %v9630_v45 }
0x11ae   :  { %v9814_v41 = vpop.f32.mrf.mxu2 }
0x11b6   :  { %v9816_v42 = vpop.f32.mrf.mxu2 }
0x11be   :  { %v2138_v44 = vpop.f32.mrf.mxu2 }
0x11bf   :  { %v2139_v49 = vadd.f32 %v8075_v5, %v2138_v44 }
0x11c6   :  { %v2141_v11 = vpop.f32.mrf.mxu2 }
0x11c7   :  { %v2142_v47 = vadd.f32 %v8075_v5, %v2141_v11 }
0x11c9   :  { %2221 = vmatpush.msrb.mxu0 %v2142_v47 }
0x11cb   :  { %2222 = vmatpush.msrb.mxu0 %v2139_v49 }
0x11cd   :  { %2351 = vmatpush.msra.mxu0 %v7421_v13  ;;  %v2043_v13 = vadd.f32 %v9823_v46, %v9816_v42 }
0x11ce   :  { %v2290_v24 = vpop.f32.mrf.mxu2 }
0x11cf   :  { %v2173_v10 = vpop.f32.mrf.mxu3  ;;  %2352 = vmatpush.msra.mxu0 %v7420_v15  ;;  %v2291_v26 = vadd.f32 %v8076_v25, %v2290_v24 }
0x11d0   :  { %v2174_v50 = vadd.f32 %v9683_v8, %v2173_v10 }
0x11d1   :  { %2353 = vmatpush.msra.mxu0 %v7419_v16 }
0x11d2   :  { %v2179_v51 = vsel %vm658_vm2, %v2174_v50, -inf }
0x11d3   :  { %2180 = vmax.xlane.f32.xlu2 %v2179_v51  ;;  %2354 = vmatpush.msra.mxu0 %v7418_v17 }
0x11d6   :  { %v2293_v28 = vpop.f32.mrf.mxu2 }
0x11d7   :  { %v2176_v52 = vpop.f32.mrf.mxu3  ;;  %v2294_v29 = vadd.f32 %v8076_v25, %v2293_v28  ;;  %v7467_v25 = vld [vmem:[%s11703_s6 + $0x398] sm:$0xff]  ;;  %v8416_v28 = vld [vmem:[%s11699_s2] sm:$0xff] }
0x11d8   :  { %v2177_v53 = vadd.f32 %v9690_v14, %v2176_v52 }
0x11da   :  { %v2182_v54 = vsel %vm658_vm2, %v2177_v53, -inf }
0x11db   :  { %2183 = vmax.xlane.f32.xlu0 %v2182_v54 }
0x11df   :  { %v2323_v55 = vpop.f32.mrf.mxu3 }
0x11e0   :  { %v2324_v59 = vadd.f32 %v8077_v56, %v2323_v55  ;;  %v7431_v55 = vld [vmem:[%s11705_s8 + $0x38] sm:$0xff] }
0x11e1   :  { %2471 = vmatpush.msrb.mxu3 %v7431_v55 }
0x11e3   :  { %2757 = vmatpush.msra.mxu3 %v7467_v25 }
0x11e7   :  { %v2326_v57 = vpop.f32.mrf.mxu3 }
0x11e8   :  { %v2327_v58 = vadd.f32 %v8077_v56, %v2326_v57 }
0x11ea   :  { %7425 = vmatpush.xpose.msk.msrb.mxu1 %vm622_vm1, %v2327_v58 }
0x11ee   :  { %7426 = vmatpush.xpose.msk.msrb.mxu1 %vm622_vm1, %v2324_v59 }
0x1246   :  { %v2181_v60 = vpop.xlane.xlu2 %2180 }
0x1247   :  { %v2185_v61 = vsub.f32 %v2174_v50, %v2181_v60 }
0x1249   :  { %v2187_v62 = vmul.f32 1.442695, %v2185_v61 }
0x124b   :  { %8222 = vpow2.f32 %v2187_v62 }
0x124e   :  { %v2184_v0 = vpop.xlane.xlu0 %2183 }
0x124f   :  { %v2186_v1 = vsub.f32 %v2177_v53, %v2184_v0 }
0x1251   :  { %v8223_v2 = vpop.eup %8222  ;;  %v2189_v3 = vmul.f32 1.442695, %v2186_v1  ;;  %v2040_v1 = vadd.f32 %v9818_v43, %v9814_v41 }
0x1252   :  { %v2191_v7 = vsel %vm658_vm2, %v8223_v2, 0.0 }
0x1253   :  { %8224 = vpow2.f32 %v2189_v3  ;;  %2192 = vadd.xlane.f32.xlu1 %v2191_v7  ;;  %v8079_v3 = vld [vmem:[%s11709_s12 + $0xa] ss:$0 sm:$0xff] }
0x1259   :  { %v8225_v9 = vpop.eup %8224 }
0x125a   :  { %v2194_v12 = vsel %vm658_vm2, %v8225_v9, 0.0 }
0x125b   :  { %2195 = vadd.xlane.f32.xlu2 %v2194_v12 }
0x12c6   :  { %v2193_v35 = vpop.xlane.xlu1 %2192 }
0x12c7   :  { %8226 = vrcp.f32 %v2193_v35 }
0x12cd   :  { %v8227_v18 = vpop.eup %8226 }
0x12ce   :  { %v2199_v39 = vmul.f32 %v8227_v18, %v8223_v2  ;;  %v2196_v19 = vpop.xlane.xlu2 %2195 }
0x12cf   :  { %8228 = vrcp.f32 %v2196_v19 }
0x12d0   :  { %7399 = vmatmul.msk.f32.vlgmr.msrb.gmra.mxu0 %vm658_vm2, %v2199_v39 }
0x12d5   :  { %v8229_v20 = vpop.eup %8228 }
0x12d6   :  { %v2200_v21 = vmul.f32 %v8229_v20, %v8225_v9 }
0x12d8   :  { %7400 = vmatmul.msk.f32.gmra.mxu0 %vm658_vm2, %v2200_v21 }
0x12e0   :  { %7423 = vmatmul.msk.f32.vlgmr.msra.gmra.mxu0 %vm526_vm0, %v9621_v6 }
0x12e8   :  { %7424 = vmatmul.msk.f32.gmra.mxu0 %vm526_vm0, %v9630_v45 }
0x134d   :  { %v2224_v22 = vpop.f32.mrf.mxu0 }
0x134e   :  { %7402 = vmatmul.msk.f32.vlgmr.msra.gmra.mxu1 %vm622_vm1, %v2224_v22 }
0x1355   :  { %v2227_v23 = vpop.f32.mrf.mxu0 }
0x1356   :  { %7403 = vmatmul.msk.f32.gmra.mxu1 %vm622_vm1, %v2227_v23 }
0x135d   :  { %v2356_v27 = vpop.f32.mrf.mxu0 }
0x135e   :  { %7427 = vmatmul.msk.f32.vlgmr.msrb.gmra.mxu1 %vm622_vm1, %v2291_v26  ;;  %v2357_v33 = vadd.f32 %v8078_v30, %v2356_v27  ;;  %v2692_v26 = vld [vmem:[%s11720_s5] sm:$0xff]  ;;  %v7466_v27 = vld [vmem:[%s11703_s6 + $0x390] sm:$0xff] }
0x135f   :  { %2758 = vmatpush.msra.mxu3 %v7466_v27 }
0x1365   :  { %v2359_v31 = vpop.f32.mrf.mxu0 }
0x1366   :  { %v2360_v32 = vadd.f32 %v8078_v30, %v2359_v31  ;;  %7428 = vmatmul.msk.f32.gmra.mxu1 %vm622_vm1, %v2294_v29  ;;  %v9915_v29 = vadd.f32 %v8416_v28, %v2692_v26  ;;  %v7465_v30 = vld [vmem:[%s11703_s6 + $0x388] sm:$0xff]  ;;  %v7464_v31 = vld [vmem:[%s11703_s6 + $0x380] sm:$0xff] }
0x1367   :  { %2759 = vmatpush.msra.mxu3 %v7465_v30 }
0x1368   :  { %2439 = vmatpush.msra.mxu2 %v2360_v32  ;;  %v2693_v32 = vld [vmem:[%s11720_s5 + $0x8] sm:$0xff]  ;;  %s8455_s5 = smov 8  }
0x1369   :  { %2760 = vmatpush.msra.mxu3 %v7464_v31 }
0x136a   :  { %2440 = vmatpush.msra.mxu2 %v2357_v33  ;;  %v8417_v33 = vld [vmem:[%s11699_s2 + $0x8] sm:$0xff] }
0x13cb   :  { %v2255_v34 = vpop.f32.mrf.mxu1 }
0x13cc   :  { %v2261_v2 = vadd.f32 %v2255_v34, %v2040_v1  ;;  %v9931_v34 = vadd.f32 %v8417_v33, %v2693_v32  ;;  %v8084_v32 = vld [vmem:[%s11704_s7 + $0x18] ss:$0 sm:$0xff] }
0x13d3   :  { %v2258_v36 = vpop.f32.mrf.mxu1 }
0x13d4   :  { %v2262_v16 = vadd.f32 %v2258_v36, %v2043_v13  ;;  %v7440_v36 = vld [vmem:[%s11706_s9 + $0x38] sm:$0xff] }
0x13d5   :  { %2576 = vmatpush.msrb.mxu0 %v7440_v36 }
0x13db   :  { %v2391_v37 = vpop.f32.mrf.mxu1 }
0x13dc   :  { %v2392_v38 = vadd.f32 %v9683_v8, %v2391_v37  ;;  %v7439_v37 = vld [vmem:[%s11706_s9 + $0x30] sm:$0xff] }
0x13dd   :  { %2577 = vmatpush.msrb.mxu0 %v7439_v37 }
0x13de   :  { %v2397_v40 = vsel %vm658_vm2, %v2392_v38, -inf }
0x13df   :  { %2398 = vmax.xlane.f32.xlu0 %v2397_v40  ;;  %v7437_v40 = vld [vmem:[%s11706_s9 + $0x20] sm:$0xff] }
0x13e3   :  { %v2394_v4 = vpop.f32.mrf.mxu1 }
0x13e4   :  { %v2395_v44 = vadd.f32 %v9690_v14, %v2394_v4  ;;  %v7460_v4 = vld [vmem:[%s11703_s6 + $0x318] sm:$0xff] }
0x13e5   :  { %2724 = vmatpush.msrb.mxu2 %v7460_v4  ;;  %v7472_v4 = vld [vmem:[%s11703_s6 + $0x408] sm:$0xff] }
0x13e6   :  { %v2400_v5 = vsel %vm658_vm2, %v2395_v44, -inf }
0x13e7   :  { %2401 = vmax.xlane.f32.xlu1 %v2400_v5 }
0x1452   :  { %v2399_v11 = vpop.xlane.xlu0 %2398 }
0x1453   :  { %v2403_v47 = vsub.f32 %v2392_v38, %v2399_v11  ;;  %v7438_v38 = vld [vmem:[%s11706_s9 + $0x28] sm:$0xff] }
0x1454   :  { %2578 = vmatpush.msrb.mxu0 %v7438_v38  ;;  %v7474_v38 = vld [vmem:[%s11703_s6 + $0x418] sm:$0xff] }
0x1455   :  { %v2405_v48 = vmul.f32 1.442695, %v2403_v47 }
0x1456   :  { %2579 = vmatpush.msrb.mxu0 %v7437_v40  ;;  %v7473_v40 = vld [vmem:[%s11703_s6 + $0x410] sm:$0xff] }
0x1457   :  { %8230 = vpow2.f32 %v2405_v48  ;;  %v7458_v48 = vld [vmem:[%s11703_s6 + $0x308] sm:$0xff] }
0x1458   :  { %2790 = vmatpush.msra.mxu0 %v7474_v38 }
0x145a   :  { %v2402_v49 = vpop.xlane.xlu1 %2401  ;;  %2791 = vmatpush.msra.mxu0 %v7473_v40 }
0x145b   :  { %v2404_v10 = vsub.f32 %v2395_v44, %v2402_v49  ;;  %v7459_v44 = vld [vmem:[%s11703_s6 + $0x310] sm:$0xff]  ;;  %v7457_v49 = vld [vmem:[%s11703_s6 + $0x300] sm:$0xff] }
0x145c   :  { %2725 = vmatpush.msrb.mxu2 %v7459_v44  ;;  %2792 = vmatpush.msra.mxu0 %v7472_v4 }
0x145d   :  { %v8231_v50 = vpop.eup %8230  ;;  %v2407_v51 = vmul.f32 1.442695, %v2404_v10  ;;  %v7451_v10 = vld [vmem:[%s11707_s10 + $0x78] sm:$0xff] }
0x145e   :  { %v2409_v52 = vsel %vm658_vm2, %v8231_v50, 0.0  ;;  %2726 = vmatpush.msrb.mxu2 %v7458_v48  ;;  %2617 = vmatpush.msra.mxu1 %v7451_v10  ;;  %v7493_v48 = vld [vmem:[%s11703_s6 + $0x3a8] sm:$0xff]  ;;  %v7492_v10 = vld [vmem:[%s11703_s6 + $0x3a0] sm:$0xff] }
0x145f   :  { %8232 = vpow2.f32 %v2407_v51  ;;  %2410 = vadd.xlane.f32.xlu2 %v2409_v52  ;;  %v7449_v51 = vld [vmem:[%s11707_s10 + $0x68] sm:$0xff] }
0x1460   :  { %2727 = vmatpush.msrb.mxu2 %v7457_v49 }
0x1465   :  { %v8233_v53 = vpop.eup %8232 }
0x1466   :  { %v2412_v54 = vsel %vm658_vm2, %v8233_v53, 0.0 }
0x1467   :  { %2413 = vadd.xlane.f32.xlu0 %v2412_v54 }
0x14d2   :  { %v2411_v56 = vpop.xlane.xlu2 %2410 }
0x14d3   :  { %8234 = vrcp.f32 %v2411_v56 }
0x14d9   :  { %v8235_v57 = vpop.eup %8234 }
0x14da   :  { %v2417_v58 = vmul.f32 %v8235_v57, %v8231_v50  ;;  %v2414_v59 = vpop.xlane.xlu0 %2413  ;;  %v7450_v50 = vld [vmem:[%s11707_s10 + $0x70] sm:$0xff] }
0x14db   :  { %8236 = vrcp.f32 %v2414_v59  ;;  %2618 = vmatpush.msra.mxu1 %v7450_v50 }
0x14dc   :  { %7429 = vmatmul.msk.f32.vlgmr.msra.gmra.mxu2 %vm658_vm2, %v2417_v58 }
0x14dd   :  { %2619 = vmatpush.msra.mxu1 %v7449_v51 }
0x14e1   :  { %v8237_v60 = vpop.eup %8236 }
0x14e2   :  { %v2418_v61 = vmul.f32 %v8237_v60, %v8233_v53 }
0x14e4   :  { %7430 = vmatmul.msk.f32.gmra.mxu2 %vm658_vm2, %v2418_v61 }
0x14ec   :  { %7462 = vmatmul.msk.f32.vlgmr.msrb.gmra.mxu2 %vm526_vm0, %v9915_v29 }
0x14f4   :  { %7463 = vmatmul.msk.f32.gmra.mxu2 %vm526_vm0, %v9931_v34 }
0x155f   :  { %v2442_v62 = vpop.f32.mrf.mxu2 }
0x1560   :  { %7432 = vmatmul.msk.f32.vlgmr.msrb.gmra.mxu3 %vm622_vm1, %v2442_v62 }
0x1567   :  { %v2445_v0 = vpop.f32.mrf.mxu2 }
0x1568   :  { %7433 = vmatmul.msk.f32.gmra.mxu3 %vm622_vm1, %v2445_v0  ;;  %v8080_v0 = vld [vmem:[%s11709_s12 + $0x6] ss:$0 sm:$0xff] }
0x156f   :  { %v2729_v31 = vpop.f32.mrf.mxu2 }
0x1570   :  { %7469 = vmatmul.msk.f32.vlgmr.msra.gmra.mxu3 %vm526_vm0, %v9915_v29  ;;  %v2730_v33 = vadd.f32 %v8084_v32, %v2729_v31 }
0x1577   :  { %v2732_v36 = vpop.f32.mrf.mxu2 }
0x1578   :  { %7470 = vmatmul.msk.f32.gmra.mxu3 %vm526_vm0, %v9931_v34  ;;  %v2733_v37 = vadd.f32 %v8084_v32, %v2732_v36  ;;  %v7484_v32 = vld [vmem:[%s11705_s8 + $0x40] sm:$0xff] }
0x15e3   :  { %v2473_v7 = vpop.f32.mrf.mxu3 }
0x15e4   :  { %v2479_v9 = vadd.f32 %v2473_v7, %v2261_v2 }
0x15e6   :  { %v2486_v12 = vadd.f32 %v8079_v3, %v2479_v9 }
0x15e8   :  { %v2488_v15 = vadd.f32 %v2486_v12, %v9621_v6 }
0x15ea   :  { %v2494_v17 = vsel %vm526_vm0, %v2488_v15, 0.0 }
0x15eb   :  { %2495 = vadd.xlane.f32.xlu1 %v2494_v17  ;;  %v2476_v35 = vpop.f32.mrf.mxu3 }
0x15ec   :  { %v2480_v18 = vadd.f32 %v2476_v35, %v2262_v16 }
0x15ee   :  { %v2487_v41 = vadd.f32 %v8079_v3, %v2480_v18  ;;  %v8081_v3 = vld [vmem:[%s11709_s12 + $0x7] ss:$0 sm:$0xff] }
0x15f0   :  { %v2489_v43 = vadd.f32 %v2487_v41, %v9630_v45 }
0x15f2   :  { %v2497_v39 = vsel %vm526_vm0, %v2489_v43, 0.0 }
0x15f3   :  { %2498 = vadd.xlane.f32.xlu2 %v2497_v39  ;;  %v7447_v39 = vld [vmem:[%s11707_s10 + $0x58] sm:$0xff] }
0x165e   :  { %v2496_v19 = vpop.xlane.xlu1 %2495 }
0x165f   :  { %v2500_v20 = vmul.f32 %v2496_v19, %v9478_v63  ;;  %v7446_v19 = vld [vmem:[%s11707_s10 + $0x50] sm:$0xff] }
0x1661   :  { %v9892_v21 = vsub.f32 %v2488_v15, %v2500_v20  ;;  %v7445_v20 = vld [vmem:[%s11707_s10 + $0x48] sm:$0xff] }
0x1663   :  { %v2504_v6 = vmul.f32 %v9892_v21, %v9892_v21 }
0x1665   :  { %v2506_v42 = vsel %vm526_vm0, %v2504_v6, 0.0  ;;  %v8082_v6 = vld [vmem:[%s11704_s7 + $0x1c] ss:$0 sm:$0xff] }
0x1666   :  { %2507 = vadd.xlane.f32.xlu0 %v2506_v42  ;;  %v2499_v46 = vpop.xlane.xlu2 %2498 }
0x1667   :  { %v2501_v22 = vmul.f32 %v2499_v46, %v9478_v63 }
0x1669   :  { %v9898_v23 = vsub.f32 %v2489_v43, %v2501_v22  ;;  %v7448_v43 = vld [vmem:[%s11707_s10 + $0x60] sm:$0xff] }
0x166a   :  { %2620 = vmatpush.msra.mxu1 %v7448_v43  ;;  %v7444_v22 = vld [vmem:[%s11707_s10 + $0x40] sm:$0xff] }
0x166b   :  { %v2505_v45 = vmul.f32 %v9898_v23, %v9898_v23 }
0x166c   :  { %2621 = vmatpush.msra.mxu1 %v7447_v39 }
0x166d   :  { %v2509_v24 = vsel %vm526_vm0, %v2505_v45, 0.0  ;;  %v8083_v45 = vld [vmem:[%s11708_s11 + $0x1] ss:$0 sm:$0xff] }
0x166e   :  { %2510 = vadd.xlane.f32.xlu1 %v2509_v24  ;;  %2622 = vmatpush.msra.mxu1 %v7446_v19 }
0x1670   :  { %2623 = vmatpush.msra.mxu1 %v7445_v20 }
0x1672   :  { %2624 = vmatpush.msra.mxu1 %v7444_v22 }
0x16d9   :  { %v2508_v5 = vpop.xlane.xlu0 %2507 }
0x16da   :  { %v2512_v11 = vmul.f32 %v2508_v5, %v9478_v63  ;;  %v7471_v5 = vld [vmem:[%s11703_s6 + $0x400] sm:$0xff] }
0x16db   :  { %2793 = vmatpush.msra.mxu0 %v7471_v5 }
0x16dc   :  { %v2514_v47 = vadd.f32 1e-05, %v2512_v11  ;;  %v7495_v11 = vld [vmem:[%s11703_s6 + $0x3b8] sm:$0xff] }
0x16de   :  { %8238 = vrsqrt.f32 %v2514_v47  ;;  %vm2522_vm5 = vweird.f32 %v2514_v47 }
0x16e1   :  { %v2511_v52 = vpop.xlane.xlu1 %2510 }
0x16e2   :  { %v2513_v53 = vmul.f32 %v2511_v52, %v9478_v63 }
0x16e4   :  { %v8239_v54 = vpop.eup %8238  ;;  %v2515_v55 = vadd.f32 1e-05, %v2513_v53 }
0x16e5   :  { %v2517_v56 = vmul.f32 %v8239_v54, %v2514_v47  ;;  %vm2523_vm4 = vweird.f32 %v8239_v54  ;;  %v7494_v47 = vld [vmem:[%s11703_s6 + $0x3b0] sm:$0xff] }
0x16e6   :  { %8240 = vrsqrt.f32 %v2515_v55  ;;  %vm2524_vm6 = vmor %vm2522_vm5, %vm2523_vm4  ;;  %vm2532_vm8 = vweird.f32 %v2515_v55 }
0x16e7   :  { %v2518_v57 = vmul.f32 %v8239_v54, %v2517_v56  ;;  %v7488_v56 = vld [vmem:[%s11703_s6 + $0x338] sm:$0xff] }
0x16e8   :  { %2911 = vmatpush.msrb.mxu3 %v7488_v56 }
0x16e9   :  { %v2519_v58 = vmul.f32 0.5, %v2518_v57  ;;  %v7486_v57 = vld [vmem:[%s11703_s6 + $0x328] sm:$0xff] }
0x16eb   :  { %v2520_v59 = vsub.f32 1.5, %v2519_v58 }
0x16ec   :  { %v8241_v60 = vpop.eup %8240 }
0x16ed   :  { %v2521_v61 = vmul.f32 %v8239_v54, %v2520_v59  ;;  %v2527_v62 = vmul.f32 %v8241_v60, %v2515_v55  ;;  %vm2533_vm7 = vweird.f32 %v8241_v60  ;;  %v8086_v59 = vld [vmem:[%s11704_s7 + $0x20] ss:$0 sm:$0xff] }
0x16ee   :  { %vm2534_vm9 = vmor %vm2532_vm8, %vm2533_vm7 }
0x16ef   :  { %v2525_v1 = vsel %vm2524_vm6, %v8239_v54, %v2521_v61  ;;  %v2528_v2 = vmul.f32 %v8241_v60, %v2527_v62 }
0x16f0   :  { %v2536_v7 = vmul.f32 %v2525_v1, %v9892_v21  ;;  %v2762_v21 = vpop.f32.mrf.mxu3 }
0x16f1   :  { %v2529_v9 = vmul.f32 0.5, %v2528_v2 }
0x16f2   :  { %v2541_v12 = vmul.f32 %v8080_v0, %v2536_v7 }
0x16f3   :  { %v2530_v13 = vsub.f32 1.5, %v2529_v9 }
0x16f4   :  { %v9981_v15 = vadd.f32 %v8081_v3, %v2541_v12 }
0x16f5   :  { %v2531_v16 = vmul.f32 %v8241_v60, %v2530_v13 }
0x16f6   :  { %7442 = vmatmul.msk.f32.vlgmr.msrb.gmra.mxu0 %vm526_vm0, %v9981_v15 }
0x16f7   :  { %v2535_v17 = vsel %vm2534_vm9, %v8241_v60, %v2531_v16  ;;  %2944 = vmatpush.msrb.mxu0 %v7495_v11 }
0x16f8   :  { %v2537_v35 = vmul.f32 %v2535_v17, %v9898_v23  ;;  %v2765_v42 = vpop.f32.mrf.mxu3  ;;  %v2763_v23 = vadd.f32 %v8082_v6, %v2762_v21  ;;  %v7502_v21 = vld [vmem:[%s11703_s6 + $0x438] sm:$0xff] }
0x16f9   :  { %v2766_v46 = vadd.f32 %v8082_v6, %v2765_v42  ;;  %2945 = vmatpush.msrb.mxu0 %v7494_v47  ;;  %v7501_v6 = vld [vmem:[%s11703_s6 + $0x430] sm:$0xff]  ;;  %v7500_v42 = vld [vmem:[%s11703_s6 + $0x428] sm:$0xff]  ;;  %v10120_v47 = vld [vmem:[%s11700_s3] sm:$0xff] }
0x16fa   :  { %v2542_v18 = vmul.f32 %v8080_v0, %v2537_v35 }
0x16fb   :  { %7478 = vmatpush.xpose.msk.msrb.mxu1 %vm622_vm1, %v2766_v46  ;;  %2946 = vmatpush.msrb.mxu0 %v7493_v48  ;;  %v7499_v46 = vld [vmem:[%s11703_s6 + $0x420] sm:$0xff] }
0x16fc   :  { %v9986_v41 = vadd.f32 %v8081_v3, %v2542_v18  ;;  %v8087_v18 = vld [vmem:[%s11704_s7 + $0x1d] ss:$0 sm:$0xff] }
0x16fd   :  { %2947 = vmatpush.msrb.mxu0 %v7492_v10 }
0x16fe   :  { %7443 = vmatmul.msk.f32.gmra.mxu0 %vm526_vm0, %v9986_v41 }
0x16ff   :  { %7479 = vmatpush.xpose.msk.msrb.mxu1 %vm622_vm1, %v2763_v23 }
0x1706   :  { %7476 = vmatmul.msk.f32.vlgmr.msra.gmra.mxu0 %vm526_vm0, %v9915_v29 }
0x170e   :  { %7477 = vmatmul.msk.f32.gmra.mxu0 %vm526_vm0, %v9931_v34 }
0x1716   :  { %7497 = vmatmul.msk.f32.vlgmr.msrb.gmra.mxu0 %vm526_vm0, %v9915_v29 }
0x171e   :  { %7498 = vmatmul.msk.f32.gmra.mxu0 %vm526_vm0, %v9931_v34 }
0x1773   :  { %v2581_v24 = vpop.f32.mrf.mxu0 }
0x1774   :  { %v2582_v25 = vadd.f32 %v8083_v45, %v2581_v24 }
0x1776   :  { %v2587_v26 = vmax.f32 %v2582_v25, 0.0 }
0x1778   :  { %7453 = vmatmul.msk.f32.vlgmr.msra.gmra.mxu1 %vm1517_vm10, %v2587_v26 }
0x1779   :  { %2977 = vmatpush.msra.mxu1 %v7502_v21 }
0x177b   :  { %v2584_v27 = vpop.f32.mrf.mxu0  ;;  %2978 = vmatpush.msra.mxu1 %v7501_v6  ;;  %v8090_v6 = vld [vmem:[%s11704_s7 + $0x1e] ss:$0 sm:$0xff] }
0x177c   :  { %v2585_v28 = vadd.f32 %v8083_v45, %v2584_v27  ;;  %v8088_v27 = vld [vmem:[%s11704_s7 + $0x19] ss:$0 sm:$0xff] }
0x177d   :  { %2979 = vmatpush.msra.mxu1 %v7500_v42 }
0x177e   :  { %v2588_v30 = vmax.f32 %v2585_v28, 0.0 }
0x177f   :  { %2980 = vmatpush.msra.mxu1 %v7499_v46 }
0x1780   :  { %7454 = vmatmul.msk.f32.gmra.mxu1 %vm1517_vm10, %v2588_v30 }
0x1783   :  { %v2795_v58 = vpop.f32.mrf.mxu0 }
0x1784   :  { %v2796_v1 = vadd.f32 %v8086_v59, %v2795_v58 }
0x1788   :  { %7480 = vmatmul.msk.f32.vlgmr.msrb.gmra.mxu1 %vm622_vm1, %v2730_v33 }
0x1789   :  { %3126 = vmatpush.msrb.mxu1 %v7484_v32  ;;  %v7531_v32 = vld [vmem:[%s11703_s6 + $0x440] sm:$0xff] }
0x178b   :  { %v2798_v62 = vpop.f32.mrf.mxu0 }
0x178c   :  { %v2799_v2 = vadd.f32 %v8086_v59, %v2798_v62  ;;  %v7527_v62 = vld [vmem:[%s11703_s6 + $0x3d8] sm:$0xff] }
0x178e   :  { %2878 = vmatpush.msra.mxu2 %v2799_v2  ;;  %v7524_v2 = vld [vmem:[%s11703_s6 + $0x3c0] sm:$0xff] }
0x1790   :  { %7481 = vmatmul.msk.f32.gmra.mxu1 %vm622_vm1, %v2733_v37  ;;  %2879 = vmatpush.msra.mxu2 %v2796_v1  ;;  %v8089_v37 = vld [vmem:[%s11704_s7 + $0x21] ss:$0 sm:$0xff]  ;;  %v7525_v1 = vld [vmem:[%s11703_s6 + $0x3c8] sm:$0xff] }
0x1793   :  { %v2949_v35 = vpop.f32.mrf.mxu0 }
0x1794   :  { %v2950_v19 = vadd.f32 %v8087_v18, %v2949_v35 }
0x1798   :  { %7504 = vmatmul.msk.f32.vlgmr.msra.gmra.mxu1 %vm526_vm0, %v9915_v29 }
0x179b   :  { %v2952_v43 = vpop.f32.mrf.mxu0 }
0x179c   :  { %v2953_v39 = vadd.f32 %v8087_v18, %v2952_v43 }
0x179e   :  { %7506 = vmatpush.xpose.msk.msrb.mxu2 %vm622_vm1, %v2953_v39  ;;  %v7512_v39 = vld [vmem:[%s11705_s8 + $0x48] sm:$0xff] }
0x179f   :  { %3097 = vmatpush.msra.mxu0 %v7512_v39 }
0x17a0   :  { %7505 = vmatmul.msk.f32.gmra.mxu1 %vm526_vm0, %v9931_v34 }
0x17a2   :  { %7507 = vmatpush.xpose.msk.msrb.mxu2 %vm622_vm1, %v2950_v19 }
0x17f5   :  { %v10029_v44 = vpop.f32.mrf.mxu1 }
0x17fd   :  { %v10045_v49 = vpop.f32.mrf.mxu1 }
0x1805   :  { %v2830_v50 = vpop.f32.mrf.mxu1 }
0x1806   :  { %v2831_v51 = vadd.f32 %v9683_v8, %v2830_v50  ;;  %v7487_v8 = vld [vmem:[%s11703_s6 + $0x330] sm:$0xff] }
0x1807   :  { %2912 = vmatpush.msrb.mxu3 %v7487_v8 }
0x1808   :  { %v2836_v52 = vsel %vm658_vm2, %v2831_v51, -inf }
0x1809   :  { %2837 = vmax.xlane.f32.xlu2 %v2836_v52  ;;  %2913 = vmatpush.msrb.mxu3 %v7486_v57 }
0x180d   :  { %v2833_v53 = vpop.f32.mrf.mxu1 }
0x180e   :  { %v2834_v54 = vadd.f32 %v9690_v14, %v2833_v53  ;;  %v7485_v14 = vld [vmem:[%s11703_s6 + $0x320] sm:$0xff] }
0x180f   :  { %2914 = vmatpush.msrb.mxu3 %v7485_v14 }
0x1810   :  { %v2839_v55 = vsel %vm658_vm2, %v2834_v54, -inf  ;;  %7490 = vmatmul.msk.f32.vlgmr.msrb.gmra.mxu3 %vm526_vm0, %v9915_v29 }
0x1811   :  { %2840 = vmax.xlane.f32.xlu0 %v2839_v55 }
0x1815   :  { %v2982_v33 = vpop.f32.mrf.mxu1 }
0x1816   :  { %v2983_v40 = vadd.f32 %v8089_v37, %v2982_v33 }
0x1818   :  { %7491 = vmatmul.msk.f32.gmra.mxu3 %vm526_vm0, %v9931_v34 }
0x181d   :  { %v2985_v38 = vpop.f32.mrf.mxu1 }
0x181e   :  { %v2986_v4 = vadd.f32 %v8089_v37, %v2985_v38 }
0x1820   :  { %3065 = vmatpush.msra.mxu3 %v2986_v4 }
0x1822   :  { %3066 = vmatpush.msra.mxu3 %v2983_v40 }
0x1824   :  { %3189 = vmatpush.msrb.mxu3 %v7527_v62 }
0x187c   :  { %v2838_v60 = vpop.xlane.xlu2 %2837 }
0x187d   :  { %v2842_v61 = vsub.f32 %v2831_v51, %v2838_v60  ;;  %v10127_v51 = vld [vmem:[%s11700_s3 + $0x8] sm:$0xff] }
0x187f   :  { %v2844_v0 = vmul.f32 1.442695, %v2842_v61 }
0x1881   :  { %8242 = vpow2.f32 %v2844_v0  ;;  %v7526_v0 = vld [vmem:[%s11703_s6 + $0x3d0] sm:$0xff] }
0x1882   :  { %3190 = vmatpush.msrb.mxu3 %v7526_v0 }
0x1884   :  { %v2841_v3 = vpop.xlane.xlu0 %2840  ;;  %3191 = vmatpush.msrb.mxu3 %v7525_v1 }
0x1885   :  { %v2843_v7 = vsub.f32 %v2834_v54, %v2841_v3  ;;  %v7520_v3 = vld [vmem:[%s11703_s6 + $0x358] sm:$0xff] }
0x1886   :  { %3192 = vmatpush.msrb.mxu3 %v7524_v2 }
0x1887   :  { %v8243_v9 = vpop.eup %8242  ;;  %v2846_v12 = vmul.f32 1.442695, %v2843_v7 }
0x1888   :  { %v2848_v13 = vsel %vm658_vm2, %v8243_v9, 0.0 }
0x1889   :  { %8244 = vpow2.f32 %v2846_v12  ;;  %2849 = vadd.xlane.f32.xlu1 %v2848_v13  ;;  %v7518_v12 = vld [vmem:[%s11703_s6 + $0x348] sm:$0xff]  ;;  %v7517_v13 = vld [vmem:[%s11703_s6 + $0x340] sm:$0xff] }
0x188f   :  { %v8245_v16 = vpop.eup %8244 }
0x1890   :  { %v2851_v17 = vsel %vm658_vm2, %v8245_v16, 0.0 }
0x1891   :  { %2852 = vadd.xlane.f32.xlu2 %v2851_v17 }
0x1893   :  { %v2916_v26 = vpop.f32.mrf.mxu3 }
0x1894   :  { %v2917_v28 = vadd.f32 %v8088_v27, %v2916_v26 }
0x189b   :  { %v2919_v30 = vpop.f32.mrf.mxu3 }
0x189c   :  { %v2920_v31 = vadd.f32 %v8088_v27, %v2919_v30  ;;  %v7534_v27 = vld [vmem:[%s11703_s6 + $0x458] sm:$0xff] }
0x189d   :  { %3222 = vmatpush.msrb.mxu0 %v7534_v27 }
0x18fc   :  { %v2850_v20 = vpop.xlane.xlu1 %2849 }
0x18fd   :  { %8246 = vrcp.f32 %v2850_v20 }
0x1903   :  { %v8247_v22 = vpop.eup %8246 }
0x1904   :  { %v2856_v23 = vmul.f32 %v8247_v22, %v8243_v9  ;;  %v2853_v45 = vpop.xlane.xlu2 %2852  ;;  %v7519_v9 = vld [vmem:[%s11703_s6 + $0x350] sm:$0xff] }
0x1905   :  { %8248 = vrcp.f32 %v2853_v45 }
0x1906   :  { %7482 = vmatmul.msk.f32.vlgmr.msra.gmra.mxu2 %vm658_vm2, %v2856_v23  ;;  %v8091_v23 = vld [vmem:[%s11704_s7 + $0x1a] ss:$0 sm:$0xff] }
0x1907   :  { %3156 = vmatpush.msra.mxu2 %v7520_v3  ;;  %v7554_v3 = vld [vmem:[%s11703_s6 + $0x3e0] sm:$0xff] }
0x1909   :  { %3157 = vmatpush.msra.mxu2 %v7519_v9  ;;  %v7549_v9 = vld [vmem:[%s11703_s6 + $0x370] sm:$0xff] }
0x190b   :  { %v8249_v24 = vpop.eup %8248  ;;  %3158 = vmatpush.msra.mxu2 %v7518_v12  ;;  %v7548_v12 = vld [vmem:[%s11703_s6 + $0x368] sm:$0xff] }
0x190c   :  { %v2857_v25 = vmul.f32 %v8249_v24, %v8245_v16 }
0x190d   :  { %3159 = vmatpush.msra.mxu2 %v7517_v13  ;;  %v7547_v13 = vld [vmem:[%s11703_s6 + $0x360] sm:$0xff] }
0x190e   :  { %7483 = vmatmul.msk.f32.gmra.mxu2 %vm658_vm2, %v2857_v25 }
0x1916   :  { %7508 = vmatmul.msk.f32.vlgmr.msrb.gmra.mxu2 %vm622_vm1, %v2917_v28  ;;  %v7533_v28 = vld [vmem:[%s11703_s6 + $0x450] sm:$0xff] }
0x1917   :  { %3223 = vmatpush.msrb.mxu0 %v7533_v28  ;;  %v7564_v28 = vld [vmem:[%s11703_s6 + $0x478] sm:$0xff] }
0x191e   :  { %7509 = vmatmul.msk.f32.gmra.mxu2 %vm622_vm1, %v2920_v31  ;;  %v7532_v31 = vld [vmem:[%s11703_s6 + $0x448] sm:$0xff] }
0x191f   :  { %3224 = vmatpush.msrb.mxu0 %v7532_v31  ;;  %v7563_v31 = vld [vmem:[%s11703_s6 + $0x470] sm:$0xff] }
0x1921   :  { %3225 = vmatpush.msrb.mxu0 %v7531_v32  ;;  %v7562_v32 = vld [vmem:[%s11703_s6 + $0x468] sm:$0xff] }
0x1926   :  { %7522 = vmatmul.msk.f32.vlgmr.msra.gmra.mxu2 %vm526_vm0, %v9915_v29 }
0x192e   :  { %7523 = vmatmul.msk.f32.gmra.mxu2 %vm526_vm0, %v9931_v34 }
0x1989   :  { %v2881_v36 = vpop.f32.mrf.mxu2 }
0x198a   :  { %7515 = vmatmul.msk.f32.vlgmr.msrb.gmra.mxu1 %vm622_vm1, %v2881_v36 }
0x1991   :  { %v2884_v5 = vpop.f32.mrf.mxu2 }
0x1992   :  { %7516 = vmatmul.msk.f32.gmra.mxu1 %vm622_vm1, %v2884_v5 }
0x1999   :  { %v3017_v11 = vpop.f32.mrf.mxu2 }
0x199a   :  { %v3018_v48 = vadd.f32 %v10120_v47, %v3017_v11 }
0x199c   :  { %v3023_v10 = vsel %vm658_vm2, %v3018_v48, -inf }
0x199d   :  { %3024 = vmax.xlane.f32.xlu0 %v3023_v10  ;;  %v7557_v10 = vld [vmem:[%s11703_s6 + $0x3f8] sm:$0xff] }
0x19a1   :  { %v3020_v50 = vpop.f32.mrf.mxu2 }
0x19a2   :  { %v3021_v52 = vadd.f32 %v10127_v51, %v3020_v50  ;;  %v7556_v50 = vld [vmem:[%s11703_s6 + $0x3f0] sm:$0xff] }
0x19a4   :  { %v3026_v53 = vsel %vm658_vm2, %v3021_v52, -inf }
0x19a5   :  { %3027 = vmax.xlane.f32.xlu1 %v3026_v53 }
0x19a9   :  { %v3161_v22 = vpop.f32.mrf.mxu2 }
0x19aa   :  { %v3162_v24 = vadd.f32 %v8091_v23, %v3161_v22 }
0x19b1   :  { %v3164_v25 = vpop.f32.mrf.mxu2 }
0x19b2   :  { %v3165_v26 = vadd.f32 %v8091_v23, %v3164_v25 }
0x1a07   :  { %v10188_v30 = vpop.f32.mrf.mxu1 }
0x1a0f   :  { %v10198_v33 = vpop.f32.mrf.mxu1 }
0x1a10   :  { %v3025_v54 = vpop.xlane.xlu0 %3024 }
0x1a11   :  { %v3029_v55 = vsub.f32 %v3018_v48, %v3025_v54  ;;  %v8092_v54 = vld [vmem:[%s11704_s7 + $0x22] ss:$0 sm:$0xff] }
0x1a13   :  { %v3031_v56 = vmul.f32 1.442695, %v3029_v55 }
0x1a15   :  { %8250 = vpow2.f32 %v3031_v56 }
0x1a18   :  { %v3028_v8 = vpop.xlane.xlu1 %3027 }
0x1a19   :  { %v3030_v57 = vsub.f32 %v3021_v52, %v3028_v8  ;;  %v7555_v52 = vld [vmem:[%s11703_s6 + $0x3e8] sm:$0xff] }
0x1a1b   :  { %v8251_v14 = vpop.eup %8250  ;;  %v3033_v58 = vmul.f32 1.442695, %v3030_v57 }
0x1a1c   :  { %v3035_v59 = vsel %vm658_vm2, %v8251_v14, 0.0 }
0x1a1d   :  { %8252 = vpow2.f32 %v3033_v58  ;;  %3036 = vadd.xlane.f32.xlu2 %v3035_v59 }
0x1a23   :  { %v8253_v60 = vpop.eup %8252 }
0x1a24   :  { %v3038_v61 = vsel %vm658_vm2, %v8253_v60, 0.0 }
0x1a25   :  { %3039 = vadd.xlane.f32.xlu0 %v3038_v61 }
0x1a90   :  { %v3037_v7 = vpop.xlane.xlu2 %3036 }
0x1a91   :  { %8254 = vrcp.f32 %v3037_v7  ;;  %v7550_v7 = vld [vmem:[%s11703_s6 + $0x378] sm:$0xff] }
0x1a97   :  { %v8255_v16 = vpop.eup %8254 }
0x1a98   :  { %v3043_v17 = vmul.f32 %v8255_v16, %v8251_v14  ;;  %v3040_v35 = vpop.xlane.xlu0 %3039 }
0x1a99   :  { %8256 = vrcp.f32 %v3040_v35 }
0x1a9a   :  { %7510 = vmatmul.msk.f32.vlgmr.msra.gmra.mxu3 %vm658_vm2, %v3043_v17 }
0x1a9f   :  { %v8257_v18 = vpop.eup %8256 }
0x1aa0   :  { %v3044_v43 = vmul.f32 %v8257_v18, %v8253_v60 }
0x1aa2   :  { %7511 = vmatmul.msk.f32.gmra.mxu3 %vm658_vm2, %v3044_v43 }
0x1aaa   :  { %7529 = vmatmul.msk.f32.vlgmr.msrb.gmra.mxu3 %vm526_vm0, %v9915_v29 }
0x1ab2   :  { %7530 = vmatmul.msk.f32.gmra.mxu3 %vm526_vm0, %v9931_v34 }
0x1b1d   :  { %v3068_v19 = vpop.f32.mrf.mxu3 }
0x1b1e   :  { %7513 = vmatmul.msk.f32.vlgmr.msra.gmra.mxu0 %vm622_vm1, %v3068_v19  ;;  %v7544_v19 = vld [vmem:[%s11705_s8 + $0x50] sm:$0xff] }
0x1b1f   :  { %3374 = vmatpush.msra.mxu0 %v7550_v7  ;;  %3342 = vmatpush.msra.mxu3 %v7544_v19  ;;  %v8096_v19 = vld [vmem:[%s11709_s12 + $0x10] ss:$0 sm:$0xff] }
0x1b21   :  { %3375 = vmatpush.msra.mxu0 %v7549_v9 }
0x1b23   :  { %3376 = vmatpush.msra.mxu0 %v7548_v12 }
0x1b25   :  { %v3071_v20 = vpop.f32.mrf.mxu3  ;;  %3377 = vmatpush.msra.mxu0 %v7547_v13 }
0x1b26   :  { %7514 = vmatmul.msk.f32.gmra.mxu0 %vm622_vm1, %v3071_v20 }
0x1b2d   :  { %v3194_v21 = vpop.f32.mrf.mxu3 }
0x1b2e   :  { %v3195_v45 = vadd.f32 %v8090_v6, %v3194_v21  ;;  %7536 = vmatmul.msk.f32.vlgmr.msrb.gmra.mxu0 %vm526_vm0, %v9915_v29  ;;  %v8093_v21 = vld [vmem:[%s11704_s7 + $0x1f] ss:$0 sm:$0xff] }
0x1b35   :  { %v3197_v42 = vpop.f32.mrf.mxu3 }
0x1b36   :  { %v3198_v46 = vadd.f32 %v8090_v6, %v3197_v42  ;;  %7537 = vmatmul.msk.f32.gmra.mxu0 %vm526_vm0, %v9931_v34 }
0x1b38   :  { %7538 = vmatpush.xpose.msk.msra.mxu1 %vm622_vm1, %v3198_v46 }
0x1b3c   :  { %7539 = vmatpush.xpose.msk.msra.mxu1 %vm622_vm1, %v3195_v45 }
0x1b3e   :  { %7552 = vmatmul.msk.f32.vlgmr.msra.gmra.mxu0 %vm526_vm0, %v9915_v29 }
0x1b3f   :  { %7540 = vmatmul.msk.f32.vlgmr.msra.gmra.mxu1 %vm622_vm1, %v3162_v24  ;;  %v8094_v24 = vld [vmem:[%s11704_s7 + $0x1b] ss:$0 sm:$0xff] }
0x1b40   :  { %3407 = vmatpush.msrb.mxu1 %v7557_v10 }
0x1b42   :  { %3408 = vmatpush.msrb.mxu1 %v7556_v50 }
0x1b44   :  { %3409 = vmatpush.msrb.mxu1 %v7555_v52 }
0x1b46   :  { %3410 = vmatpush.msrb.mxu1 %v7554_v3  ;;  %7553 = vmatmul.msk.f32.gmra.mxu0 %vm526_vm0, %v9931_v34  ;;  %v7574_v3 = vld [vmem:[%s11705_s8 + $0x58] sm:$0xff] }
0x1b47   :  { %7541 = vmatmul.msk.f32.gmra.mxu1 %vm622_vm1, %v3165_v26 }
0x1b48   :  { %3560 = vmatpush.msra.mxu1 %v7574_v3  ;;  %v8097_v3 = vld [vmem:[%s11709_s12 + $0xc] ss:$0 sm:$0xff] }
0x1b4f   :  { %7559 = vmatmul.msk.f32.vlgmr.msrb.gmra.mxu1 %vm526_vm0, %v9915_v29 }
0x1b57   :  { %7560 = vmatmul.msk.f32.gmra.mxu1 %vm526_vm0, %v9931_v34 }
0x1b9b   :  { %v10206_v11 = vpop.f32.mrf.mxu0 }
0x1ba3   :  { %v10208_v48 = vpop.f32.mrf.mxu0 }
0x1bab   :  { %v3227_v53 = vpop.f32.mrf.mxu0 }
0x1bac   :  { %v3228_v14 = vadd.f32 %v8092_v54, %v3227_v53 }
0x1bb3   :  { %v3230_v8 = vpop.f32.mrf.mxu0 }
0x1bb4   :  { %v3231_v58 = vadd.f32 %v8092_v54, %v3230_v8  ;;  %v8095_v8 = vld [vmem:[%s11704_s7 + $0x23] ss:$0 sm:$0xff] }
0x1bb6   :  { %3310 = vmatpush.msrb.mxu2 %v3231_v58 }
0x1bb8   :  { %3311 = vmatpush.msrb.mxu2 %v3228_v14 }
0x1bba   :  { %3440 = vmatpush.msra.mxu2 %v7564_v28 }
0x1bbb   :  { %v3379_v45 = vpop.f32.mrf.mxu0 }
0x1bbc   :  { %v3262_v36 = vpop.f32.mrf.mxu1  ;;  %v3380_v25 = vadd.f32 %v8094_v24, %v3379_v45  ;;  %3441 = vmatpush.msra.mxu2 %v7563_v31 }
0x1bbd   :  { %v3263_v37 = vadd.f32 %v10120_v47, %v3262_v36 }
0x1bbe   :  { %3442 = vmatpush.msra.mxu2 %v7562_v32 }
0x1bbf   :  { %v3268_v38 = vsel %vm658_vm2, %v3263_v37, -inf }
0x1bc0   :  { %3269 = vmax.xlane.f32.xlu1 %v3268_v38 }
0x1bc3   :  { %v3382_v26 = vpop.f32.mrf.mxu0 }
0x1bc4   :  { %v3265_v40 = vpop.f32.mrf.mxu1  ;;  %v3383_v27 = vadd.f32 %v8094_v24, %v3382_v26 }
0x1bc5   :  { %v3266_v4 = vadd.f32 %v10127_v51, %v3265_v40 }
0x1bc7   :  { %v3271_v5 = vsel %vm658_vm2, %v3266_v4, -inf }
0x1bc8   :  { %3272 = vmax.xlane.f32.xlu2 %v3271_v5 }
0x1bcc   :  { %v3412_v20 = vpop.f32.mrf.mxu1 }
0x1bcd   :  { %v3413_v46 = vadd.f32 %v8093_v21, %v3412_v20 }
0x1bd4   :  { %v3415_v6 = vpop.f32.mrf.mxu1 }
0x1bd5   :  { %v3416_v42 = vadd.f32 %v8093_v21, %v3415_v6 }
0x1bd7   :  { %7568 = vmatpush.xpose.msk.msrb.mxu3 %vm622_vm1, %v3416_v42  ;;  %v3132_v42 = vadd.f32 %v10198_v33, %v10208_v48 }
0x1bdb   :  { %7569 = vmatpush.xpose.msk.msrb.mxu3 %vm622_vm1, %v3413_v46 }
0x1c33   :  { %v3270_v55 = vpop.xlane.xlu1 %3269 }
0x1c34   :  { %v3274_v56 = vsub.f32 %v3263_v37, %v3270_v55  ;;  %v7561_v37 = vld [vmem:[%s11703_s6 + $0x460] sm:$0xff] }
0x1c35   :  { %3443 = vmatpush.msra.mxu2 %v7561_v37 }
0x1c36   :  { %v3276_v57 = vmul.f32 1.442695, %v3274_v56 }
0x1c38   :  { %8258 = vpow2.f32 %v3276_v57 }
0x1c3b   :  { %v3273_v59 = vpop.xlane.xlu2 %3272 }
0x1c3c   :  { %v3275_v60 = vsub.f32 %v3266_v4, %v3273_v59 }
0x1c3e   :  { %v8259_v61 = vpop.eup %8258  ;;  %v3278_v62 = vmul.f32 1.442695, %v3275_v60 }
0x1c3f   :  { %v3280_v0 = vsel %vm658_vm2, %v8259_v61, 0.0 }
0x1c40   :  { %8260 = vpow2.f32 %v3278_v62  ;;  %3281 = vadd.xlane.f32.xlu0 %v3280_v0 }
0x1c46   :  { %v8261_v1 = vpop.eup %8260 }
0x1c47   :  { %v3283_v2 = vsel %vm658_vm2, %v8261_v1, 0.0 }
0x1c48   :  { %3284 = vadd.xlane.f32.xlu1 %v3283_v2 }
0x1cb3   :  { %v3282_v16 = vpop.xlane.xlu0 %3281 }
0x1cb4   :  { %8262 = vrcp.f32 %v3282_v16 }
0x1cba   :  { %v8263_v17 = vpop.eup %8262 }
0x1cbb   :  { %v3288_v35 = vmul.f32 %v8263_v17, %v8259_v61  ;;  %v3285_v18 = vpop.xlane.xlu1 %3284 }
0x1cbc   :  { %8264 = vrcp.f32 %v3285_v18 }
0x1cbd   :  { %7542 = vmatmul.msk.f32.vlgmr.msrb.gmra.mxu2 %vm658_vm2, %v3288_v35 }
0x1cc2   :  { %v8265_v43 = vpop.eup %8264 }
0x1cc3   :  { %v3289_v39 = vmul.f32 %v8265_v43, %v8261_v1  ;;  %v3129_v43 = vadd.f32 %v10188_v30, %v10206_v11 }
0x1cc5   :  { %7543 = vmatmul.msk.f32.gmra.mxu2 %vm658_vm2, %v3289_v39 }
0x1ccd   :  { %7566 = vmatmul.msk.f32.vlgmr.msra.gmra.mxu2 %vm526_vm0, %v9915_v29 }
0x1cd5   :  { %7567 = vmatmul.msk.f32.gmra.mxu2 %vm526_vm0, %v9931_v34 }
0x1d40   :  { %v3313_v22 = vpop.f32.mrf.mxu2 }
0x1d41   :  { %7545 = vmatmul.msk.f32.vlgmr.msra.gmra.mxu3 %vm622_vm1, %v3313_v22 }
0x1d48   :  { %v3316_v23 = vpop.f32.mrf.mxu2 }
0x1d49   :  { %7546 = vmatmul.msk.f32.gmra.mxu3 %vm622_vm1, %v3316_v23 }
0x1d50   :  { %v3445_v54 = vpop.f32.mrf.mxu2 }
0x1d51   :  { %7570 = vmatmul.msk.f32.vlgmr.msrb.gmra.mxu3 %vm622_vm1, %v3380_v25  ;;  %v3446_v59 = vadd.f32 %v8095_v8, %v3445_v54  ;;  %v7592_v54 = vld [vmem:[%s11707_s10 + $0xa8] sm:$0xff] }
0x1d58   :  { %v3448_v14 = vpop.f32.mrf.mxu2 }
0x1d59   :  { %7571 = vmatmul.msk.f32.gmra.mxu3 %vm622_vm1, %v3383_v27  ;;  %v3449_v60 = vadd.f32 %v8095_v8, %v3448_v14  ;;  %v7591_v8 = vld [vmem:[%s11707_s10 + $0xa0] sm:$0xff] }
0x1d5b   :  { %3528 = vmatpush.msrb.mxu0 %v3449_v60 }
0x1d5d   :  { %3529 = vmatpush.msrb.mxu0 %v3446_v59 }
0x1dc4   :  { %v3344_v36 = vpop.f32.mrf.mxu3 }
0x1dc5   :  { %v3350_v39 = vadd.f32 %v3344_v36, %v3129_v43 }
0x1dcc   :  { %v3347_v38 = vpop.f32.mrf.mxu3 }
0x1dcd   :  { %v3351_v22 = vadd.f32 %v3347_v38, %v3132_v42  ;;  %v7582_v38 = vld [vmem:[%s11706_s9 + $0x50] sm:$0xff]  ;;  %v7588_v42 = vld [vmem:[%s11707_s10 + $0x88] sm:$0xff] }
0x1dd4   :  { %v3480_v40 = vpop.f32.mrf.mxu3 }
0x1dd5   :  { %v3481_v4 = vadd.f32 %v10120_v47, %v3480_v40  ;;  %v7581_v40 = vld [vmem:[%s11706_s9 + $0x48] sm:$0xff] }
0x1dd7   :  { %v3486_v5 = vsel %vm658_vm2, %v3481_v4, -inf }
0x1dd8   :  { %3487 = vmax.xlane.f32.xlu2 %v3486_v5 }
0x1ddc   :  { %v3483_v10 = vpop.f32.mrf.mxu3 }
0x1ddd   :  { %v3484_v50 = vadd.f32 %v10127_v51, %v3483_v10 }
0x1ddf   :  { %v3489_v52 = vsel %vm658_vm2, %v3484_v50, -inf }
0x1de0   :  { %3490 = vmax.xlane.f32.xlu0 %v3489_v52  ;;  %v7594_v52 = vld [vmem:[%s11707_s10 + $0xb8] sm:$0xff] }
0x1de1   :  { %3706 = vmatpush.msra.mxu3 %v7594_v52 }
0x1e4b   :  { %v3488_v53 = vpop.xlane.xlu2 %3487 }
0x1e4c   :  { %v3492_v55 = vsub.f32 %v3481_v4, %v3488_v53  ;;  %v7580_v4 = vld [vmem:[%s11706_s9 + $0x40] sm:$0xff]  ;;  %v7593_v53 = vld [vmem:[%s11707_s10 + $0xb0] sm:$0xff] }
0x1e4d   :  { %3707 = vmatpush.msra.mxu3 %v7593_v53 }
0x1e4e   :  { %v3494_v56 = vmul.f32 1.442695, %v3492_v55 }
0x1e4f   :  { %3708 = vmatpush.msra.mxu3 %v7592_v54  ;;  %v7603_v54 = vld [vmem:[%s11703_s6 + $0x498] sm:$0xff] }
0x1e50   :  { %8266 = vpow2.f32 %v3494_v56  ;;  %3809 = vmatpush.msra.mxu0 %v7603_v54  ;;  %v8105_v54 = vld [vmem:[%s11704_s7 + $0x2c] ss:$0 sm:$0xff] }
0x1e51   :  { %3709 = vmatpush.msra.mxu3 %v7591_v8  ;;  %v7602_v8 = vld [vmem:[%s11703_s6 + $0x490] sm:$0xff] }
0x1e52   :  { %3810 = vmatpush.msra.mxu0 %v7602_v8 }
0x1e53   :  { %v3491_v57 = vpop.xlane.xlu0 %3490 }
0x1e54   :  { %v3493_v58 = vsub.f32 %v3484_v50, %v3491_v57 }
0x1e56   :  { %v8267_v61 = vpop.eup %8266  ;;  %v3496_v62 = vmul.f32 1.442695, %v3493_v58  ;;  %v7590_v58 = vld [vmem:[%s11707_s10 + $0x98] sm:$0xff] }
0x1e57   :  { %v3498_v0 = vsel %vm658_vm2, %v8267_v61, 0.0  ;;  %3710 = vmatpush.msra.mxu3 %v7590_v58  ;;  %v7601_v58 = vld [vmem:[%s11703_s6 + $0x488] sm:$0xff] }
0x1e58   :  { %8268 = vpow2.f32 %v3496_v62  ;;  %3499 = vadd.xlane.f32.xlu1 %v3498_v0  ;;  %3811 = vmatpush.msra.mxu0 %v7601_v58  ;;  %v7643_v58 = vld [vmem:[%s11703_s6 + $0x5a8] sm:$0xff] }
0x1e5e   :  { %v8269_v1 = vpop.eup %8268 }
0x1e5f   :  { %v3501_v2 = vsel %vm658_vm2, %v8269_v1, 0.0 }
0x1e60   :  { %3502 = vadd.xlane.f32.xlu2 %v3501_v2 }
0x1ecb   :  { %v3500_v7 = vpop.xlane.xlu1 %3499 }
0x1ecc   :  { %8270 = vrcp.f32 %v3500_v7 }
0x1ed2   :  { %v8271_v9 = vpop.eup %8270 }
0x1ed3   :  { %v3506_v12 = vmul.f32 %v8271_v9, %v8267_v61  ;;  %v3503_v13 = vpop.xlane.xlu2 %3502 }
0x1ed4   :  { %8272 = vrcp.f32 %v3503_v13 }
0x1ed5   :  { %7572 = vmatmul.msk.f32.vlgmr.msrb.gmra.mxu0 %vm658_vm2, %v3506_v12  ;;  %v8098_v12 = vld [vmem:[%s11709_s12 + $0xd] ss:$0 sm:$0xff] }
0x1eda   :  { %v8273_v16 = vpop.eup %8272 }
0x1edb   :  { %v3507_v17 = vmul.f32 %v8273_v16, %v8269_v1 }
0x1edd   :  { %7573 = vmatmul.msk.f32.gmra.mxu0 %vm658_vm2, %v3507_v17 }
0x1f52   :  { %v3531_v35 = vpop.f32.mrf.mxu0 }
0x1f53   :  { %7575 = vmatmul.msk.f32.vlgmr.msra.gmra.mxu1 %vm622_vm1, %v3531_v35 }
0x1f5a   :  { %v3534_v18 = vpop.f32.mrf.mxu0 }
0x1f5b   :  { %7576 = vmatmul.msk.f32.gmra.mxu1 %vm622_vm1, %v3534_v18 }
0x1fd0   :  { %v3562_v20 = vpop.f32.mrf.mxu1 }
0x1fd1   :  { %v3568_v21 = vadd.f32 %v3562_v20, %v3350_v39 }
0x1fd3   :  { %v3575_v6 = vadd.f32 %v8096_v19, %v3568_v21 }
0x1fd5   :  { %v3577_v46 = vadd.f32 %v3575_v6, %v9915_v29  ;;  %v7589_v6 = vld [vmem:[%s11707_s10 + $0x90] sm:$0xff] }
0x1fd6   :  { %3711 = vmatpush.msra.mxu3 %v7589_v6 }
0x1fd7   :  { %v3583_v23 = vsel %vm526_vm0, %v3577_v46, 0.0 }
0x1fd8   :  { %3584 = vadd.xlane.f32.xlu0 %v3583_v23  ;;  %v3565_v45 = vpop.f32.mrf.mxu1  ;;  %3712 = vmatpush.msra.mxu3 %v7588_v42 }
0x1fd9   :  { %v3569_v24 = vadd.f32 %v3565_v45, %v3351_v22  ;;  %v8099_v22 = vld [vmem:[%s11708_s11 + $0x2] ss:$0 sm:$0xff] }
0x1fdb   :  { %v3576_v30 = vadd.f32 %v8096_v19, %v3569_v24 }
0x1fdd   :  { %v3578_v11 = vadd.f32 %v3576_v30, %v9931_v34  ;;  %v7583_v34 = vld [vmem:[%s11706_s9 + $0x58] sm:$0xff] }
0x1fde   :  { %3665 = vmatpush.msrb.mxu2 %v7583_v34 }
0x1fdf   :  { %v3586_v25 = vsel %vm526_vm0, %v3578_v11, 0.0 }
0x1fe0   :  { %3587 = vadd.xlane.f32.xlu1 %v3586_v25  ;;  %3666 = vmatpush.msrb.mxu2 %v7582_v38 }
0x1fe2   :  { %3667 = vmatpush.msrb.mxu2 %v7581_v40 }
0x1fe4   :  { %3668 = vmatpush.msrb.mxu2 %v7580_v4 }
0x204b   :  { %v3585_v26 = vpop.xlane.xlu0 %3584 }
0x204c   :  { %v3589_v27 = vmul.f32 %v3585_v26, %v9478_v63  ;;  %v8100_v26 = vld [vmem:[%s11709_s12 + $0x11] ss:$0 sm:$0xff] }
0x204e   :  { %v3591_v28 = vsub.f32 %v3577_v46, %v3589_v27  ;;  %v7587_v46 = vld [vmem:[%s11707_s10 + $0x80] sm:$0xff] }
0x204f   :  { %3713 = vmatpush.msra.mxu3 %v7587_v46 }
0x2050   :  { %v3593_v31 = vmul.f32 %v3591_v28, %v3591_v28 }
0x2052   :  { %v3595_v33 = vsel %vm526_vm0, %v3593_v31, 0.0 }
0x2053   :  { %3596 = vadd.xlane.f32.xlu2 %v3595_v33  ;;  %v3588_v29 = vpop.xlane.xlu1 %3587 }
0x2054   :  { %v3590_v48 = vmul.f32 %v3588_v29, %v9478_v63 }
0x2056   :  { %v3592_v32 = vsub.f32 %v3578_v11, %v3590_v48 }
0x2058   :  { %v3594_v36 = vmul.f32 %v3592_v32, %v3592_v32 }
0x205a   :  { %v3598_v37 = vsel %vm526_vm0, %v3594_v36, 0.0 }
0x205b   :  { %3599 = vadd.xlane.f32.xlu0 %v3598_v37 }
0x20c6   :  { %v3597_v5 = vpop.xlane.xlu2 %3596 }
0x20c7   :  { %v3601_v10 = vmul.f32 %v3597_v5, %v9478_v63 }
0x20c9   :  { %v3603_v50 = vadd.f32 1e-05, %v3601_v10 }
0x20cb   :  { %8274 = vrsqrt.f32 %v3603_v50  ;;  %vm3611_vm12 = vweird.f32 %v3603_v50 }
0x20ce   :  { %v3600_v55 = vpop.xlane.xlu0 %3599 }
0x20cf   :  { %v3602_v56 = vmul.f32 %v3600_v55, %v9478_v63  ;;  %v7610_v55 = vld [vmem:[%s11703_s6 + $0x518] sm:$0xff] }
0x20d0   :  { %3842 = vmatpush.msrb.mxu1 %v7610_v55 }
0x20d1   :  { %v8275_v57 = vpop.eup %8274  ;;  %v3604_v14 = vadd.f32 1e-05, %v3602_v56  ;;  %v7617_v56 = vld [vmem:[%s11703_s6 + $0x598] sm:$0xff] }
0x20d2   :  { %v3606_v59 = vmul.f32 %v8275_v57, %v3603_v50  ;;  %vm3612_vm11 = vweird.f32 %v8275_v57  ;;  %3875 = vmatpush.msra.mxu2 %v7617_v56 }
0x20d3   :  { %8276 = vrsqrt.f32 %v3604_v14  ;;  %vm3613_vm13 = vmor %vm3611_vm12, %vm3612_vm11  ;;  %vm3621_vm15 = vweird.f32 %v3604_v14 }
0x20d4   :  { %v3607_v60 = vmul.f32 %v8275_v57, %v3606_v59  ;;  %v7608_v59 = vld [vmem:[%s11703_s6 + $0x508] sm:$0xff] }
0x20d6   :  { %v3608_v61 = vmul.f32 0.5, %v3607_v60  ;;  %v7615_v60 = vld [vmem:[%s11703_s6 + $0x588] sm:$0xff] }
0x20d8   :  { %v3609_v62 = vsub.f32 1.5, %v3608_v61  ;;  %v7600_v61 = vld [vmem:[%s11703_s6 + $0x480] sm:$0xff] }
0x20d9   :  { %v8277_v0 = vpop.eup %8276  ;;  %3812 = vmatpush.msra.mxu0 %v7600_v61 }
0x20da   :  { %v3610_v1 = vmul.f32 %v8275_v57, %v3609_v62  ;;  %v3616_v2 = vmul.f32 %v8277_v0, %v3604_v14  ;;  %vm3622_vm14 = vweird.f32 %v8277_v0  ;;  %v7616_v14 = vld [vmem:[%s11703_s6 + $0x590] sm:$0xff]  ;;  %v7607_v62 = vld [vmem:[%s11703_s6 + $0x500] sm:$0xff] }
0x20db   :  { %vm3623_vm3 = vmor %vm3621_vm15, %vm3622_vm14  ;;  %3876 = vmatpush.msra.mxu2 %v7616_v14 }
0x20dc   :  { %v3614_v7 = vsel %vm3613_vm13, %v8275_v57, %v3610_v1  ;;  %v3617_v9 = vmul.f32 %v8277_v0, %v3616_v2  ;;  %v7609_v57 = vld [vmem:[%s11703_s6 + $0x510] sm:$0xff] }
0x20dd   :  { %v3625_v13 = vmul.f32 %v3614_v7, %v3591_v28  ;;  %3843 = vmatpush.msrb.mxu1 %v7609_v57  ;;  %3877 = vmatpush.msra.mxu2 %v7615_v60  ;;  %v7631_v7 = vld [vmem:[%s11703_s6 + $0x4b8] sm:$0xff]  ;;  %v7644_v57 = vld [vmem:[%s11703_s6 + $0x5b0] sm:$0xff] }
0x20de   :  { %v3618_v16 = vmul.f32 0.5, %v3617_v9  ;;  %v7638_v9 = vld [vmem:[%s11703_s6 + $0x538] sm:$0xff] }
0x20df   :  { %v3630_v17 = vmul.f32 %v8097_v3, %v3625_v13  ;;  %3844 = vmatpush.msrb.mxu1 %v7608_v59  ;;  %v7637_v13 = vld [vmem:[%s11703_s6 + $0x530] sm:$0xff]  ;;  %v7642_v59 = vld [vmem:[%s11703_s6 + $0x5a0] sm:$0xff] }
0x20e0   :  { %v3619_v35 = vsub.f32 1.5, %v3618_v16 }
0x20e1   :  { %v3635_v18 = vadd.f32 %v8098_v12, %v3630_v17  ;;  %3845 = vmatpush.msrb.mxu1 %v7607_v62  ;;  %v7629_v17 = vld [vmem:[%s11703_s6 + $0x4a8] sm:$0xff] }
0x20e2   :  { %v3620_v43 = vmul.f32 %v8277_v0, %v3619_v35  ;;  %v7636_v35 = vld [vmem:[%s11703_s6 + $0x528] sm:$0xff] }
0x20e3   :  { %7585 = vmatmul.msk.f32.vlgmr.msrb.gmra.mxu2 %vm526_vm0, %v3635_v18  ;;  %3996 = vmatpush.msra.mxu1 %v7631_v7 }
0x20e4   :  { %v3624_v39 = vsel %vm3623_vm3, %v8277_v0, %v3620_v43  ;;  %v7614_v0 = vld [vmem:[%s11703_s6 + $0x580] sm:$0xff] }
0x20e5   :  { %v3626_v19 = vmul.f32 %v3624_v39, %v3592_v32  ;;  %3878 = vmatpush.msra.mxu2 %v7614_v0  ;;  %v7628_v43 = vld [vmem:[%s11703_s6 + $0x4a0] sm:$0xff]  ;;  %v8107_v0 = vld [vmem:[%s11704_s7 + $0x29] ss:$0 sm:$0xff] }
0x20e6   :  { %v7635_v39 = vld [vmem:[%s11703_s6 + $0x520] sm:$0xff] }
0x20e7   :  { %v3631_v20 = vmul.f32 %v8097_v3, %v3626_v19  ;;  %4029 = vmatpush.msrb.mxu2 %v7638_v9 }
0x20e9   :  { %v3636_v21 = vadd.f32 %v8098_v12, %v3631_v20  ;;  %v7630_v12 = vld [vmem:[%s11703_s6 + $0x4b0] sm:$0xff]  ;;  %4030 = vmatpush.msrb.mxu2 %v7637_v13 }
0x20ea   :  { %3997 = vmatpush.msra.mxu1 %v7630_v12 }
0x20eb   :  { %7586 = vmatmul.msk.f32.gmra.mxu2 %vm526_vm0, %v3636_v21 }
0x20ec   :  { %3998 = vmatpush.msra.mxu1 %v7629_v17  ;;  %4031 = vmatpush.msrb.mxu2 %v7636_v35 }
0x20ee   :  { %3999 = vmatpush.msra.mxu1 %v7628_v43  ;;  %4032 = vmatpush.msrb.mxu2 %v7635_v39 }
0x2166   :  { %v3670_v23 = vpop.f32.mrf.mxu2 }
0x2167   :  { %v3671_v45 = vadd.f32 %v8099_v22, %v3670_v23 }
0x2169   :  { %v3676_v24 = vmax.f32 %v3671_v45, 0.0 }
0x216b   :  { %7596 = vmatmul.msk.f32.vlgmr.msra.gmra.mxu3 %vm1517_vm10, %v3676_v24  ;;  %v8101_v24 = vld [vmem:[%s11709_s12 + $0xe] ss:$0 sm:$0xff] }
0x216e   :  { %v3673_v30 = vpop.f32.mrf.mxu2 }
0x216f   :  { %v3674_v11 = vadd.f32 %v8099_v22, %v3673_v30 }
0x2171   :  { %v3677_v25 = vmax.f32 %v3674_v11, 0.0 }
0x2173   :  { %7597 = vmatmul.msk.f32.gmra.mxu3 %vm1517_vm10, %v3677_v25  ;;  %v8102_v25 = vld [vmem:[%s11709_s12 + $0xf] ss:$0 sm:$0xff] }
0x21ee   :  { %v3715_v27 = vpop.f32.mrf.mxu3 }
0x21ef   :  { %v3716_v28 = vadd.f32 %v8100_v26, %v3715_v27 }
0x21f1   :  { %v3721_v31 = vadd.f32 %v3716_v28, %v3635_v18 }
0x21f3   :  { %v3727_v33 = vsel %vm526_vm0, %v3721_v31, 0.0 }
0x21f4   :  { %3728 = vadd.xlane.f32.xlu1 %v3727_v33 }
0x21f6   :  { %v3718_v29 = vpop.f32.mrf.mxu3 }
0x21f7   :  { %v3719_v48 = vadd.f32 %v8100_v26, %v3718_v29 }
0x21f9   :  { %v3722_v32 = vadd.f32 %v3719_v48, %v3636_v21 }
0x21fb   :  { %v3730_v36 = vsel %vm526_vm0, %v3722_v32, 0.0 }
0x21fc   :  { %3731 = vadd.xlane.f32.xlu2 %v3730_v36 }
0x2267   :  { %v3729_v37 = vpop.xlane.xlu1 %3728 }
0x2268   :  { %v3733_v34 = vmul.f32 %v3729_v37, %v9478_v63 }
0x226a   :  { %v10368_v38 = vsub.f32 %v3721_v31, %v3733_v34 }
0x226c   :  { %v3737_v40 = vmul.f32 %v10368_v38, %v10368_v38 }
0x226e   :  { %v3739_v4 = vsel %vm526_vm0, %v3737_v40, 0.0 }
0x226f   :  { %v3732_v5 = vpop.xlane.xlu2 %3731  ;;  %3740 = vadd.xlane.f32.xlu0 %v3739_v4 }
0x2270   :  { %v3734_v10 = vmul.f32 %v3732_v5, %v9478_v63 }
0x2272   :  { %v10374_v50 = vsub.f32 %v3722_v32, %v3734_v10 }
0x2274   :  { %v3738_v52 = vmul.f32 %v10374_v50, %v10374_v50 }
0x2276   :  { %v3742_v53 = vsel %vm526_vm0, %v3738_v52, 0.0 }
0x2277   :  { %3743 = vadd.xlane.f32.xlu1 %v3742_v53  ;;  %v7645_v53 = vld [vmem:[%s11703_s6 + $0x5b8] sm:$0xff] }
0x22e2   :  { %v3741_v1 = vpop.xlane.xlu0 %3740 }
0x22e3   :  { %v3745_v2 = vmul.f32 %v3741_v1, %v9478_v63 }
0x22e5   :  { %v3747_v3 = vadd.f32 1e-05, %v3745_v2 }
0x22e7   :  { %8278 = vrsqrt.f32 %v3747_v3  ;;  %vm3755_vm5 = vweird.f32 %v3747_v3 }
0x22ea   :  { %v3744_v16 = vpop.xlane.xlu1 %3743 }
0x22eb   :  { %v3746_v18 = vmul.f32 %v3744_v16, %v9478_v63 }
0x22ed   :  { %v8279_v19 = vpop.eup %8278  ;;  %v3748_v20 = vadd.f32 1e-05, %v3746_v18  ;;  %v8108_v18 = vld [vmem:[%s11704_s7 + $0x2d] ss:$0 sm:$0xff] }
0x22ee   :  { %v3750_v21 = vmul.f32 %v8279_v19, %v3747_v3  ;;  %vm3756_vm4 = vweird.f32 %v8279_v19 }
0x22ef   :  { %8280 = vrsqrt.f32 %v3748_v20  ;;  %vm3757_vm6 = vmor %vm3755_vm5, %vm3756_vm4  ;;  %vm3765_vm8 = vweird.f32 %v3748_v20 }
0x22f0   :  { %v3751_v6 = vmul.f32 %v8279_v19, %v3750_v21 }
0x22f2   :  { %v3752_v42 = vmul.f32 0.5, %v3751_v6 }
0x22f4   :  { %v3753_v46 = vsub.f32 1.5, %v3752_v42 }
0x22f5   :  { %v8281_v22 = vpop.eup %8280 }
0x22f6   :  { %v3754_v23 = vmul.f32 %v8279_v19, %v3753_v46  ;;  %v3760_v45 = vmul.f32 %v8281_v22, %v3748_v20  ;;  %vm3766_vm7 = vweird.f32 %v8281_v22 }
0x22f7   :  { %vm3767_vm9 = vmor %vm3765_vm8, %vm3766_vm7 }
0x22f8   :  { %v3758_v30 = vsel %vm3757_vm6, %v8279_v19, %v3754_v23  ;;  %v3761_v11 = vmul.f32 %v8281_v22, %v3760_v45 }
0x22f9   :  { %v3769_v26 = vmul.f32 %v3758_v30, %v10368_v38  ;;  %v8104_v38 = vld [vmem:[%s11704_s7 + $0x28] ss:$0 sm:$0xff] }
0x22fa   :  { %v3762_v27 = vmul.f32 0.5, %v3761_v11 }
0x22fb   :  { %v3774_v28 = vmul.f32 %v8101_v24, %v3769_v26  ;;  %v7663_v26 = vld [vmem:[%s11703_s6 + $0x4d8] sm:$0xff] }
0x22fc   :  { %v3763_v31 = vsub.f32 1.5, %v3762_v27  ;;  %v7662_v27 = vld [vmem:[%s11703_s6 + $0x4d0] sm:$0xff] }
0x22fd   :  { %v10448_v33 = vadd.f32 %v8102_v25, %v3774_v28  ;;  %v7661_v28 = vld [vmem:[%s11703_s6 + $0x4c8] sm:$0xff] }
0x22fe   :  { %v3764_v29 = vmul.f32 %v8281_v22, %v3763_v31  ;;  %v7660_v31 = vld [vmem:[%s11703_s6 + $0x4c0] sm:$0xff] }
0x22ff   :  { %7605 = vmatmul.msk.f32.vlgmr.msra.gmra.mxu0 %vm526_vm0, %v10448_v33  ;;  %7612 = vmatmul.msk.f32.vlgmr.msrb.gmra.mxu1 %vm526_vm0, %v10448_v33 }
0x2300   :  { %v3768_v48 = vsel %vm3767_vm9, %v8281_v22, %v3764_v29  ;;  %7619 = vmatmul.msk.f32.vlgmr.msra.gmra.mxu2 %vm526_vm0, %v10448_v33 }
0x2301   :  { %v3770_v32 = vmul.f32 %v3768_v48, %v10374_v50  ;;  %v8103_v50 = vld [vmem:[%s11704_s7 + $0x24] ss:$0 sm:$0xff] }
0x2303   :  { %v3775_v36 = vmul.f32 %v8101_v24, %v3770_v32 }
0x2305   :  { %v10457_v37 = vadd.f32 %v8102_v25, %v3775_v36  ;;  %v8106_v36 = vld [vmem:[%s11704_s7 + $0x25] ss:$0 sm:$0xff] }
0x2307   :  { %7606 = vmatmul.msk.f32.gmra.mxu0 %vm526_vm0, %v10457_v37  ;;  %7613 = vmatmul.msk.f32.gmra.mxu1 %vm526_vm0, %v10457_v37 }
0x2308   :  { %7620 = vmatmul.msk.f32.gmra.mxu2 %vm526_vm0, %v10457_v37 }
0x230f   :  { %7633 = vmatmul.msk.f32.vlgmr.msra.gmra.mxu1 %vm526_vm0, %v10448_v33 }
0x2310   :  { %7640 = vmatmul.msk.f32.vlgmr.msrb.gmra.mxu2 %vm526_vm0, %v10448_v33 }
0x2317   :  { %7634 = vmatmul.msk.f32.gmra.mxu1 %vm526_vm0, %v10457_v37 }
0x2318   :  { %7641 = vmatmul.msk.f32.gmra.mxu2 %vm526_vm0, %v10457_v37 }
0x237c   :  { %v3847_v34 = vpop.f32.mrf.mxu1  ;;  %v3814_v10 = vpop.f32.mrf.mxu0 }
0x237d   :  { %v3848_v52 = vadd.f32 %v8104_v38, %v3847_v34  ;;  %v3815_v56 = vadd.f32 %v8103_v50, %v3814_v10 }
0x2383   :  { %v3880_v40 = vpop.f32.mrf.mxu2 }
0x2384   :  { %v3850_v4 = vpop.f32.mrf.mxu1  ;;  %v3881_v14 = vadd.f32 %v8105_v54, %v3880_v40  ;;  %v3817_v60 = vpop.f32.mrf.mxu0 }
0x2385   :  { %v3851_v5 = vadd.f32 %v8104_v38, %v3850_v4  ;;  %v3818_v62 = vadd.f32 %v8103_v50, %v3817_v60  ;;  %v7627_v4 = vld [vmem:[%s11705_s8 + $0x60] sm:$0xff] }
0x2387   :  { %7621 = vmatpush.xpose.msk.msrb.mxu3 %vm622_vm1, %v3851_v5 }
0x238b   :  { %v3883_v55 = vpop.f32.mrf.mxu2  ;;  %7622 = vmatpush.xpose.msk.msrb.mxu3 %vm622_vm1, %v3848_v52  ;;  %v10547_v52 = vld [vmem:[%s11700_s3] sm:$0xff] }
0x238c   :  { %v3884_v8 = vadd.f32 %v8105_v54, %v3883_v55  ;;  %v4001_v32 = vpop.f32.mrf.mxu1 }
0x238d   :  { %v4002_v34 = vadd.f32 %v8106_v36, %v4001_v32  ;;  %v7698_v32 = vld [vmem:[%s11703_s6 + $0x568] sm:$0xff] }
0x238e   :  { %3963 = vmatpush.msrb.mxu0 %v3884_v8  ;;  %7623 = vmatmul.msk.f32.vlgmr.msrb.gmra.mxu3 %vm622_vm1, %v3815_v56  ;;  %v10554_v56 = vld [vmem:[%s11700_s3 + $0x8] sm:$0xff] }
0x238f   :  { %4062 = vmatpush.msra.mxu3 %v7645_v53 }
0x2390   :  { %3964 = vmatpush.msrb.mxu0 %v3881_v14 }
0x2391   :  { %4063 = vmatpush.msra.mxu3 %v7644_v57 }
0x2393   :  { %4064 = vmatpush.msra.mxu3 %v7643_v58  ;;  %v4034_v61 = vpop.f32.mrf.mxu2 }
0x2394   :  { %v4035_v3 = vadd.f32 %v8107_v0, %v4034_v61  ;;  %v4004_v38 = vpop.f32.mrf.mxu1 }
0x2395   :  { %4065 = vmatpush.msra.mxu3 %v7642_v59  ;;  %v4005_v40 = vadd.f32 %v8106_v36, %v4004_v38  ;;  %v7697_v36 = vld [vmem:[%s11703_s6 + $0x560] sm:$0xff] }
0x2396   :  { %7624 = vmatmul.msk.f32.gmra.mxu3 %vm622_vm1, %v3818_v62 }
0x2397   :  { %4211 = vmatpush.msrb.mxu3 %v7627_v4 }
0x239b   :  { %v4037_v1 = vpop.f32.mrf.mxu2 }
0x239c   :  { %v4038_v2 = vadd.f32 %v8107_v0, %v4037_v1 }
0x239e   :  { %7649 = vmatpush.xpose.msk.msra.mxu0 %vm622_vm1, %v4038_v2  ;;  %7647 = vmatmul.msk.f32.vlgmr.msra.gmra.mxu3 %vm526_vm0, %v10448_v33 }
0x23a2   :  { %7650 = vmatpush.xpose.msk.msra.mxu0 %vm622_vm1, %v4035_v3 }
0x23a6   :  { %7648 = vmatmul.msk.f32.gmra.mxu3 %vm526_vm0, %v10457_v37 }
0x2411   :  { %v3915_v7 = vpop.f32.mrf.mxu3 }
0x2412   :  { %v3916_v9 = vadd.f32 %v10120_v47, %v3915_v7  ;;  %v7670_v7 = vld [vmem:[%s11703_s6 + $0x558] sm:$0xff] }
0x2414   :  { %v3921_v12 = vsel %vm658_vm2, %v3916_v9, -inf }
0x2415   :  { %3922 = vmax.xlane.f32.xlu2 %v3921_v12  ;;  %v7668_v12 = vld [vmem:[%s11703_s6 + $0x548] sm:$0xff] }
0x2419   :  { %v3918_v13 = vpop.f32.mrf.mxu3 }
0x241a   :  { %v3919_v16 = vadd.f32 %v10127_v51, %v3918_v13  ;;  %v7667_v13 = vld [vmem:[%s11703_s6 + $0x540] sm:$0xff] }
0x241c   :  { %v3924_v17 = vsel %vm658_vm2, %v3919_v16, -inf }
0x241d   :  { %3925 = vmax.xlane.f32.xlu0 %v3924_v17 }
0x2421   :  { %v4067_v35 = vpop.f32.mrf.mxu3 }
0x2422   :  { %v4068_v19 = vadd.f32 %v8108_v18, %v4067_v35 }
0x2429   :  { %v4070_v43 = vpop.f32.mrf.mxu3 }
0x242a   :  { %v4071_v39 = vadd.f32 %v8108_v18, %v4070_v43 }
0x242c   :  { %4150 = vmatpush.msrb.mxu1 %v4071_v39 }
0x242e   :  { %4151 = vmatpush.msrb.mxu1 %v4068_v19  ;;  %v7655_v19 = vld [vmem:[%s11705_s8 + $0x68] sm:$0xff] }
0x242f   :  { %4182 = vmatpush.msra.mxu2 %v7655_v19 }
0x2430   :  { %4274 = vmatpush.msra.mxu1 %v7670_v7 }
0x2488   :  { %v3923_v47 = vpop.xlane.xlu2 %3922 }
0x2489   :  { %v3927_v20 = vsub.f32 %v3916_v9, %v3923_v47  ;;  %v7669_v9 = vld [vmem:[%s11703_s6 + $0x550] sm:$0xff]  ;;  %v7677_v47 = vld [vmem:[%s11703_s6 + $0x5d8] sm:$0xff] }
0x248a   :  { %4275 = vmatpush.msra.mxu1 %v7669_v9  ;;  %4307 = vmatpush.msrb.mxu2 %v7677_v47  ;;  %v7707_v47 = vld [vmem:[%s11703_s6 + $0x5f8] sm:$0xff] }
0x248b   :  { %v3929_v21 = vmul.f32 1.442695, %v3927_v20  ;;  %v7676_v20 = vld [vmem:[%s11703_s6 + $0x5d0] sm:$0xff] }
0x248c   :  { %4276 = vmatpush.msra.mxu1 %v7668_v12  ;;  %4308 = vmatpush.msrb.mxu2 %v7676_v20  ;;  %v7706_v20 = vld [vmem:[%s11703_s6 + $0x5f0] sm:$0xff] }
0x248d   :  { %8282 = vpow2.f32 %v3929_v21  ;;  %v7675_v21 = vld [vmem:[%s11703_s6 + $0x5c8] sm:$0xff] }
0x248e   :  { %4277 = vmatpush.msra.mxu1 %v7667_v13  ;;  %4309 = vmatpush.msrb.mxu2 %v7675_v21  ;;  %v7705_v21 = vld [vmem:[%s11703_s6 + $0x5e8] sm:$0xff] }
0x2490   :  { %v3926_v6 = vpop.xlane.xlu0 %3925 }
0x2491   :  { %v3928_v42 = vsub.f32 %v3919_v16, %v3926_v6  ;;  %v7674_v6 = vld [vmem:[%s11703_s6 + $0x5c0] sm:$0xff] }
0x2492   :  { %4310 = vmatpush.msrb.mxu2 %v7674_v6  ;;  %v7704_v6 = vld [vmem:[%s11703_s6 + $0x5e0] sm:$0xff] }
0x2493   :  { %v8283_v51 = vpop.eup %8282  ;;  %v3931_v46 = vmul.f32 1.442695, %v3928_v42  ;;  %v7693_v42 = vld [vmem:[%s11703_s6 + $0x4f8] sm:$0xff] }
0x2494   :  { %v3933_v22 = vsel %vm658_vm2, %v8283_v51, 0.0 }
0x2495   :  { %8284 = vpow2.f32 %v3931_v46  ;;  %3934 = vadd.xlane.f32.xlu1 %v3933_v22  ;;  %v7692_v46 = vld [vmem:[%s11703_s6 + $0x4f0] sm:$0xff]  ;;  %v7691_v22 = vld [vmem:[%s11703_s6 + $0x4e8] sm:$0xff] }
0x249b   :  { %v8285_v23 = vpop.eup %8284 }
0x249c   :  { %v3936_v45 = vsel %vm658_vm2, %v8285_v23, 0.0 }
0x249d   :  { %3937 = vadd.xlane.f32.xlu2 %v3936_v45 }
0x2508   :  { %v3935_v24 = vpop.xlane.xlu1 %3934 }
0x2509   :  { %8286 = vrcp.f32 %v3935_v24 }
0x250f   :  { %v8287_v30 = vpop.eup %8286 }
0x2510   :  { %v3941_v11 = vmul.f32 %v8287_v30, %v8283_v51  ;;  %v3938_v25 = vpop.xlane.xlu2 %3937  ;;  %v8110_v30 = vld [vmem:[%s11704_s7 + $0x2a] ss:$0 sm:$0xff] }
0x2511   :  { %8288 = vrcp.f32 %v3938_v25 }
0x2512   :  { %7625 = vmatmul.msk.f32.vlgmr.msrb.gmra.mxu0 %vm658_vm2, %v3941_v11 }
0x2513   :  { %4241 = vmatpush.msrb.mxu0 %v7663_v26 }
0x2515   :  { %4242 = vmatpush.msrb.mxu0 %v7662_v27  ;;  %v8109_v27 = vld [vmem:[%s11704_s7 + $0x26] ss:$0 sm:$0xff] }
0x2517   :  { %v8289_v29 = vpop.eup %8288  ;;  %4243 = vmatpush.msrb.mxu0 %v7661_v28 }
0x2518   :  { %v3942_v48 = vmul.f32 %v8289_v29, %v8285_v23  ;;  %v7690_v23 = vld [vmem:[%s11703_s6 + $0x4e0] sm:$0xff] }
0x2519   :  { %4244 = vmatpush.msrb.mxu0 %v7660_v31  ;;  %v7700_v31 = vld [vmem:[%s11703_s6 + $0x578] sm:$0xff] }
0x251a   :  { %7626 = vmatmul.msk.f32.gmra.mxu0 %vm658_vm2, %v3942_v48  ;;  %v7699_v48 = vld [vmem:[%s11703_s6 + $0x570] sm:$0xff] }
0x2522   :  { %7651 = vmatmul.msk.f32.vlgmr.msra.gmra.mxu0 %vm622_vm1, %v4002_v34 }
0x252a   :  { %7652 = vmatmul.msk.f32.gmra.mxu0 %vm622_vm1, %v4005_v40 }
0x2532   :  { %7665 = vmatmul.msk.f32.vlgmr.msrb.gmra.mxu0 %vm526_vm0, %v10448_v33 }
0x253a   :  { %7666 = vmatmul.msk.f32.gmra.mxu0 %vm526_vm0, %v10457_v37 }
0x258f   :  { %v3966_v5 = vpop.f32.mrf.mxu0 }
0x2590   :  { %7658 = vmatmul.msk.f32.vlgmr.msrb.gmra.mxu3 %vm622_vm1, %v3966_v5 }
0x2597   :  { %v3969_v10 = vpop.f32.mrf.mxu0 }
0x2598   :  { %7659 = vmatmul.msk.f32.gmra.mxu3 %vm622_vm1, %v3969_v10 }
0x259f   :  { %v4102_v50 = vpop.f32.mrf.mxu0 }
0x25a0   :  { %v4103_v53 = vadd.f32 %v10547_v52, %v4102_v50  ;;  %v8111_v50 = vld [vmem:[%s11704_s7 + $0x2e] ss:$0 sm:$0xff] }
0x25a2   :  { %v4108_v54 = vsel %vm658_vm2, %v4103_v53, -inf }
0x25a3   :  { %4109 = vmax.xlane.f32.xlu0 %v4108_v54 }
0x25a7   :  { %v4105_v55 = vpop.f32.mrf.mxu0 }
0x25a8   :  { %v4106_v8 = vadd.f32 %v10554_v56, %v4105_v55 }
0x25aa   :  { %v4111_v57 = vsel %vm658_vm2, %v4106_v8, -inf }
0x25ab   :  { %4112 = vmax.xlane.f32.xlu1 %v4111_v57 }
0x25af   :  { %v4246_v26 = vpop.f32.mrf.mxu0 }
0x25b0   :  { %v4247_v29 = vadd.f32 %v8109_v27, %v4246_v26 }
0x25b7   :  { %v4249_v34 = vpop.f32.mrf.mxu0 }
0x25b8   :  { %v4250_v38 = vadd.f32 %v8109_v27, %v4249_v34 }
0x2613   :  { %v10645_v5 = vpop.f32.mrf.mxu3 }
0x2616   :  { %v4110_v14 = vpop.xlane.xlu0 %4109 }
0x2617   :  { %v4114_v58 = vsub.f32 %v4103_v53, %v4110_v14 }
0x2619   :  { %v4116_v59 = vmul.f32 1.442695, %v4114_v58 }
0x261b   :  { %8290 = vpow2.f32 %v4116_v59  ;;  %v10650_v54 = vpop.f32.mrf.mxu3 }
0x261e   :  { %v4113_v60 = vpop.xlane.xlu1 %4112 }
0x261f   :  { %v4115_v61 = vsub.f32 %v4106_v8, %v4113_v60  ;;  %v7687_v8 = vld [vmem:[%s11705_s8 + $0x70] sm:$0xff] }
0x2621   :  { %v8291_v62 = vpop.eup %8290  ;;  %v4118_v0 = vmul.f32 1.442695, %v4115_v61 }
0x2622   :  { %v4120_v1 = vsel %vm658_vm2, %v8291_v62, 0.0 }
0x2623   :  { %8292 = vpow2.f32 %v4118_v0  ;;  %4121 = vadd.xlane.f32.xlu2 %v4120_v1  ;;  %v8113_v1 = vld [vmem:[%s11704_s7 + $0x2b] ss:$0 sm:$0xff] }
0x2629   :  { %v8293_v2 = vpop.eup %8292 }
0x262a   :  { %v4123_v3 = vsel %vm658_vm2, %v8293_v2, 0.0 }
0x262b   :  { %4124 = vadd.xlane.f32.xlu0 %v4123_v3 }
0x2696   :  { %v4122_v16 = vpop.xlane.xlu2 %4121 }
0x2697   :  { %8294 = vrcp.f32 %v4122_v16 }
0x269d   :  { %v8295_v17 = vpop.eup %8294 }
0x269e   :  { %v4128_v35 = vmul.f32 %v8295_v17, %v8291_v62  ;;  %v4125_v18 = vpop.xlane.xlu0 %4124 }
0x269f   :  { %8296 = vrcp.f32 %v4125_v18 }
0x26a0   :  { %7653 = vmatmul.msk.f32.vlgmr.msrb.gmra.mxu1 %vm658_vm2, %v4128_v35 }
0x26a1   :  { %4427 = vmatpush.msrb.mxu1 %v7687_v8 }
0x26a5   :  { %v8297_v43 = vpop.eup %8296 }
0x26a6   :  { %v4129_v39 = vmul.f32 %v8297_v43, %v8293_v2 }
0x26a8   :  { %7654 = vmatmul.msk.f32.gmra.mxu1 %vm658_vm2, %v4129_v39 }
0x26b0   :  { %7672 = vmatmul.msk.f32.vlgmr.msra.gmra.mxu1 %vm526_vm0, %v10448_v33 }
0x26b8   :  { %7673 = vmatmul.msk.f32.gmra.mxu1 %vm526_vm0, %v10457_v37 }
0x271d   :  { %v4153_v51 = vpop.f32.mrf.mxu1 }
0x271e   :  { %7656 = vmatmul.msk.f32.vlgmr.msra.gmra.mxu2 %vm622_vm1, %v4153_v51 }
0x271f   :  { %4459 = vmatpush.msra.mxu2 %v7693_v42 }
0x2721   :  { %4460 = vmatpush.msra.mxu2 %v7692_v46 }
0x2723   :  { %4461 = vmatpush.msra.mxu2 %v7691_v22 }
0x2725   :  { %v4156_v45 = vpop.f32.mrf.mxu1  ;;  %4462 = vmatpush.msra.mxu2 %v7690_v23 }
0x2726   :  { %7657 = vmatmul.msk.f32.gmra.mxu2 %vm622_vm1, %v4156_v45 }
0x272d   :  { %v4279_v24 = vpop.f32.mrf.mxu1 }
0x272e   :  { %7679 = vmatmul.msk.f32.vlgmr.msrb.gmra.mxu2 %vm526_vm0, %v10448_v33  ;;  %v4280_v28 = vadd.f32 %v8110_v30, %v4279_v24 }
0x2735   :  { %v4282_v11 = vpop.f32.mrf.mxu1 }
0x2736   :  { %v4283_v25 = vadd.f32 %v8110_v30, %v4282_v11  ;;  %7680 = vmatmul.msk.f32.gmra.mxu2 %vm526_vm0, %v10457_v37 }
0x2738   :  { %7681 = vmatpush.xpose.msk.msra.mxu3 %vm622_vm1, %v4283_v25  ;;  %v8112_v25 = vld [vmem:[%s11704_s7 + $0x27] ss:$0 sm:$0xff] }
0x273c   :  { %7682 = vmatpush.xpose.msk.msra.mxu3 %vm622_vm1, %v4280_v28 }
0x273e   :  { %7695 = vmatmul.msk.f32.vlgmr.msra.gmra.mxu2 %vm526_vm0, %v10448_v33 }
0x273f   :  { %7683 = vmatmul.msk.f32.vlgmr.msra.gmra.mxu3 %vm622_vm1, %v4247_v29  ;;  %v8114_v29 = vld [vmem:[%s11704_s7 + $0x2f] ss:$0 sm:$0xff] }
0x2740   :  { %4492 = vmatpush.msrb.mxu3 %v7700_v31 }
0x2742   :  { %4493 = vmatpush.msrb.mxu3 %v7699_v48 }
0x2744   :  { %4494 = vmatpush.msrb.mxu3 %v7698_v32 }
0x2746   :  { %4495 = vmatpush.msrb.mxu3 %v7697_v36  ;;  %7696 = vmatmul.msk.f32.gmra.mxu2 %vm526_vm0, %v10457_v37 }
0x2747   :  { %7684 = vmatmul.msk.f32.gmra.mxu3 %vm622_vm1, %v4250_v38 }
0x274f   :  { %7702 = vmatmul.msk.f32.vlgmr.msrb.gmra.mxu3 %vm526_vm0, %v10448_v33 }
0x2757   :  { %7703 = vmatmul.msk.f32.gmra.mxu3 %vm526_vm0, %v10457_v37 }
0x27a1   :  { %v10641_v40 = vpop.f32.mrf.mxu2 }
0x27a9   :  { %v10643_v4 = vpop.f32.mrf.mxu2 }
0x27b1   :  { %v4312_v10 = vpop.f32.mrf.mxu2 }
0x27b2   :  { %v4313_v57 = vadd.f32 %v8111_v50, %v4312_v10 }
0x27b9   :  { %v4315_v53 = vpop.f32.mrf.mxu2 }
0x27ba   :  { %v4316_v55 = vadd.f32 %v8111_v50, %v4315_v53 }
0x27bc   :  { %4395 = vmatpush.msra.mxu0 %v4316_v55 }
0x27be   :  { %4396 = vmatpush.msra.mxu0 %v4313_v57 }
0x27c0   :  { %4525 = vmatpush.msrb.mxu0 %v7707_v47 }
0x27c1   :  { %v4464_v11 = vpop.f32.mrf.mxu2 }
0x27c2   :  { %v4347_v14 = vpop.f32.mrf.mxu3  ;;  %4526 = vmatpush.msrb.mxu0 %v7706_v20  ;;  %v4465_v26 = vadd.f32 %v8112_v25, %v4464_v11 }
0x27c3   :  { %v4348_v58 = vadd.f32 %v10547_v52, %v4347_v14 }
0x27c4   :  { %4527 = vmatpush.msrb.mxu0 %v7705_v21  ;;  %v4217_v21 = vadd.f32 %v10650_v54, %v10643_v4 }
0x27c5   :  { %v4353_v59 = vsel %vm658_vm2, %v4348_v58, -inf }
0x27c6   :  { %4354 = vmax.xlane.f32.xlu1 %v4353_v59  ;;  %4528 = vmatpush.msrb.mxu0 %v7704_v6 }
0x27c9   :  { %v4467_v28 = vpop.f32.mrf.mxu2 }
0x27ca   :  { %v4350_v60 = vpop.f32.mrf.mxu3  ;;  %v4468_v31 = vadd.f32 %v8112_v25, %v4467_v28 }
0x27cb   :  { %v4351_v61 = vadd.f32 %v10554_v56, %v4350_v60 }
0x27cd   :  { %v4356_v62 = vsel %vm658_vm2, %v4351_v61, -inf }
0x27ce   :  { %4357 = vmax.xlane.f32.xlu2 %v4356_v62 }
0x27d2   :  { %v4497_v0 = vpop.f32.mrf.mxu3 }
0x27d3   :  { %v4498_v7 = vadd.f32 %v8113_v1, %v4497_v0 }
0x27da   :  { %v4500_v2 = vpop.f32.mrf.mxu3 }
0x27db   :  { %v4501_v3 = vadd.f32 %v8113_v1, %v4500_v2 }
0x27dd   :  { %7711 = vmatpush.xpose.msk.msra.mxu1 %vm622_vm1, %v4501_v3 }
0x27e1   :  { %7712 = vmatpush.xpose.msk.msra.mxu1 %vm622_vm1, %v4498_v7 }
0x2839   :  { %v4355_v9 = vpop.xlane.xlu1 %4354 }
0x283a   :  { %v4359_v12 = vsub.f32 %v4348_v58, %v4355_v9 }
0x283c   :  { %v4361_v13 = vmul.f32 1.442695, %v4359_v12 }
0x283e   :  { %8298 = vpow2.f32 %v4361_v13 }
0x2841   :  { %v4358_v16 = vpop.xlane.xlu2 %4357 }
0x2842   :  { %v4360_v17 = vsub.f32 %v4351_v61, %v4358_v16 }
0x2844   :  { %v8299_v35 = vpop.eup %8298  ;;  %v4363_v18 = vmul.f32 1.442695, %v4360_v17 }
0x2845   :  { %v4365_v43 = vsel %vm658_vm2, %v8299_v35, 0.0 }
0x2846   :  { %8300 = vpow2.f32 %v4363_v18  ;;  %4366 = vadd.xlane.f32.xlu0 %v4365_v43  ;;  %v4214_v18 = vadd.f32 %v10645_v5, %v10641_v40  ;;  %v8085_v40 = vld [vmem:[%s11709_s12 + $0xb] ss:$0 sm:$0xff] }
0x284c   :  { %v8301_v39 = vpop.eup %8300 }
0x284d   :  { %v4368_v19 = vsel %vm658_vm2, %v8301_v39, 0.0 }
0x284e   :  { %4369 = vadd.xlane.f32.xlu1 %v4368_v19 }
0x28b9   :  { %v4367_v42 = vpop.xlane.xlu0 %4366 }
0x28ba   :  { %8302 = vrcp.f32 %v4367_v42 }
0x28c0   :  { %v8303_v51 = vpop.eup %8302 }
0x28c1   :  { %v4373_v46 = vmul.f32 %v8303_v51, %v8299_v35  ;;  %v4370_v22 = vpop.xlane.xlu1 %4369 }
0x28c2   :  { %8304 = vrcp.f32 %v4370_v22 }
0x28c3   :  { %7685 = vmatmul.msk.f32.vlgmr.msra.gmra.mxu0 %vm658_vm2, %v4373_v46 }
0x28c8   :  { %v8305_v23 = vpop.eup %8304 }
0x28c9   :  { %v4374_v45 = vmul.f32 %v8305_v23, %v8301_v39  ;;  %v8115_v39 = vld [vmem:[%s11709_s12 + $0x16] ss:$0 sm:$0xff] }
0x28cb   :  { %7686 = vmatmul.msk.f32.gmra.mxu0 %vm658_vm2, %v4374_v45  ;;  %v2627_v45 = vadd.f32 %v8085_v40, %v10029_v44 }
0x28d3   :  { %7709 = vmatmul.msk.f32.vlgmr.msrb.gmra.mxu0 %vm526_vm0, %v10448_v33 }
0x28db   :  { %7710 = vmatmul.msk.f32.gmra.mxu0 %vm526_vm0, %v10457_v37 }
0x2940   :  { %v4398_v24 = vpop.f32.mrf.mxu0 }
0x2941   :  { %7688 = vmatmul.msk.f32.vlgmr.msrb.gmra.mxu1 %vm622_vm1, %v4398_v24 }
0x2948   :  { %v4401_v30 = vpop.f32.mrf.mxu0 }
0x2949   :  { %7689 = vmatmul.msk.f32.gmra.mxu1 %vm622_vm1, %v4401_v30 }
0x2950   :  { %v4530_v27 = vpop.f32.mrf.mxu0 }
0x2951   :  { %7713 = vmatmul.msk.f32.vlgmr.msra.gmra.mxu1 %vm622_vm1, %v4465_v26  ;;  %v4531_v36 = vadd.f32 %v8114_v29, %v4530_v27 }
0x2958   :  { %v4533_v48 = vpop.f32.mrf.mxu0 }
0x2959   :  { %v4534_v32 = vadd.f32 %v8114_v29, %v4533_v48  ;;  %7714 = vmatmul.msk.f32.gmra.mxu1 %vm622_vm1, %v4468_v31 }
0x295b   :  { %4613 = vmatpush.msrb.mxu2 %v4534_v32  ;;  %v7726_v32 = vld [vmem:[%s11706_s9 + $0x78] sm:$0xff] }
0x295c   :  { %4750 = vmatpush.msra.mxu0 %v7726_v32 }
0x295d   :  { %4614 = vmatpush.msrb.mxu2 %v4531_v36  ;;  %v7725_v36 = vld [vmem:[%s11706_s9 + $0x70] sm:$0xff] }
0x295e   :  { %4751 = vmatpush.msra.mxu0 %v7725_v36 }
0x29be   :  { %v4429_v34 = vpop.f32.mrf.mxu1 }
0x29bf   :  { %v4435_v43 = vadd.f32 %v4429_v34, %v4214_v18 }
0x29c6   :  { %v4432_v38 = vpop.f32.mrf.mxu1 }
0x29c7   :  { %v4436_v42 = vadd.f32 %v4432_v38, %v4217_v21  ;;  %v7732_v21 = vld [vmem:[%s11707_s10 + $0xd0] sm:$0xff] }
0x29ce   :  { %v4565_v10 = vpop.f32.mrf.mxu1 }
0x29cf   :  { %v4566_v50 = vadd.f32 %v10547_v52, %v4565_v10 }
0x29d1   :  { %v4571_v53 = vsel %vm658_vm2, %v4566_v50, -inf }
0x29d2   :  { %4572 = vmax.xlane.f32.xlu2 %v4571_v53  ;;  %v7736_v53 = vld [vmem:[%s11707_s10 + $0xf0] sm:$0xff] }
0x29d6   :  { %v4568_v55 = vpop.f32.mrf.mxu1 }
0x29d7   :  { %v4569_v8 = vadd.f32 %v10554_v56, %v4568_v55  ;;  %v7717_v56 = vld [vmem:[%s11705_s8 + $0x78] sm:$0xff]  ;;  %v7735_v55 = vld [vmem:[%s11707_s10 + $0xe8] sm:$0xff] }
0x29d8   :  { %4645 = vmatpush.msra.mxu3 %v7717_v56 }
0x29d9   :  { %v4574_v57 = vsel %vm658_vm2, %v4569_v8, -inf }
0x29da   :  { %4575 = vmax.xlane.f32.xlu0 %v4574_v57 }
0x2a45   :  { %v4573_v14 = vpop.xlane.xlu2 %4572 }
0x2a46   :  { %v4577_v58 = vsub.f32 %v4566_v50, %v4573_v14  ;;  %v7737_v50 = vld [vmem:[%s11707_s10 + $0xf8] sm:$0xff]  ;;  %v7734_v14 = vld [vmem:[%s11707_s10 + $0xe0] sm:$0xff] }
0x2a47   :  { %4791 = vmatpush.msrb.mxu1 %v7737_v50  ;;  %v4867_v50 = vld [vmem:[%s11710_s13 + $0x8] sm:$0xff] }
0x2a48   :  { %v4579_v59 = vmul.f32 1.442695, %v4577_v58 }
0x2a49   :  { %4792 = vmatpush.msrb.mxu1 %v7736_v53 }
0x2a4a   :  { %8306 = vpow2.f32 %v4579_v59 }
0x2a4b   :  { %4793 = vmatpush.msrb.mxu1 %v7735_v55  ;;  %v4866_v55 = vld [vmem:[%s11710_s13] sm:$0xff] }
0x2a4d   :  { %v4576_v60 = vpop.xlane.xlu0 %4575  ;;  %4794 = vmatpush.msrb.mxu1 %v7734_v14 }
0x2a4e   :  { %v4578_v61 = vsub.f32 %v4569_v8, %v4576_v60  ;;  %v7733_v60 = vld [vmem:[%s11707_s10 + $0xd8] sm:$0xff] }
0x2a4f   :  { %4795 = vmatpush.msrb.mxu1 %v7733_v60 }
0x2a50   :  { %v8307_v62 = vpop.eup %8306  ;;  %v4581_v0 = vmul.f32 1.442695, %v4578_v61 }
0x2a51   :  { %v4583_v1 = vsel %vm658_vm2, %v8307_v62, 0.0  ;;  %4796 = vmatpush.msrb.mxu1 %v7732_v21 }
0x2a52   :  { %8308 = vpow2.f32 %v4581_v0  ;;  %4584 = vadd.xlane.f32.xlu1 %v4583_v1 }
0x2a58   :  { %v8309_v52 = vpop.eup %8308 }
0x2a59   :  { %v4586_v2 = vsel %vm658_vm2, %v8309_v52, 0.0 }
0x2a5a   :  { %4587 = vadd.xlane.f32.xlu2 %v4586_v2 }
0x2ac5   :  { %v4585_v3 = vpop.xlane.xlu1 %4584 }
0x2ac6   :  { %8310 = vrcp.f32 %v4585_v3  ;;  %v8116_v3 = vld [vmem:[%s11709_s12 + $0x12] ss:$0 sm:$0xff] }
0x2acc   :  { %v8311_v7 = vpop.eup %8310 }
0x2acd   :  { %v4591_v9 = vmul.f32 %v8311_v7, %v8307_v62  ;;  %v4588_v12 = vpop.xlane.xlu2 %4587 }
0x2ace   :  { %8312 = vrcp.f32 %v4588_v12  ;;  %v8117_v12 = vld [vmem:[%s11709_s12 + $0x13] ss:$0 sm:$0xff] }
0x2acf   :  { %7715 = vmatmul.msk.f32.vlgmr.msrb.gmra.mxu2 %vm658_vm2, %v4591_v9 }
0x2ad4   :  { %v8313_v13 = vpop.eup %8312 }
0x2ad5   :  { %v4592_v16 = vmul.f32 %v8313_v13, %v8309_v52 }
0x2ad7   :  { %7716 = vmatmul.msk.f32.gmra.mxu2 %vm658_vm2, %v4592_v16 }
0x2b52   :  { %v4616_v17 = vpop.f32.mrf.mxu2 }
0x2b53   :  { %7718 = vmatmul.msk.f32.vlgmr.msra.gmra.mxu3 %vm622_vm1, %v4616_v17 }
0x2b5a   :  { %v4619_v35 = vpop.f32.mrf.mxu2 }
0x2b5b   :  { %7719 = vmatmul.msk.f32.gmra.mxu3 %vm622_vm1, %v4619_v35 }
0x2bd6   :  { %v4647_v19 = vpop.f32.mrf.mxu3 }
0x2bd7   :  { %v4653_v47 = vadd.f32 %v4647_v19, %v4435_v43 }
0x2bd9   :  { %v4660_v20 = vadd.f32 %v8115_v39, %v4653_v47 }
0x2bdb   :  { %v4662_v6 = vadd.f32 %v4660_v20, %v10448_v33  ;;  %v10723_v33 = vadd.f32 %v2627_v45, %v9981_v15  ;;  %v2630_v15 = vadd.f32 %v8085_v40, %v10045_v49  ;;  %v7724_v49 = vld [vmem:[%s11706_s9 + $0x68] sm:$0xff] }
0x2bdc   :  { %4752 = vmatpush.msra.mxu0 %v7724_v49 }
0x2bdd   :  { %v4668_v51 = vsel %vm526_vm0, %v4662_v6, 0.0  ;;  %v2638_v4 = vsel %vm526_vm0, %v10723_v33, 0.0  ;;  %v10733_v29 = vadd.f32 %v2630_v15, %v9986_v41  ;;  %v7723_v41 = vld [vmem:[%s11706_s9 + $0x60] sm:$0xff] }
0x2bde   :  { %4669 = vadd.xlane.f32.xlu0 %v4668_v51  ;;  %v4650_v46 = vpop.f32.mrf.mxu3  ;;  %4753 = vmatpush.msra.mxu0 %v7723_v41  ;;  %v8118_v51 = vld [vmem:[%s11708_s11 + $0x3] ss:$0 sm:$0xff] }
0x2bdf   :  { %v4654_v22 = vadd.f32 %v4650_v46, %v4436_v42  ;;  %v2641_v48 = vsel %vm526_vm0, %v10733_v29, 0.0  ;;  %v7730_v42 = vld [vmem:[%s11707_s10 + $0xc0] sm:$0xff] }
0x2be1   :  { %v4661_v5 = vadd.f32 %v8115_v39, %v4654_v22 }
0x2be3   :  { %v4663_v23 = vadd.f32 %v4661_v5, %v10457_v37 }
0x2be5   :  { %v4671_v24 = vsel %vm526_vm0, %v4663_v23, 0.0 }
0x2be6   :  { %4672 = vadd.xlane.f32.xlu1 %v4671_v24  ;;  %v8119_v24 = vld [vmem:[%s11709_s12 + $0x17] ss:$0 sm:$0xff] }
0x2bee   :  { %2639 = vadd.xlane.f32.xlu1 %v2638_v4 }
0x2c51   :  { %v4670_v54 = vpop.xlane.xlu0 %4669 }
0x2c52   :  { %v4674_v30 = vmul.f32 %v4670_v54, %v9478_v63 }
0x2c54   :  { %v4676_v11 = vsub.f32 %v4662_v6, %v4674_v30  ;;  %v7731_v6 = vld [vmem:[%s11707_s10 + $0xc8] sm:$0xff] }
0x2c55   :  { %4797 = vmatpush.msrb.mxu1 %v7731_v6 }
0x2c56   :  { %v4678_v25 = vmul.f32 %v4676_v11, %v4676_v11 }
0x2c57   :  { %4798 = vmatpush.msrb.mxu1 %v7730_v42 }
0x2c58   :  { %v4680_v26 = vsel %vm526_vm0, %v4678_v25, 0.0 }
0x2c59   :  { %4681 = vadd.xlane.f32.xlu2 %v4680_v26  ;;  %v4673_v37 = vpop.xlane.xlu1 %4672 }
0x2c5a   :  { %v4675_v44 = vmul.f32 %v4673_v37, %v9478_v63 }
0x2c5c   :  { %v4677_v27 = vsub.f32 %v4663_v23, %v4675_v44 }
0x2c5e   :  { %v4679_v28 = vmul.f32 %v4677_v27, %v4677_v27 }
0x2c60   :  { %v4683_v31 = vsel %vm526_vm0, %v4679_v28, 0.0 }
0x2c61   :  { %4684 = vadd.xlane.f32.xlu0 %v4683_v31  ;;  %v2640_v4 = vpop.xlane.xlu1 %2639 }
0x2c62   :  { %v2644_v30 = vmul.f32 %v2640_v4, %v9478_v63  ;;  %v7743_v4 = vld [vmem:[%s11710_s13 + $0x20] sm:$0xff] }
0x2c64   :  { %v2646_v26 = vsub.f32 %v10723_v33, %v2644_v30 }
0x2c66   :  { %v2648_v31 = vmul.f32 %v2646_v26, %v2646_v26 }
0x2c68   :  { %v2650_v49 = vsel %vm526_vm0, %v2648_v31, 0.0 }
0x2c69   :  { %2642 = vadd.xlane.f32.xlu0 %v2641_v48 }
0x2ccc   :  { %v4682_v34 = vpop.xlane.xlu2 %4681 }
0x2ccd   :  { %v4686_v38 = vmul.f32 %v4682_v34, %v9478_v63  ;;  %v4869_v34 = vld [vmem:[%s11710_s13 + $0x18] sm:$0xff] }
0x2cce   :  { %4922 = vmatpush.msrb.mxu3 %v4869_v34 }
0x2ccf   :  { %v4688_v10 = vadd.f32 1e-05, %v4686_v38 }
0x2cd1   :  { %8314 = vrsqrt.f32 %v4688_v10  ;;  %vm4696_vm12 = vweird.f32 %v4688_v10 }
0x2cd4   :  { %v4685_v8 = vpop.xlane.xlu0 %4684 }
0x2cd5   :  { %v4687_v57 = vmul.f32 %v4685_v8, %v9478_v63 }
0x2cd7   :  { %v8315_v58 = vpop.eup %8314  ;;  %v4689_v59 = vadd.f32 1e-05, %v4687_v57 }
0x2cd8   :  { %v4691_v61 = vmul.f32 %v8315_v58, %v4688_v10  ;;  %vm4697_vm11 = vweird.f32 %v8315_v58 }
0x2cd9   :  { %8316 = vrsqrt.f32 %v4689_v59  ;;  %vm4698_vm13 = vmor %vm4696_vm12, %vm4697_vm11  ;;  %vm4706_vm15 = vweird.f32 %v4689_v59 }
0x2cda   :  { %v4692_v62 = vmul.f32 %v8315_v58, %v4691_v61 }
0x2cdc   :  { %v4693_v0 = vmul.f32 0.5, %v4692_v62  ;;  %v2643_v44 = vpop.xlane.xlu0 %2642 }
0x2cdd   :  { %v2645_v28 = vmul.f32 %v2643_v44, %v9478_v63 }
0x2cde   :  { %v4694_v1 = vsub.f32 1.5, %v4693_v0 }
0x2cdf   :  { %v8317_v52 = vpop.eup %8316  ;;  %v10796_v32 = vsub.f32 %v10733_v29, %v2645_v28  ;;  %v4868_v29 = vld [vmem:[%s11710_s13 + $0x10] sm:$0xff] }
0x2ce0   :  { %v4695_v2 = vmul.f32 %v8315_v58, %v4694_v1  ;;  %v4701_v56 = vmul.f32 %v8317_v52, %v4689_v59  ;;  %vm4707_vm14 = vweird.f32 %v8317_v52  ;;  %4923 = vmatpush.msrb.mxu3 %v4868_v29  ;;  %v7768_v29 = vld [vmem:[%s11703_s6 + $0x718] sm:$0xff] }
0x2ce1   :  { %vm4708_vm3 = vmor %vm4706_vm15, %vm4707_vm14  ;;  %v2649_v33 = vmul.f32 %v10796_v32, %v10796_v32 }
0x2ce2   :  { %v4699_v7 = vsel %vm4698_vm13, %v8315_v58, %v4695_v2  ;;  %v4702_v9 = vmul.f32 %v8317_v52, %v4701_v56  ;;  %4924 = vmatpush.msrb.mxu3 %v4867_v50 }
0x2ce3   :  { %v4710_v13 = vmul.f32 %v4699_v7, %v4676_v11  ;;  %v2653_v41 = vsel %vm526_vm0, %v2649_v33, 0.0  ;;  %v7754_v33 = vld [vmem:[%s11703_s6 + $0x618] sm:$0xff] }
0x2ce4   :  { %v4703_v16 = vmul.f32 0.5, %v4702_v9  ;;  %4925 = vmatpush.msrb.mxu3 %v4866_v55  ;;  %4967 = vmatpush.msrb.mxu0 %v7754_v33 }
0x2ce5   :  { %v4715_v17 = vmul.f32 %v8116_v3, %v4710_v13 }
0x2ce6   :  { %v4704_v35 = vsub.f32 1.5, %v4703_v16 }
0x2ce7   :  { %v4720_v18 = vadd.f32 %v8117_v12, %v4715_v17 }
0x2ce8   :  { %v4705_v43 = vmul.f32 %v8317_v52, %v4704_v35 }
0x2ce9   :  { %7728 = vmatmul.msk.f32.vlgmr.msra.gmra.mxu0 %vm526_vm0, %v4720_v18 }
0x2cea   :  { %v4709_v39 = vsel %vm4708_vm3, %v8317_v52, %v4705_v43 }
0x2ceb   :  { %v4711_v19 = vmul.f32 %v4709_v39, %v4677_v27 }
0x2ced   :  { %v4716_v47 = vmul.f32 %v8116_v3, %v4711_v19  ;;  %v8121_v19 = vld [vmem:[%s11709_s12 + $0x9] ss:$0 sm:$0xff] }
0x2cef   :  { %v4721_v20 = vadd.f32 %v8117_v12, %v4716_v47 }
0x2cf1   :  { %7729 = vmatmul.msk.f32.gmra.mxu0 %vm526_vm0, %v4721_v20 }
0x2d66   :  { %v4755_v46 = vpop.f32.mrf.mxu0 }
0x2d67   :  { %v4756_v22 = vadd.f32 %v8118_v51, %v4755_v46 }
0x2d69   :  { %v4761_v40 = vmax.f32 %v4756_v22, 0.0 }
0x2d6b   :  { %7739 = vmatmul.msk.f32.vlgmr.msrb.gmra.mxu1 %vm1517_vm10, %v4761_v40 }
0x2d6e   :  { %v4758_v5 = vpop.f32.mrf.mxu0 }
0x2d6f   :  { %v4759_v23 = vadd.f32 %v8118_v51, %v4758_v5 }
0x2d71   :  { %v4762_v45 = vmax.f32 %v4759_v23, 0.0  ;;  %v7746_v23 = vld [vmem:[%s11710_s13 + $0x38] sm:$0xff] }
0x2d72   :  { %4893 = vmatpush.msra.mxu2 %v7746_v23 }
0x2d73   :  { %7740 = vmatmul.msk.f32.gmra.mxu1 %vm1517_vm10, %v4762_v45  ;;  %v7745_v45 = vld [vmem:[%s11710_s13 + $0x30] sm:$0xff] }
0x2d74   :  { %4894 = vmatpush.msra.mxu2 %v7745_v45 }
0x2de8   :  { %v4800_v54 = vpop.f32.mrf.mxu1 }
0x2de9   :  { %v4801_v11 = vadd.f32 %v8119_v24, %v4800_v54 }
0x2deb   :  { %v4806_v25 = vadd.f32 %v4801_v11, %v4720_v18  ;;  %v8120_v18 = vld [vmem:[%s11709_s12 + $0x8] ss:$0 sm:$0xff] }
0x2ded   :  { %v4812_v37 = vsel %vm526_vm0, %v4806_v25, 0.0 }
0x2dee   :  { %4813 = vadd.xlane.f32.xlu2 %v4812_v37 }
0x2df0   :  { %v4803_v27 = vpop.f32.mrf.mxu1 }
0x2df1   :  { %v4804_v15 = vadd.f32 %v8119_v24, %v4803_v27  ;;  %v7744_v24 = vld [vmem:[%s11710_s13 + $0x28] sm:$0xff] }
0x2df2   :  { %4895 = vmatpush.msra.mxu2 %v7744_v24 }
0x2df3   :  { %v4807_v48 = vadd.f32 %v4804_v15, %v4721_v20 }
0x2df4   :  { %4896 = vmatpush.msra.mxu2 %v7743_v4 }
0x2df5   :  { %v4815_v36 = vsel %vm526_vm0, %v4807_v48, 0.0 }
0x2df6   :  { %4816 = vadd.xlane.f32.xlu1 %v4815_v36  ;;  %2651 = vadd.xlane.f32.xlu2 %v2650_v49 }
0x2df7   :  { %5033 = vmatpush.msrb.mxu2 %v7768_v29  ;;  %v10986_v29 = vld [vmem:[%s11700_s3] sm:$0xff] }
0x2dfe   :  { %2654 = vadd.xlane.f32.xlu1 %v2653_v41  ;;  %v7761_v41 = vld [vmem:[%s11703_s6 + $0x698] sm:$0xff] }
0x2dff   :  { %5000 = vmatpush.msra.mxu1 %v7761_v41 }
0x2e61   :  { %v4814_v38 = vpop.xlane.xlu2 %4813 }
0x2e62   :  { %v4818_v10 = vmul.f32 %v4814_v38, %v9478_v63 }
0x2e64   :  { %v10813_v53 = vsub.f32 %v4806_v25, %v4818_v10  ;;  %v8123_v10 = vld [vmem:[%s11709_s12 + $0x15] ss:$0 sm:$0xff] }
0x2e66   :  { %v4822_v8 = vmul.f32 %v10813_v53, %v10813_v53 }
0x2e68   :  { %v4824_v57 = vsel %vm526_vm0, %v4822_v8, 0.0 }
0x2e69   :  { %v2652_v14 = vpop.xlane.xlu2 %2651  ;;  %v4817_v58 = vpop.xlane.xlu1 %4816  ;;  %4825 = vadd.xlane.f32.xlu0 %v4824_v57 }
0x2e6a   :  { %v2656_v59 = vmul.f32 %v2652_v14, %v9478_v63  ;;  %v4819_v60 = vmul.f32 %v4817_v58, %v9478_v63 }
0x2e6c   :  { %v2658_v61 = vadd.f32 1e-05, %v2656_v59  ;;  %v10823_v62 = vsub.f32 %v4807_v48, %v4819_v60 }
0x2e6e   :  { %8318 = vrsqrt.f32 %v2658_v61  ;;  %v4823_v0 = vmul.f32 %v10823_v62, %v10823_v62  ;;  %vm2666_vm5 = vweird.f32 %v2658_v61 }
0x2e70   :  { %v4827_v1 = vsel %vm526_vm0, %v4823_v0, 0.0 }
0x2e71   :  { %4828 = vadd.xlane.f32.xlu2 %v4827_v1  ;;  %v2655_v52 = vpop.xlane.xlu1 %2654  ;;  %v7760_v1 = vld [vmem:[%s11703_s6 + $0x690] sm:$0xff] }
0x2e72   :  { %v2657_v2 = vmul.f32 %v2655_v52, %v9478_v63  ;;  %v7767_v52 = vld [vmem:[%s11703_s6 + $0x710] sm:$0xff]  ;;  %5001 = vmatpush.msra.mxu1 %v7760_v1 }
0x2e73   :  { %5034 = vmatpush.msrb.mxu2 %v7767_v52 }
0x2e74   :  { %v8319_v56 = vpop.eup %8318  ;;  %v2659_v3 = vadd.f32 1e-05, %v2657_v2  ;;  %v7759_v2 = vld [vmem:[%s11703_s6 + $0x688] sm:$0xff] }
0x2e75   :  { %v2661_v7 = vmul.f32 %v8319_v56, %v2658_v61  ;;  %vm2667_vm4 = vweird.f32 %v8319_v56  ;;  %5002 = vmatpush.msra.mxu1 %v7759_v2 }
0x2e76   :  { %8320 = vrsqrt.f32 %v2659_v3  ;;  %vm2668_vm6 = vmor %vm2666_vm5, %vm2667_vm4  ;;  %vm2676_vm8 = vweird.f32 %v2659_v3 }
0x2e77   :  { %v2662_v9 = vmul.f32 %v8319_v56, %v2661_v7  ;;  %v7758_v7 = vld [vmem:[%s11703_s6 + $0x680] sm:$0xff] }
0x2e78   :  { %5003 = vmatpush.msra.mxu1 %v7758_v7 }
0x2e79   :  { %v2663_v12 = vmul.f32 0.5, %v2662_v9  ;;  %v7765_v9 = vld [vmem:[%s11703_s6 + $0x700] sm:$0xff] }
0x2e7b   :  { %v2664_v13 = vsub.f32 1.5, %v2663_v12  ;;  %v7782_v12 = vld [vmem:[%s11703_s6 + $0x638] sm:$0xff] }
0x2e7c   :  { %v8321_v16 = vpop.eup %8320  ;;  %5154 = vmatpush.msrb.mxu1 %v7782_v12 }
0x2e7d   :  { %v2665_v17 = vmul.f32 %v8319_v56, %v2664_v13  ;;  %v2671_v35 = vmul.f32 %v8321_v16, %v2659_v3  ;;  %vm2677_vm7 = vweird.f32 %v8321_v16  ;;  %v7751_v3 = vld [vmem:[%s11703_s6 + $0x600] sm:$0xff]  ;;  %v7789_v13 = vld [vmem:[%s11703_s6 + $0x6b8] sm:$0xff] }
0x2e7e   :  { %vm2678_vm9 = vmor %vm2676_vm8, %vm2677_vm7 }
0x2e7f   :  { %v2669_v43 = vsel %vm2668_vm6, %v8319_v56, %v2665_v17  ;;  %v2672_v39 = vmul.f32 %v8321_v16, %v2671_v35  ;;  %v7766_v56 = vld [vmem:[%s11703_s6 + $0x708] sm:$0xff]  ;;  %v7788_v17 = vld [vmem:[%s11703_s6 + $0x6b0] sm:$0xff] }
0x2e80   :  { %v2680_v47 = vmul.f32 %v2669_v43, %v2646_v26  ;;  %5035 = vmatpush.msrb.mxu2 %v7766_v56  ;;  %v7780_v35 = vld [vmem:[%s11703_s6 + $0x628] sm:$0xff]  ;;  %v7779_v43 = vld [vmem:[%s11703_s6 + $0x620] sm:$0xff] }
0x2e81   :  { %v2673_v20 = vmul.f32 0.5, %v2672_v39  ;;  %v7786_v39 = vld [vmem:[%s11703_s6 + $0x6a0] sm:$0xff] }
0x2e82   :  { %v2685_v21 = vmul.f32 %v8120_v18, %v2680_v47  ;;  %5036 = vmatpush.msrb.mxu2 %v7765_v9  ;;  %v8124_v47 = vld [vmem:[%s11711_s14] ss:$0 sm:$0xff] }
0x2e83   :  { %v2674_v6 = vsub.f32 1.5, %v2673_v20 }
0x2e84   :  { %v2690_v42 = vadd.f32 %v8121_v19, %v2685_v21 }
0x2e85   :  { %v2675_v51 = vmul.f32 %v8321_v16, %v2674_v6 }
0x2e86   :  { %7749 = vmatmul.msk.f32.vlgmr.msrb.gmra.mxu3 %vm526_vm0, %v2690_v42 }
0x2e87   :  { %v2679_v46 = vsel %vm2678_vm9, %v8321_v16, %v2675_v51  ;;  %v7781_v16 = vld [vmem:[%s11703_s6 + $0x630] sm:$0xff] }
0x2e88   :  { %v2681_v22 = vmul.f32 %v2679_v46, %v10796_v32  ;;  %v8122_v32 = vld [vmem:[%s11709_s12 + $0x14] ss:$0 sm:$0xff]  ;;  %5155 = vmatpush.msrb.mxu1 %v7781_v16 }
0x2e8a   :  { %v2686_v40 = vmul.f32 %v8120_v18, %v2681_v22  ;;  %v7787_v18 = vld [vmem:[%s11703_s6 + $0x6a8] sm:$0xff]  ;;  %5156 = vmatpush.msrb.mxu1 %v7780_v35 }
0x2e8c   :  { %v2691_v5 = vadd.f32 %v8121_v19, %v2686_v40  ;;  %5157 = vmatpush.msrb.mxu1 %v7779_v43  ;;  %v7813_v43 = vld [vmem:[%s11703_s6 + $0x650] sm:$0xff] }
0x2e8e   :  { %7750 = vmatmul.msk.f32.gmra.mxu3 %vm526_vm0, %v2691_v5  ;;  %v8126_v5 = vld [vmem:[%s11704_s7 + $0x34] ss:$0 sm:$0xff] }
0x2edc   :  { %v4826_v54 = vpop.xlane.xlu0 %4825 }
0x2edd   :  { %v4830_v30 = vmul.f32 %v4826_v54, %v9478_v63  ;;  %v8125_v54 = vld [vmem:[%s11704_s7 + $0x30] ss:$0 sm:$0xff] }
0x2edf   :  { %v4832_v11 = vadd.f32 1e-05, %v4830_v30 }
0x2ee1   :  { %8322 = vrsqrt.f32 %v4832_v11  ;;  %vm4840_vm12 = vweird.f32 %v4832_v11 }
0x2ee4   :  { %v4829_v25 = vpop.xlane.xlu2 %4828 }
0x2ee5   :  { %v4831_v26 = vmul.f32 %v4829_v25, %v9478_v63  ;;  %v8127_v25 = vld [vmem:[%s11704_s7 + $0x38] ss:$0 sm:$0xff] }
0x2ee7   :  { %v8323_v37 = vpop.eup %8322  ;;  %v4833_v44 = vadd.f32 1e-05, %v4831_v26 }
0x2ee8   :  { %v4835_v27 = vmul.f32 %v8323_v37, %v4832_v11  ;;  %vm4841_vm11 = vweird.f32 %v8323_v37  ;;  %v7796_v11 = vld [vmem:[%s11703_s6 + $0x738] sm:$0xff] }
0x2ee9   :  { %8324 = vrsqrt.f32 %v4833_v44  ;;  %vm4842_vm13 = vmor %vm4840_vm12, %vm4841_vm11  ;;  %vm4850_vm15 = vweird.f32 %v4833_v44 }
0x2eea   :  { %v4836_v28 = vmul.f32 %v8323_v37, %v4835_v27  ;;  %v7795_v27 = vld [vmem:[%s11703_s6 + $0x730] sm:$0xff] }
0x2eec   :  { %v4837_v15 = vmul.f32 0.5, %v4836_v28 }
0x2eee   :  { %v4838_v31 = vsub.f32 1.5, %v4837_v15  ;;  %v7794_v15 = vld [vmem:[%s11703_s6 + $0x728] sm:$0xff] }
0x2eef   :  { %v8325_v48 = vpop.eup %8324 }
0x2ef0   :  { %v4839_v36 = vmul.f32 %v8323_v37, %v4838_v31  ;;  %v4845_v49 = vmul.f32 %v8325_v48, %v4833_v44  ;;  %vm4851_vm14 = vweird.f32 %v8325_v48  ;;  %v7793_v31 = vld [vmem:[%s11703_s6 + $0x720] sm:$0xff] }
0x2ef1   :  { %vm4852_vm3 = vmor %vm4850_vm15, %vm4851_vm14 }
0x2ef2   :  { %v4843_v34 = vsel %vm4842_vm13, %v8323_v37, %v4839_v36  ;;  %v4846_v38 = vmul.f32 %v8325_v48, %v4845_v49  ;;  %v8129_v49 = vld [vmem:[%s11704_s7 + $0x35] ss:$0 sm:$0xff] }
0x2ef3   :  { %v4854_v50 = vmul.f32 %v4843_v34, %v10813_v53  ;;  %v7753_v53 = vld [vmem:[%s11703_s6 + $0x610] sm:$0xff] }
0x2ef4   :  { %v4847_v55 = vmul.f32 0.5, %v4846_v38  ;;  %4968 = vmatpush.msrb.mxu0 %v7753_v53 }
0x2ef5   :  { %v4859_v8 = vmul.f32 %v8122_v32, %v4854_v50 }
0x2ef6   :  { %v4848_v57 = vsub.f32 1.5, %v4847_v55 }
0x2ef7   :  { %v4864_v14 = vadd.f32 %v8123_v10, %v4859_v8  ;;  %v10993_v8 = vld [vmem:[%s11700_s3 + $0x8] sm:$0xff] }
0x2ef8   :  { %v4849_v58 = vmul.f32 %v8325_v48, %v4848_v57 }
0x2ef9   :  { %7747 = vmatmul.msk.f32.vlgmr.msra.gmra.mxu2 %vm526_vm0, %v4864_v14 }
0x2efa   :  { %v4853_v59 = vsel %vm4852_vm3, %v8325_v48, %v4849_v58  ;;  %5187 = vmatpush.msra.mxu2 %v7789_v13 }
0x2efb   :  { %v4855_v60 = vmul.f32 %v4853_v59, %v10823_v62  ;;  %v7752_v62 = vld [vmem:[%s11703_s6 + $0x608] sm:$0xff]  ;;  %v8130_v59 = vld [vmem:[%s11704_s7 + $0x39] ss:$0 sm:$0xff] }
0x2efc   :  { %4969 = vmatpush.msrb.mxu0 %v7752_v62  ;;  %5188 = vmatpush.msra.mxu2 %v7788_v17 }
0x2efd   :  { %v4860_v61 = vmul.f32 %v8122_v32, %v4855_v60 }
0x2efe   :  { %4970 = vmatpush.msrb.mxu0 %v7751_v3  ;;  %5189 = vmatpush.msra.mxu2 %v7787_v18  ;;  %v7814_v18 = vld [vmem:[%s11703_s6 + $0x658] sm:$0xff] }
0x2eff   :  { %v4865_v0 = vadd.f32 %v8123_v10, %v4860_v61 }
0x2f00   :  { %5190 = vmatpush.msra.mxu2 %v7786_v39  ;;  %v7812_v39 = vld [vmem:[%s11703_s6 + $0x648] sm:$0xff] }
0x2f01   :  { %7748 = vmatmul.msk.f32.gmra.mxu2 %vm526_vm0, %v4865_v0 }
0x2f09   :  { %v4927_v19 = vpop.f32.mrf.mxu3 }
0x2f11   :  { %v4930_v42 = vpop.f32.mrf.mxu3 }
0x2f7c   :  { %v4898_v20 = vpop.f32.mrf.mxu2 }
0x2f7d   :  { %v4928_v21 = vadd.f32 %v4927_v19, %v4898_v20  ;;  %v7811_v19 = vld [vmem:[%s11703_s6 + $0x640] sm:$0xff] }
0x2f7f   :  { %v10925_v6 = vadd.f32 %v8124_v47, %v4928_v21 }
0x2f81   :  { %7756 = vmatmul.msk.f32.vlgmr.msrb.gmra.mxu0 %vm526_vm0, %v10925_v6  ;;  %7763 = vmatmul.msk.f32.vlgmr.msra.gmra.mxu1 %vm526_vm0, %v10925_v6 }
0x2f82   :  { %7770 = vmatmul.msk.f32.vlgmr.msrb.gmra.mxu2 %vm526_vm0, %v10925_v6 }
0x2f84   :  { %v4901_v51 = vpop.f32.mrf.mxu2 }
0x2f85   :  { %v4931_v46 = vadd.f32 %v4930_v42, %v4901_v51  ;;  %v8128_v42 = vld [vmem:[%s11704_s7 + $0x31] ss:$0 sm:$0xff] }
0x2f87   :  { %v10933_v22 = vadd.f32 %v8124_v47, %v4931_v46 }
0x2f89   :  { %7757 = vmatmul.msk.f32.gmra.mxu0 %vm526_vm0, %v10933_v22  ;;  %7764 = vmatmul.msk.f32.gmra.mxu1 %vm526_vm0, %v10933_v22 }
0x2f8a   :  { %7771 = vmatmul.msk.f32.gmra.mxu2 %vm526_vm0, %v10933_v22 }
0x2f91   :  { %7784 = vmatmul.msk.f32.vlgmr.msrb.gmra.mxu1 %vm526_vm0, %v10925_v6 }
0x2f92   :  { %7791 = vmatmul.msk.f32.vlgmr.msra.gmra.mxu2 %vm526_vm0, %v10925_v6 }
0x2f99   :  { %7785 = vmatmul.msk.f32.gmra.mxu1 %vm526_vm0, %v10933_v22 }
0x2f9a   :  { %7792 = vmatmul.msk.f32.gmra.mxu2 %vm526_vm0, %v10933_v22 }
0x2ffe   :  { %v5005_v40 = vpop.f32.mrf.mxu1  ;;  %v4972_v4 = vpop.f32.mrf.mxu0 }
0x2fff   :  { %v5006_v30 = vadd.f32 %v8126_v5, %v5005_v40  ;;  %v4973_v37 = vadd.f32 %v8125_v54, %v4972_v4 }
0x3005   :  { %v5038_v23 = vpop.f32.mrf.mxu2 }
0x3006   :  { %v5008_v45 = vpop.f32.mrf.mxu1  ;;  %v5039_v28 = vadd.f32 %v8127_v25, %v5038_v23  ;;  %v4975_v48 = vpop.f32.mrf.mxu0 }
0x3007   :  { %v5009_v24 = vadd.f32 %v8126_v5, %v5008_v45  ;;  %v4976_v36 = vadd.f32 %v8125_v54, %v4975_v48  ;;  %v7778_v5 = vld [vmem:[%s11705_s8 + $0x80] sm:$0xff] }
0x3009   :  { %7772 = vmatpush.xpose.msk.msra.mxu3 %vm622_vm1, %v5009_v24 }
0x300d   :  { %v5041_v26 = vpop.f32.mrf.mxu2  ;;  %7773 = vmatpush.xpose.msk.msra.mxu3 %vm622_vm1, %v5006_v30 }
0x300e   :  { %v5042_v44 = vadd.f32 %v8127_v25, %v5041_v26  ;;  %v5159_v21 = vpop.f32.mrf.mxu1 }
0x300f   :  { %v5160_v51 = vadd.f32 %v8128_v42, %v5159_v21 }
0x3010   :  { %5121 = vmatpush.msra.mxu0 %v5042_v44  ;;  %7774 = vmatmul.msk.f32.vlgmr.msra.gmra.mxu3 %vm622_vm1, %v4973_v37 }
0x3011   :  { %5220 = vmatpush.msrb.mxu3 %v7796_v11 }
0x3012   :  { %5122 = vmatpush.msra.mxu0 %v5039_v28 }
0x3013   :  { %5221 = vmatpush.msrb.mxu3 %v7795_v27 }
0x3015   :  { %5222 = vmatpush.msrb.mxu3 %v7794_v15  ;;  %v5192_v32 = vpop.f32.mrf.mxu2 }
0x3016   :  { %v5193_v34 = vadd.f32 %v8129_v49, %v5192_v32  ;;  %v5162_v46 = vpop.f32.mrf.mxu1 }
0x3017   :  { %5223 = vmatpush.msrb.mxu3 %v7793_v31  ;;  %v5163_v40 = vadd.f32 %v8128_v42, %v5162_v46 }
0x3018   :  { %7775 = vmatmul.msk.f32.gmra.mxu3 %vm622_vm1, %v4976_v36 }
0x3019   :  { %5369 = vmatpush.msra.mxu3 %v7778_v5 }
0x301d   :  { %v5195_v33 = vpop.f32.mrf.mxu2 }
0x301e   :  { %v5196_v41 = vadd.f32 %v8129_v49, %v5195_v33  ;;  %v7821_v49 = vld [vmem:[%s11703_s6 + $0x6d8] sm:$0xff]  ;;  %v7820_v33 = vld [vmem:[%s11703_s6 + $0x6d0] sm:$0xff] }
0x3020   :  { %7800 = vmatpush.xpose.msk.msrb.mxu0 %vm622_vm1, %v5196_v41  ;;  %7798 = vmatmul.msk.f32.vlgmr.msrb.gmra.mxu3 %vm526_vm0, %v10925_v6  ;;  %v7819_v41 = vld [vmem:[%s11703_s6 + $0x6c8] sm:$0xff] }
0x3024   :  { %7801 = vmatpush.xpose.msk.msrb.mxu0 %vm622_vm1, %v5193_v34  ;;  %v7818_v34 = vld [vmem:[%s11703_s6 + $0x6c0] sm:$0xff] }
0x3028   :  { %7799 = vmatmul.msk.f32.gmra.mxu3 %vm526_vm0, %v10933_v22 }
0x3093   :  { %v5073_v38 = vpop.f32.mrf.mxu3 }
0x3094   :  { %v5074_v10 = vadd.f32 %v10986_v29, %v5073_v38 }
0x3096   :  { %v5079_v50 = vsel %vm658_vm2, %v5074_v10, -inf }
0x3097   :  { %5080 = vmax.xlane.f32.xlu0 %v5079_v50 }
0x309b   :  { %v5076_v55 = vpop.f32.mrf.mxu3 }
0x309c   :  { %v5077_v57 = vadd.f32 %v10993_v8, %v5076_v55 }
0x309e   :  { %v5082_v14 = vsel %vm658_vm2, %v5077_v57, -inf }
0x309f   :  { %5083 = vmax.xlane.f32.xlu1 %v5082_v14 }
0x30a3   :  { %v5225_v58 = vpop.f32.mrf.mxu3 }
0x30a4   :  { %v5226_v0 = vadd.f32 %v8130_v59, %v5225_v58  ;;  %v7806_v58 = vld [vmem:[%s11705_s8 + $0x88] sm:$0xff] }
0x30a5   :  { %5340 = vmatpush.msrb.mxu2 %v7806_v58  ;;  %v7856_v58 = vld [vmem:[%s11703_s6 + $0x768] sm:$0xff] }
0x30ab   :  { %v5228_v60 = vpop.f32.mrf.mxu3 }
0x30ac   :  { %v5229_v61 = vadd.f32 %v8130_v59, %v5228_v60  ;;  %v7828_v59 = vld [vmem:[%s11703_s6 + $0x758] sm:$0xff]  ;;  %v7827_v60 = vld [vmem:[%s11703_s6 + $0x750] sm:$0xff] }
0x30ad   :  { %5465 = vmatpush.msra.mxu2 %v7828_v59  ;;  %v7855_v59 = vld [vmem:[%s11703_s6 + $0x760] sm:$0xff] }
0x30ae   :  { %5308 = vmatpush.msra.mxu1 %v5229_v61  ;;  %v7826_v61 = vld [vmem:[%s11703_s6 + $0x748] sm:$0xff] }
0x30af   :  { %5466 = vmatpush.msra.mxu2 %v7827_v60 }
0x30b0   :  { %5309 = vmatpush.msra.mxu1 %v5226_v0  ;;  %v7825_v0 = vld [vmem:[%s11703_s6 + $0x740] sm:$0xff] }
0x30b1   :  { %5467 = vmatpush.msra.mxu2 %v7826_v61 }
0x30b2   :  { %5432 = vmatpush.msrb.mxu1 %v7821_v49 }
0x30b3   :  { %5468 = vmatpush.msra.mxu2 %v7825_v0 }
0x30b4   :  { %5433 = vmatpush.msrb.mxu1 %v7820_v33 }
0x30b6   :  { %5434 = vmatpush.msrb.mxu1 %v7819_v41 }
0x30b8   :  { %5435 = vmatpush.msrb.mxu1 %v7818_v34 }
0x310a   :  { %v5081_v53 = vpop.xlane.xlu0 %5080 }
0x310b   :  { %v5085_v1 = vsub.f32 %v5074_v10, %v5081_v53  ;;  %v7844_v53 = vld [vmem:[%s11703_s6 + $0x678] sm:$0xff] }
0x310d   :  { %v5087_v52 = vmul.f32 1.442695, %v5085_v1 }
0x310f   :  { %8326 = vpow2.f32 %v5087_v52  ;;  %v7843_v52 = vld [vmem:[%s11703_s6 + $0x670] sm:$0xff] }
0x3112   :  { %v5084_v62 = vpop.xlane.xlu1 %5083 }
0x3113   :  { %v5086_v2 = vsub.f32 %v5077_v57, %v5084_v62  ;;  %v7842_v62 = vld [vmem:[%s11703_s6 + $0x668] sm:$0xff] }
0x3115   :  { %v8327_v56 = vpop.eup %8326  ;;  %v5089_v3 = vmul.f32 1.442695, %v5086_v2  ;;  %v7841_v2 = vld [vmem:[%s11703_s6 + $0x660] sm:$0xff] }
0x3116   :  { %v5091_v7 = vsel %vm658_vm2, %v8327_v56, 0.0 }
0x3117   :  { %8328 = vpow2.f32 %v5089_v3  ;;  %5092 = vadd.xlane.f32.xlu2 %v5091_v7  ;;  %v8132_v7 = vld [vmem:[%s11704_s7 + $0x36] ss:$0 sm:$0xff] }
0x311d   :  { %v8329_v9 = vpop.eup %8328 }
0x311e   :  { %v5094_v12 = vsel %vm658_vm2, %v8329_v9, 0.0 }
0x311f   :  { %5095 = vadd.xlane.f32.xlu0 %v5094_v12 }
0x318a   :  { %v5093_v13 = vpop.xlane.xlu2 %5092 }
0x318b   :  { %8330 = vrcp.f32 %v5093_v13 }
0x3191   :  { %v8331_v16 = vpop.eup %8330 }
0x3192   :  { %v5099_v17 = vmul.f32 %v8331_v16, %v8327_v56  ;;  %v5096_v35 = vpop.xlane.xlu0 %5095  ;;  %v8131_v16 = vld [vmem:[%s11704_s7 + $0x32] ss:$0 sm:$0xff] }
0x3193   :  { %8332 = vrcp.f32 %v5096_v35  ;;  %v7851_v35 = vld [vmem:[%s11703_s6 + $0x6f8] sm:$0xff] }
0x3194   :  { %7776 = vmatmul.msk.f32.vlgmr.msra.gmra.mxu0 %vm658_vm2, %v5099_v17 }
0x3195   :  { %5399 = vmatpush.msra.mxu0 %v7814_v18 }
0x3197   :  { %5400 = vmatpush.msra.mxu0 %v7813_v43  ;;  %v7850_v43 = vld [vmem:[%s11703_s6 + $0x6f0] sm:$0xff] }
0x3199   :  { %v8333_v47 = vpop.eup %8332  ;;  %5401 = vmatpush.msra.mxu0 %v7812_v39  ;;  %v7849_v39 = vld [vmem:[%s11703_s6 + $0x6e8] sm:$0xff] }
0x319a   :  { %v5100_v20 = vmul.f32 %v8333_v47, %v8329_v9 }
0x319b   :  { %5402 = vmatpush.msra.mxu0 %v7811_v19  ;;  %v7848_v19 = vld [vmem:[%s11703_s6 + $0x6e0] sm:$0xff] }
0x319c   :  { %7777 = vmatmul.msk.f32.gmra.mxu0 %vm658_vm2, %v5100_v20 }
0x31a4   :  { %7802 = vmatmul.msk.f32.vlgmr.msrb.gmra.mxu0 %vm622_vm1, %v5160_v51 }
0x31ac   :  { %7803 = vmatmul.msk.f32.gmra.mxu0 %vm622_vm1, %v5163_v40 }
0x31b4   :  { %7816 = vmatmul.msk.f32.vlgmr.msra.gmra.mxu0 %vm526_vm0, %v10925_v6 }
0x31bc   :  { %7817 = vmatmul.msk.f32.gmra.mxu0 %vm526_vm0, %v10933_v22 }
0x3211   :  { %v5124_v23 = vpop.f32.mrf.mxu0 }
0x3212   :  { %7809 = vmatmul.msk.f32.vlgmr.msra.gmra.mxu3 %vm622_vm1, %v5124_v23  ;;  %v8133_v23 = vld [vmem:[%s11704_s7 + $0x3a] ss:$0 sm:$0xff] }
0x3219   :  { %v5127_v45 = vpop.f32.mrf.mxu0 }
0x321a   :  { %7810 = vmatmul.msk.f32.gmra.mxu3 %vm622_vm1, %v5127_v45 }
0x3221   :  { %v5260_v24 = vpop.f32.mrf.mxu0 }
0x3222   :  { %v5261_v4 = vadd.f32 %v10986_v29, %v5260_v24 }
0x3224   :  { %v5266_v54 = vsel %vm658_vm2, %v5261_v4, -inf }
0x3225   :  { %5267 = vmax.xlane.f32.xlu1 %v5266_v54 }
0x3229   :  { %v5263_v30 = vpop.f32.mrf.mxu0 }
0x322a   :  { %v5264_v11 = vadd.f32 %v10993_v8, %v5263_v30 }
0x322c   :  { %v5269_v25 = vsel %vm658_vm2, %v5264_v11, -inf }
0x322d   :  { %5270 = vmax.xlane.f32.xlu2 %v5269_v25 }
0x3231   :  { %v5404_v13 = vpop.f32.mrf.mxu0 }
0x3232   :  { %v5405_v18 = vadd.f32 %v8131_v16, %v5404_v13 }
0x3239   :  { %v5407_v47 = vpop.f32.mrf.mxu0 }
0x323a   :  { %v5408_v20 = vadd.f32 %v8131_v16, %v5407_v47  ;;  %v8136_v16 = vld [vmem:[%s11704_s7 + $0x3b] ss:$0 sm:$0xff] }
0x3295   :  { %v11117_v21 = vpop.f32.mrf.mxu3 }
0x3298   :  { %v5268_v26 = vpop.xlane.xlu1 %5267 }
0x3299   :  { %v5272_v37 = vsub.f32 %v5261_v4, %v5268_v26  ;;  %v7838_v4 = vld [vmem:[%s11705_s8 + $0x90] sm:$0xff] }
0x329b   :  { %v5274_v44 = vmul.f32 1.442695, %v5272_v37 }
0x329d   :  { %8334 = vpow2.f32 %v5274_v44  ;;  %v5374_v51 = vpop.f32.mrf.mxu3 }
0x32a0   :  { %v5271_v27 = vpop.xlane.xlu2 %5270 }
0x32a1   :  { %v5273_v28 = vsub.f32 %v5264_v11, %v5271_v27 }
0x32a3   :  { %v8335_v15 = vpop.eup %8334  ;;  %v5276_v31 = vmul.f32 1.442695, %v5273_v28  ;;  %v8135_v28 = vld [vmem:[%s11704_s7 + $0x37] ss:$0 sm:$0xff] }
0x32a4   :  { %v5278_v48 = vsel %vm658_vm2, %v8335_v15, 0.0 }
0x32a5   :  { %8336 = vpow2.f32 %v5276_v31  ;;  %5279 = vadd.xlane.f32.xlu0 %v5278_v48 }
0x32ab   :  { %v8337_v32 = vpop.eup %8336 }
0x32ac   :  { %v5281_v36 = vsel %vm658_vm2, %v8337_v32, 0.0 }
0x32ad   :  { %5282 = vadd.xlane.f32.xlu1 %v5281_v36 }
0x3318   :  { %v5280_v38 = vpop.xlane.xlu0 %5279 }
0x3319   :  { %8338 = vrcp.f32 %v5280_v38 }
0x331f   :  { %v8339_v10 = vpop.eup %8338 }
0x3320   :  { %v5286_v50 = vmul.f32 %v8339_v10, %v8335_v15  ;;  %v5283_v55 = vpop.xlane.xlu1 %5282 }
0x3321   :  { %8340 = vrcp.f32 %v5283_v55 }
0x3322   :  { %7804 = vmatmul.msk.f32.vlgmr.msra.gmra.mxu1 %vm658_vm2, %v5286_v50 }
0x3323   :  { %5585 = vmatpush.msra.mxu1 %v7838_v4 }
0x3327   :  { %v8341_v57 = vpop.eup %8340 }
0x3328   :  { %v5287_v14 = vmul.f32 %v8341_v57, %v8337_v32  ;;  %v7858_v57 = vld [vmem:[%s11703_s6 + $0x778] sm:$0xff] }
0x332a   :  { %7805 = vmatmul.msk.f32.gmra.mxu1 %vm658_vm2, %v5287_v14  ;;  %v7857_v14 = vld [vmem:[%s11703_s6 + $0x770] sm:$0xff] }
0x3332   :  { %7823 = vmatmul.msk.f32.vlgmr.msrb.gmra.mxu1 %vm526_vm0, %v10925_v6 }
0x333a   :  { %7824 = vmatmul.msk.f32.gmra.mxu1 %vm526_vm0, %v10933_v22 }
0x339f   :  { %v5311_v1 = vpop.f32.mrf.mxu1 }
0x33a0   :  { %7807 = vmatmul.msk.f32.vlgmr.msrb.gmra.mxu2 %vm622_vm1, %v5311_v1 }
0x33a1   :  { %5617 = vmatpush.msrb.mxu2 %v7844_v53 }
0x33a3   :  { %5618 = vmatpush.msrb.mxu2 %v7843_v52 }
0x33a5   :  { %5619 = vmatpush.msrb.mxu2 %v7842_v62 }
0x33a7   :  { %v5314_v56 = vpop.f32.mrf.mxu1  ;;  %5620 = vmatpush.msrb.mxu2 %v7841_v2 }
0x33a8   :  { %7808 = vmatmul.msk.f32.gmra.mxu2 %vm622_vm1, %v5314_v56 }
0x33af   :  { %v5437_v3 = vpop.f32.mrf.mxu1 }
0x33b0   :  { %7830 = vmatmul.msk.f32.vlgmr.msra.gmra.mxu2 %vm526_vm0, %v10925_v6  ;;  %v5438_v17 = vadd.f32 %v8132_v7, %v5437_v3  ;;  %v8134_v3 = vld [vmem:[%s11704_s7 + $0x33] ss:$0 sm:$0xff] }
0x33b7   :  { %v5440_v9 = vpop.f32.mrf.mxu1 }
0x33b8   :  { %v5441_v12 = vadd.f32 %v8132_v7, %v5440_v9  ;;  %7831 = vmatmul.msk.f32.gmra.mxu2 %vm526_vm0, %v10933_v22 }
0x33ba   :  { %7832 = vmatpush.xpose.msk.msrb.mxu3 %vm622_vm1, %v5441_v12 }
0x33be   :  { %7833 = vmatpush.xpose.msk.msrb.mxu3 %vm622_vm1, %v5438_v17 }
0x33c0   :  { %7846 = vmatmul.msk.f32.vlgmr.msrb.gmra.mxu2 %vm526_vm0, %v10925_v6 }
0x33c1   :  { %7834 = vmatmul.msk.f32.vlgmr.msrb.gmra.mxu3 %vm622_vm1, %v5405_v18 }
0x33c2   :  { %5650 = vmatpush.msra.mxu3 %v7851_v35 }
0x33c4   :  { %5651 = vmatpush.msra.mxu3 %v7850_v43 }
0x33c6   :  { %5652 = vmatpush.msra.mxu3 %v7849_v39 }
0x33c8   :  { %5653 = vmatpush.msra.mxu3 %v7848_v19  ;;  %7847 = vmatmul.msk.f32.gmra.mxu2 %vm526_vm0, %v10933_v22 }
0x33c9   :  { %7835 = vmatmul.msk.f32.gmra.mxu3 %vm622_vm1, %v5408_v20 }
0x33d1   :  { %7853 = vmatmul.msk.f32.vlgmr.msra.gmra.mxu3 %vm526_vm0, %v10925_v6 }
0x33d9   :  { %7854 = vmatmul.msk.f32.gmra.mxu3 %vm526_vm0, %v10933_v22 }
0x3423   :  { %v11119_v42 = vpop.f32.mrf.mxu2 }
0x3424   :  { %v5372_v43 = vadd.f32 %v11117_v21, %v11119_v42 }
0x342b   :  { %v5345_v46 = vpop.f32.mrf.mxu2 }
0x342c   :  { %v11121_v40 = vadd.f32 %v5374_v51, %v5345_v46 }
0x3433   :  { %v5470_v5 = vpop.f32.mrf.mxu2 }
0x3434   :  { %v5471_v54 = vadd.f32 %v8133_v23, %v5470_v5 }
0x343b   :  { %v5473_v45 = vpop.f32.mrf.mxu2 }
0x343c   :  { %v5474_v24 = vadd.f32 %v8133_v23, %v5473_v45 }
0x343e   :  { %5553 = vmatpush.msrb.mxu0 %v5474_v24 }
0x3440   :  { %5554 = vmatpush.msrb.mxu0 %v5471_v54 }
0x3442   :  { %5683 = vmatpush.msra.mxu0 %v7858_v57 }
0x3443   :  { %v5622_v56 = vpop.f32.mrf.mxu2 }
0x3444   :  { %v5505_v30 = vpop.f32.mrf.mxu3  ;;  %5684 = vmatpush.msra.mxu0 %v7857_v14  ;;  %v5623_v7 = vadd.f32 %v8134_v3, %v5622_v56  ;;  %v7875_v56 = vld [vmem:[%s11706_s9 + $0x88] sm:$0xff] }
0x3445   :  { %v5506_v11 = vadd.f32 %v10986_v29, %v5505_v30 }
0x3446   :  { %5685 = vmatpush.msra.mxu0 %v7856_v58 }
0x3447   :  { %v5511_v25 = vsel %vm658_vm2, %v5506_v11, -inf }
0x3448   :  { %5512 = vmax.xlane.f32.xlu2 %v5511_v25  ;;  %5686 = vmatpush.msra.mxu0 %v7855_v59 }
0x344b   :  { %v5625_v12 = vpop.f32.mrf.mxu2 }
0x344c   :  { %v5508_v26 = vpop.f32.mrf.mxu3  ;;  %v5626_v13 = vadd.f32 %v8134_v3, %v5625_v12  ;;  %v7874_v3 = vld [vmem:[%s11706_s9 + $0x80] sm:$0xff] }
0x344d   :  { %v5509_v37 = vadd.f32 %v10993_v8, %v5508_v26 }
0x344f   :  { %v5514_v44 = vsel %vm658_vm2, %v5509_v37, -inf }
0x3450   :  { %5515 = vmax.xlane.f32.xlu0 %v5514_v44 }
0x3454   :  { %v5655_v27 = vpop.f32.mrf.mxu3 }
0x3455   :  { %v5656_v48 = vadd.f32 %v8135_v28, %v5655_v27 }
0x345c   :  { %v5658_v15 = vpop.f32.mrf.mxu3 }
0x345d   :  { %v5659_v31 = vadd.f32 %v8135_v28, %v5658_v15 }
0x345f   :  { %7862 = vmatpush.xpose.msk.msrb.mxu1 %vm622_vm1, %v5659_v31 }
0x3463   :  { %7863 = vmatpush.xpose.msk.msrb.mxu1 %vm622_vm1, %v5656_v48 }
0x34bb   :  { %v5513_v32 = vpop.xlane.xlu2 %5512 }
0x34bc   :  { %v5517_v36 = vsub.f32 %v5506_v11, %v5513_v32 }
0x34be   :  { %v5519_v49 = vmul.f32 1.442695, %v5517_v36  ;;  %v8137_v36 = vld [vmem:[%s11709_s12 + $0x1c] ss:$0 sm:$0xff] }
0x34c0   :  { %8342 = vpow2.f32 %v5519_v49 }
0x34c3   :  { %v5516_v33 = vpop.xlane.xlu0 %5515 }
0x34c4   :  { %v5518_v41 = vsub.f32 %v5509_v37, %v5516_v33 }
0x34c6   :  { %v8343_v34 = vpop.eup %8342  ;;  %v5521_v38 = vmul.f32 1.442695, %v5518_v41 }
0x34c7   :  { %v5523_v10 = vsel %vm658_vm2, %v8343_v34, 0.0 }
0x34c8   :  { %8344 = vpow2.f32 %v5521_v38  ;;  %5524 = vadd.xlane.f32.xlu1 %v5523_v10 }
0x34ce   :  { %v8345_v50 = vpop.eup %8344 }
0x34cf   :  { %v5526_v55 = vsel %vm658_vm2, %v8345_v50, 0.0 }
0x34d0   :  { %5527 = vadd.xlane.f32.xlu2 %v5526_v55 }
0x353b   :  { %v5525_v60 = vpop.xlane.xlu1 %5524 }
0x353c   :  { %8346 = vrcp.f32 %v5525_v60 }
0x3542   :  { %v8347_v61 = vpop.eup %8346 }
0x3543   :  { %v5531_v0 = vmul.f32 %v8347_v61, %v8343_v34  ;;  %v5528_v53 = vpop.xlane.xlu2 %5527 }
0x3544   :  { %8348 = vrcp.f32 %v5528_v53 }
0x3545   :  { %7836 = vmatmul.msk.f32.vlgmr.msrb.gmra.mxu0 %vm658_vm2, %v5531_v0 }
0x354a   :  { %v8349_v1 = vpop.eup %8348 }
0x354b   :  { %v5532_v52 = vmul.f32 %v8349_v1, %v8345_v50 }
0x354d   :  { %7837 = vmatmul.msk.f32.gmra.mxu0 %vm658_vm2, %v5532_v52 }
0x3555   :  { %7860 = vmatmul.msk.f32.vlgmr.msra.gmra.mxu0 %vm526_vm0, %v10925_v6 }
0x355d   :  { %7861 = vmatmul.msk.f32.gmra.mxu0 %vm526_vm0, %v10933_v22 }
0x35c2   :  { %v5556_v62 = vpop.f32.mrf.mxu0 }
0x35c3   :  { %7839 = vmatmul.msk.f32.vlgmr.msra.gmra.mxu1 %vm622_vm1, %v5556_v62 }
0x35ca   :  { %v5559_v2 = vpop.f32.mrf.mxu0 }
0x35cb   :  { %7840 = vmatmul.msk.f32.gmra.mxu1 %vm622_vm1, %v5559_v2  ;;  %v7876_v2 = vld [vmem:[%s11706_s9 + $0x90] sm:$0xff] }
0x35d2   :  { %v5688_v9 = vpop.f32.mrf.mxu0 }
0x35d3   :  { %7864 = vmatmul.msk.f32.vlgmr.msrb.gmra.mxu1 %vm622_vm1, %v5623_v7  ;;  %v5689_v18 = vadd.f32 %v8136_v16, %v5688_v9 }
0x35da   :  { %v5691_v17 = vpop.f32.mrf.mxu0 }
0x35db   :  { %v5692_v35 = vadd.f32 %v8136_v16, %v5691_v17  ;;  %7865 = vmatmul.msk.f32.gmra.mxu1 %vm622_vm1, %v5626_v13  ;;  %v7888_v13 = vld [vmem:[%s11707_s10 + $0x138] sm:$0xff]  ;;  %v7887_v16 = vld [vmem:[%s11707_s10 + $0x130] sm:$0xff]  ;;  %v7886_v17 = vld [vmem:[%s11707_s10 + $0x128] sm:$0xff] }
0x35dc   :  { %5949 = vmatpush.msra.mxu1 %v7888_v13  ;;  %v7903_v13 = vld [vmem:[%s11703_s6 + $0x810] sm:$0xff] }
0x35dd   :  { %5771 = vmatpush.msra.mxu2 %v5692_v35 }
0x35de   :  { %5950 = vmatpush.msra.mxu1 %v7887_v16  ;;  %v7910_v16 = vld [vmem:[%s11703_s6 + $0x890] sm:$0xff] }
0x35df   :  { %5772 = vmatpush.msra.mxu2 %v5689_v18 }
0x35e0   :  { %5951 = vmatpush.msra.mxu1 %v7886_v17  ;;  %v7895_v17 = vld [vmem:[%s11703_s6 + $0x788] sm:$0xff] }
0x3640   :  { %v5587_v39 = vpop.f32.mrf.mxu1 }
0x3641   :  { %v5593_v19 = vadd.f32 %v5587_v39, %v5372_v43  ;;  %v7885_v43 = vld [vmem:[%s11707_s10 + $0x120] sm:$0xff] }
0x3642   :  { %5952 = vmatpush.msra.mxu1 %v7885_v43  ;;  %v7894_v43 = vld [vmem:[%s11703_s6 + $0x780] sm:$0xff] }
0x3648   :  { %v5590_v47 = vpop.f32.mrf.mxu1 }
0x3649   :  { %v5594_v20 = vadd.f32 %v5590_v47, %v11121_v40  ;;  %v7884_v47 = vld [vmem:[%s11707_s10 + $0x118] sm:$0xff] }
0x364a   :  { %5953 = vmatpush.msra.mxu1 %v7884_v47 }
0x3650   :  { %v5723_v51 = vpop.f32.mrf.mxu1 }
0x3651   :  { %v5724_v46 = vadd.f32 %v10986_v29, %v5723_v51 }
0x3653   :  { %v5729_v5 = vsel %vm658_vm2, %v5724_v46, -inf }
0x3654   :  { %5730 = vmax.xlane.f32.xlu0 %v5729_v5 }
0x3658   :  { %v5726_v23 = vpop.f32.mrf.mxu1 }
0x3659   :  { %v5727_v45 = vadd.f32 %v10993_v8, %v5726_v23  ;;  %v7868_v8 = vld [vmem:[%s11705_s8 + $0x98] sm:$0xff] }
0x365a   :  { %5803 = vmatpush.msrb.mxu3 %v7868_v8 }
0x365b   :  { %v5732_v24 = vsel %vm658_vm2, %v5727_v45, -inf }
0x365c   :  { %5733 = vmax.xlane.f32.xlu1 %v5732_v24 }
0x36c7   :  { %v5731_v4 = vpop.xlane.xlu0 %5730 }
0x36c8   :  { %v5735_v54 = vsub.f32 %v5724_v46, %v5731_v4  ;;  %v8138_v4 = vld [vmem:[%s11709_s12 + $0x18] ss:$0 sm:$0xff] }
0x36ca   :  { %v5737_v21 = vmul.f32 1.442695, %v5735_v54 }
0x36cc   :  { %8350 = vpow2.f32 %v5737_v21 }
0x36cf   :  { %v5734_v42 = vpop.xlane.xlu1 %5733 }
0x36d0   :  { %v5736_v30 = vsub.f32 %v5727_v45, %v5734_v42  ;;  %v8139_v42 = vld [vmem:[%s11709_s12 + $0x19] ss:$0 sm:$0xff] }
0x36d2   :  { %v8351_v11 = vpop.eup %8350  ;;  %v5739_v40 = vmul.f32 1.442695, %v5736_v30 }
0x36d3   :  { %v5741_v25 = vsel %vm658_vm2, %v8351_v11, 0.0 }
0x36d4   :  { %8352 = vpow2.f32 %v5739_v40  ;;  %5742 = vadd.xlane.f32.xlu2 %v5741_v25 }
0x36da   :  { %v8353_v29 = vpop.eup %8352 }
0x36db   :  { %v5744_v26 = vsel %vm658_vm2, %v8353_v29, 0.0 }
0x36dc   :  { %5745 = vadd.xlane.f32.xlu0 %v5744_v26 }
0x3747   :  { %v5743_v37 = vpop.xlane.xlu2 %5742 }
0x3748   :  { %8354 = vrcp.f32 %v5743_v37 }
0x374e   :  { %v8355_v44 = vpop.eup %8354 }
0x374f   :  { %v5749_v27 = vmul.f32 %v8355_v44, %v8351_v11  ;;  %v5746_v28 = vpop.xlane.xlu0 %5745 }
0x3750   :  { %8356 = vrcp.f32 %v5746_v28  ;;  %v7883_v28 = vld [vmem:[%s11707_s10 + $0x110] sm:$0xff] }
0x3751   :  { %7866 = vmatmul.msk.f32.vlgmr.msra.gmra.mxu2 %vm658_vm2, %v5749_v27  ;;  %5954 = vmatpush.msra.mxu1 %v7883_v28  ;;  %v8142_v28 = vld [vmem:[%s11709_s12 + $0x1a] ss:$0 sm:$0xff] }
0x3756   :  { %v8357_v15 = vpop.eup %8356 }
0x3757   :  { %v5750_v31 = vmul.f32 %v8357_v15, %v8353_v29  ;;  %v7882_v15 = vld [vmem:[%s11707_s10 + $0x108] sm:$0xff] }
0x3758   :  { %5955 = vmatpush.msra.mxu1 %v7882_v15 }
0x3759   :  { %7867 = vmatmul.msk.f32.gmra.mxu2 %vm658_vm2, %v5750_v31  ;;  %v7881_v31 = vld [vmem:[%s11707_s10 + $0x100] sm:$0xff] }
0x375a   :  { %5956 = vmatpush.msra.mxu1 %v7881_v31 }
0x37d4   :  { %v5774_v48 = vpop.f32.mrf.mxu2 }
0x37d5   :  { %7869 = vmatmul.msk.f32.vlgmr.msrb.gmra.mxu3 %vm622_vm1, %v5774_v48  ;;  %v8140_v48 = vld [vmem:[%s11708_s11 + $0x4] ss:$0 sm:$0xff] }
0x37dc   :  { %v5777_v32 = vpop.f32.mrf.mxu2 }
0x37dd   :  { %7870 = vmatmul.msk.f32.gmra.mxu3 %vm622_vm1, %v5777_v32 }
0x3858   :  { %v5805_v49 = vpop.f32.mrf.mxu3 }
0x3859   :  { %v5811_v33 = vadd.f32 %v5805_v49, %v5593_v19 }
0x385b   :  { %v5818_v41 = vadd.f32 %v8137_v36, %v5811_v33 }
0x385d   :  { %v5820_v34 = vadd.f32 %v5818_v41, %v10925_v6 }
0x385f   :  { %v5826_v38 = vsel %vm526_vm0, %v5820_v34, 0.0 }
0x3860   :  { %5827 = vadd.xlane.f32.xlu1 %v5826_v38  ;;  %v5808_v10 = vpop.f32.mrf.mxu3  ;;  %v8141_v38 = vld [vmem:[%s11709_s12 + $0x1d] ss:$0 sm:$0xff] }
0x3861   :  { %v5812_v50 = vadd.f32 %v5808_v10, %v5594_v20 }
0x3863   :  { %v5819_v55 = vadd.f32 %v8137_v36, %v5812_v50 }
0x3865   :  { %v5821_v57 = vadd.f32 %v5819_v55, %v10933_v22  ;;  %v7877_v22 = vld [vmem:[%s11706_s9 + $0x98] sm:$0xff] }
0x3866   :  { %5908 = vmatpush.msrb.mxu0 %v7877_v22 }
0x3867   :  { %v5829_v14 = vsel %vm526_vm0, %v5821_v57, 0.0 }
0x3868   :  { %5830 = vadd.xlane.f32.xlu2 %v5829_v14  ;;  %5909 = vmatpush.msrb.mxu0 %v7876_v2 }
0x386a   :  { %5910 = vmatpush.msrb.mxu0 %v7875_v56 }
0x386c   :  { %5911 = vmatpush.msrb.mxu0 %v7874_v3  ;;  %v7897_v3 = vld [vmem:[%s11703_s6 + $0x798] sm:$0xff] }
0x386d   :  { %6052 = vmatpush.msrb.mxu2 %v7897_v3  ;;  %v7938_v3 = vld [vmem:[%s11703_s6 + $0x8b0] sm:$0xff] }
0x38d3   :  { %v5828_v58 = vpop.xlane.xlu1 %5827 }
0x38d4   :  { %v5832_v59 = vmul.f32 %v5828_v58, %v9478_v63 }
0x38d6   :  { %v5834_v60 = vsub.f32 %v5820_v34, %v5832_v59 }
0x38d8   :  { %v5836_v61 = vmul.f32 %v5834_v60, %v5834_v60 }
0x38da   :  { %v5838_v0 = vsel %vm526_vm0, %v5836_v61, 0.0 }
0x38db   :  { %5839 = vadd.xlane.f32.xlu0 %v5838_v0  ;;  %v5831_v6 = vpop.xlane.xlu2 %5830 }
0x38dc   :  { %v5833_v53 = vmul.f32 %v5831_v6, %v9478_v63 }
0x38de   :  { %v5835_v1 = vsub.f32 %v5821_v57, %v5833_v53 }
0x38e0   :  { %v5837_v52 = vmul.f32 %v5835_v1, %v5835_v1 }
0x38e2   :  { %v5841_v62 = vsel %vm526_vm0, %v5837_v52, 0.0 }
0x38e3   :  { %5842 = vadd.xlane.f32.xlu1 %v5841_v62 }
0x394e   :  { %v5840_v7 = vpop.xlane.xlu0 %5839 }
0x394f   :  { %v5844_v9 = vmul.f32 %v5840_v7, %v9478_v63  ;;  %v7904_v7 = vld [vmem:[%s11703_s6 + $0x818] sm:$0xff] }
0x3950   :  { %6085 = vmatpush.msra.mxu3 %v7904_v7  ;;  %v8147_v7 = vld [vmem:[%s11704_s7 + $0x41] ss:$0 sm:$0xff] }
0x3951   :  { %v5846_v12 = vadd.f32 1e-05, %v5844_v9  ;;  %v7911_v9 = vld [vmem:[%s11703_s6 + $0x898] sm:$0xff] }
0x3952   :  { %6118 = vmatpush.msra.mxu0 %v7911_v9  ;;  %6086 = vmatpush.msra.mxu3 %v7903_v13  ;;  %v7937_v9 = vld [vmem:[%s11703_s6 + $0x8a8] sm:$0xff] }
0x3953   :  { %8358 = vrsqrt.f32 %v5846_v12  ;;  %vm5854_vm5 = vweird.f32 %v5846_v12 }
0x3954   :  { %6119 = vmatpush.msra.mxu0 %v7910_v16  ;;  %v7936_v16 = vld [vmem:[%s11703_s6 + $0x8a0] sm:$0xff] }
0x3956   :  { %v5843_v35 = vpop.xlane.xlu1 %5842 }
0x3957   :  { %v5845_v18 = vmul.f32 %v5843_v35, %v9478_v63  ;;  %v7902_v35 = vld [vmem:[%s11703_s6 + $0x808] sm:$0xff] }
0x3958   :  { %6087 = vmatpush.msra.mxu3 %v7902_v35 }
0x3959   :  { %v8359_v39 = vpop.eup %8358  ;;  %v5847_v19 = vadd.f32 1e-05, %v5845_v18  ;;  %v7909_v18 = vld [vmem:[%s11703_s6 + $0x888] sm:$0xff] }
0x395a   :  { %v5849_v20 = vmul.f32 %v8359_v39, %v5846_v12  ;;  %vm5855_vm4 = vweird.f32 %v8359_v39  ;;  %v7896_v12 = vld [vmem:[%s11703_s6 + $0x790] sm:$0xff]  ;;  %6120 = vmatpush.msra.mxu0 %v7909_v18 }
0x395b   :  { %8360 = vrsqrt.f32 %v5847_v19  ;;  %vm5856_vm6 = vmor %vm5854_vm5, %vm5855_vm4  ;;  %vm5864_vm8 = vweird.f32 %v5847_v19  ;;  %6053 = vmatpush.msrb.mxu2 %v7896_v12 }
0x395c   :  { %v5850_v51 = vmul.f32 %v8359_v39, %v5849_v20 }
0x395d   :  { %6054 = vmatpush.msrb.mxu2 %v7895_v17 }
0x395e   :  { %v5851_v46 = vmul.f32 0.5, %v5850_v51 }
0x395f   :  { %6055 = vmatpush.msrb.mxu2 %v7894_v43 }
0x3960   :  { %v5852_v5 = vsub.f32 1.5, %v5851_v46  ;;  %v7925_v46 = vld [vmem:[%s11703_s6 + $0x7b8] sm:$0xff] }
0x3961   :  { %v8361_v23 = vpop.eup %8360 }
0x3962   :  { %v5853_v45 = vmul.f32 %v8359_v39, %v5852_v5  ;;  %v5859_v24 = vmul.f32 %v8361_v23, %v5847_v19  ;;  %vm5865_vm7 = vweird.f32 %v8361_v23  ;;  %v7908_v19 = vld [vmem:[%s11703_s6 + $0x880] sm:$0xff]  ;;  %v7932_v5 = vld [vmem:[%s11703_s6 + $0x838] sm:$0xff] }
0x3963   :  { %vm5866_vm9 = vmor %vm5864_vm8, %vm5865_vm7  ;;  %6121 = vmatpush.msra.mxu0 %v7908_v19 }
0x3964   :  { %v5857_v54 = vsel %vm5856_vm6, %v8359_v39, %v5853_v45  ;;  %v5860_v21 = vmul.f32 %v8361_v23, %v5859_v24  ;;  %v7901_v39 = vld [vmem:[%s11703_s6 + $0x800] sm:$0xff]  ;;  %v7931_v45 = vld [vmem:[%s11703_s6 + $0x830] sm:$0xff] }
0x3965   :  { %v5868_v30 = vmul.f32 %v5857_v54, %v5834_v60  ;;  %6088 = vmatpush.msra.mxu3 %v7901_v39  ;;  %v7930_v54 = vld [vmem:[%s11703_s6 + $0x828] sm:$0xff]  ;;  %v11394_v39 = vld [vmem:[%s11700_s3] sm:$0xff] }
0x3966   :  { %v5861_v11 = vmul.f32 0.5, %v5860_v21 }
0x3967   :  { %v5873_v40 = vmul.f32 %v8138_v4, %v5868_v30  ;;  %6239 = vmatpush.msrb.mxu3 %v7925_v46  ;;  %v7929_v30 = vld [vmem:[%s11703_s6 + $0x820] sm:$0xff] }
0x3968   :  { %v5862_v25 = vsub.f32 1.5, %v5861_v11 }
0x3969   :  { %v5878_v29 = vadd.f32 %v8139_v42, %v5873_v40 }
0x396a   :  { %v5863_v26 = vmul.f32 %v8361_v23, %v5862_v25 }
0x396b   :  { %7879 = vmatmul.msk.f32.vlgmr.msrb.gmra.mxu0 %vm526_vm0, %v5878_v29 }
0x396c   :  { %v5867_v8 = vsel %vm5866_vm9, %v8361_v23, %v5863_v26  ;;  %v7924_v23 = vld [vmem:[%s11703_s6 + $0x7b0] sm:$0xff]  ;;  %6272 = vmatpush.msrb.mxu0 %v7932_v5 }
0x396d   :  { %v5869_v37 = vmul.f32 %v5867_v8, %v5835_v1  ;;  %6240 = vmatpush.msrb.mxu3 %v7924_v23 }
0x396e   :  { %6273 = vmatpush.msrb.mxu0 %v7931_v45  ;;  %v8149_v45 = vld [vmem:[%s11704_s7 + $0x45] ss:$0 sm:$0xff] }
0x396f   :  { %v5874_v44 = vmul.f32 %v8138_v4, %v5869_v37  ;;  %v7923_v4 = vld [vmem:[%s11703_s6 + $0x7a8] sm:$0xff] }
0x3970   :  { %6241 = vmatpush.msrb.mxu3 %v7923_v4  ;;  %6274 = vmatpush.msrb.mxu0 %v7930_v54 }
0x3971   :  { %v5879_v27 = vadd.f32 %v8139_v42, %v5874_v44  ;;  %v7922_v42 = vld [vmem:[%s11703_s6 + $0x7a0] sm:$0xff] }
0x3972   :  { %6242 = vmatpush.msrb.mxu3 %v7922_v42  ;;  %6275 = vmatpush.msrb.mxu0 %v7929_v30 }
0x3973   :  { %7880 = vmatmul.msk.f32.gmra.mxu0 %vm526_vm0, %v5879_v27 }
0x39e8   :  { %v5913_v32 = vpop.f32.mrf.mxu0 }
0x39e9   :  { %v5914_v36 = vadd.f32 %v8140_v48, %v5913_v32 }
0x39eb   :  { %v5919_v49 = vmax.f32 %v5914_v36, 0.0 }
0x39ed   :  { %7890 = vmatmul.msk.f32.vlgmr.msra.gmra.mxu1 %vm1517_vm10, %v5919_v49 }
0x39f0   :  { %v5916_v33 = vpop.f32.mrf.mxu0 }
0x39f1   :  { %v5917_v41 = vadd.f32 %v8140_v48, %v5916_v33  ;;  %v8143_v48 = vld [vmem:[%s11709_s12 + $0x1b] ss:$0 sm:$0xff] }
0x39f3   :  { %v5920_v34 = vmax.f32 %v5917_v41, 0.0 }
0x39f5   :  { %7891 = vmatmul.msk.f32.gmra.mxu1 %vm1517_vm10, %v5920_v34 }
0x3a6a   :  { %v5958_v10 = vpop.f32.mrf.mxu1 }
0x3a6b   :  { %v5959_v50 = vadd.f32 %v8141_v38, %v5958_v10 }
0x3a6d   :  { %v5964_v55 = vadd.f32 %v5959_v50, %v5878_v29 }
0x3a6f   :  { %v5970_v57 = vsel %vm526_vm0, %v5964_v55, 0.0 }
0x3a70   :  { %5971 = vadd.xlane.f32.xlu2 %v5970_v57 }
0x3a72   :  { %v5961_v14 = vpop.f32.mrf.mxu1 }
0x3a73   :  { %v5962_v58 = vadd.f32 %v8141_v38, %v5961_v14 }
0x3a75   :  { %v5965_v59 = vadd.f32 %v5962_v58, %v5879_v27  ;;  %v8144_v58 = vld [vmem:[%s11704_s7 + $0x44] ss:$0 sm:$0xff] }
0x3a77   :  { %v5973_v60 = vsel %vm526_vm0, %v5965_v59, 0.0 }
0x3a78   :  { %5974 = vadd.xlane.f32.xlu0 %v5973_v60 }
0x3ae3   :  { %v5972_v61 = vpop.xlane.xlu2 %5971 }
0x3ae4   :  { %v5976_v0 = vmul.f32 %v5972_v61, %v9478_v63 }
0x3ae6   :  { %v11252_v6 = vsub.f32 %v5964_v55, %v5976_v0  ;;  %v8146_v0 = vld [vmem:[%s11704_s7 + $0x40] ss:$0 sm:$0xff] }
0x3ae8   :  { %v5980_v53 = vmul.f32 %v11252_v6, %v11252_v6 }
0x3aea   :  { %v5982_v1 = vsel %vm526_vm0, %v5980_v53, 0.0 }
0x3aeb   :  { %v5975_v52 = vpop.xlane.xlu0 %5974  ;;  %5983 = vadd.xlane.f32.xlu1 %v5982_v1 }
0x3aec   :  { %v5977_v62 = vmul.f32 %v5975_v52, %v9478_v63 }
0x3aee   :  { %v11258_v22 = vsub.f32 %v5965_v59, %v5977_v62  ;;  %v8145_v62 = vld [vmem:[%s11704_s7 + $0x3c] ss:$0 sm:$0xff] }
0x3af0   :  { %v5981_v2 = vmul.f32 %v11258_v22, %v11258_v22 }
0x3af2   :  { %v5985_v56 = vsel %vm526_vm0, %v5981_v2, 0.0  ;;  %v7939_v2 = vld [vmem:[%s11703_s6 + $0x8b8] sm:$0xff] }
0x3af3   :  { %5986 = vadd.xlane.f32.xlu2 %v5985_v56 }
0x3b5e   :  { %v5984_v47 = vpop.xlane.xlu1 %5983 }
0x3b5f   :  { %v5988_v20 = vmul.f32 %v5984_v47, %v9478_v63 }
0x3b61   :  { %v5990_v51 = vadd.f32 1e-05, %v5988_v20 }
0x3b63   :  { %8362 = vrsqrt.f32 %v5990_v51  ;;  %vm5998_vm12 = vweird.f32 %v5990_v51 }
0x3b66   :  { %v5987_v24 = vpop.xlane.xlu2 %5986 }
0x3b67   :  { %v5989_v21 = vmul.f32 %v5987_v24, %v9478_v63 }
0x3b69   :  { %v8363_v11 = vpop.eup %8362  ;;  %v5991_v40 = vadd.f32 1e-05, %v5989_v21 }
0x3b6a   :  { %v5993_v25 = vmul.f32 %v8363_v11, %v5990_v51  ;;  %vm5999_vm11 = vweird.f32 %v8363_v11  ;;  %v11401_v51 = vld [vmem:[%s11700_s3 + $0x8] sm:$0xff] }
0x3b6b   :  { %8364 = vrsqrt.f32 %v5991_v40  ;;  %vm6000_vm13 = vmor %vm5998_vm12, %vm5999_vm11  ;;  %vm6008_vm15 = vweird.f32 %v5991_v40 }
0x3b6c   :  { %v5994_v29 = vmul.f32 %v8363_v11, %v5993_v25 }
0x3b6e   :  { %v5995_v26 = vmul.f32 0.5, %v5994_v29 }
0x3b70   :  { %v5996_v8 = vsub.f32 1.5, %v5995_v26 }
0x3b71   :  { %v8365_v37 = vpop.eup %8364 }
0x3b72   :  { %v5997_v44 = vmul.f32 %v8363_v11, %v5996_v8  ;;  %v6003_v27 = vmul.f32 %v8365_v37, %v5991_v40  ;;  %vm6009_vm14 = vweird.f32 %v8365_v37 }
0x3b73   :  { %vm6010_vm3 = vmor %vm6008_vm15, %vm6009_vm14  ;;  %vm7146_vm14 = vcmask 326656  }
0x3b74   :  { %v6001_v15 = vsel %vm6000_vm13, %v8363_v11, %v5997_v44  ;;  %v6004_v31 = vmul.f32 %v8365_v37, %v6003_v27 }
0x3b75   :  { %v6012_v32 = vmul.f32 %v6001_v15, %v11252_v6 }
0x3b76   :  { %v6005_v36 = vmul.f32 0.5, %v6004_v31  ;;  %v7957_v31 = vld [vmem:[%s11703_s6 + $0x7d8] sm:$0xff] }
0x3b77   :  { %v6017_v49 = vmul.f32 %v8142_v28, %v6012_v32  ;;  %v7955_v32 = vld [vmem:[%s11703_s6 + $0x7c8] sm:$0xff] }
0x3b78   :  { %v6006_v33 = vsub.f32 1.5, %v6005_v36  ;;  %v7954_v36 = vld [vmem:[%s11703_s6 + $0x7c0] sm:$0xff] }
0x3b79   :  { %v11332_v41 = vadd.f32 %v8143_v48, %v6017_v49 }
0x3b7a   :  { %v6007_v34 = vmul.f32 %v8365_v37, %v6006_v33 }
0x3b7b   :  { %7899 = vmatmul.msk.f32.vlgmr.msrb.gmra.mxu2 %vm526_vm0, %v11332_v41  ;;  %7906 = vmatmul.msk.f32.vlgmr.msra.gmra.mxu3 %vm526_vm0, %v11332_v41 }
0x3b7c   :  { %v6011_v38 = vsel %vm6010_vm3, %v8365_v37, %v6007_v34  ;;  %7913 = vmatmul.msk.f32.vlgmr.msra.gmra.mxu0 %vm526_vm0, %v11332_v41 }
0x3b7d   :  { %v6013_v10 = vmul.f32 %v6011_v38, %v11258_v22  ;;  %v8148_v38 = vld [vmem:[%s11704_s7 + $0x3d] ss:$0 sm:$0xff] }
0x3b7f   :  { %v6018_v50 = vmul.f32 %v8142_v28, %v6013_v10 }
0x3b81   :  { %v11341_v55 = vadd.f32 %v8143_v48, %v6018_v50  ;;  %v7956_v48 = vld [vmem:[%s11703_s6 + $0x7d0] sm:$0xff] }
0x3b83   :  { %7900 = vmatmul.msk.f32.gmra.mxu2 %vm526_vm0, %v11341_v55  ;;  %7907 = vmatmul.msk.f32.gmra.mxu3 %vm526_vm0, %v11341_v55 }
0x3b84   :  { %7914 = vmatmul.msk.f32.gmra.mxu0 %vm526_vm0, %v11341_v55 }
0x3b8b   :  { %7927 = vmatmul.msk.f32.vlgmr.msrb.gmra.mxu3 %vm526_vm0, %v11332_v41 }
0x3b8c   :  { %7934 = vmatmul.msk.f32.vlgmr.msrb.gmra.mxu0 %vm526_vm0, %v11332_v41 }
0x3b93   :  { %7928 = vmatmul.msk.f32.gmra.mxu3 %vm526_vm0, %v11341_v55 }
0x3b94   :  { %7935 = vmatmul.msk.f32.gmra.mxu0 %vm526_vm0, %v11341_v55 }
0x3bf9   :  { %v6123_v57 = vpop.f32.mrf.mxu0 }
0x3bfa   :  { %v6124_v61 = vadd.f32 %v8144_v58, %v6123_v57 }
0x3bfe   :  { %v6090_v14 = vpop.f32.mrf.mxu3  ;;  %v6057_v1 = vpop.f32.mrf.mxu2 }
0x3bff   :  { %v6091_v22 = vadd.f32 %v8146_v0, %v6090_v14  ;;  %v6058_v56 = vadd.f32 %v8145_v62, %v6057_v1  ;;  %v7921_v14 = vld [vmem:[%s11705_s8 + $0xa0] sm:$0xff] }
0x3c01   :  { %v6126_v59 = vpop.f32.mrf.mxu0 }
0x3c02   :  { %v6127_v60 = vadd.f32 %v8144_v58, %v6126_v59 }
0x3c04   :  { %6206 = vmatpush.msra.mxu2 %v6127_v60 }
0x3c06   :  { %6207 = vmatpush.msra.mxu2 %v6124_v61  ;;  %v6093_v6 = vpop.f32.mrf.mxu3  ;;  %v6060_v17 = vpop.f32.mrf.mxu2 }
0x3c07   :  { %v6094_v53 = vadd.f32 %v8146_v0, %v6093_v6  ;;  %v6061_v35 = vadd.f32 %v8145_v62, %v6060_v17  ;;  %v7963_v17 = vld [vmem:[%s11703_s6 + $0x850] sm:$0xff] }
0x3c09   :  { %v6277_v52 = vpop.f32.mrf.mxu0  ;;  %7915 = vmatpush.xpose.msk.msrb.mxu1 %vm622_vm1, %v6094_v53 }
0x3c0a   :  { %v6278_v18 = vadd.f32 %v8147_v7, %v6277_v52 }
0x3c0d   :  { %7916 = vmatpush.xpose.msk.msrb.mxu1 %vm622_vm1, %v6091_v22 }
0x3c0e   :  { %v6244_v34 = vpop.f32.mrf.mxu3 }
0x3c0f   :  { %v6245_v10 = vadd.f32 %v8148_v38, %v6244_v34 }
0x3c10   :  { %7917 = vmatmul.msk.f32.vlgmr.msrb.gmra.mxu1 %vm622_vm1, %v6058_v56 }
0x3c11   :  { %6305 = vmatpush.msra.mxu1 %v7939_v2  ;;  %v6280_v12 = vpop.f32.mrf.mxu0 }
0x3c12   :  { %v6281_v13 = vadd.f32 %v8147_v7, %v6280_v12 }
0x3c13   :  { %6306 = vmatpush.msra.mxu1 %v7938_v3 }
0x3c14   :  { %7943 = vmatpush.xpose.msk.msrb.mxu2 %vm622_vm1, %v6281_v13 }
0x3c15   :  { %6307 = vmatpush.msra.mxu1 %v7937_v9 }
0x3c16   :  { %v6247_v50 = vpop.f32.mrf.mxu3 }
0x3c17   :  { %6308 = vmatpush.msra.mxu1 %v7936_v16  ;;  %v6248_v57 = vadd.f32 %v8148_v38, %v6247_v50  ;;  %v7964_v16 = vld [vmem:[%s11703_s6 + $0x858] sm:$0xff] }
0x3c18   :  { %7944 = vmatpush.xpose.msk.msrb.mxu2 %vm622_vm1, %v6278_v18  ;;  %7918 = vmatmul.msk.f32.gmra.mxu1 %vm622_vm1, %v6061_v35  ;;  %v7962_v35 = vld [vmem:[%s11703_s6 + $0x848] sm:$0xff]  ;;  %v7961_v18 = vld [vmem:[%s11703_s6 + $0x840] sm:$0xff] }
0x3c19   :  { %6454 = vmatpush.msrb.mxu1 %v7921_v14 }
0x3c20   :  { %7941 = vmatmul.msk.f32.vlgmr.msra.gmra.mxu1 %vm526_vm0, %v11332_v41 }
0x3c28   :  { %7942 = vmatmul.msk.f32.gmra.mxu1 %vm526_vm0, %v11341_v55 }
0x3c8d   :  { %v6158_v43 = vpop.f32.mrf.mxu1 }
0x3c8e   :  { %v6159_v19 = vadd.f32 %v11394_v39, %v6158_v43 }
0x3c90   :  { %v6164_v47 = vsel %vm658_vm2, %v6159_v19, -inf }
0x3c91   :  { %6165 = vmax.xlane.f32.xlu0 %v6164_v47 }
0x3c95   :  { %v6161_v20 = vpop.f32.mrf.mxu1 }
0x3c96   :  { %v6162_v46 = vadd.f32 %v11401_v51, %v6161_v20 }
0x3c98   :  { %v6167_v5 = vsel %vm658_vm2, %v6162_v46, -inf }
0x3c99   :  { %6168 = vmax.xlane.f32.xlu1 %v6167_v5 }
0x3c9d   :  { %v6310_v23 = vpop.f32.mrf.mxu1 }
0x3c9e   :  { %v6311_v54 = vadd.f32 %v8149_v45, %v6310_v23  ;;  %v7949_v23 = vld [vmem:[%s11705_s8 + $0xa8] sm:$0xff] }
0x3c9f   :  { %6425 = vmatpush.msra.mxu0 %v7949_v23  ;;  %v7999_v23 = vld [vmem:[%s11703_s6 + $0x8e8] sm:$0xff] }
0x3ca5   :  { %v6313_v24 = vpop.f32.mrf.mxu1 }
0x3ca6   :  { %v6314_v4 = vadd.f32 %v8149_v45, %v6313_v24  ;;  %v7971_v45 = vld [vmem:[%s11703_s6 + $0x8d8] sm:$0xff]  ;;  %v7970_v24 = vld [vmem:[%s11703_s6 + $0x8d0] sm:$0xff] }
0x3ca7   :  { %6550 = vmatpush.msrb.mxu0 %v7971_v45  ;;  %v7998_v45 = vld [vmem:[%s11703_s6 + $0x8e0] sm:$0xff] }
0x3ca8   :  { %6393 = vmatpush.msra.mxu3 %v6314_v4  ;;  %v7969_v4 = vld [vmem:[%s11703_s6 + $0x8c8] sm:$0xff] }
0x3ca9   :  { %6551 = vmatpush.msrb.mxu0 %v7970_v24 }
0x3caa   :  { %6394 = vmatpush.msra.mxu3 %v6311_v54  ;;  %v7968_v54 = vld [vmem:[%s11703_s6 + $0x8c0] sm:$0xff] }
0x3cab   :  { %6552 = vmatpush.msrb.mxu0 %v7969_v4 }
0x3cac   :  { %6517 = vmatpush.msrb.mxu3 %v7964_v16 }
0x3cad   :  { %6553 = vmatpush.msrb.mxu0 %v7968_v54 }
0x3cae   :  { %6518 = vmatpush.msrb.mxu3 %v7963_v17 }
0x3cb0   :  { %6519 = vmatpush.msrb.mxu3 %v7962_v35 }
0x3cb2   :  { %6520 = vmatpush.msrb.mxu3 %v7961_v18 }
0x3d04   :  { %v6166_v21 = vpop.xlane.xlu0 %6165 }
0x3d05   :  { %v6170_v42 = vsub.f32 %v6159_v19, %v6166_v21  ;;  %v7987_v21 = vld [vmem:[%s11703_s6 + $0x7f8] sm:$0xff] }
0x3d07   :  { %v6172_v30 = vmul.f32 1.442695, %v6170_v42 }
0x3d09   :  { %8366 = vpow2.f32 %v6172_v30  ;;  %v7986_v30 = vld [vmem:[%s11703_s6 + $0x7f0] sm:$0xff] }
0x3d0c   :  { %v6169_v11 = vpop.xlane.xlu1 %6168 }
0x3d0d   :  { %v6171_v40 = vsub.f32 %v6162_v46, %v6169_v11  ;;  %v7985_v11 = vld [vmem:[%s11703_s6 + $0x7e8] sm:$0xff] }
0x3d0f   :  { %v8367_v25 = vpop.eup %8366  ;;  %v6174_v29 = vmul.f32 1.442695, %v6171_v40  ;;  %v7984_v40 = vld [vmem:[%s11703_s6 + $0x7e0] sm:$0xff] }
0x3d10   :  { %v6176_v26 = vsel %vm658_vm2, %v8367_v25, 0.0 }
0x3d11   :  { %8368 = vpow2.f32 %v6174_v29  ;;  %6177 = vadd.xlane.f32.xlu2 %v6176_v26  ;;  %v8151_v26 = vld [vmem:[%s11704_s7 + $0x42] ss:$0 sm:$0xff] }
0x3d17   :  { %v8369_v8 = vpop.eup %8368 }
0x3d18   :  { %v6179_v37 = vsel %vm658_vm2, %v8369_v8, 0.0 }
0x3d19   :  { %6180 = vadd.xlane.f32.xlu0 %v6179_v37 }
0x3d84   :  { %v6178_v44 = vpop.xlane.xlu2 %6177 }
0x3d85   :  { %8370 = vrcp.f32 %v6178_v44 }
0x3d8b   :  { %v8371_v27 = vpop.eup %8370 }
0x3d8c   :  { %v6184_v28 = vmul.f32 %v8371_v27, %v8367_v25  ;;  %v6181_v15 = vpop.xlane.xlu0 %6180  ;;  %v8150_v27 = vld [vmem:[%s11704_s7 + $0x3e] ss:$0 sm:$0xff] }
0x3d8d   :  { %8372 = vrcp.f32 %v6181_v15  ;;  %v7994_v15 = vld [vmem:[%s11703_s6 + $0x878] sm:$0xff] }
0x3d8e   :  { %7919 = vmatmul.msk.f32.vlgmr.msra.gmra.mxu2 %vm658_vm2, %v6184_v28 }
0x3d8f   :  { %6484 = vmatpush.msra.mxu2 %v7957_v31 }
0x3d91   :  { %6485 = vmatpush.msra.mxu2 %v7956_v48  ;;  %v7993_v48 = vld [vmem:[%s11703_s6 + $0x870] sm:$0xff] }
0x3d93   :  { %v8373_v49 = vpop.eup %8372  ;;  %6486 = vmatpush.msra.mxu2 %v7955_v32  ;;  %v7992_v32 = vld [vmem:[%s11703_s6 + $0x868] sm:$0xff] }
0x3d94   :  { %v6185_v33 = vmul.f32 %v8373_v49, %v8369_v8 }
0x3d95   :  { %6487 = vmatpush.msra.mxu2 %v7954_v36  ;;  %v7991_v36 = vld [vmem:[%s11703_s6 + $0x860] sm:$0xff] }
0x3d96   :  { %7920 = vmatmul.msk.f32.gmra.mxu2 %vm658_vm2, %v6185_v33 }
0x3d9e   :  { %7945 = vmatmul.msk.f32.vlgmr.msrb.gmra.mxu2 %vm622_vm1, %v6245_v10 }
0x3da6   :  { %7946 = vmatmul.msk.f32.gmra.mxu2 %vm622_vm1, %v6248_v57 }
0x3dae   :  { %7959 = vmatmul.msk.f32.vlgmr.msra.gmra.mxu2 %vm526_vm0, %v11332_v41 }
0x3db6   :  { %7960 = vmatmul.msk.f32.gmra.mxu2 %vm526_vm0, %v11341_v55 }
0x3e11   :  { %v6209_v58 = vpop.f32.mrf.mxu2 }
0x3e12   :  { %7952 = vmatmul.msk.f32.vlgmr.msrb.gmra.mxu1 %vm622_vm1, %v6209_v58  ;;  %v8152_v58 = vld [vmem:[%s11704_s7 + $0x46] ss:$0 sm:$0xff] }
0x3e19   :  { %v6212_v59 = vpop.f32.mrf.mxu2 }
0x3e1a   :  { %7953 = vmatmul.msk.f32.gmra.mxu1 %vm622_vm1, %v6212_v59 }
0x3e21   :  { %v6345_v60 = vpop.f32.mrf.mxu2 }
0x3e22   :  { %v6346_v61 = vadd.f32 %v11394_v39, %v6345_v60 }
0x3e24   :  { %v6351_v0 = vsel %vm658_vm2, %v6346_v61, -inf }
0x3e25   :  { %6352 = vmax.xlane.f32.xlu1 %v6351_v0 }
0x3e29   :  { %v6348_v6 = vpop.f32.mrf.mxu2 }
0x3e2a   :  { %v6349_v53 = vadd.f32 %v11401_v51, %v6348_v6 }
0x3e2c   :  { %v6354_v1 = vsel %vm658_vm2, %v6349_v53, -inf }
0x3e2d   :  { %6355 = vmax.xlane.f32.xlu2 %v6354_v1 }
0x3e31   :  { %v6489_v44 = vpop.f32.mrf.mxu2 }
0x3e32   :  { %v6490_v31 = vadd.f32 %v8150_v27, %v6489_v44 }
0x3e39   :  { %v6492_v49 = vpop.f32.mrf.mxu2 }
0x3e3a   :  { %v6493_v33 = vadd.f32 %v8150_v27, %v6492_v49  ;;  %v8155_v27 = vld [vmem:[%s11704_s7 + $0x47] ss:$0 sm:$0xff] }
0x3e8f   :  { %v11525_v34 = vpop.f32.mrf.mxu1 }
0x3e97   :  { %v6459_v10 = vpop.f32.mrf.mxu1 }
0x3e98   :  { %v6353_v52 = vpop.xlane.xlu1 %6352 }
0x3e99   :  { %v6357_v62 = vsub.f32 %v6346_v61, %v6353_v52  ;;  %v7981_v61 = vld [vmem:[%s11705_s8 + $0xb0] sm:$0xff] }
0x3e9b   :  { %v6359_v22 = vmul.f32 1.442695, %v6357_v62 }
0x3e9d   :  { %8374 = vpow2.f32 %v6359_v22 }
0x3ea0   :  { %v6356_v2 = vpop.xlane.xlu2 %6355 }
0x3ea1   :  { %v6358_v56 = vsub.f32 %v6349_v53, %v6356_v2 }
0x3ea3   :  { %v8375_v3 = vpop.eup %8374  ;;  %v6361_v7 = vmul.f32 1.442695, %v6358_v56  ;;  %v8154_v56 = vld [vmem:[%s11704_s7 + $0x43] ss:$0 sm:$0xff] }
0x3ea4   :  { %v6363_v9 = vsel %vm658_vm2, %v8375_v3, 0.0 }
0x3ea5   :  { %8376 = vpow2.f32 %v6361_v7  ;;  %6364 = vadd.xlane.f32.xlu0 %v6363_v9 }
0x3eab   :  { %v8377_v12 = vpop.eup %8376 }
0x3eac   :  { %v6366_v13 = vsel %vm658_vm2, %v8377_v12, 0.0 }
0x3ead   :  { %6367 = vadd.xlane.f32.xlu1 %v6366_v13 }
0x3f18   :  { %v6365_v43 = vpop.xlane.xlu0 %6364 }
0x3f19   :  { %8378 = vrcp.f32 %v6365_v43 }
0x3f1f   :  { %v8379_v19 = vpop.eup %8378 }
0x3f20   :  { %v6371_v47 = vmul.f32 %v8379_v19, %v8375_v3  ;;  %v6368_v20 = vpop.xlane.xlu1 %6367 }
0x3f21   :  { %8380 = vrcp.f32 %v6368_v20 }
0x3f22   :  { %7947 = vmatmul.msk.f32.vlgmr.msra.gmra.mxu3 %vm658_vm2, %v6371_v47 }
0x3f23   :  { %6670 = vmatpush.msra.mxu3 %v7981_v61 }
0x3f27   :  { %v8381_v46 = vpop.eup %8380 }
0x3f28   :  { %v6372_v5 = vmul.f32 %v8381_v46, %v8377_v12  ;;  %v8001_v46 = vld [vmem:[%s11703_s6 + $0x8f8] sm:$0xff] }
0x3f2a   :  { %7948 = vmatmul.msk.f32.gmra.mxu3 %vm658_vm2, %v6372_v5  ;;  %v8000_v5 = vld [vmem:[%s11703_s6 + $0x8f0] sm:$0xff] }
0x3f32   :  { %7966 = vmatmul.msk.f32.vlgmr.msrb.gmra.mxu3 %vm526_vm0, %v11332_v41 }
0x3f3a   :  { %7967 = vmatmul.msk.f32.gmra.mxu3 %vm526_vm0, %v11341_v55 }
0x3fa5   :  { %v6396_v42 = vpop.f32.mrf.mxu3 }
0x3fa6   :  { %7950 = vmatmul.msk.f32.vlgmr.msra.gmra.mxu0 %vm622_vm1, %v6396_v42 }
0x3fa7   :  { %6702 = vmatpush.msra.mxu0 %v7987_v21 }
0x3fa9   :  { %6703 = vmatpush.msra.mxu0 %v7986_v30 }
0x3fab   :  { %6704 = vmatpush.msra.mxu0 %v7985_v11 }
0x3fad   :  { %v6399_v25 = vpop.f32.mrf.mxu3  ;;  %6705 = vmatpush.msra.mxu0 %v7984_v40 }
0x3fae   :  { %7951 = vmatmul.msk.f32.gmra.mxu0 %vm622_vm1, %v6399_v25 }
0x3fb5   :  { %v6522_v29 = vpop.f32.mrf.mxu3 }
0x3fb6   :  { %7973 = vmatmul.msk.f32.vlgmr.msrb.gmra.mxu0 %vm526_vm0, %v11332_v41  ;;  %v6523_v28 = vadd.f32 %v8151_v26, %v6522_v29  ;;  %v8153_v29 = vld [vmem:[%s11704_s7 + $0x3f] ss:$0 sm:$0xff]  ;;  %s8454_s7 = smov 128  }
0x3fbd   :  { %v6525_v8 = vpop.f32.mrf.mxu3 }
0x3fbe   :  { %v6526_v37 = vadd.f32 %v8151_v26, %v6525_v8  ;;  %7974 = vmatmul.msk.f32.gmra.mxu0 %vm526_vm0, %v11341_v55 }
0x3fc0   :  { %7975 = vmatpush.xpose.msk.msra.mxu1 %vm622_vm1, %v6526_v37 }
0x3fc4   :  { %7976 = vmatpush.xpose.msk.msra.mxu1 %vm622_vm1, %v6523_v28 }
0x3fc6   :  { %7989 = vmatmul.msk.f32.vlgmr.msra.gmra.mxu0 %vm526_vm0, %v11332_v41 }
0x3fc7   :  { %7977 = vmatmul.msk.f32.vlgmr.msra.gmra.mxu1 %vm622_vm1, %v6490_v31 }
0x3fc8   :  { %6735 = vmatpush.msrb.mxu1 %v7994_v15 }
0x3fca   :  { %6736 = vmatpush.msrb.mxu1 %v7993_v48 }
0x3fcc   :  { %6737 = vmatpush.msrb.mxu1 %v7992_v32 }
0x3fce   :  { %6738 = vmatpush.msrb.mxu1 %v7991_v36  ;;  %7990 = vmatmul.msk.f32.gmra.mxu0 %vm526_vm0, %v11341_v55 }
0x3fcf   :  { %7978 = vmatmul.msk.f32.gmra.mxu1 %vm622_vm1, %v6493_v33 }
0x3fd7   :  { %7996 = vmatmul.msk.f32.vlgmr.msrb.gmra.mxu1 %vm526_vm0, %v11332_v41 }
0x3fdf   :  { %7997 = vmatmul.msk.f32.gmra.mxu1 %vm526_vm0, %v11341_v55 }
0x4023   :  { %v11527_v38 = vpop.f32.mrf.mxu0 }
0x4024   :  { %v6457_v48 = vadd.f32 %v11525_v34, %v11527_v38 }
0x402b   :  { %v6430_v50 = vpop.f32.mrf.mxu0 }
0x402c   :  { %v11529_v57 = vadd.f32 %v6459_v10, %v6430_v50 }
0x4033   :  { %v6555_v14 = vpop.f32.mrf.mxu0 }
0x4034   :  { %v6556_v0 = vadd.f32 %v8152_v58, %v6555_v14 }
0x403b   :  { %v6558_v59 = vpop.f32.mrf.mxu0 }
0x403c   :  { %v6559_v60 = vadd.f32 %v8152_v58, %v6558_v59 }
0x403e   :  { %6638 = vmatpush.msrb.mxu2 %v6559_v60 }
0x4040   :  { %6639 = vmatpush.msrb.mxu2 %v6556_v0 }
0x4042   :  { %6768 = vmatpush.msra.mxu2 %v8001_v46 }
0x4043   :  { %v6707_v25 = vpop.f32.mrf.mxu0 }
0x4044   :  { %v6590_v6 = vpop.f32.mrf.mxu1  ;;  %6769 = vmatpush.msra.mxu2 %v8000_v5  ;;  %v6708_v26 = vadd.f32 %v8153_v29, %v6707_v25  ;;  %v8018_v25 = vld [vmem:[%s11706_s9 + $0xa8] sm:$0xff] }
0x4045   :  { %v6591_v53 = vadd.f32 %v11394_v39, %v6590_v6 }
0x4046   :  { %6770 = vmatpush.msra.mxu2 %v7999_v23 }
0x4047   :  { %v6596_v1 = vsel %vm658_vm2, %v6591_v53, -inf }
0x4048   :  { %6597 = vmax.xlane.f32.xlu2 %v6596_v1  ;;  %6771 = vmatpush.msra.mxu2 %v7998_v45 }
0x404b   :  { %v6710_v37 = vpop.f32.mrf.mxu0 }
0x404c   :  { %v6593_v52 = vpop.f32.mrf.mxu1  ;;  %v6711_v44 = vadd.f32 %v8153_v29, %v6710_v37  ;;  %v8017_v29 = vld [vmem:[%s11706_s9 + $0xa0] sm:$0xff] }
0x404d   :  { %v6594_v62 = vadd.f32 %v11401_v51, %v6593_v52 }
0x404f   :  { %v6599_v22 = vsel %vm658_vm2, %v6594_v62, -inf }
0x4050   :  { %6600 = vmax.xlane.f32.xlu0 %v6599_v22 }
0x4054   :  { %v6740_v2 = vpop.f32.mrf.mxu1 }
0x4055   :  { %v6741_v9 = vadd.f32 %v8154_v56, %v6740_v2 }
0x405c   :  { %v6743_v3 = vpop.f32.mrf.mxu1 }
0x405d   :  { %v6744_v7 = vadd.f32 %v8154_v56, %v6743_v3 }
0x405f   :  { %8005 = vmatpush.xpose.msk.msrb.mxu3 %vm622_vm1, %v6744_v7 }
0x4063   :  { %8006 = vmatpush.xpose.msk.msrb.mxu3 %vm622_vm1, %v6741_v9 }
0x40bb   :  { %v6598_v12 = vpop.xlane.xlu2 %6597 }
0x40bc   :  { %v6602_v13 = vsub.f32 %v6591_v53, %v6598_v12 }
0x40be   :  { %v6604_v16 = vmul.f32 1.442695, %v6602_v13  ;;  %v8156_v13 = vld [vmem:[%s11709_s12 + $0x22] ss:$0 sm:$0xff] }
0x40c0   :  { %8382 = vpow2.f32 %v6604_v16 }
0x40c3   :  { %v6601_v17 = vpop.xlane.xlu0 %6600 }
0x40c4   :  { %v6603_v35 = vsub.f32 %v6594_v62, %v6601_v17 }
0x40c6   :  { %v8383_v18 = vpop.eup %8382  ;;  %v6606_v43 = vmul.f32 1.442695, %v6603_v35 }
0x40c7   :  { %v6608_v19 = vsel %vm658_vm2, %v8383_v18, 0.0 }
0x40c8   :  { %8384 = vpow2.f32 %v6606_v43  ;;  %6609 = vadd.xlane.f32.xlu1 %v6608_v19 }
0x40ce   :  { %v8385_v47 = vpop.eup %8384 }
0x40cf   :  { %v6611_v20 = vsel %vm658_vm2, %v8385_v47, 0.0 }
0x40d0   :  { %6612 = vadd.xlane.f32.xlu2 %v6611_v20 }
0x413b   :  { %v6610_v24 = vpop.xlane.xlu1 %6609 }
0x413c   :  { %8386 = vrcp.f32 %v6610_v24 }
0x4142   :  { %v8387_v4 = vpop.eup %8386 }
0x4143   :  { %v6616_v54 = vmul.f32 %v8387_v4, %v8383_v18  ;;  %v6613_v21 = vpop.xlane.xlu2 %6612 }
0x4144   :  { %8388 = vrcp.f32 %v6613_v21 }
0x4145   :  { %7979 = vmatmul.msk.f32.vlgmr.msrb.gmra.mxu2 %vm658_vm2, %v6616_v54 }
0x414a   :  { %v8389_v42 = vpop.eup %8388 }
0x414b   :  { %v6617_v30 = vmul.f32 %v8389_v42, %v8385_v47 }
0x414d   :  { %7980 = vmatmul.msk.f32.gmra.mxu2 %vm658_vm2, %v6617_v30 }
0x4155   :  { %8003 = vmatmul.msk.f32.vlgmr.msra.gmra.mxu2 %vm526_vm0, %v11332_v41 }
0x415d   :  { %8004 = vmatmul.msk.f32.gmra.mxu2 %vm526_vm0, %v11341_v55 }
0x41c8   :  { %v6641_v11 = vpop.f32.mrf.mxu2 }
0x41c9   :  { %7982 = vmatmul.msk.f32.vlgmr.msra.gmra.mxu3 %vm622_vm1, %v6641_v11 }
0x41d0   :  { %v6644_v40 = vpop.f32.mrf.mxu2 }
0x41d1   :  { %7983 = vmatmul.msk.f32.gmra.mxu3 %vm622_vm1, %v6644_v40  ;;  %v8019_v40 = vld [vmem:[%s11706_s9 + $0xb0] sm:$0xff] }
0x41d8   :  { %v6773_v8 = vpop.f32.mrf.mxu2 }
0x41d9   :  { %8007 = vmatmul.msk.f32.vlgmr.msrb.gmra.mxu3 %vm622_vm1, %v6708_v26  ;;  %v6774_v31 = vadd.f32 %v8155_v27, %v6773_v8 }
0x41e0   :  { %v6776_v28 = vpop.f32.mrf.mxu2 }
0x41e1   :  { %v6777_v15 = vadd.f32 %v8155_v27, %v6776_v28  ;;  %8008 = vmatmul.msk.f32.gmra.mxu3 %vm622_vm1, %v6711_v44  ;;  %v8031_v44 = vld [vmem:[%s11707_s10 + $0x178] sm:$0xff]  ;;  %v8030_v27 = vld [vmem:[%s11707_s10 + $0x170] sm:$0xff]  ;;  %v8029_v28 = vld [vmem:[%s11707_s10 + $0x168] sm:$0xff] }
0x41e2   :  { %7034 = vmatpush.msra.mxu3 %v8031_v44 }
0x41e3   :  { %6856 = vmatpush.msrb.mxu0 %v6777_v15 }
0x41e4   :  { %7035 = vmatpush.msra.mxu3 %v8030_v27 }
0x41e5   :  { %6857 = vmatpush.msrb.mxu0 %v6774_v31 }
0x41e6   :  { %7036 = vmatpush.msra.mxu3 %v8029_v28 }
0x424c   :  { %v6672_v32 = vpop.f32.mrf.mxu3 }
0x424d   :  { %v6678_v36 = vadd.f32 %v6672_v32, %v6457_v48  ;;  %v8028_v48 = vld [vmem:[%s11707_s10 + $0x160] sm:$0xff] }
0x424e   :  { %7037 = vmatpush.msra.mxu3 %v8028_v48 }
0x4254   :  { %v6675_v49 = vpop.f32.mrf.mxu3 }
0x4255   :  { %v6679_v33 = vadd.f32 %v6675_v49, %v11529_v57  ;;  %v8027_v49 = vld [vmem:[%s11707_s10 + $0x158] sm:$0xff] }
0x4256   :  { %7038 = vmatpush.msra.mxu3 %v8027_v49 }
0x425c   :  { %v6808_v10 = vpop.f32.mrf.mxu3 }
0x425d   :  { %v6809_v50 = vadd.f32 %v11394_v39, %v6808_v10 }
0x425f   :  { %v6814_v14 = vsel %vm658_vm2, %v6809_v50, -inf }
0x4260   :  { %6815 = vmax.xlane.f32.xlu0 %v6814_v14 }
0x4264   :  { %v6811_v58 = vpop.f32.mrf.mxu3 }
0x4265   :  { %v6812_v59 = vadd.f32 %v11401_v51, %v6811_v58  ;;  %v8011_v51 = vld [vmem:[%s11705_s8 + $0xb8] sm:$0xff] }
0x4266   :  { %6888 = vmatpush.msra.mxu1 %v8011_v51 }
0x4267   :  { %v6817_v60 = vsel %vm658_vm2, %v6812_v59, -inf }
0x4268   :  { %6818 = vmax.xlane.f32.xlu1 %v6817_v60 }
0x42d3   :  { %v6816_v61 = vpop.xlane.xlu0 %6815 }
0x42d4   :  { %v6820_v0 = vsub.f32 %v6809_v50, %v6816_v61  ;;  %v8157_v61 = vld [vmem:[%s11709_s12 + $0x1e] ss:$0 sm:$0xff] }
0x42d6   :  { %v6822_v34 = vmul.f32 1.442695, %v6820_v0 }
0x42d8   :  { %8390 = vpow2.f32 %v6822_v34 }
0x42db   :  { %v6819_v38 = vpop.xlane.xlu1 %6818 }
0x42dc   :  { %v6821_v6 = vsub.f32 %v6812_v59, %v6819_v38  ;;  %v8158_v38 = vld [vmem:[%s11709_s12 + $0x1f] ss:$0 sm:$0xff] }
0x42de   :  { %v8391_v53 = vpop.eup %8390  ;;  %v6824_v57 = vmul.f32 1.442695, %v6821_v6 }
0x42df   :  { %v6826_v1 = vsel %vm658_vm2, %v8391_v53, 0.0 }
0x42e0   :  { %8392 = vpow2.f32 %v6824_v57  ;;  %6827 = vadd.xlane.f32.xlu2 %v6826_v1 }
0x42e6   :  { %v8393_v39 = vpop.eup %8392 }
0x42e7   :  { %v6829_v52 = vsel %vm658_vm2, %v8393_v39, 0.0 }
0x42e8   :  { %6830 = vadd.xlane.f32.xlu0 %v6829_v52 }
0x4353   :  { %v6828_v62 = vpop.xlane.xlu2 %6827 }
0x4354   :  { %8394 = vrcp.f32 %v6828_v62 }
0x435a   :  { %v8395_v22 = vpop.eup %8394 }
0x435b   :  { %v6834_v2 = vmul.f32 %v8395_v22, %v8391_v53  ;;  %v6831_v56 = vpop.xlane.xlu0 %6830 }
0x435c   :  { %8396 = vrcp.f32 %v6831_v56  ;;  %v8026_v56 = vld [vmem:[%s11707_s10 + $0x150] sm:$0xff] }
0x435d   :  { %8009 = vmatmul.msk.f32.vlgmr.msrb.gmra.mxu0 %vm658_vm2, %v6834_v2  ;;  %7039 = vmatpush.msra.mxu3 %v8026_v56 }
0x4362   :  { %v8397_v3 = vpop.eup %8396 }
0x4363   :  { %v6835_v7 = vmul.f32 %v8397_v3, %v8393_v39  ;;  %v8025_v3 = vld [vmem:[%s11707_s10 + $0x148] sm:$0xff] }
0x4364   :  { %7040 = vmatpush.msra.mxu3 %v8025_v3 }
0x4365   :  { %8010 = vmatmul.msk.f32.gmra.mxu0 %vm658_vm2, %v6835_v7  ;;  %v8024_v7 = vld [vmem:[%s11707_s10 + $0x140] sm:$0xff] }
0x4366   :  { %7041 = vmatpush.msra.mxu3 %v8024_v7 }
0x43da   :  { %v6859_v9 = vpop.f32.mrf.mxu0 }
0x43db   :  { %8012 = vmatmul.msk.f32.vlgmr.msra.gmra.mxu1 %vm622_vm1, %v6859_v9  ;;  %v8159_v9 = vld [vmem:[%s11708_s11 + $0x5] ss:$0 sm:$0xff] }
0x43e2   :  { %v6862_v12 = vpop.f32.mrf.mxu0 }
0x43e3   :  { %8013 = vmatmul.msk.f32.gmra.mxu1 %vm622_vm1, %v6862_v12 }
0x4458   :  { %v6890_v16 = vpop.f32.mrf.mxu1 }
0x4459   :  { %v6896_v17 = vadd.f32 %v6890_v16, %v6678_v36 }
0x445b   :  { %v6903_v35 = vadd.f32 %v8156_v13, %v6896_v17 }
0x445d   :  { %v6905_v18 = vadd.f32 %v6903_v35, %v11332_v41 }
0x445f   :  { %v6911_v43 = vsel %vm526_vm0, %v6905_v18, 0.0 }
0x4460   :  { %6912 = vadd.xlane.f32.xlu1 %v6911_v43  ;;  %v6893_v19 = vpop.f32.mrf.mxu1  ;;  %v8160_v43 = vld [vmem:[%s11709_s12 + $0x23] ss:$0 sm:$0xff] }
0x4461   :  { %v6897_v47 = vadd.f32 %v6893_v19, %v6679_v33 }
0x4463   :  { %v6904_v20 = vadd.f32 %v8156_v13, %v6897_v47 }
0x4465   :  { %v6906_v46 = vadd.f32 %v6904_v20, %v11341_v55  ;;  %v8020_v55 = vld [vmem:[%s11706_s9 + $0xb8] sm:$0xff] }
0x4466   :  { %6993 = vmatpush.msrb.mxu2 %v8020_v55 }
0x4467   :  { %v6914_v5 = vsel %vm526_vm0, %v6906_v46, 0.0 }
0x4468   :  { %6915 = vadd.xlane.f32.xlu2 %v6914_v5  ;;  %6994 = vmatpush.msrb.mxu2 %v8019_v40 }
0x446a   :  { %6995 = vmatpush.msrb.mxu2 %v8018_v25 }
0x446c   :  { %6996 = vmatpush.msrb.mxu2 %v8017_v29  ;;  %v7112_v29 = vld [vmem:[%s11712_s15 + $0x18] sm:$0xff] }
0x446d   :  { %7135 = vmatpush.msra.mxu0 %v7112_v29 }
0x44d3   :  { %v6913_v23 = vpop.xlane.xlu1 %6912 }
0x44d4   :  { %v6917_v45 = vmul.f32 %v6913_v23, %v9478_v63 }
0x44d6   :  { %v6919_v24 = vsub.f32 %v6905_v18, %v6917_v45 }
0x44d8   :  { %v6921_v4 = vmul.f32 %v6919_v24, %v6919_v24 }
0x44da   :  { %v6923_v54 = vsel %vm526_vm0, %v6921_v4, 0.0 }
0x44db   :  { %6924 = vadd.xlane.f32.xlu0 %v6923_v54  ;;  %v6916_v41 = vpop.xlane.xlu2 %6915 }
0x44dc   :  { %v6918_v21 = vmul.f32 %v6916_v41, %v9478_v63 }
0x44de   :  { %v6920_v42 = vsub.f32 %v6906_v46, %v6918_v21 }
0x44e0   :  { %v6922_v30 = vmul.f32 %v6920_v42, %v6920_v42 }
0x44e2   :  { %v6926_v11 = vsel %vm526_vm0, %v6922_v30, 0.0 }
0x44e3   :  { %6927 = vadd.xlane.f32.xlu1 %v6926_v11 }
0x454e   :  { %v6925_v26 = vpop.xlane.xlu0 %6924 }
0x454f   :  { %v6929_v8 = vmul.f32 %v6925_v26, %v9478_v63  ;;  %v7111_v26 = vld [vmem:[%s11712_s15 + $0x10] sm:$0xff] }
0x4550   :  { %7136 = vmatpush.msra.mxu0 %v7111_v26 }
0x4551   :  { %v6931_v37 = vadd.f32 1e-05, %v6929_v8  ;;  %v7110_v8 = vld [vmem:[%s11712_s15 + $0x8] sm:$0xff] }
0x4552   :  { %7137 = vmatpush.msra.mxu0 %v7110_v8 }
0x4553   :  { %8398 = vrsqrt.f32 %v6931_v37  ;;  %vm6939_vm2 = vweird.f32 %v6931_v37 }
0x4556   :  { %v6928_v15 = vpop.xlane.xlu1 %6927 }
0x4557   :  { %v6930_v31 = vmul.f32 %v6928_v15, %v9478_v63 }
0x4559   :  { %v8399_v32 = vpop.eup %8398  ;;  %v6932_v36 = vadd.f32 1e-05, %v6930_v31 }
0x455a   :  { %v6934_v33 = vmul.f32 %v8399_v32, %v6931_v37  ;;  %vm6940_vm1 = vweird.f32 %v8399_v32  ;;  %v7109_v37 = vld [vmem:[%s11712_s15] sm:$0xff] }
0x455b   :  { %8400 = vrsqrt.f32 %v6932_v36  ;;  %vm6941_vm4 = vmor %vm6939_vm2, %vm6940_vm1  ;;  %vm6949_vm6 = vweird.f32 %v6932_v36  ;;  %7138 = vmatpush.msra.mxu0 %v7109_v37 }
0x455c   :  { %v6935_v10 = vmul.f32 %v8399_v32, %v6934_v33 }
0x455e   :  { %v6936_v50 = vmul.f32 0.5, %v6935_v10 }
0x4560   :  { %v6937_v14 = vsub.f32 1.5, %v6936_v50 }
0x4561   :  { %v8401_v58 = vpop.eup %8400 }
0x4562   :  { %v6938_v59 = vmul.f32 %v8399_v32, %v6937_v14  ;;  %v6944_v60 = vmul.f32 %v8401_v58, %v6932_v36  ;;  %vm6950_vm5 = vweird.f32 %v8401_v58 }
0x4563   :  { %vm6951_vm7 = vmor %vm6949_vm6, %vm6950_vm5 }
0x4564   :  { %v6942_v0 = vsel %vm6941_vm4, %v8399_v32, %v6938_v59  ;;  %v6945_v34 = vmul.f32 %v8401_v58, %v6944_v60  ;;  %v8161_v59 = vld [vmem:[%s11709_s12 + $0x20] ss:$0 sm:$0xff] }
0x4565   :  { %v6953_v6 = vmul.f32 %v6942_v0, %v6919_v24 }
0x4566   :  { %v6946_v53 = vmul.f32 0.5, %v6945_v34 }
0x4567   :  { %v6958_v57 = vmul.f32 %v8157_v61, %v6953_v6 }
0x4568   :  { %v6947_v1 = vsub.f32 1.5, %v6946_v53 }
0x4569   :  { %v6963_v39 = vadd.f32 %v8158_v38, %v6958_v57 }
0x456a   :  { %v6948_v52 = vmul.f32 %v8401_v58, %v6947_v1 }
0x456b   :  { %8022 = vmatmul.msk.f32.vlgmr.msrb.gmra.mxu2 %vm526_vm0, %v6963_v39 }
0x456c   :  { %v6952_v51 = vsel %vm6951_vm7, %v8401_v58, %v6948_v52 }
0x456d   :  { %v6954_v62 = vmul.f32 %v6952_v51, %v6920_v42 }
0x456f   :  { %v6959_v22 = vmul.f32 %v8157_v61, %v6954_v62  ;;  %v8163_v62 = vld [vmem:[%s11713_s16] ss:$0 sm:$0xff] }
0x4571   :  { %v6964_v2 = vadd.f32 %v8158_v38, %v6959_v22 }
0x4573   :  { %8023 = vmatmul.msk.f32.gmra.mxu2 %vm526_vm0, %v6964_v2 }
0x45ee   :  { %v6998_v12 = vpop.f32.mrf.mxu2 }
0x45ef   :  { %v6999_v13 = vadd.f32 %v8159_v9, %v6998_v12 }
0x45f1   :  { %v7004_v16 = vmax.f32 %v6999_v13, 0.0 }
0x45f3   :  { %8033 = vmatmul.msk.f32.vlgmr.msra.gmra.mxu3 %vm1517_vm10, %v7004_v16 }
0x45f6   :  { %v7001_v17 = vpop.f32.mrf.mxu2 }
0x45f7   :  { %v7002_v35 = vadd.f32 %v8159_v9, %v7001_v17 }
0x45f9   :  { %v7005_v18 = vmax.f32 %v7002_v35, 0.0 }
0x45fb   :  { %8034 = vmatmul.msk.f32.gmra.mxu3 %vm1517_vm10, %v7005_v18 }
0x4676   :  { %v7043_v19 = vpop.f32.mrf.mxu3 }
0x4677   :  { %v7044_v47 = vadd.f32 %v8160_v43, %v7043_v19 }
0x4679   :  { %v7049_v20 = vadd.f32 %v7044_v47, %v6963_v39 }
0x467b   :  { %v7055_v46 = vsel %vm526_vm0, %v7049_v20, 0.0 }
0x467c   :  { %7056 = vadd.xlane.f32.xlu2 %v7055_v46 }
0x467e   :  { %v7046_v5 = vpop.f32.mrf.mxu3 }
0x467f   :  { %v7047_v23 = vadd.f32 %v8160_v43, %v7046_v5 }
0x4681   :  { %v7050_v45 = vadd.f32 %v7047_v23, %v6964_v2 }
0x4683   :  { %v7058_v24 = vsel %vm526_vm0, %v7050_v45, 0.0 }
0x4684   :  { %7059 = vadd.xlane.f32.xlu0 %v7058_v24 }
0x46ef   :  { %v7057_v4 = vpop.xlane.xlu2 %7056 }
0x46f0   :  { %v7061_v54 = vmul.f32 %v7057_v4, %v9478_v63 }
0x46f2   :  { %v7063_v41 = vsub.f32 %v7049_v20, %v7061_v54 }
0x46f4   :  { %v7065_v21 = vmul.f32 %v7063_v41, %v7063_v41 }
0x46f6   :  { %v7067_v42 = vsel %vm526_vm0, %v7065_v21, 0.0 }
0x46f7   :  { %v7060_v30 = vpop.xlane.xlu0 %7059  ;;  %7068 = vadd.xlane.f32.xlu1 %v7067_v42 }
0x46f8   :  { %v7062_v11 = vmul.f32 %v7060_v30, %v9478_v63 }
0x46fa   :  { %v7064_v55 = vsub.f32 %v7050_v45, %v7062_v11 }
0x46fc   :  { %v7066_v40 = vmul.f32 %v7064_v55, %v7064_v55 }
0x46fe   :  { %v7070_v25 = vsel %vm526_vm0, %v7066_v40, 0.0 }
0x46ff   :  { %7071 = vadd.xlane.f32.xlu2 %v7070_v25 }
0x476a   :  { %v7069_v44 = vpop.xlane.xlu1 %7068 }
0x476b   :  { %v7073_v27 = vmul.f32 %v7069_v44, %v9478_v63 }
0x476d   :  { %v7075_v28 = vadd.f32 1e-05, %v7073_v27 }
0x476f   :  { %8402 = vrsqrt.f32 %v7075_v28  ;;  %vm7083_vm8 = vweird.f32 %v7075_v28 }
0x4772   :  { %v7072_v15 = vpop.xlane.xlu2 %7071 }
0x4773   :  { %v7074_v31 = vmul.f32 %v7072_v15, %v9478_v63  ;;  %v8162_v63 = vld [vmem:[%s11709_s12 + $0x21] ss:$0 sm:$0xff]  ;;  %s8453_s12 = smov [#allocation2]  }
0x4774   :  { %s7177_s16 = sshll.u32 %s8453_s12, 4  ;;  %s7178_s16 = int_to_ptr.vmem [resolvable:$true] %s7177_s16 }
0x4775   :  { %v8403_v48 = vpop.eup %8402  ;;  %v7076_v32 = vadd.f32 1e-05, %v7074_v31 }
0x4776   :  { %v7078_v36 = vmul.f32 %v8403_v48, %v7075_v28  ;;  %vm7084_vm10 = vweird.f32 %v8403_v48 }
0x4777   :  { %8404 = vrsqrt.f32 %v7076_v32  ;;  %vm7085_vm9 = vmor %vm7083_vm8, %vm7084_vm10  ;;  %vm7093_vm12 = vweird.f32 %v7076_v32 }
0x4778   :  { %v7079_v49 = vmul.f32 %v8403_v48, %v7078_v36 }
0x477a   :  { %v7080_v33 = vmul.f32 0.5, %v7079_v49 }
0x477c   :  { %v7081_v10 = vsub.f32 1.5, %v7080_v33 }
0x477d   :  { %v8405_v50 = vpop.eup %8404 }
0x477e   :  { %v7082_v14 = vmul.f32 %v8403_v48, %v7081_v10  ;;  %v7088_v58 = vmul.f32 %v8405_v50, %v7076_v32  ;;  %vm7094_vm11 = vweird.f32 %v8405_v50 }
0x477f   :  { %vm7095_vm13 = vmor %vm7093_vm12, %vm7094_vm11 }
0x4780   :  { %v7086_v60 = vsel %vm7085_vm9, %v8403_v48, %v7082_v14  ;;  %v7089_v61 = vmul.f32 %v8405_v50, %v7088_v58 }
0x4781   :  { %v7097_v0 = vmul.f32 %v7086_v60, %v7063_v41 }
0x4782   :  { %v7090_v34 = vmul.f32 0.5, %v7089_v61 }
0x4783   :  { %v7102_v38 = vmul.f32 %v8161_v59, %v7097_v0 }
0x4784   :  { %v7091_v6 = vsub.f32 1.5, %v7090_v34 }
0x4785   :  { %v7107_v53 = vadd.f32 %v8162_v63, %v7102_v38 }
0x4786   :  { %v7092_v57 = vmul.f32 %v8405_v50, %v7091_v6 }
0x4787   :  { %8037 = vmatmul.msk.f32.vlgmr.msra.gmra.mxu0 %vm526_vm0, %v7107_v53 }
0x4788   :  { %v7096_v1 = vsel %vm7095_vm13, %v8405_v50, %v7092_v57 }
0x4789   :  { %v7098_v39 = vmul.f32 %v7096_v1, %v7064_v55 }
0x478b   :  { %v7103_v52 = vmul.f32 %v8161_v59, %v7098_v39 }
0x478d   :  { %v7108_v51 = vadd.f32 %v8162_v63, %v7103_v52 }
0x478f   :  { %8038 = vmatmul.msk.f32.gmra.mxu0 %vm526_vm0, %v7108_v51 }
0x4804   :  { %v7140_v22 = vpop.f32.mrf.mxu0 }
0x4805   :  { %v7141_v2 = vadd.f32 %v8163_v62, %v7140_v22 }
0x4807   :  { %v7147_v56 = vsel %vm7146_vm14, %v7141_v2, -inf }
0x4808   :  { %7148 = vmax.xlane.f32.xlu0 %v7147_v56 }
0x480c   :  { %v7143_v3 = vpop.f32.mrf.mxu0 }
0x480d   :  { %v7144_v7 = vadd.f32 %v8163_v62, %v7143_v3 }
0x480f   :  { %v7150_v9 = vsel %vm7146_vm14, %v7144_v7, -inf }
0x4810   :  { %7151 = vmax.xlane.f32.xlu1 %v7150_v9 }
0x487b   :  { %v7149_v12 = vpop.xlane.xlu0 %7148 }
0x487c   :  { %v7153_v13 = vsub.f32 %v7141_v2, %v7149_v12 }
0x487e   :  { %v7155_v16 = vmul.f32 1.442695, %v7153_v13 }
0x4880   :  { %8406 = vpow2.f32 %v7155_v16 }
0x4883   :  { %v7152_v17 = vpop.xlane.xlu1 %7151 }
0x4884   :  { %v7154_v35 = vsub.f32 %v7144_v7, %v7152_v17 }
0x4886   :  { %v8407_v18 = vpop.eup %8406  ;;  %v7157_v43 = vmul.f32 1.442695, %v7154_v35 }
0x4887   :  { %v7159_v19 = vsel %vm7146_vm14, %v8407_v18, 0.0 }
0x4888   :  { %8408 = vpow2.f32 %v7157_v43  ;;  %7160 = vadd.xlane.f32.xlu2 %v7159_v19 }
0x488e   :  { %v8409_v47 = vpop.eup %8408 }
0x488f   :  { %v7162_v20 = vsel %vm7146_vm14, %v8409_v47, 0.0 }
0x4890   :  { %7163 = vadd.xlane.f32.xlu0 %v7162_v20 }
0x48fb   :  { %v7161_v46 = vpop.xlane.xlu2 %7160 }
0x48fc   :  { %8410 = vlog2.f32 %v7161_v46 }
0x4902   :  { %v8411_v5 = vpop.eup %8410 }
0x4903   :  { %v7166_v23 = vmul.f32 0.6931472, %v8411_v5  ;;  %v7164_v45 = vpop.xlane.xlu0 %7163 }
0x4904   :  { %8412 = vlog2.f32 %v7164_v45 }
0x4905   :  { %v7169_v24 = vsub.f32 %v7153_v13, %v7166_v23 }
0x4907   :  { %7171 = vst.msk [vmem:[#allocation2] sm:$0xff] %vm7146_vm14, %v7169_v24 }
0x490a   :  { %v8413_v4 = vpop.eup %8412 }
0x490b   :  { %v7168_v54 = vmul.f32 0.6931472, %v8413_v4 }
0x490d   :  { %v7170_v41 = vsub.f32 %v7154_v35, %v7168_v54 }
0x490f   :  { %7172 = vst.msk [vmem:[#allocation2 + $0x8] sm:$0xff] %vm7146_vm14, %v7170_v41 }
0x4910   :  { %7185 = dma.vmem_to_hbm [thread:$0]  %s7178_s16, 256, %s7180_s1, [#allocation3], %s8454_s7, %s8454_s7, %s8455_s5  }
0x4911   :  { %8450 = dma.done.wait [#allocation3], 256  }
0x4912   :  { %8451 = vsyncadd [#allocation3], 4294967040 }
0x4913   :  { %7190 = vsyncpa [#allocation3], 1 }

</bundles_post_ra>
